<compile_context>
chip_gen: v6e
topology: v6e:2x2x1
jax: 0.10.0
libtpu: 0.0.40
codegen_flags: <defaults>
</compile_context>

<pallas_src>
import jax
import jax.numpy as jnp
from jax import lax
from jax.experimental import pallas as pl
from jax.experimental.pallas import tpu as pltpu


# ------------------------------ fused kernel --------------------------------

def _frm_fused_kernel(f1_ref, p1_ref,
                      w1a_ref, w1b_ref, b1_ref,
                      w2_ref, b2_ref,
                      w3_ref, b3_ref,
                      w4_ref, b4_ref,
                      w5_ref, b5_ref,
                      w6_ref, b6_ref,
                      o_ref,
                      pad_c_ref, pad_q_ref):
    # f1_ref / p1_ref / o_ref : (1, H, W, C)   activations (NHWC block)
    # w1a/w1b : (C, C)        conv1 weight split for the fused channel concat
    # w2/w4/w6: (3, 3, Cin, Cout), w3: (C, C//4), w5: (C//4, C)
    # biases  : (1, Cout)
    # pad_c_ref: (PADM, C), pad_q_ref: (PADM, C//4)  VMEM halo slabs
    _, H, W, C = o_ref.shape
    M = H * W
    OFF = (pad_c_ref.shape[0] - M) // 2          # static, multiple of 8

    # Zero the halo slabs once per step: only the interior [OFF, OFF+M) is
    # ever (re)written, so the borders stay zero for every 3x3 below.
    pad_c_ref[...] = jnp.zeros_like(pad_c_ref)
    pad_q_ref[...] = jnp.zeros_like(pad_q_ref)

    # Column-index masks (hoisted, shared by all three 3x3 convs).  They kill
    # the row-wraparound contributions of the dx = +/-1 taps.
    col = lax.broadcasted_iota(jnp.int32, (M, 1), 0) % W
    ok_left = col != 0            # valid source exists for dx = -1
    ok_right = col != (W - 1)     # valid source exists for dx = +1

    def conv3x3(x_slab, pad_ref, w_ref, b_ref):
        # x_slab: (M, Cin) f32 activation in slab (row-major spatial) form.
        cout = w_ref.shape[3]
        pad_ref[OFF:OFF + M, :] = x_slab          # aligned store (OFF % 8 == 0)
        acc = jnp.zeros((M, cout), jnp.float32)
        for dy in (-1, 0, 1):
            for dx in (-1, 0, 1):
                start = OFF + dy * W + dx          # static slice start
                patch = pad_ref[start:start + M, :]
                if dx == -1:
                    patch = jnp.where(ok_left, patch, 0.0)
                elif dx == 1:
                    patch = jnp.where(ok_right, patch, 0.0)
                acc = acc + jnp.dot(patch, w_ref[dy + 1, dx + 1],
                                    preferred_element_type=jnp.float32)
        return acc + b_ref[...]

    # Load the two inputs as (M, C) slabs (leading-dim collapse; W % 8 == 0
    # keeps this layout-trivial).
    f1 = f1_ref[0].reshape(M, C)
    p1 = p1_ref[0].reshape(M, C)

    # conv1 (1x1, 2c -> c) with the channel concat fused in.
    y = (jnp.dot(f1, w1a_ref[...], preferred_element_type=jnp.float32)
         + jnp.dot(p1, w1b_ref[...], preferred_element_type=jnp.float32)
         + b1_ref[...])
    # conv2 (3x3, c -> c)
    y = conv3x3(y, pad_c_ref, w2_ref, b2_ref)
    # conv3 (1x1, c -> c/4)
    y = jnp.dot(y, w3_ref[...], preferred_element_type=jnp.float32) + b3_ref[...]
    # conv4 (3x3, c/4 -> c/4)
    y = conv3x3(y, pad_q_ref, w4_ref, b4_ref)
    # conv5 (1x1, c/4 -> c)
    y = jnp.dot(y, w5_ref[...], preferred_element_type=jnp.float32) + b5_ref[...]
    # conv6 (3x3, c -> c)  (reuses pad_c_ref; borders are still zero)
    y = conv3x3(y, pad_c_ref, w6_ref, b6_ref)

    # Single full-block output store.
    o_ref[0] = y.reshape(H, W, C).astype(o_ref.dtype)


def _round_up(x, m):
    return ((x + m - 1) // m) * m


def _frm_pallas(f1_up, p1, params):
    """f1_up, p1: (N, H, W, C) NHWC float32 -> (N, H, W, C)."""
    N, H, W, C = p1.shape
    Cq = params["w3"].shape[1]                 # c // 4
    M = H * W
    OFF = _round_up(W + 1, 8)                  # halo slab offset, 8-aligned
    PADM = M + 2 * OFF

    w1 = params["w1"]
    w1a, w1b = w1[:C], w1[C:]                  # concat fused into conv1
    b1 = params["b1"].reshape(1, C)
    b2 = params["b2"].reshape(1, C)
    b3 = params["b3"].reshape(1, Cq)
    b4 = params["b4"].reshape(1, Cq)
    b5 = params["b5"].reshape(1, C)
    b6 = params["b6"].reshape(1, C)

    img_spec = pl.BlockSpec((1, H, W, C), lambda n: (n, 0, 0, 0))
    z2 = lambda n: (0, 0)
    z4 = lambda n: (0, 0, 0, 0)

    in_specs = [
        img_spec,                                   # f1_up
        img_spec,                                   # p1
        pl.BlockSpec((C, C), z2),                   # w1a
        pl.BlockSpec((C, C), z2),                   # w1b
        pl.BlockSpec((1, C), z2),                   # b1
        pl.BlockSpec((3, 3, C, C), z4),             # w2
        pl.BlockSpec((1, C), z2),                   # b2
        pl.BlockSpec((C, Cq), z2),                  # w3
        pl.BlockSpec((1, Cq), z2),                  # b3
        pl.BlockSpec((3, 3, Cq, Cq), z4),           # w4
        pl.BlockSpec((1, Cq), z2),                  # b4
        pl.BlockSpec((Cq, C), z2),                  # w5
        pl.BlockSpec((1, C), z2),                   # b5
        pl.BlockSpec((3, 3, C, C), z4),             # w6
        pl.BlockSpec((1, C), z2),                   # b6
    ]

    return pl.pallas_call(
        _frm_fused_kernel,
        out_shape=jax.ShapeDtypeStruct((N, H, W, C), p1.dtype),
        grid=(N,),
        in_specs=in_specs,
        out_specs=pl.BlockSpec((1, H, W, C), lambda n: (n, 0, 0, 0)),
        scratch_shapes=[pltpu.VMEM((PADM, C), jnp.float32),
                        pltpu.VMEM((PADM, Cq), jnp.float32)],
        compiler_params=pltpu.CompilerParams(
            dimension_semantics=("parallel",)),
    )(f1_up, p1, w1a, w1b, b1, w2 := params["w2"], b2,
      params["w3"], b3, params["w4"], b4, params["w5"], b5,
      params["w6"], b6)


# ------------------------------ FRM forward ---------------------------------

def nearest_upsample(x, size):
    """NCHW nearest upsample, matches F.interpolate(mode='nearest')."""
    _, _, h, w = x.shape
    H, W = size
    idx_h = (jnp.arange(H) * h) // H
    idx_w = (jnp.arange(W) * w) // W
    return x[:, :, idx_h[:, None], idx_w[None, :]]


@jax.jit
def frm_forward(F1, P1, params):
    """F1: (N,c,h,w), P1: (N,c,H,W) NCHW like PyTorch -> (N,c,H,W)."""
    H, W = P1.shape[-2:]
    F1_up = nearest_upsample(F1, (H, W))               # NCHW glue
    f1 = jnp.transpose(F1_up, (0, 2, 3, 1))            # -> NHWC
    p1 = jnp.transpose(P1, (0, 2, 3, 1))
    out = _frm_pallas(f1, p1, params)                  # fused conv1..conv6
    return jnp.transpose(out, (0, 3, 1, 2))            # back to NCHW


# ---------------------- reference (XLA conv) for check ----------------------

def _ref_conv(x, w, b):
    k = w.shape[0]
    pad = (k - 1) // 2
    y = lax.conv_general_dilated(
        x, w, window_strides=(1, 1), padding=[(pad, pad), (pad, pad)],
        dimension_numbers=("NHWC", "HWIO", "NHWC"))
    return y + b


def frm_reference(F1, P1, params):
    H, W = P1.shape[-2:]
    F1_up = nearest_upsample(F1, (H, W))
    x = jnp.concatenate([F1_up, P1], axis=1)
    x = jnp.transpose(x, (0, 2, 3, 1))
    x = _ref_conv(x, params["w1"][None, None], params["b1"])
    x = _ref_conv(x, params["w2"], params["b2"])
    x = _ref_conv(x, params["w3"][None, None], params["b3"])
    x = _ref_conv(x, params["w4"], params["b4"])
    x = _ref_conv(x, params["w5"][None, None], params["b5"])
    x = _ref_conv(x, params["w6"], params["b6"])
    return jnp.transpose(x, (0, 3, 1, 2))


# ------------------------------ param init ----------------------------------

def init_params(key, c):
    # Synthetic init mimicking PyTorch Conv2d default
    # (uniform[-1/sqrt(fan_in), 1/sqrt(fan_in)]).  Weights stored HWIO
    # (1x1 weights as plain (Cin, Cout)).
    cfg = [("1", 1, 2 * c, c), ("2", 3, c, c),
           ("3", 1, c, c // 4), ("4", 3, c // 4, c // 4),
           ("5", 1, c // 4, c), ("6", 3, c, c)]
    params = {}
    for i, (name, k, cin, cout) in enumerate(cfg):
        kw, kb = jax.random.split(jax.random.fold_in(key, i))
        bound = 1.0 / float(cin * k * k) ** 0.5
        w = jax.random.uniform(kw, (k, k, cin, cout), jnp.float32, -bound, bound)
        b = jax.random.uniform(kb, (cout,), jnp.float32, -bound, bound)
        params["w" + name] = w[0, 0] if k == 1 else w
        params["b" + name] = b
    return params


if __name__ == "__main__":
    key = jax.random.PRNGKey(0)
    c = 8                       # channel count (c % 4 == 0 required by conv3)
    N = 2
    k1, k2, k3 = jax.random.split(key, 3)
    F1 = jax.random.normal(k1, (N, c, 8, 8), jnp.float32)     # coarse level
    P1 = jax.random.normal(k2, (N, c, 16, 16), jnp.float32)   # fine level
    params = init_params(k3, c)

    out = frm_forward(F1, P1, params)
    out = jax.block_until_ready(out)

    assert out.shape == (N, c, 16, 16)
    ref = frm_reference(F1, P1, params)
    if not jnp.allclose(out, ref, atol=1e-3, rtol=1e-3):
        raise AssertionError("Pallas FRM output mismatch vs XLA reference")

    print("KERNEL_OK")
</pallas_src>

<mosaic_0001>
module attributes {stable_mosaic.version = 11 : i64} {
  func.func @_frm_fused_kernel(%arg0: i32, %arg1: memref<1x16x16x8xf32, #tpu.memory_space<vmem>>, %arg2: memref<1x16x16x8xf32, #tpu.memory_space<vmem>>, %arg3: memref<8x8xf32, #tpu.memory_space<vmem>>, %arg4: memref<8x8xf32, #tpu.memory_space<vmem>>, %arg5: memref<1x8xf32, #tpu.memory_space<vmem>>, %arg6: memref<3x3x8x8xf32, #tpu.memory_space<vmem>>, %arg7: memref<1x8xf32, #tpu.memory_space<vmem>>, %arg8: memref<8x2xf32, #tpu.memory_space<vmem>>, %arg9: memref<1x2xf32, #tpu.memory_space<vmem>>, %arg10: memref<3x3x2x2xf32, #tpu.memory_space<vmem>>, %arg11: memref<1x2xf32, #tpu.memory_space<vmem>>, %arg12: memref<2x8xf32, #tpu.memory_space<vmem>>, %arg13: memref<1x8xf32, #tpu.memory_space<vmem>>, %arg14: memref<3x3x8x8xf32, #tpu.memory_space<vmem>>, %arg15: memref<1x8xf32, #tpu.memory_space<vmem>>, %arg16: memref<1x16x16x8xf32, #tpu.memory_space<vmem>>, %arg17: memref<304x8xf32, #tpu.memory_space<vmem>>, %arg18: memref<304x2xf32, #tpu.memory_space<vmem>>) attributes {dimension_semantics = [#tpu.dimension_semantics<parallel>], iteration_bounds = array<i64: 2>, scalar_prefetch = 0 : i64, scratch_operands = 2 : i64, tpu.core_type = #tpu.core_type<tc>, window_params = [{transform_indices = @transform_0, window_bounds = array<i64: 1, 16, 16, 8>}, {transform_indices = @transform_1, window_bounds = array<i64: 1, 16, 16, 8>}, {pipeline_mode = #tpu.pipeline_mode<synchronous>, transform_indices = @transform_2, window_bounds = array<i64: 8, 8>}, {pipeline_mode = #tpu.pipeline_mode<synchronous>, transform_indices = @transform_3, window_bounds = array<i64: 8, 8>}, {pipeline_mode = #tpu.pipeline_mode<synchronous>, transform_indices = @transform_4, window_bounds = array<i64: 1, 8>}, {pipeline_mode = #tpu.pipeline_mode<synchronous>, transform_indices = @transform_5, window_bounds = array<i64: 3, 3, 8, 8>}, {pipeline_mode = #tpu.pipeline_mode<synchronous>, transform_indices = @transform_6, window_bounds = array<i64: 1, 8>}, {pipeline_mode = #tpu.pipeline_mode<synchronous>, transform_indices = @transform_7, window_bounds = array<i64: 8, 2>}, {pipeline_mode = #tpu.pipeline_mode<synchronous>, transform_indices = @transform_8, window_bounds = array<i64: 1, 2>}, {pipeline_mode = #tpu.pipeline_mode<synchronous>, transform_indices = @transform_9, window_bounds = array<i64: 3, 3, 2, 2>}, {pipeline_mode = #tpu.pipeline_mode<synchronous>, transform_indices = @transform_10, window_bounds = array<i64: 1, 2>}, {pipeline_mode = #tpu.pipeline_mode<synchronous>, transform_indices = @transform_11, window_bounds = array<i64: 2, 8>}, {pipeline_mode = #tpu.pipeline_mode<synchronous>, transform_indices = @transform_12, window_bounds = array<i64: 1, 8>}, {pipeline_mode = #tpu.pipeline_mode<synchronous>, transform_indices = @transform_13, window_bounds = array<i64: 3, 3, 8, 8>}, {pipeline_mode = #tpu.pipeline_mode<synchronous>, transform_indices = @transform_14, window_bounds = array<i64: 1, 8>}, {transform_indices = @transform_15, window_bounds = array<i64: 1, 16, 16, 8>}]} {
    %cst = arith.constant 0.000000e+00 : f32
    %0 = vector.broadcast %cst : f32 to vector<304x8xf32>
    %c0 = arith.constant 0 : index
    %c0_0 = arith.constant 0 : index
    %1 = vector.load %arg17[%c0, %c0_0] : memref<304x8xf32, #tpu.memory_space<vmem>>, vector<304x8xf32>
    tpu.vector_store %arg17[%c0, %c0_0], %0 {strides = array<i32>} : memref<304x8xf32, #tpu.memory_space<vmem>>, vector<304x8xf32>,
    %cst_1 = arith.constant 0.000000e+00 : f32
    %2 = vector.broadcast %cst_1 : f32 to vector<304x2xf32>
    %c0_2 = arith.constant 0 : index
    %c0_3 = arith.constant 0 : index
    %3 = vector.load %arg18[%c0_2, %c0_3] : memref<304x2xf32, #tpu.memory_space<vmem>>, vector<304x2xf32>
    tpu.vector_store %arg18[%c0_2, %c0_3], %2 {strides = array<i32>} : memref<304x2xf32, #tpu.memory_space<vmem>>, vector<304x2xf32>,
    %4 = tpu.iota {dimensions = array<i32: 0>} : vector<256x1xi32>
    %c16_i32 = arith.constant 16 : i32
    %c0_i32 = arith.constant 0 : i32
    %5 = arith.cmpi eq, %c16_i32, %c0_i32 : i32
    %c1_i32 = arith.constant 1 : i32
    %6 = arith.select %5, %c1_i32, %c16_i32 : i32
    %7 = vector.broadcast %6 : i32 to vector<256x1xi32>
    %8 = arith.remsi %4, %7 : vector<256x1xi32>
    %c0_i32_4 = arith.constant 0 : i32
    %9 = vector.broadcast %c0_i32_4 : i32 to vector<256x1xi32>
    %10 = arith.cmpi ne, %8, %9 : vector<256x1xi32>
    %c0_i32_5 = arith.constant 0 : i32
    %11 = vector.broadcast %c0_i32_5 : i32 to vector<256x1xi32>
    %12 = arith.cmpi slt, %8, %11 : vector<256x1xi32>
    %c0_i32_6 = arith.constant 0 : i32
    %13 = arith.cmpi slt, %6, %c0_i32_6 : i32
    %14 = vector.broadcast %13 : i1 to vector<256x1xi1>
    %15 = vector.broadcast %14 : vector<256x1xi1> to vector<256x1xi1>
    %16 = arith.xori %12, %15 : vector<256x1xi1>
    %17 = arith.andi %16, %10 : vector<256x1xi1>
    %18 = vector.broadcast %6 : i32 to vector<256x1xi32>
    %19 = arith.addi %8, %18 : vector<256x1xi32>
    %20 = arith.select %17, %19, %8 : vector<256x1xi1>, vector<256x1xi32>
    %c0_i32_7 = arith.constant 0 : i32
    %21 = vector.broadcast %c0_i32_7 : i32 to vector<256x1xi32>
    %22 = arith.cmpi ne, %20, %21 : vector<256x1xi32>
    %c15_i32 = arith.constant 15 : i32
    %23 = vector.broadcast %c15_i32 : i32 to vector<256x1xi32>
    %24 = arith.cmpi ne, %20, %23 : vector<256x1xi32>
    %c0_8 = arith.constant 0 : index
    %c0_9 = arith.constant 0 : index
    %c0_10 = arith.constant 0 : index
    %c0_11 = arith.constant 0 : index
    %25 = vector.load %arg1[%c0_8, %c0_9, %c0_10, %c0_11] : memref<1x16x16x8xf32, #tpu.memory_space<vmem>>, vector<1x16x16x8xf32>
    %26 = vector.shape_cast %25 : vector<1x16x16x8xf32> to vector<16x16x8xf32>
    %27 = vector.shape_cast %26 : vector<16x16x8xf32> to vector<256x8xf32>
    %c0_12 = arith.constant 0 : index
    %c0_13 = arith.constant 0 : index
    %c0_14 = arith.constant 0 : index
    %c0_15 = arith.constant 0 : index
    %28 = vector.load %arg2[%c0_12, %c0_13, %c0_14, %c0_15] : memref<1x16x16x8xf32, #tpu.memory_space<vmem>>, vector<1x16x16x8xf32>
    %29 = vector.shape_cast %28 : vector<1x16x16x8xf32> to vector<16x16x8xf32>
    %30 = vector.shape_cast %29 : vector<16x16x8xf32> to vector<256x8xf32>
    %c0_16 = arith.constant 0 : index
    %c0_17 = arith.constant 0 : index
    %31 = vector.load %arg3[%c0_16, %c0_17] : memref<8x8xf32, #tpu.memory_space<vmem>>, vector<8x8xf32>
    %cst_18 = arith.constant dense<0.000000e+00> : vector<256x8xf32>
    %32 = tpu.matmul %27, %31, %cst_18 {dimension_numbers = #tpu.dot_dimension_numbers<[1], [0], [0], [1], [0, 0, 1, 1], [], []>} : vector<256x8xf32>, vector<8x8xf32>, vector<256x8xf32> -> vector<256x8xf32>
    %c0_19 = arith.constant 0 : index
    %c0_20 = arith.constant 0 : index
    %33 = vector.load %arg4[%c0_19, %c0_20] : memref<8x8xf32, #tpu.memory_space<vmem>>, vector<8x8xf32>
    %cst_21 = arith.constant dense<0.000000e+00> : vector<256x8xf32>
    %34 = tpu.matmul %30, %33, %cst_21 {dimension_numbers = #tpu.dot_dimension_numbers<[1], [0], [0], [1], [0, 0, 1, 1], [], []>} : vector<256x8xf32>, vector<8x8xf32>, vector<256x8xf32> -> vector<256x8xf32>
    %35 = arith.addf %32, %34 : vector<256x8xf32>
    %c0_22 = arith.constant 0 : index
    %c0_23 = arith.constant 0 : index
    %36 = vector.load %arg5[%c0_22, %c0_23] : memref<1x8xf32, #tpu.memory_space<vmem>>, vector<1x8xf32>
    %37 = vector.broadcast %36 : vector<1x8xf32> to vector<256x8xf32>
    %38 = arith.addf %35, %37 : vector<256x8xf32>
    %c24 = arith.constant 24 : index
    %c0_24 = arith.constant 0 : index
    %39 = vector.load %arg17[%c24, %c0_24] : memref<304x8xf32, #tpu.memory_space<vmem>>, vector<256x8xf32>
    tpu.vector_store %arg17[%c24, %c0_24], %38 {strides = array<i32>} : memref<304x8xf32, #tpu.memory_space<vmem>>, vector<256x8xf32>,
    %cst_25 = arith.constant 0.000000e+00 : f32
    %40 = vector.broadcast %cst_25 : f32 to vector<256x8xf32>
    %c7 = arith.constant 7 : index
    %c0_26 = arith.constant 0 : index
    %41 = vector.load %arg17[%c7, %c0_26] : memref<304x8xf32, #tpu.memory_space<vmem>>, vector<256x8xf32>
    %cst_27 = arith.constant 0.000000e+00 : f32
    %42 = vector.shape_cast %22 : vector<256x1xi1> to vector<256x1xi1>
    %43 = vector.broadcast %42 : vector<256x1xi1> to vector<256x8xi1>
    %44 = vector.broadcast %cst_27 : f32 to vector<256x8xf32>
    %45 = arith.select %43, %41, %44 : vector<256x8xi1>, vector<256x8xf32>
    %c0_28 = arith.constant 0 : index
    %c0_29 = arith.constant 0 : index
    %c0_30 = arith.constant 0 : index
    %c0_31 = arith.constant 0 : index
    %46 = vector.load %arg6[%c0_28, %c0_29, %c0_30, %c0_31] : memref<3x3x8x8xf32, #tpu.memory_space<vmem>>, vector<1x1x8x8xf32>
    %47 = vector.shape_cast %46 : vector<1x1x8x8xf32> to vector<8x8xf32>
    %cst_32 = arith.constant dense<0.000000e+00> : vector<256x8xf32>
    %48 = tpu.matmul %45, %47, %cst_32 {dimension_numbers = #tpu.dot_dimension_numbers<[1], [0], [0], [1], [0, 0, 1, 1], [], []>} : vector<256x8xf32>, vector<8x8xf32>, vector<256x8xf32> -> vector<256x8xf32>
    %49 = arith.addf %40, %48 : vector<256x8xf32>
    %c8 = arith.constant 8 : index
    %c0_33 = arith.constant 0 : index
    %50 = vector.load %arg17[%c8, %c0_33] : memref<304x8xf32, #tpu.memory_space<vmem>>, vector<256x8xf32>
    %c0_34 = arith.constant 0 : index
    %c1 = arith.constant 1 : index
    %c0_35 = arith.constant 0 : index
    %c0_36 = arith.constant 0 : index
    %51 = vector.load %arg6[%c0_34, %c1, %c0_35, %c0_36] : memref<3x3x8x8xf32, #tpu.memory_space<vmem>>, vector<1x1x8x8xf32>
    %52 = vector.shape_cast %51 : vector<1x1x8x8xf32> to vector<8x8xf32>
    %cst_37 = arith.constant dense<0.000000e+00> : vector<256x8xf32>
    %53 = tpu.matmul %50, %52, %cst_37 {dimension_numbers = #tpu.dot_dimension_numbers<[1], [0], [0], [1], [0, 0, 1, 1], [], []>} : vector<256x8xf32>, vector<8x8xf32>, vector<256x8xf32> -> vector<256x8xf32>
    %54 = arith.addf %49, %53 : vector<256x8xf32>
    %c9 = arith.constant 9 : index
    %c0_38 = arith.constant 0 : index
    %55 = vector.load %arg17[%c9, %c0_38] : memref<304x8xf32, #tpu.memory_space<vmem>>, vector<256x8xf32>
    %cst_39 = arith.constant 0.000000e+00 : f32
    %56 = vector.shape_cast %24 : vector<256x1xi1> to vector<256x1xi1>
    %57 = vector.broadcast %56 : vector<256x1xi1> to vector<256x8xi1>
    %58 = vector.broadcast %cst_39 : f32 to vector<256x8xf32>
    %59 = arith.select %57, %55, %58 : vector<256x8xi1>, vector<256x8xf32>
    %c0_40 = arith.constant 0 : index
    %c2 = arith.constant 2 : index
    %c0_41 = arith.constant 0 : index
    %c0_42 = arith.constant 0 : index
    %60 = vector.load %arg6[%c0_40, %c2, %c0_41, %c0_42] : memref<3x3x8x8xf32, #tpu.memory_space<vmem>>, vector<1x1x8x8xf32>
    %61 = vector.shape_cast %60 : vector<1x1x8x8xf32> to vector<8x8xf32>
    %cst_43 = arith.constant dense<0.000000e+00> : vector<256x8xf32>
    %62 = tpu.matmul %59, %61, %cst_43 {dimension_numbers = #tpu.dot_dimension_numbers<[1], [0], [0], [1], [0, 0, 1, 1], [], []>} : vector<256x8xf32>, vector<8x8xf32>, vector<256x8xf32> -> vector<256x8xf32>
    %63 = arith.addf %54, %62 : vector<256x8xf32>
    %c23 = arith.constant 23 : index
    %c0_44 = arith.constant 0 : index
    %64 = vector.load %arg17[%c23, %c0_44] : memref<304x8xf32, #tpu.memory_space<vmem>>, vector<256x8xf32>
    %cst_45 = arith.constant 0.000000e+00 : f32
    %65 = vector.shape_cast %22 : vector<256x1xi1> to vector<256x1xi1>
    %66 = vector.broadcast %65 : vector<256x1xi1> to vector<256x8xi1>
    %67 = vector.broadcast %cst_45 : f32 to vector<256x8xf32>
    %68 = arith.select %66, %64, %67 : vector<256x8xi1>, vector<256x8xf32>
    %c1_46 = arith.constant 1 : index
    %c0_47 = arith.constant 0 : index
    %c0_48 = arith.constant 0 : index
    %c0_49 = arith.constant 0 : index
    %69 = vector.load %arg6[%c1_46, %c0_47, %c0_48, %c0_49] : memref<3x3x8x8xf32, #tpu.memory_space<vmem>>, vector<1x1x8x8xf32>
    %70 = vector.shape_cast %69 : vector<1x1x8x8xf32> to vector<8x8xf32>
    %cst_50 = arith.constant dense<0.000000e+00> : vector<256x8xf32>
    %71 = tpu.matmul %68, %70, %cst_50 {dimension_numbers = #tpu.dot_dimension_numbers<[1], [0], [0], [1], [0, 0, 1, 1], [], []>} : vector<256x8xf32>, vector<8x8xf32>, vector<256x8xf32> -> vector<256x8xf32>
    %72 = arith.addf %63, %71 : vector<256x8xf32>
    %c24_51 = arith.constant 24 : index
    %c0_52 = arith.constant 0 : index
    %73 = vector.load %arg17[%c24_51, %c0_52] : memref<304x8xf32, #tpu.memory_space<vmem>>, vector<256x8xf32>
    %c1_53 = arith.constant 1 : index
    %c1_54 = arith.constant 1 : index
    %c0_55 = arith.constant 0 : index
    %c0_56 = arith.constant 0 : index
    %74 = vector.load %arg6[%c1_53, %c1_54, %c0_55, %c0_56] : memref<3x3x8x8xf32, #tpu.memory_space<vmem>>, vector<1x1x8x8xf32>
    %75 = vector.shape_cast %74 : vector<1x1x8x8xf32> to vector<8x8xf32>
    %cst_57 = arith.constant dense<0.000000e+00> : vector<256x8xf32>
    %76 = tpu.matmul %73, %75, %cst_57 {dimension_numbers = #tpu.dot_dimension_numbers<[1], [0], [0], [1], [0, 0, 1, 1], [], []>} : vector<256x8xf32>, vector<8x8xf32>, vector<256x8xf32> -> vector<256x8xf32>
    %77 = arith.addf %72, %76 : vector<256x8xf32>
    %c25 = arith.constant 25 : index
    %c0_58 = arith.constant 0 : index
    %78 = vector.load %arg17[%c25, %c0_58] : memref<304x8xf32, #tpu.memory_space<vmem>>, vector<256x8xf32>
    %cst_59 = arith.constant 0.000000e+00 : f32
    %79 = vector.shape_cast %24 : vector<256x1xi1> to vector<256x1xi1>
    %80 = vector.broadcast %79 : vector<256x1xi1> to vector<256x8xi1>
    %81 = vector.broadcast %cst_59 : f32 to vector<256x8xf32>
    %82 = arith.select %80, %78, %81 : vector<256x8xi1>, vector<256x8xf32>
    %c1_60 = arith.constant 1 : index
    %c2_61 = arith.constant 2 : index
    %c0_62 = arith.constant 0 : index
    %c0_63 = arith.constant 0 : index
    %83 = vector.load %arg6[%c1_60, %c2_61, %c0_62, %c0_63] : memref<3x3x8x8xf32, #tpu.memory_space<vmem>>, vector<1x1x8x8xf32>
    %84 = vector.shape_cast %83 : vector<1x1x8x8xf32> to vector<8x8xf32>
    %cst_64 = arith.constant dense<0.000000e+00> : vector<256x8xf32>
    %85 = tpu.matmul %82, %84, %cst_64 {dimension_numbers = #tpu.dot_dimension_numbers<[1], [0], [0], [1], [0, 0, 1, 1], [], []>} : vector<256x8xf32>, vector<8x8xf32>, vector<256x8xf32> -> vector<256x8xf32>
    %86 = arith.addf %77, %85 : vector<256x8xf32>
    %c39 = arith.constant 39 : index
    %c0_65 = arith.constant 0 : index
    %87 = vector.load %arg17[%c39, %c0_65] : memref<304x8xf32, #tpu.memory_space<vmem>>, vector<256x8xf32>
    %cst_66 = arith.constant 0.000000e+00 : f32
    %88 = vector.shape_cast %22 : vector<256x1xi1> to vector<256x1xi1>
    %89 = vector.broadcast %88 : vector<256x1xi1> to vector<256x8xi1>
    %90 = vector.broadcast %cst_66 : f32 to vector<256x8xf32>
    %91 = arith.select %89, %87, %90 : vector<256x8xi1>, vector<256x8xf32>
    %c2_67 = arith.constant 2 : index
    %c0_68 = arith.constant 0 : index
    %c0_69 = arith.constant 0 : index
    %c0_70 = arith.constant 0 : index
    %92 = vector.load %arg6[%c2_67, %c0_68, %c0_69, %c0_70] : memref<3x3x8x8xf32, #tpu.memory_space<vmem>>, vector<1x1x8x8xf32>
    %93 = vector.shape_cast %92 : vector<1x1x8x8xf32> to vector<8x8xf32>
    %cst_71 = arith.constant dense<0.000000e+00> : vector<256x8xf32>
    %94 = tpu.matmul %91, %93, %cst_71 {dimension_numbers = #tpu.dot_dimension_numbers<[1], [0], [0], [1], [0, 0, 1, 1], [], []>} : vector<256x8xf32>, vector<8x8xf32>, vector<256x8xf32> -> vector<256x8xf32>
    %95 = arith.addf %86, %94 : vector<256x8xf32>
    %c40 = arith.constant 40 : index
    %c0_72 = arith.constant 0 : index
    %96 = vector.load %arg17[%c40, %c0_72] : memref<304x8xf32, #tpu.memory_space<vmem>>, vector<256x8xf32>
    %c2_73 = arith.constant 2 : index
    %c1_74 = arith.constant 1 : index
    %c0_75 = arith.constant 0 : index
    %c0_76 = arith.constant 0 : index
    %97 = vector.load %arg6[%c2_73, %c1_74, %c0_75, %c0_76] : memref<3x3x8x8xf32, #tpu.memory_space<vmem>>, vector<1x1x8x8xf32>
    %98 = vector.shape_cast %97 : vector<1x1x8x8xf32> to vector<8x8xf32>
    %cst_77 = arith.constant dense<0.000000e+00> : vector<256x8xf32>
    %99 = tpu.matmul %96, %98, %cst_77 {dimension_numbers = #tpu.dot_dimension_numbers<[1], [0], [0], [1], [0, 0, 1, 1], [], []>} : vector<256x8xf32>, vector<8x8xf32>, vector<256x8xf32> -> vector<256x8xf32>
    %100 = arith.addf %95, %99 : vector<256x8xf32>
    %c41 = arith.constant 41 : index
    %c0_78 = arith.constant 0 : index
    %101 = vector.load %arg17[%c41, %c0_78] : memref<304x8xf32, #tpu.memory_space<vmem>>, vector<256x8xf32>
    %cst_79 = arith.constant 0.000000e+00 : f32
    %102 = vector.shape_cast %24 : vector<256x1xi1> to vector<256x1xi1>
    %103 = vector.broadcast %102 : vector<256x1xi1> to vector<256x8xi1>
    %104 = vector.broadcast %cst_79 : f32 to vector<256x8xf32>
    %105 = arith.select %103, %101, %104 : vector<256x8xi1>, vector<256x8xf32>
    %c2_80 = arith.constant 2 : index
    %c2_81 = arith.constant 2 : index
    %c0_82 = arith.constant 0 : index
    %c0_83 = arith.constant 0 : index
    %106 = vector.load %arg6[%c2_80, %c2_81, %c0_82, %c0_83] : memref<3x3x8x8xf32, #tpu.memory_space<vmem>>, vector<1x1x8x8xf32>
    %107 = vector.shape_cast %106 : vector<1x1x8x8xf32> to vector<8x8xf32>
    %cst_84 = arith.constant dense<0.000000e+00> : vector<256x8xf32>
    %108 = tpu.matmul %105, %107, %cst_84 {dimension_numbers = #tpu.dot_dimension_numbers<[1], [0], [0], [1], [0, 0, 1, 1], [], []>} : vector<256x8xf32>, vector<8x8xf32>, vector<256x8xf32> -> vector<256x8xf32>
    %109 = arith.addf %100, %108 : vector<256x8xf32>
    %c0_85 = arith.constant 0 : index
    %c0_86 = arith.constant 0 : index
    %110 = vector.load %arg7[%c0_85, %c0_86] : memref<1x8xf32, #tpu.memory_space<vmem>>, vector<1x8xf32>
    %111 = vector.broadcast %110 : vector<1x8xf32> to vector<256x8xf32>
    %112 = arith.addf %109, %111 : vector<256x8xf32>
    %c0_87 = arith.constant 0 : index
    %c0_88 = arith.constant 0 : index
    %113 = vector.load %arg8[%c0_87, %c0_88] : memref<8x2xf32, #tpu.memory_space<vmem>>, vector<8x2xf32>
    %cst_89 = arith.constant dense<0.000000e+00> : vector<256x2xf32>
    %114 = tpu.matmul %112, %113, %cst_89 {dimension_numbers = #tpu.dot_dimension_numbers<[1], [0], [0], [1], [0, 0, 1, 1], [], []>} : vector<256x8xf32>, vector<8x2xf32>, vector<256x2xf32> -> vector<256x2xf32>
    %c0_90 = arith.constant 0 : index
    %c0_91 = arith.constant 0 : index
    %115 = vector.load %arg9[%c0_90, %c0_91] : memref<1x2xf32, #tpu.memory_space<vmem>>, vector<1x2xf32>
    %116 = vector.broadcast %115 : vector<1x2xf32> to vector<256x2xf32>
    %117 = arith.addf %114, %116 : vector<256x2xf32>
    %c24_92 = arith.constant 24 : index
    %c0_93 = arith.constant 0 : index
    %118 = vector.load %arg18[%c24_92, %c0_93] : memref<304x2xf32, #tpu.memory_space<vmem>>, vector<256x2xf32>
    tpu.vector_store %arg18[%c24_92, %c0_93], %117 {strides = array<i32>} : memref<304x2xf32, #tpu.memory_space<vmem>>, vector<256x2xf32>,
    %cst_94 = arith.constant 0.000000e+00 : f32
    %119 = vector.broadcast %cst_94 : f32 to vector<256x2xf32>
    %c7_95 = arith.constant 7 : index
    %c0_96 = arith.constant 0 : index
    %120 = vector.load %arg18[%c7_95, %c0_96] : memref<304x2xf32, #tpu.memory_space<vmem>>, vector<256x2xf32>
    %cst_97 = arith.constant 0.000000e+00 : f32
    %121 = vector.shape_cast %22 : vector<256x1xi1> to vector<256x1xi1>
    %122 = vector.broadcast %121 : vector<256x1xi1> to vector<256x2xi1>
    %123 = vector.broadcast %cst_97 : f32 to vector<256x2xf32>
    %124 = arith.select %122, %120, %123 : vector<256x2xi1>, vector<256x2xf32>
    %c0_98 = arith.constant 0 : index
    %c0_99 = arith.constant 0 : index
    %c0_100 = arith.constant 0 : index
    %c0_101 = arith.constant 0 : index
    %125 = vector.load %arg10[%c0_98, %c0_99, %c0_100, %c0_101] : memref<3x3x2x2xf32, #tpu.memory_space<vmem>>, vector<1x1x2x2xf32>
    %126 = vector.shape_cast %125 : vector<1x1x2x2xf32> to vector<2x2xf32>
    %cst_102 = arith.constant dense<0.000000e+00> : vector<256x2xf32>
    %127 = tpu.matmul %124, %126, %cst_102 {dimension_numbers = #tpu.dot_dimension_numbers<[1], [0], [0], [1], [0, 0, 1, 1], [], []>} : vector<256x2xf32>, vector<2x2xf32>, vector<256x2xf32> -> vector<256x2xf32>
    %128 = arith.addf %119, %127 : vector<256x2xf32>
    %c8_103 = arith.constant 8 : index
    %c0_104 = arith.constant 0 : index
    %129 = vector.load %arg18[%c8_103, %c0_104] : memref<304x2xf32, #tpu.memory_space<vmem>>, vector<256x2xf32>
    %c0_105 = arith.constant 0 : index
    %c1_106 = arith.constant 1 : index
    %c0_107 = arith.constant 0 : index
    %c0_108 = arith.constant 0 : index
    %130 = vector.load %arg10[%c0_105, %c1_106, %c0_107, %c0_108] : memref<3x3x2x2xf32, #tpu.memory_space<vmem>>, vector<1x1x2x2xf32>
    %131 = vector.shape_cast %130 : vector<1x1x2x2xf32> to vector<2x2xf32>
    %cst_109 = arith.constant dense<0.000000e+00> : vector<256x2xf32>
    %132 = tpu.matmul %129, %131, %cst_109 {dimension_numbers = #tpu.dot_dimension_numbers<[1], [0], [0], [1], [0, 0, 1, 1], [], []>} : vector<256x2xf32>, vector<2x2xf32>, vector<256x2xf32> -> vector<256x2xf32>
    %133 = arith.addf %128, %132 : vector<256x2xf32>
    %c9_110 = arith.constant 9 : index
    %c0_111 = arith.constant 0 : index
    %134 = vector.load %arg18[%c9_110, %c0_111] : memref<304x2xf32, #tpu.memory_space<vmem>>, vector<256x2xf32>
    %cst_112 = arith.constant 0.000000e+00 : f32
    %135 = vector.shape_cast %24 : vector<256x1xi1> to vector<256x1xi1>
    %136 = vector.broadcast %135 : vector<256x1xi1> to vector<256x2xi1>
    %137 = vector.broadcast %cst_112 : f32 to vector<256x2xf32>
    %138 = arith.select %136, %134, %137 : vector<256x2xi1>, vector<256x2xf32>
    %c0_113 = arith.constant 0 : index
    %c2_114 = arith.constant 2 : index
    %c0_115 = arith.constant 0 : index
    %c0_116 = arith.constant 0 : index
    %139 = vector.load %arg10[%c0_113, %c2_114, %c0_115, %c0_116] : memref<3x3x2x2xf32, #tpu.memory_space<vmem>>, vector<1x1x2x2xf32>
    %140 = vector.shape_cast %139 : vector<1x1x2x2xf32> to vector<2x2xf32>
    %cst_117 = arith.constant dense<0.000000e+00> : vector<256x2xf32>
    %141 = tpu.matmul %138, %140, %cst_117 {dimension_numbers = #tpu.dot_dimension_numbers<[1], [0], [0], [1], [0, 0, 1, 1], [], []>} : vector<256x2xf32>, vector<2x2xf32>, vector<256x2xf32> -> vector<256x2xf32>
    %142 = arith.addf %133, %141 : vector<256x2xf32>
    %c23_118 = arith.constant 23 : index
    %c0_119 = arith.constant 0 : index
    %143 = vector.load %arg18[%c23_118, %c0_119] : memref<304x2xf32, #tpu.memory_space<vmem>>, vector<256x2xf32>
    %cst_120 = arith.constant 0.000000e+00 : f32
    %144 = vector.shape_cast %22 : vector<256x1xi1> to vector<256x1xi1>
    %145 = vector.broadcast %144 : vector<256x1xi1> to vector<256x2xi1>
    %146 = vector.broadcast %cst_120 : f32 to vector<256x2xf32>
    %147 = arith.select %145, %143, %146 : vector<256x2xi1>, vector<256x2xf32>
    %c1_121 = arith.constant 1 : index
    %c0_122 = arith.constant 0 : index
    %c0_123 = arith.constant 0 : index
    %c0_124 = arith.constant 0 : index
    %148 = vector.load %arg10[%c1_121, %c0_122, %c0_123, %c0_124] : memref<3x3x2x2xf32, #tpu.memory_space<vmem>>, vector<1x1x2x2xf32>
    %149 = vector.shape_cast %148 : vector<1x1x2x2xf32> to vector<2x2xf32>
    %cst_125 = arith.constant dense<0.000000e+00> : vector<256x2xf32>
    %150 = tpu.matmul %147, %149, %cst_125 {dimension_numbers = #tpu.dot_dimension_numbers<[1], [0], [0], [1], [0, 0, 1, 1], [], []>} : vector<256x2xf32>, vector<2x2xf32>, vector<256x2xf32> -> vector<256x2xf32>
    %151 = arith.addf %142, %150 : vector<256x2xf32>
    %c24_126 = arith.constant 24 : index
    %c0_127 = arith.constant 0 : index
    %152 = vector.load %arg18[%c24_126, %c0_127] : memref<304x2xf32, #tpu.memory_space<vmem>>, vector<256x2xf32>
    %c1_128 = arith.constant 1 : index
    %c1_129 = arith.constant 1 : index
    %c0_130 = arith.constant 0 : index
    %c0_131 = arith.constant 0 : index
    %153 = vector.load %arg10[%c1_128, %c1_129, %c0_130, %c0_131] : memref<3x3x2x2xf32, #tpu.memory_space<vmem>>, vector<1x1x2x2xf32>
    %154 = vector.shape_cast %153 : vector<1x1x2x2xf32> to vector<2x2xf32>
    %cst_132 = arith.constant dense<0.000000e+00> : vector<256x2xf32>
    %155 = tpu.matmul %152, %154, %cst_132 {dimension_numbers = #tpu.dot_dimension_numbers<[1], [0], [0], [1], [0, 0, 1, 1], [], []>} : vector<256x2xf32>, vector<2x2xf32>, vector<256x2xf32> -> vector<256x2xf32>
    %156 = arith.addf %151, %155 : vector<256x2xf32>
    %c25_133 = arith.constant 25 : index
    %c0_134 = arith.constant 0 : index
    %157 = vector.load %arg18[%c25_133, %c0_134] : memref<304x2xf32, #tpu.memory_space<vmem>>, vector<256x2xf32>
    %cst_135 = arith.constant 0.000000e+00 : f32
    %158 = vector.shape_cast %24 : vector<256x1xi1> to vector<256x1xi1>
    %159 = vector.broadcast %158 : vector<256x1xi1> to vector<256x2xi1>
    %160 = vector.broadcast %cst_135 : f32 to vector<256x2xf32>
    %161 = arith.select %159, %157, %160 : vector<256x2xi1>, vector<256x2xf32>
    %c1_136 = arith.constant 1 : index
    %c2_137 = arith.constant 2 : index
    %c0_138 = arith.constant 0 : index
    %c0_139 = arith.constant 0 : index
    %162 = vector.load %arg10[%c1_136, %c2_137, %c0_138, %c0_139] : memref<3x3x2x2xf32, #tpu.memory_space<vmem>>, vector<1x1x2x2xf32>
    %163 = vector.shape_cast %162 : vector<1x1x2x2xf32> to vector<2x2xf32>
    %cst_140 = arith.constant dense<0.000000e+00> : vector<256x2xf32>
    %164 = tpu.matmul %161, %163, %cst_140 {dimension_numbers = #tpu.dot_dimension_numbers<[1], [0], [0], [1], [0, 0, 1, 1], [], []>} : vector<256x2xf32>, vector<2x2xf32>, vector<256x2xf32> -> vector<256x2xf32>
    %165 = arith.addf %156, %164 : vector<256x2xf32>
    %c39_141 = arith.constant 39 : index
    %c0_142 = arith.constant 0 : index
    %166 = vector.load %arg18[%c39_141, %c0_142] : memref<304x2xf32, #tpu.memory_space<vmem>>, vector<256x2xf32>
    %cst_143 = arith.constant 0.000000e+00 : f32
    %167 = vector.shape_cast %22 : vector<256x1xi1> to vector<256x1xi1>
    %168 = vector.broadcast %167 : vector<256x1xi1> to vector<256x2xi1>
    %169 = vector.broadcast %cst_143 : f32 to vector<256x2xf32>
    %170 = arith.select %168, %166, %169 : vector<256x2xi1>, vector<256x2xf32>
    %c2_144 = arith.constant 2 : index
    %c0_145 = arith.constant 0 : index
    %c0_146 = arith.constant 0 : index
    %c0_147 = arith.constant 0 : index
    %171 = vector.load %arg10[%c2_144, %c0_145, %c0_146, %c0_147] : memref<3x3x2x2xf32, #tpu.memory_space<vmem>>, vector<1x1x2x2xf32>
    %172 = vector.shape_cast %171 : vector<1x1x2x2xf32> to vector<2x2xf32>
    %cst_148 = arith.constant dense<0.000000e+00> : vector<256x2xf32>
    %173 = tpu.matmul %170, %172, %cst_148 {dimension_numbers = #tpu.dot_dimension_numbers<[1], [0], [0], [1], [0, 0, 1, 1], [], []>} : vector<256x2xf32>, vector<2x2xf32>, vector<256x2xf32> -> vector<256x2xf32>
    %174 = arith.addf %165, %173 : vector<256x2xf32>
    %c40_149 = arith.constant 40 : index
    %c0_150 = arith.constant 0 : index
    %175 = vector.load %arg18[%c40_149, %c0_150] : memref<304x2xf32, #tpu.memory_space<vmem>>, vector<256x2xf32>
    %c2_151 = arith.constant 2 : index
    %c1_152 = arith.constant 1 : index
    %c0_153 = arith.constant 0 : index
    %c0_154 = arith.constant 0 : index
    %176 = vector.load %arg10[%c2_151, %c1_152, %c0_153, %c0_154] : memref<3x3x2x2xf32, #tpu.memory_space<vmem>>, vector<1x1x2x2xf32>
    %177 = vector.shape_cast %176 : vector<1x1x2x2xf32> to vector<2x2xf32>
    %cst_155 = arith.constant dense<0.000000e+00> : vector<256x2xf32>
    %178 = tpu.matmul %175, %177, %cst_155 {dimension_numbers = #tpu.dot_dimension_numbers<[1], [0], [0], [1], [0, 0, 1, 1], [], []>} : vector<256x2xf32>, vector<2x2xf32>, vector<256x2xf32> -> vector<256x2xf32>
    %179 = arith.addf %174, %178 : vector<256x2xf32>
    %c41_156 = arith.constant 41 : index
    %c0_157 = arith.constant 0 : index
    %180 = vector.load %arg18[%c41_156, %c0_157] : memref<304x2xf32, #tpu.memory_space<vmem>>, vector<256x2xf32>
    %cst_158 = arith.constant 0.000000e+00 : f32
    %181 = vector.shape_cast %24 : vector<256x1xi1> to vector<256x1xi1>
    %182 = vector.broadcast %181 : vector<256x1xi1> to vector<256x2xi1>
    %183 = vector.broadcast %cst_158 : f32 to vector<256x2xf32>
    %184 = arith.select %182, %180, %183 : vector<256x2xi1>, vector<256x2xf32>
    %c2_159 = arith.constant 2 : index
    %c2_160 = arith.constant 2 : index
    %c0_161 = arith.constant 0 : index
    %c0_162 = arith.constant 0 : index
    %185 = vector.load %arg10[%c2_159, %c2_160, %c0_161, %c0_162] : memref<3x3x2x2xf32, #tpu.memory_space<vmem>>, vector<1x1x2x2xf32>
    %186 = vector.shape_cast %185 : vector<1x1x2x2xf32> to vector<2x2xf32>
    %cst_163 = arith.constant dense<0.000000e+00> : vector<256x2xf32>
    %187 = tpu.matmul %184, %186, %cst_163 {dimension_numbers = #tpu.dot_dimension_numbers<[1], [0], [0], [1], [0, 0, 1, 1], [], []>} : vector<256x2xf32>, vector<2x2xf32>, vector<256x2xf32> -> vector<256x2xf32>
    %188 = arith.addf %179, %187 : vector<256x2xf32>
    %c0_164 = arith.constant 0 : index
    %c0_165 = arith.constant 0 : index
    %189 = vector.load %arg11[%c0_164, %c0_165] : memref<1x2xf32, #tpu.memory_space<vmem>>, vector<1x2xf32>
    %190 = vector.broadcast %189 : vector<1x2xf32> to vector<256x2xf32>
    %191 = arith.addf %188, %190 : vector<256x2xf32>
    %c0_166 = arith.constant 0 : index
    %c0_167 = arith.constant 0 : index
    %192 = vector.load %arg12[%c0_166, %c0_167] : memref<2x8xf32, #tpu.memory_space<vmem>>, vector<2x8xf32>
    %cst_168 = arith.constant dense<0.000000e+00> : vector<256x8xf32>
    %193 = tpu.matmul %191, %192, %cst_168 {dimension_numbers = #tpu.dot_dimension_numbers<[1], [0], [0], [1], [0, 0, 1, 1], [], []>} : vector<256x2xf32>, vector<2x8xf32>, vector<256x8xf32> -> vector<256x8xf32>
    %c0_169 = arith.constant 0 : index
    %c0_170 = arith.constant 0 : index
    %194 = vector.load %arg13[%c0_169, %c0_170] : memref<1x8xf32, #tpu.memory_space<vmem>>, vector<1x8xf32>
    %195 = vector.broadcast %194 : vector<1x8xf32> to vector<256x8xf32>
    %196 = arith.addf %193, %195 : vector<256x8xf32>
    %c24_171 = arith.constant 24 : index
    %c0_172 = arith.constant 0 : index
    %197 = vector.load %arg17[%c24_171, %c0_172] : memref<304x8xf32, #tpu.memory_space<vmem>>, vector<256x8xf32>
    tpu.vector_store %arg17[%c24_171, %c0_172], %196 {strides = array<i32>} : memref<304x8xf32, #tpu.memory_space<vmem>>, vector<256x8xf32>,
    %cst_173 = arith.constant 0.000000e+00 : f32
    %198 = vector.broadcast %cst_173 : f32 to vector<256x8xf32>
    %c7_174 = arith.constant 7 : index
    %c0_175 = arith.constant 0 : index
    %199 = vector.load %arg17[%c7_174, %c0_175] : memref<304x8xf32, #tpu.memory_space<vmem>>, vector<256x8xf32>
    %cst_176 = arith.constant 0.000000e+00 : f32
    %200 = vector.shape_cast %22 : vector<256x1xi1> to vector<256x1xi1>
    %201 = vector.broadcast %200 : vector<256x1xi1> to vector<256x8xi1>
    %202 = vector.broadcast %cst_176 : f32 to vector<256x8xf32>
    %203 = arith.select %201, %199, %202 : vector<256x8xi1>, vector<256x8xf32>
    %c0_177 = arith.constant 0 : index
    %c0_178 = arith.constant 0 : index
    %c0_179 = arith.constant 0 : index
    %c0_180 = arith.constant 0 : index
    %204 = vector.load %arg14[%c0_177, %c0_178, %c0_179, %c0_180] : memref<3x3x8x8xf32, #tpu.memory_space<vmem>>, vector<1x1x8x8xf32>
    %205 = vector.shape_cast %204 : vector<1x1x8x8xf32> to vector<8x8xf32>
    %cst_181 = arith.constant dense<0.000000e+00> : vector<256x8xf32>
    %206 = tpu.matmul %203, %205, %cst_181 {dimension_numbers = #tpu.dot_dimension_numbers<[1], [0], [0], [1], [0, 0, 1, 1], [], []>} : vector<256x8xf32>, vector<8x8xf32>, vector<256x8xf32> -> vector<256x8xf32>
    %207 = arith.addf %198, %206 : vector<256x8xf32>
    %c8_182 = arith.constant 8 : index
    %c0_183 = arith.constant 0 : index
    %208 = vector.load %arg17[%c8_182, %c0_183] : memref<304x8xf32, #tpu.memory_space<vmem>>, vector<256x8xf32>
    %c0_184 = arith.constant 0 : index
    %c1_185 = arith.constant 1 : index
    %c0_186 = arith.constant 0 : index
    %c0_187 = arith.constant 0 : index
    %209 = vector.load %arg14[%c0_184, %c1_185, %c0_186, %c0_187] : memref<3x3x8x8xf32, #tpu.memory_space<vmem>>, vector<1x1x8x8xf32>
    %210 = vector.shape_cast %209 : vector<1x1x8x8xf32> to vector<8x8xf32>
    %cst_188 = arith.constant dense<0.000000e+00> : vector<256x8xf32>
    %211 = tpu.matmul %208, %210, %cst_188 {dimension_numbers = #tpu.dot_dimension_numbers<[1], [0], [0], [1], [0, 0, 1, 1], [], []>} : vector<256x8xf32>, vector<8x8xf32>, vector<256x8xf32> -> vector<256x8xf32>
    %212 = arith.addf %207, %211 : vector<256x8xf32>
    %c9_189 = arith.constant 9 : index
    %c0_190 = arith.constant 0 : index
    %213 = vector.load %arg17[%c9_189, %c0_190] : memref<304x8xf32, #tpu.memory_space<vmem>>, vector<256x8xf32>
    %cst_191 = arith.constant 0.000000e+00 : f32
    %214 = vector.shape_cast %24 : vector<256x1xi1> to vector<256x1xi1>
    %215 = vector.broadcast %214 : vector<256x1xi1> to vector<256x8xi1>
    %216 = vector.broadcast %cst_191 : f32 to vector<256x8xf32>
    %217 = arith.select %215, %213, %216 : vector<256x8xi1>, vector<256x8xf32>
    %c0_192 = arith.constant 0 : index
    %c2_193 = arith.constant 2 : index
    %c0_194 = arith.constant 0 : index
    %c0_195 = arith.constant 0 : index
    %218 = vector.load %arg14[%c0_192, %c2_193, %c0_194, %c0_195] : memref<3x3x8x8xf32, #tpu.memory_space<vmem>>, vector<1x1x8x8xf32>
    %219 = vector.shape_cast %218 : vector<1x1x8x8xf32> to vector<8x8xf32>
    %cst_196 = arith.constant dense<0.000000e+00> : vector<256x8xf32>
    %220 = tpu.matmul %217, %219, %cst_196 {dimension_numbers = #tpu.dot_dimension_numbers<[1], [0], [0], [1], [0, 0, 1, 1], [], []>} : vector<256x8xf32>, vector<8x8xf32>, vector<256x8xf32> -> vector<256x8xf32>
    %221 = arith.addf %212, %220 : vector<256x8xf32>
    %c23_197 = arith.constant 23 : index
    %c0_198 = arith.constant 0 : index
    %222 = vector.load %arg17[%c23_197, %c0_198] : memref<304x8xf32, #tpu.memory_space<vmem>>, vector<256x8xf32>
    %cst_199 = arith.constant 0.000000e+00 : f32
    %223 = vector.shape_cast %22 : vector<256x1xi1> to vector<256x1xi1>
    %224 = vector.broadcast %223 : vector<256x1xi1> to vector<256x8xi1>
    %225 = vector.broadcast %cst_199 : f32 to vector<256x8xf32>
    %226 = arith.select %224, %222, %225 : vector<256x8xi1>, vector<256x8xf32>
    %c1_200 = arith.constant 1 : index
    %c0_201 = arith.constant 0 : index
    %c0_202 = arith.constant 0 : index
    %c0_203 = arith.constant 0 : index
    %227 = vector.load %arg14[%c1_200, %c0_201, %c0_202, %c0_203] : memref<3x3x8x8xf32, #tpu.memory_space<vmem>>, vector<1x1x8x8xf32>
    %228 = vector.shape_cast %227 : vector<1x1x8x8xf32> to vector<8x8xf32>
    %cst_204 = arith.constant dense<0.000000e+00> : vector<256x8xf32>
    %229 = tpu.matmul %226, %228, %cst_204 {dimension_numbers = #tpu.dot_dimension_numbers<[1], [0], [0], [1], [0, 0, 1, 1], [], []>} : vector<256x8xf32>, vector<8x8xf32>, vector<256x8xf32> -> vector<256x8xf32>
    %230 = arith.addf %221, %229 : vector<256x8xf32>
    %c24_205 = arith.constant 24 : index
    %c0_206 = arith.constant 0 : index
    %231 = vector.load %arg17[%c24_205, %c0_206] : memref<304x8xf32, #tpu.memory_space<vmem>>, vector<256x8xf32>
    %c1_207 = arith.constant 1 : index
    %c1_208 = arith.constant 1 : index
    %c0_209 = arith.constant 0 : index
    %c0_210 = arith.constant 0 : index
    %232 = vector.load %arg14[%c1_207, %c1_208, %c0_209, %c0_210] : memref<3x3x8x8xf32, #tpu.memory_space<vmem>>, vector<1x1x8x8xf32>
    %233 = vector.shape_cast %232 : vector<1x1x8x8xf32> to vector<8x8xf32>
    %cst_211 = arith.constant dense<0.000000e+00> : vector<256x8xf32>
    %234 = tpu.matmul %231, %233, %cst_211 {dimension_numbers = #tpu.dot_dimension_numbers<[1], [0], [0], [1], [0, 0, 1, 1], [], []>} : vector<256x8xf32>, vector<8x8xf32>, vector<256x8xf32> -> vector<256x8xf32>
    %235 = arith.addf %230, %234 : vector<256x8xf32>
    %c25_212 = arith.constant 25 : index
    %c0_213 = arith.constant 0 : index
    %236 = vector.load %arg17[%c25_212, %c0_213] : memref<304x8xf32, #tpu.memory_space<vmem>>, vector<256x8xf32>
    %cst_214 = arith.constant 0.000000e+00 : f32
    %237 = vector.shape_cast %24 : vector<256x1xi1> to vector<256x1xi1>
    %238 = vector.broadcast %237 : vector<256x1xi1> to vector<256x8xi1>
    %239 = vector.broadcast %cst_214 : f32 to vector<256x8xf32>
    %240 = arith.select %238, %236, %239 : vector<256x8xi1>, vector<256x8xf32>
    %c1_215 = arith.constant 1 : index
    %c2_216 = arith.constant 2 : index
    %c0_217 = arith.constant 0 : index
    %c0_218 = arith.constant 0 : index
    %241 = vector.load %arg14[%c1_215, %c2_216, %c0_217, %c0_218] : memref<3x3x8x8xf32, #tpu.memory_space<vmem>>, vector<1x1x8x8xf32>
    %242 = vector.shape_cast %241 : vector<1x1x8x8xf32> to vector<8x8xf32>
    %cst_219 = arith.constant dense<0.000000e+00> : vector<256x8xf32>
    %243 = tpu.matmul %240, %242, %cst_219 {dimension_numbers = #tpu.dot_dimension_numbers<[1], [0], [0], [1], [0, 0, 1, 1], [], []>} : vector<256x8xf32>, vector<8x8xf32>, vector<256x8xf32> -> vector<256x8xf32>
    %244 = arith.addf %235, %243 : vector<256x8xf32>
    %c39_220 = arith.constant 39 : index
    %c0_221 = arith.constant 0 : index
    %245 = vector.load %arg17[%c39_220, %c0_221] : memref<304x8xf32, #tpu.memory_space<vmem>>, vector<256x8xf32>
    %cst_222 = arith.constant 0.000000e+00 : f32
    %246 = vector.shape_cast %22 : vector<256x1xi1> to vector<256x1xi1>
    %247 = vector.broadcast %246 : vector<256x1xi1> to vector<256x8xi1>
    %248 = vector.broadcast %cst_222 : f32 to vector<256x8xf32>
    %249 = arith.select %247, %245, %248 : vector<256x8xi1>, vector<256x8xf32>
    %c2_223 = arith.constant 2 : index
    %c0_224 = arith.constant 0 : index
    %c0_225 = arith.constant 0 : index
    %c0_226 = arith.constant 0 : index
    %250 = vector.load %arg14[%c2_223, %c0_224, %c0_225, %c0_226] : memref<3x3x8x8xf32, #tpu.memory_space<vmem>>, vector<1x1x8x8xf32>
    %251 = vector.shape_cast %250 : vector<1x1x8x8xf32> to vector<8x8xf32>
    %cst_227 = arith.constant dense<0.000000e+00> : vector<256x8xf32>
    %252 = tpu.matmul %249, %251, %cst_227 {dimension_numbers = #tpu.dot_dimension_numbers<[1], [0], [0], [1], [0, 0, 1, 1], [], []>} : vector<256x8xf32>, vector<8x8xf32>, vector<256x8xf32> -> vector<256x8xf32>
    %253 = arith.addf %244, %252 : vector<256x8xf32>
    %c40_228 = arith.constant 40 : index
    %c0_229 = arith.constant 0 : index
    %254 = vector.load %arg17[%c40_228, %c0_229] : memref<304x8xf32, #tpu.memory_space<vmem>>, vector<256x8xf32>
    %c2_230 = arith.constant 2 : index
    %c1_231 = arith.constant 1 : index
    %c0_232 = arith.constant 0 : index
    %c0_233 = arith.constant 0 : index
    %255 = vector.load %arg14[%c2_230, %c1_231, %c0_232, %c0_233] : memref<3x3x8x8xf32, #tpu.memory_space<vmem>>, vector<1x1x8x8xf32>
    %256 = vector.shape_cast %255 : vector<1x1x8x8xf32> to vector<8x8xf32>
    %cst_234 = arith.constant dense<0.000000e+00> : vector<256x8xf32>
    %257 = tpu.matmul %254, %256, %cst_234 {dimension_numbers = #tpu.dot_dimension_numbers<[1], [0], [0], [1], [0, 0, 1, 1], [], []>} : vector<256x8xf32>, vector<8x8xf32>, vector<256x8xf32> -> vector<256x8xf32>
    %258 = arith.addf %253, %257 : vector<256x8xf32>
    %c41_235 = arith.constant 41 : index
    %c0_236 = arith.constant 0 : index
    %259 = vector.load %arg17[%c41_235, %c0_236] : memref<304x8xf32, #tpu.memory_space<vmem>>, vector<256x8xf32>
    %cst_237 = arith.constant 0.000000e+00 : f32
    %260 = vector.shape_cast %24 : vector<256x1xi1> to vector<256x1xi1>
    %261 = vector.broadcast %260 : vector<256x1xi1> to vector<256x8xi1>
    %262 = vector.broadcast %cst_237 : f32 to vector<256x8xf32>
    %263 = arith.select %261, %259, %262 : vector<256x8xi1>, vector<256x8xf32>
    %c2_238 = arith.constant 2 : index
    %c2_239 = arith.constant 2 : index
    %c0_240 = arith.constant 0 : index
    %c0_241 = arith.constant 0 : index
    %264 = vector.load %arg14[%c2_238, %c2_239, %c0_240, %c0_241] : memref<3x3x8x8xf32, #tpu.memory_space<vmem>>, vector<1x1x8x8xf32>
    %265 = vector.shape_cast %264 : vector<1x1x8x8xf32> to vector<8x8xf32>
    %cst_242 = arith.constant dense<0.000000e+00> : vector<256x8xf32>
    %266 = tpu.matmul %263, %265, %cst_242 {dimension_numbers = #tpu.dot_dimension_numbers<[1], [0], [0], [1], [0, 0, 1, 1], [], []>} : vector<256x8xf32>, vector<8x8xf32>, vector<256x8xf32> -> vector<256x8xf32>
    %267 = arith.addf %258, %266 : vector<256x8xf32>
    %c0_243 = arith.constant 0 : index
    %c0_244 = arith.constant 0 : index
    %268 = vector.load %arg15[%c0_243, %c0_244] : memref<1x8xf32, #tpu.memory_space<vmem>>, vector<1x8xf32>
    %269 = vector.broadcast %268 : vector<1x8xf32> to vector<256x8xf32>
    %270 = arith.addf %267, %269 : vector<256x8xf32>
    %271 = vector.shape_cast %270 : vector<256x8xf32> to vector<16x16x8xf32>
    %c0_245 = arith.constant 0 : index
    %c0_246 = arith.constant 0 : index
    %c0_247 = arith.constant 0 : index
    %c0_248 = arith.constant 0 : index
    %272 = vector.load %arg16[%c0_245, %c0_246, %c0_247, %c0_248] : memref<1x16x16x8xf32, #tpu.memory_space<vmem>>, vector<1x16x16x8xf32>
    %273 = vector.shape_cast %272 : vector<1x16x16x8xf32> to vector<16x16x8xf32>
    %274 = vector.shape_cast %271 : vector<16x16x8xf32> to vector<1x16x16x8xf32>
    tpu.vector_store %arg16[%c0_245, %c0_246, %c0_247, %c0_248], %274 {strides = array<i32>} : memref<1x16x16x8xf32, #tpu.memory_space<vmem>>, vector<1x16x16x8xf32>,
    return
  }
  func.func @transform_0(%arg0: i32) -> (i32, i32, i32, i32) {
    %c0_i32 = arith.constant 0 : i32
    %c0_i32_0 = arith.constant 0 : i32
    %c0_i32_1 = arith.constant 0 : i32
    %c0_i32_2 = arith.constant 0 : i32
    return %arg0, %c0_i32, %c0_i32_0, %c0_i32_1 : i32, i32, i32, i32
  }
  func.func @transform_1(%arg0: i32) -> (i32, i32, i32, i32) {
    %c0_i32 = arith.constant 0 : i32
    %c0_i32_0 = arith.constant 0 : i32
    %c0_i32_1 = arith.constant 0 : i32
    %c0_i32_2 = arith.constant 0 : i32
    return %arg0, %c0_i32, %c0_i32_0, %c0_i32_1 : i32, i32, i32, i32
  }
  func.func @transform_2(%arg0: i32) -> (i32, i32) {
    %c0_i32 = arith.constant 0 : i32
    %c0_i32_0 = arith.constant 0 : i32
    %c0_i32_1 = arith.constant 0 : i32
    return %c0_i32, %c0_i32_0 : i32, i32
  }
  func.func @transform_3(%arg0: i32) -> (i32, i32) {
    %c0_i32 = arith.constant 0 : i32
    %c0_i32_0 = arith.constant 0 : i32
    %c0_i32_1 = arith.constant 0 : i32
    return %c0_i32, %c0_i32_0 : i32, i32
  }
  func.func @transform_4(%arg0: i32) -> (i32, i32) {
    %c0_i32 = arith.constant 0 : i32
    %c0_i32_0 = arith.constant 0 : i32
    %c0_i32_1 = arith.constant 0 : i32
    return %c0_i32, %c0_i32_0 : i32, i32
  }
  func.func @transform_5(%arg0: i32) -> (i32, i32, i32, i32) {
    %c0_i32 = arith.constant 0 : i32
    %c0_i32_0 = arith.constant 0 : i32
    %c0_i32_1 = arith.constant 0 : i32
    %c0_i32_2 = arith.constant 0 : i32
    %c0_i32_3 = arith.constant 0 : i32
    return %c0_i32, %c0_i32_0, %c0_i32_1, %c0_i32_2 : i32, i32, i32, i32
  }
  func.func @transform_6(%arg0: i32) -> (i32, i32) {
    %c0_i32 = arith.constant 0 : i32
    %c0_i32_0 = arith.constant 0 : i32
    %c0_i32_1 = arith.constant 0 : i32
    return %c0_i32, %c0_i32_0 : i32, i32
  }
  func.func @transform_7(%arg0: i32) -> (i32, i32) {
    %c0_i32 = arith.constant 0 : i32
    %c0_i32_0 = arith.constant 0 : i32
    %c0_i32_1 = arith.constant 0 : i32
    return %c0_i32, %c0_i32_0 : i32, i32
  }
  func.func @transform_8(%arg0: i32) -> (i32, i32) {
    %c0_i32 = arith.constant 0 : i32
    %c0_i32_0 = arith.constant 0 : i32
    %c0_i32_1 = arith.constant 0 : i32
    return %c0_i32, %c0_i32_0 : i32, i32
  }
  func.func @transform_9(%arg0: i32) -> (i32, i32, i32, i32) {
    %c0_i32 = arith.constant 0 : i32
    %c0_i32_0 = arith.constant 0 : i32
    %c0_i32_1 = arith.constant 0 : i32
    %c0_i32_2 = arith.constant 0 : i32
    %c0_i32_3 = arith.constant 0 : i32
    return %c0_i32, %c0_i32_0, %c0_i32_1, %c0_i32_2 : i32, i32, i32, i32
  }
  func.func @transform_10(%arg0: i32) -> (i32, i32) {
    %c0_i32 = arith.constant 0 : i32
    %c0_i32_0 = arith.constant 0 : i32
    %c0_i32_1 = arith.constant 0 : i32
    return %c0_i32, %c0_i32_0 : i32, i32
  }
  func.func @transform_11(%arg0: i32) -> (i32, i32) {
    %c0_i32 = arith.constant 0 : i32
    %c0_i32_0 = arith.constant 0 : i32
    %c0_i32_1 = arith.constant 0 : i32
    return %c0_i32, %c0_i32_0 : i32, i32
  }
  func.func @transform_12(%arg0: i32) -> (i32, i32) {
    %c0_i32 = arith.constant 0 : i32
    %c0_i32_0 = arith.constant 0 : i32
    %c0_i32_1 = arith.constant 0 : i32
    return %c0_i32, %c0_i32_0 : i32, i32
  }
  func.func @transform_13(%arg0: i32) -> (i32, i32, i32, i32) {
    %c0_i32 = arith.constant 0 : i32
    %c0_i32_0 = arith.constant 0 : i32
    %c0_i32_1 = arith.constant 0 : i32
    %c0_i32_2 = arith.constant 0 : i32
    %c0_i32_3 = arith.constant 0 : i32
    return %c0_i32, %c0_i32_0, %c0_i32_1, %c0_i32_2 : i32, i32, i32, i32
  }
  func.func @transform_14(%arg0: i32) -> (i32, i32) {
    %c0_i32 = arith.constant 0 : i32
    %c0_i32_0 = arith.constant 0 : i32
    %c0_i32_1 = arith.constant 0 : i32
    return %c0_i32, %c0_i32_0 : i32, i32
  }
  func.func @transform_15(%arg0: i32) -> (i32, i32, i32, i32) {
    %c0_i32 = arith.constant 0 : i32
    %c0_i32_0 = arith.constant 0 : i32
    %c0_i32_1 = arith.constant 0 : i32
    %c0_i32_2 = arith.constant 0 : i32
    return %arg0, %c0_i32, %c0_i32_0, %c0_i32_1 : i32, i32, i32, i32
  }
}

</mosaic_0001>

<bundles_post_ra>
// kernel: frm_forward.1
= control target key start
LH: loop header
LB: loop body
LE: loop exit
PB: predicated region body
PF: predicated region fallthrough
CT: control target
= control target key end

     0   :  { %s17501_s18 = smov 0   ;;  %s23050_s0 = inlined_call_operand.vmem [shape: f32[2,16,16,8], index: 0, kind: input, shape index: {}]   ;;  %s23051_s1 = inlined_call_operand.vmem [shape: f32[2,16,16,8], index: 1, kind: input, shape index: {}]   ;;  %s23052_s2 = inlined_call_operand.vmem [shape: f32[8,8], index: 2, kind: input, shape index: {}]   ;;  %s23053_s3 = inlined_call_operand.vmem [shape: f32[8,8], index: 3, kind: input, shape index: {}]   ;;  %s23054_s4 = inlined_call_operand.vmem [shape: f32[1,8], index: 4, kind: input, shape index: {}]   ;;  %s23055_s5 = inlined_call_operand.vmem [shape: f32[3,3,8,8], index: 5, kind: input, shape index: {}]   ;;  %s23056_s6 = inlined_call_operand.vmem [shape: f32[1,8], index: 6, kind: input, shape index: {}]   ;;  %s23057_s7 = inlined_call_operand.vmem [shape: f32[8,2], index: 7, kind: input, shape index: {}]   ;;  %s23058_s8 = inlined_call_operand.vmem [shape: f32[1,2], index: 8, kind: input, shape index: {}]   ;;  %s23059_s9 = inlined_call_operand.vmem [shape: f32[3,3,2,2], index: 9, kind: input, shape index: {}]   ;;  %s23060_s10 = inlined_call_operand.vmem [shape: f32[1,2], index: 10, kind: input, shape index: {}]   ;;  %s23061_s11 = inlined_call_operand.vmem [shape: f32[2,8], index: 11, kind: input, shape index: {}]   ;;  %s23062_s12 = inlined_call_operand.vmem [shape: f32[1,8], index: 12, kind: input, shape index: {}]   ;;  %s23063_s13 = inlined_call_operand.vmem [shape: f32[3,3,8,8], index: 13, kind: input, shape index: {}]   ;;  %s23064_s14 = inlined_call_operand.vmem [shape: f32[1,8], index: 14, kind: input, shape index: {}]   ;;  %s23065_s15 = inlined_call_operand.vmem [shape: f32[2,16,16,8], index: 15, kind: output, shape index: {}]  }
   0x1 LB: > { %s13780_s19 = sadd.s32 4294967295, %s17418_s18   ;;  %p13784_p0 = scmp.ge.s32.totalorder %s17418_s18, 1  ;;  %s17418_s18 = sphi %s17501_s18, %s25_s18  }
   0x2   : > { %p447_p1 = scmp.lt.s32.totalorder %s17418_s18, 3 }
   0x4   : > { %p448_p2 = pnand %p13784_p0, %p447_p1 }
   0x6   : > { %451 = sbr.rel (%p448_p2) target bundleno = 2113 (0x841), region = 80 }
   0xb   : > { %v1139_v0 = vld [vmem:[%s23053_s3] sm:$0xff]  ;;  %p500_p3 = scmp.lt.s32.totalorder %s13780_s19, 1  ;;  %vm23204_vm0 = vcmask 64512   ;;  %v13856_v59 = vld [vmem:[%s23055_s5 + $0x8] sm:$0xff] }
   0xc   : > { %v1138_v1 = vld [vmem:[%s23052_s2] sm:$0xff]  ;;  %17401 = vmatprep.subr.mxu1 %v1139_v0  ;;  %15851 = vmatprep.subr.mxu0 %v1139_v0 }
   0xd   : > { %17402 = vmatpush3.msra.mxu1 %v1139_v0  ;;  %s25020_s19 = smov (!%p500_p3, %s13780_s19), 1  ;;  %15852 = vmatpush3.msra.mxu0 %v1139_v0 }
   0xe   : > { %15901 = vmatprep.subr.mxu1 %v1138_v1  ;;  %s17515_s24 = sshll.u32 %s25020_s19, 8  ;;  %15951 = vmatprep.subr.mxu0 %v13856_v59 }
   0xf   : > { %s17521_s27 = scalar_lea.vmem %s23051_s1, %s17515_s24  ;;  %s17578_s30 = scalar_lea.vmem %s23050_s0, %s17515_s24 }
  0x10   : > { %v1122_v2 = vld [vmem:[%s17521_s27 + $0x80] sm:$0xff]  ;;  %v1123_v3 = vld [vmem:[%s17521_s27 + $0x88] sm:$0xff]  ;;  %v1124_v4 = vld [vmem:[%s17521_s27 + $0x90] sm:$0xff]  ;;  %s22833_s25 = scalar_lea.vmem %s23065_s15, %s17515_s24 }
  0x11   : > { %15877 = vmatprep.mubr.msk.f32.mxu1 %vm23204_vm0, %v1122_v2  ;;  %v1125_v5 = vld [vmem:[%s17521_s27 + $0x98] sm:$0xff]  ;;  %v1126_v6 = vld [vmem:[%s17521_s27 + $0xa0] sm:$0xff]  ;;  %v1107_v8 = vld [vmem:[%s17521_s27 + $0x8] sm:$0xff] }
  0x12   : > { %15878 = vmatmul.mubr.msk.f32.vlgmr.msra.gmra.mxu1 %vm23204_vm0, %v1123_v3  ;;  %v1106_v7 = vld [vmem:[%s17521_s27] sm:$0xff]  ;;  %v1108_v9 = vld [vmem:[%s17521_s27 + $0x10] sm:$0xff]  ;;  %v1127_v10 = vld [vmem:[%s17521_s27 + $0xa8] sm:$0xff]  ;;  %v23066_v3 = vmov 0.0  }
  0x13   : > { %15902 = vmatpush3.msra.mxu1 %v1138_v1  ;;  %15880 = vmatprep.mubr.msk.f32.mxu1 %vm23204_vm0, %v1124_v4  ;;  %v1128_v11 = vld [vmem:[%s17521_s27 + $0xb0] sm:$0xff]  ;;  %v1109_v12 = vld [vmem:[%s17521_s27 + $0x18] sm:$0xff]  ;;  %v1110_v13 = vld [vmem:[%s17521_s27 + $0x20] sm:$0xff]  ;;  %520 = vst.msk [vmem:[#allocation2 + $0x20] sm:$0xff] %vm23204_vm0, %v23066_v3  ;;  %v593_v4 = vlaneseq }
  0x14   : > { %15853 = vmatprep.mubr.msk.f32.mxu0 %vm23204_vm0, %v1106_v7  ;;  %v1129_v14 = vld [vmem:[%s17521_s27 + $0xb8] sm:$0xff]  ;;  %v1130_v15 = vld [vmem:[%s17521_s27 + $0xc0] sm:$0xff]  ;;  %v1111_v16 = vld [vmem:[%s17521_s27 + $0x28] sm:$0xff]  ;;  %516 = vst.msk [vmem:[#allocation2] sm:$0xff] %vm23204_vm0, %v23066_v3 }
  0x15   : > { %15854 = vmatmul.mubr.msk.f32.vlgmr.msra.gmra.mxu0 %vm23204_vm0, %v1107_v8  ;;  %v1112_v17 = vld [vmem:[%s17521_s27 + $0x30] sm:$0xff]  ;;  %v1131_v18 = vld [vmem:[%s17521_s27 + $0xc8] sm:$0xff]  ;;  %v1113_v20 = vld [vmem:[%s17521_s27 + $0x38] sm:$0xff]  ;;  %517 = vst.msk [vmem:[#allocation2 + $0x8] sm:$0xff] %vm23204_vm0, %v23066_v3  ;;  %v23355_v8 = vmov 0 }
  0x16   : > { %15881 = vmatmul.mubr.msk.f32.gmra.mxu1 %vm23204_vm0, %v1125_v5  ;;  %15856 = vmatprep.mubr.msk.f32.mxu0 %vm23204_vm0, %v1108_v9  ;;  %v1132_v19 = vld [vmem:[%s17521_s27 + $0xd0] sm:$0xff]  ;;  %v1114_v21 = vld [vmem:[%s17521_s27 + $0x40] sm:$0xff]  ;;  %v1133_v22 = vld [vmem:[%s17521_s27 + $0xd8] sm:$0xff]  ;;  %518 = vst.msk [vmem:[#allocation2 + $0x10] sm:$0xff] %vm23204_vm0, %v23066_v3  ;;  %v17736_v5 = vshrl.u32 %v593_v4, 7  ;;  %v23358_v4 = vmov 0 }
  0x17   : > { %15883 = vmatprep.mubr.msk.f32.mxu1 %vm23204_vm0, %v1126_v6  ;;  %v1134_v23 = vld [vmem:[%s17521_s27 + $0xe0] sm:$0xff]  ;;  %v1115_v24 = vld [vmem:[%s17521_s27 + $0x48] sm:$0xff]  ;;  %v1116_v25 = vld [vmem:[%s17521_s27 + $0x50] sm:$0xff]  ;;  %15952 = vmatpush3.msra.mxu0 %v13856_v59  ;;  %519 = vst.msk [vmem:[#allocation2 + $0x18] sm:$0xff] %vm23204_vm0, %v23066_v3 }
  0x18   : > { %v1135_v26 = vld [vmem:[%s17521_s27 + $0xe8] sm:$0xff]  ;;  %v1136_v27 = vld [vmem:[%s17521_s27 + $0xf0] sm:$0xff]  ;;  %v1117_v28 = vld [vmem:[%s17521_s27 + $0x58] sm:$0xff]  ;;  %521 = vst.msk [vmem:[#allocation2 + $0x28] sm:$0xff] %vm23204_vm0, %v23066_v3  ;;  %v630_v6 = vand.u32 15, %v17736_v5 }
  0x19   : > { %15857 = vmatmul.mubr.msk.f32.gmra.mxu0 %vm23204_vm0, %v1109_v12  ;;  %v1118_v29 = vld [vmem:[%s17521_s27 + $0x60] sm:$0xff]  ;;  %v1137_v30 = vld [vmem:[%s17521_s27 + $0xf8] sm:$0xff]  ;;  %v1119_v32 = vld [vmem:[%s17521_s27 + $0x68] sm:$0xff]  ;;  %522 = vst.msk [vmem:[#allocation2 + $0x30] sm:$0xff] %vm23204_vm0, %v23066_v3 }
  0x1a   : > { %15884 = vmatmul.mubr.msk.f32.gmra.mxu1 %vm23204_vm0, %v1127_v10  ;;  %15859 = vmatprep.mubr.msk.f32.mxu0 %vm23204_vm0, %v1110_v13  ;;  %v1074_v31 = vld [vmem:[%s17578_s30] sm:$0xff]  ;;  %v1120_v33 = vld [vmem:[%s17521_s27 + $0x70] sm:$0xff]  ;;  %v1075_v34 = vld [vmem:[%s17578_s30 + $0x8] sm:$0xff]  ;;  %523 = vst.msk [vmem:[#allocation2 + $0x38] sm:$0xff] %vm23204_vm0, %v23066_v3  ;;  %vm17742_vm1 = vcmp.ne.s32.totalorder %v630_v6, 0 }
  0x1b   : > { %15886 = vmatprep.mubr.msk.f32.mxu1 %vm23204_vm0, %v1128_v11  ;;  %v1076_v35 = vld [vmem:[%s17578_s30 + $0x10] sm:$0xff]  ;;  %v1121_v36 = vld [vmem:[%s17521_s27 + $0x78] sm:$0xff]  ;;  %v1078_v38 = vld [vmem:[%s17578_s30 + $0x20] sm:$0xff]  ;;  %524 = vst.msk [vmem:[#allocation2 + $0x40] sm:$0xff] %vm23204_vm0, %v23066_v3  ;;  %v23356_v8 = vsel %vm17742_vm1, 4294967295, %v23355_v8 }
  0x1c   : > { %v1077_v37 = vld [vmem:[%s17578_s30 + $0x18] sm:$0xff]  ;;  %v1079_v39 = vld [vmem:[%s17578_s30 + $0x28] sm:$0xff]  ;;  %v1080_v40 = vld [vmem:[%s17578_s30 + $0x30] sm:$0xff]  ;;  %525 = vst.msk [vmem:[#allocation2 + $0x48] sm:$0xff] %vm23204_vm0, %v23066_v3 }
  0x1d   : > { %15860 = vmatmul.mubr.msk.f32.gmra.mxu0 %vm23204_vm0, %v1111_v16  ;;  %v1081_v41 = vld [vmem:[%s17578_s30 + $0x38] sm:$0xff]  ;;  %v1082_v42 = vld [vmem:[%s17578_s30 + $0x40] sm:$0xff]  ;;  %v1083_v43 = vld [vmem:[%s17578_s30 + $0x48] sm:$0xff]  ;;  %526 = vst.msk [vmem:[#allocation2 + $0x50] sm:$0xff] %vm23204_vm0, %v23066_v3 }
  0x1e   : > { %15887 = vmatmul.mubr.msk.f32.gmra.mxu1 %vm23204_vm0, %v1129_v14  ;;  %15862 = vmatprep.mubr.msk.f32.mxu0 %vm23204_vm0, %v1112_v17  ;;  %v1084_v44 = vld [vmem:[%s17578_s30 + $0x50] sm:$0xff]  ;;  %v1085_v45 = vld [vmem:[%s17578_s30 + $0x58] sm:$0xff]  ;;  %v1086_v46 = vld [vmem:[%s17578_s30 + $0x60] sm:$0xff]  ;;  %527 = vst.msk [vmem:[#allocation2 + $0x58] sm:$0xff] %vm23204_vm0, %v23066_v3 }
  0x1f   : > { %15889 = vmatprep.mubr.msk.f32.mxu1 %vm23204_vm0, %v1130_v15  ;;  %v1087_v47 = vld [vmem:[%s17578_s30 + $0x68] sm:$0xff]  ;;  %v1088_v48 = vld [vmem:[%s17578_s30 + $0x70] sm:$0xff]  ;;  %v1089_v49 = vld [vmem:[%s17578_s30 + $0x78] sm:$0xff]  ;;  %528 = vst.msk [vmem:[#allocation2 + $0x60] sm:$0xff] %vm23204_vm0, %v23066_v3 }
  0x20   : > { %v1090_v50 = vld [vmem:[%s17578_s30 + $0x80] sm:$0xff]  ;;  %v1091_v51 = vld [vmem:[%s17578_s30 + $0x88] sm:$0xff]  ;;  %v1092_v52 = vld [vmem:[%s17578_s30 + $0x90] sm:$0xff]  ;;  %529 = vst.msk [vmem:[#allocation2 + $0x68] sm:$0xff] %vm23204_vm0, %v23066_v3 }
  0x21   : > { %15863 = vmatmul.mubr.msk.f32.gmra.mxu0 %vm23204_vm0, %v1113_v20  ;;  %v1093_v53 = vld [vmem:[%s17578_s30 + $0x98] sm:$0xff]  ;;  %v1094_v54 = vld [vmem:[%s17578_s30 + $0xa0] sm:$0xff]  ;;  %v1095_v55 = vld [vmem:[%s17578_s30 + $0xa8] sm:$0xff]  ;;  %530 = vst.msk [vmem:[#allocation2 + $0x70] sm:$0xff] %vm23204_vm0, %v23066_v3 }
  0x22   : > { %15890 = vmatmul.mubr.msk.f32.gmra.mxu1 %vm23204_vm0, %v1131_v18  ;;  %15865 = vmatprep.mubr.msk.f32.mxu0 %vm23204_vm0, %v1114_v21  ;;  %v1096_v56 = vld [vmem:[%s17578_s30 + $0xb0] sm:$0xff]  ;;  %v1097_v57 = vld [vmem:[%s17578_s30 + $0xb8] sm:$0xff]  ;;  %v1098_v58 = vld [vmem:[%s17578_s30 + $0xc0] sm:$0xff]  ;;  %531 = vst.msk [vmem:[#allocation2 + $0x78] sm:$0xff] %vm23204_vm0, %v23066_v3 }
  0x23   : > { %15892 = vmatprep.mubr.msk.f32.mxu1 %vm23204_vm0, %v1132_v19  ;;  %v1099_v60 = vld [vmem:[%s17578_s30 + $0xc8] sm:$0xff]  ;;  %v1100_v61 = vld [vmem:[%s17578_s30 + $0xd0] sm:$0xff]  ;;  %v1101_v62 = vld [vmem:[%s17578_s30 + $0xd8] sm:$0xff]  ;;  %532 = vst.msk [vmem:[#allocation2 + $0x80] sm:$0xff] %vm23204_vm0, %v23066_v3 }
  0x24   : > { %v1102_v63 = vld [vmem:[%s17578_s30 + $0xe0] sm:$0xff]  ;;  %v1103_v0 = vld [vmem:[%s17578_s30 + $0xe8] sm:$0xff]  ;;  %v1104_v1 = vld [vmem:[%s17578_s30 + $0xf0] sm:$0xff]  ;;  %533 = vst.msk [vmem:[#allocation2 + $0x88] sm:$0xff] %vm23204_vm0, %v23066_v3 }
  0x25   : > { %15866 = vmatmul.mubr.msk.f32.gmra.mxu0 %vm23204_vm0, %v1115_v24  ;;  %v1105_v2 = vld [vmem:[%s17578_s30 + $0xf8] sm:$0xff]  ;;  %534 = vst.msk [vmem:[#allocation2 + $0x90] sm:$0xff] %vm23204_vm0, %v23066_v3  ;;  %535 = vst.msk [vmem:[#allocation2 + $0x98] sm:$0xff] %vm23204_vm0, %v23066_v3  ;;  %v1981_v7 = vld [vmem:[%s23055_s5] sm:$0xff] }
  0x26   : > { %15893 = vmatmul.mubr.msk.f32.gmra.mxu1 %vm23204_vm0, %v1133_v22  ;;  %15868 = vmatprep.mubr.msk.f32.mxu0 %vm23204_vm0, %v1116_v25  ;;  %536 = vst.msk [vmem:[#allocation2 + $0xa0] sm:$0xff] %vm23204_vm0, %v23066_v3  ;;  %537 = vst.msk [vmem:[#allocation2 + $0xa8] sm:$0xff] %vm23204_vm0, %v23066_v3  ;;  %v1853_v9 = vld [vmem:[#allocation2 + $0x7] sm:$0xff]  ;;  %v1983_v12 = vld [vmem:[#allocation2 + $0x10] sm:$0xff] }
  0x27   : > { %15895 = vmatprep.mubr.msk.f32.mxu1 %vm23204_vm0, %v1134_v23  ;;  %538 = vst.msk [vmem:[#allocation2 + $0xb0] sm:$0xff] %vm23204_vm0, %v23066_v3  ;;  %539 = vst.msk [vmem:[#allocation2 + $0xb8] sm:$0xff] %vm23204_vm0, %v23066_v3  ;;  %16001 = vmatprep.subr.mxu1 %v1981_v7  ;;  %v1982_v10 = vld [vmem:[#allocation2 + $0x8] sm:$0xff]  ;;  %v1949_v11 = vsel %vm17742_vm1, %v1853_v9, 0.0  ;;  %v13921_v14 = vld [vmem:[%s23055_s5 + $0x10] sm:$0xff] }
  0x28   : > { %540 = vst.msk [vmem:[#allocation2 + $0xc0] sm:$0xff] %vm23204_vm0, %v23066_v3  ;;  %541 = vst.msk [vmem:[#allocation2 + $0xc8] sm:$0xff] %vm23204_vm0, %v23066_v3  ;;  %v1854_v13 = vld [vmem:[#allocation2 + $0xf] sm:$0xff]  ;;  %16051 = vmatprep.subr.mxu0 %v13921_v14  ;;  %v13954_v15 = vld [vmem:[%s23055_s5 + $0x18] sm:$0xff] }
  0x29   : > { %15869 = vmatmul.mubr.msk.f32.gmra.mxu0 %vm23204_vm0, %v1117_v28  ;;  %542 = vst.msk [vmem:[#allocation2 + $0xd0] sm:$0xff] %vm23204_vm0, %v23066_v3  ;;  %543 = vst.msk [vmem:[#allocation2 + $0xd8] sm:$0xff] %vm23204_vm0, %v23066_v3  ;;  %v17761_v16 = vld [vmem:[%s23055_s5 + $0x20] sm:$0xff] }
  0x2a   : > { %15896 = vmatmul.mubr.msk.f32.gmra.mxu1 %vm23204_vm0, %v1135_v26  ;;  %15871 = vmatprep.mubr.msk.f32.mxu0 %vm23204_vm0, %v1118_v29  ;;  %544 = vst.msk [vmem:[#allocation2 + $0xe0] sm:$0xff] %vm23204_vm0, %v23066_v3  ;;  %545 = vst.msk [vmem:[#allocation2 + $0xe8] sm:$0xff] %vm23204_vm0, %v23066_v3 }
  0x2b   : > { %15898 = vmatprep.mubr.msk.f32.mxu1 %vm23204_vm0, %v1136_v27  ;;  %546 = vst.msk [vmem:[#allocation2 + $0xf0] sm:$0xff] %vm23204_vm0, %v23066_v3  ;;  %547 = vst.msk [vmem:[#allocation2 + $0xf8] sm:$0xff] %vm23204_vm0, %v23066_v3 }
  0x2c   : > { %548 = vst.msk [vmem:[#allocation2 + $0x100] sm:$0xff] %vm23204_vm0, %v23066_v3  ;;  %549 = vst.msk [vmem:[#allocation2 + $0x108] sm:$0xff] %vm23204_vm0, %v23066_v3 }
  0x2d   : > { %15872 = vmatmul.mubr.msk.f32.gmra.mxu0 %vm23204_vm0, %v1119_v32  ;;  %550 = vst.msk [vmem:[#allocation2 + $0x110] sm:$0xff] %vm23204_vm0, %v23066_v3  ;;  %551 = vst.msk [vmem:[#allocation2 + $0x118] sm:$0xff] %vm23204_vm0, %v23066_v3 }
  0x2e   : > { %15899 = vmatmul.mubr.msk.f32.gmra.mxu1 %vm23204_vm0, %v1137_v30  ;;  %15874 = vmatprep.mubr.msk.f32.mxu0 %vm23204_vm0, %v1120_v33  ;;  %552 = vst.msk [vmem:[#allocation2 + $0x120] sm:$0xff] %vm23204_vm0, %v23066_v3  ;;  %553 = vst.msk [vmem:[#allocation2 + $0x128] sm:$0xff] %vm23204_vm0, %v23066_v3 }
  0x2f   : > { %15903 = vmatprep.mubr.msk.f32.mxu1 %vm23204_vm0, %v1074_v31  ;;  %23357 = vst [vmem:[#allocation4_spill] sm:$0xff] %v23356_v8 }
  0x31   : > { %15875 = vmatmul.mubr.msk.f32.gmra.mxu0 %vm23204_vm0, %v1121_v36 }
  0x32   : > { %15904 = vmatmul.mubr.msk.f32.vlgmr.msra.gmra.mxu1 %vm23204_vm0, %v1075_v34  ;;  %15953 = vmatprep.mubr.msk.f32.mxu0 %vm23204_vm0, %v1982_v10 }
  0x33   : > { %15906 = vmatprep.mubr.msk.f32.mxu1 %vm23204_vm0, %v1076_v35  ;;  %16002 = vmatpush3.msra.mxu1 %v1981_v7  ;;  %v600_v7 = vadd.s32 48, %v17736_v5 }
  0x34   : > { %16101 = vmatprep.subr.mxu1 %v13954_v15 }
  0x35   : > { %15954 = vmatmul.mubr.msk.f32.vlgmr.msra.gmra.mxu0 %vm23204_vm0, %v1983_v12 }
  0x36   : > { %15907 = vmatmul.mubr.msk.f32.gmra.mxu1 %vm23204_vm0, %v1077_v37  ;;  %16052 = vmatpush3.msra.mxu0 %v13921_v14 }
  0x37   : > { %15909 = vmatprep.mubr.msk.f32.mxu1 %vm23204_vm0, %v1078_v38  ;;  %16151 = vmatprep.subr.mxu0 %v17761_v16 }
  0x3a   : > { %15910 = vmatmul.mubr.msk.f32.gmra.mxu1 %vm23204_vm0, %v1079_v39 }
  0x3b   : > { %15912 = vmatprep.mubr.msk.f32.mxu1 %vm23204_vm0, %v1080_v40 }
  0x3e   : > { %15913 = vmatmul.mubr.msk.f32.gmra.mxu1 %vm23204_vm0, %v1081_v41 }
  0x3f   : > { %15915 = vmatprep.mubr.msk.f32.mxu1 %vm23204_vm0, %v1082_v42  ;;  %v17799_v42 = vld [vmem:[%s23054_s4] ss:$0 sm:$0xff] }
  0x42   : > { %15916 = vmatmul.mubr.msk.f32.gmra.mxu1 %vm23204_vm0, %v1083_v43 }
  0x43   : > { %15918 = vmatprep.mubr.msk.f32.mxu1 %vm23204_vm0, %v1084_v44 }
  0x46   : > { %15919 = vmatmul.mubr.msk.f32.gmra.mxu1 %vm23204_vm0, %v1085_v45 }
  0x47   : > { %15921 = vmatprep.mubr.msk.f32.mxu1 %vm23204_vm0, %v1086_v46 }
  0x4a   : > { %15922 = vmatmul.mubr.msk.f32.gmra.mxu1 %vm23204_vm0, %v1087_v47 }
  0x4b   : > { %15924 = vmatprep.mubr.msk.f32.mxu1 %vm23204_vm0, %v1088_v48 }
  0x4e   : > { %15925 = vmatmul.mubr.msk.f32.gmra.mxu1 %vm23204_vm0, %v1089_v49  ;;  %v596_v49 = vadd.s32 16, %v17736_v5 }
  0x4f   : > { %15927 = vmatprep.mubr.msk.f32.mxu1 %vm23204_vm0, %v1090_v50 }
  0x52   : > { %15928 = vmatmul.mubr.msk.f32.gmra.mxu1 %vm23204_vm0, %v1091_v51 }
  0x53   : > { %15930 = vmatprep.mubr.msk.f32.mxu1 %vm23204_vm0, %v1092_v52 }
  0x56   : > { %15931 = vmatmul.mubr.msk.f32.gmra.mxu1 %vm23204_vm0, %v1093_v53 }
  0x57   : > { %15933 = vmatprep.mubr.msk.f32.mxu1 %vm23204_vm0, %v1094_v54 }
  0x5a   : > { %15934 = vmatmul.mubr.msk.f32.gmra.mxu1 %vm23204_vm0, %v1095_v55 }
  0x5b   : > { %15936 = vmatprep.mubr.msk.f32.mxu1 %vm23204_vm0, %v1096_v56 }
  0x5e   : > { %15937 = vmatmul.mubr.msk.f32.gmra.mxu1 %vm23204_vm0, %v1097_v57  ;;  %v644_v57 = vand.u32 15, %v596_v49 }
  0x5f   : > { %15939 = vmatprep.mubr.msk.f32.mxu1 %vm23204_vm0, %v1098_v58  ;;  %v598_v58 = vadd.s32 32, %v17736_v5 }
  0x60   : > { %vm17818_vm2 = vcmp.ne.s32.totalorder %v644_v57, 0 }
  0x61   : > { %v23359_v4 = vsel %vm17818_vm2, 4294967295, %v23358_v4  ;;  %v658_v6 = vand.u32 15, %v598_v58 }
  0x62   : > { %15940 = vmatmul.mubr.msk.f32.gmra.mxu1 %vm23204_vm0, %v1099_v60  ;;  %23360 = vst [vmem:[#allocation5_spill] sm:$0xff] %v23359_v4 }
  0x63   : > { %15942 = vmatprep.mubr.msk.f32.mxu1 %vm23204_vm0, %v1100_v61  ;;  %vm17843_vm3 = vcmp.ne.s32.totalorder %v658_v6, 0 }
  0x66   : > { %15943 = vmatmul.mubr.msk.f32.gmra.mxu1 %vm23204_vm0, %v1101_v62 }
  0x67   : > { %15945 = vmatprep.mubr.msk.f32.mxu1 %vm23204_vm0, %v1102_v63  ;;  %v17813_v63 = vld [vmem:[%s23055_s5 + $0x28] sm:$0xff] }
  0x6a   : > { %15946 = vmatmul.mubr.msk.f32.gmra.mxu1 %vm23204_vm0, %v1103_v0 }
  0x6b   : > { %15948 = vmatprep.mubr.msk.f32.mxu1 %vm23204_vm0, %v1104_v1 }
  0x6e   : > { %15949 = vmatmul.mubr.msk.f32.gmra.mxu1 %vm23204_vm0, %v1105_v2 }
  0x6f   : > { %16003 = vmatprep.mubr.msk.f32.mxu1 %vm23204_vm0, %v1949_v11 }
  0x72   : > { %16004 = vmatmul.mubr.msk.f32.vlgmr.msra.gmra.mxu1 %vm23204_vm0, %v1854_v13 }
  0x73   : > { %16102 = vmatpush3.msra.mxu1 %v13954_v15 }
  0x74   : > { %16201 = vmatprep.subr.mxu1 %v17813_v63 }
  0xd2   : > { %v17764_v17 = vpop.f32.mrf.mxu1 }
  0xd4   : > { %v17766_v18 = vpop.f32.mrf.mxu1 }
  0xd5   : > { %v15855_v20 = vpop.f32.mrf.mxu0 }
  0xd6   : > { %v17768_v19 = vpop.f32.mrf.mxu1 }
  0xd7   : > { %v1302_v22 = vpop.f32.mrf.mxu0 }
  0xd8   : > { %v17770_v21 = vpop.f32.mrf.mxu1 }
  0xd9   : > { %v15858_v25 = vpop.f32.mrf.mxu0 }
  0xda   : > { %v17772_v23 = vpop.f32.mrf.mxu1 }
  0xdb   : > { %v1312_v28 = vpop.f32.mrf.mxu0 }
  0xdc   : > { %v17774_v24 = vpop.f32.mrf.mxu1 }
  0xdd   : > { %v15861_v31 = vpop.f32.mrf.mxu0 }
  0xde   : > { %v17776_v26 = vpop.f32.mrf.mxu1 }
  0xdf   : > { %v1322_v34 = vpop.f32.mrf.mxu0 }
  0xe0   : > { %v17778_v27 = vpop.f32.mrf.mxu1 }
  0xe1   : > { %v15864_v37 = vpop.f32.mrf.mxu0 }
  0xe2   : > { %v17780_v29 = vpop.f32.mrf.mxu1 }
  0xe3   : > { %v1332_v40 = vpop.f32.mrf.mxu0 }
  0xe4   : > { %v17782_v30 = vpop.f32.mrf.mxu1 }
  0xe5   : > { %v15867_v45 = vpop.f32.mrf.mxu0 }
  0xe6   : > { %v17784_v32 = vpop.f32.mrf.mxu1 }
  0xe7   : > { %v1342_v53 = vpop.f32.mrf.mxu0 }
  0xe8   : > { %v17786_v33 = vpop.f32.mrf.mxu1 }
  0xe9   : > { %v15870_v62 = vpop.f32.mrf.mxu0 }
  0xea   : > { %v17788_v35 = vpop.f32.mrf.mxu1 }
  0xeb   : > { %v1352_v14 = vpop.f32.mrf.mxu0 }
  0xec   : > { %v17790_v36 = vpop.f32.mrf.mxu1 }
  0xee   : > { %v17792_v38 = vpop.f32.mrf.mxu1 }
  0xf0   : > { %v17794_v39 = vpop.f32.mrf.mxu1 }
  0xf2   : > { %v15905_v41 = vpop.f32.mrf.mxu1 }
  0xf3   : > { %v1629_v43 = vadd.f32 %v15905_v41, %v15855_v20 }
  0xf4   : > { %v1623_v44 = vpop.f32.mrf.mxu1 }
  0xf5   : > { %v1790_v46 = vadd.f32 %v17799_v42, %v1629_v43  ;;  %v1624_v47 = vadd.f32 %v1623_v44, %v1302_v22 }
  0xf6   : > { %v15908_v48 = vpop.f32.mrf.mxu1 }
  0xf7   : > { %1822 = vst.msk [vmem:[#allocation2 + $0x20] sm:$0xff] %vm23204_vm0, %v1790_v46  ;;  %v1789_v50 = vadd.f32 %v17799_v42, %v1624_v47  ;;  %v1639_v51 = vadd.f32 %v15908_v48, %v15858_v25  ;;  %v15873_v48 = vpop.f32.mrf.mxu0 }
  0xf8   : > { %v1633_v52 = vpop.f32.mrf.mxu1 }
  0xf9   : > { %1821 = vst.msk [vmem:[#allocation2 + $0x18] sm:$0xff] %vm23204_vm0, %v1789_v50  ;;  %v1792_v54 = vadd.f32 %v17799_v42, %v1639_v51  ;;  %v1634_v55 = vadd.f32 %v1633_v52, %v1312_v28 }
  0xfa   : > { %v15911_v56 = vpop.f32.mrf.mxu1 }
  0xfb   : > { %1824 = vst.msk [vmem:[#allocation2 + $0x30] sm:$0xff] %vm23204_vm0, %v1792_v54  ;;  %v1791_v59 = vadd.f32 %v17799_v42, %v1634_v55  ;;  %v1649_v60 = vadd.f32 %v15911_v56, %v15861_v31  ;;  %v23364_v55 = vmov 0  ;;  %v604_v56 = vadd.s32 80, %v17736_v5 }
  0xfc   : > { %v1643_v61 = vpop.f32.mrf.mxu1 }
  0xfd   : > { %1823 = vst.msk [vmem:[#allocation2 + $0x28] sm:$0xff] %vm23204_vm0, %v1791_v59  ;;  %v1794_v0 = vadd.f32 %v17799_v42, %v1649_v60  ;;  %v1644_v1 = vadd.f32 %v1643_v61, %v1322_v34  ;;  %v23361_v34 = vmov 0  ;;  %v1362_v61 = vpop.f32.mrf.mxu0 }
  0xfe   : > { %v15914_v2 = vpop.f32.mrf.mxu1  ;;  %v17833_v22 = vld [vmem:[#allocation2 + $0x20] sm:$0xff]  ;;  %v23362_v34 = vsel %vm17843_vm3, 4294967295, %v23361_v34 }
  0xff   : > { %1826 = vst.msk [vmem:[#allocation2 + $0x40] sm:$0xff] %vm23204_vm0, %v1794_v0  ;;  %v1793_v9 = vadd.f32 %v17799_v42, %v1644_v1  ;;  %v1659_v10 = vadd.f32 %v15914_v2, %v15864_v37  ;;  %23363 = vst [vmem:[#allocation6_spill] sm:$0xff] %v23362_v34  ;;  %v672_v37 = vand.u32 15, %v600_v7 }
 0x100   : > { %v1653_v11 = vpop.f32.mrf.mxu1  ;;  %v17825_v12 = vld [vmem:[#allocation2 + $0x18] sm:$0xff] }
 0x101   : > { %v17827_v13 = vld [vmem:[#allocation2 + $0x17] sm:$0xff]  ;;  %1825 = vst.msk [vmem:[#allocation2 + $0x38] sm:$0xff] %vm23204_vm0, %v1793_v9  ;;  %v1796_v15 = vadd.f32 %v17799_v42, %v1659_v10  ;;  %v1654_v20 = vadd.f32 %v1653_v11, %v1332_v40  ;;  %15956 = vmatprep.mubr.msk.f32.mxu0 %vm23204_vm0, %v17825_v12  ;;  %v17841_v31 = vld [vmem:[#allocation2 + $0x1f] sm:$0xff]  ;;  %v602_v40 = vadd.s32 64, %v17736_v5  ;;  %vm17870_vm4 = vcmp.ne.s32.totalorder %v672_v37, 0 }
 0x102   : > { %v1951_v25 = vsel %vm17818_vm2, %v17827_v13, 0.0  ;;  %v15917_v28 = vpop.f32.mrf.mxu1  ;;  %15957 = vmatmul.mubr.msk.f32.gmra.mxu0 %vm23204_vm0, %v17833_v22  ;;  %v17860_v51 = vld [vmem:[#allocation2 + $0x30] sm:$0xff]  ;;  %v23365_v55 = vsel %vm17870_vm4, 4294967295, %v23364_v55  ;;  %v23369_v10 = vmov 0  ;;  %v700_v11 = vand.u32 15, %v604_v56 }
 0x103   : > { %16006 = vmatprep.mubr.msk.f32.mxu1 %vm23204_vm0, %v1951_v25  ;;  %1828 = vst.msk [vmem:[#allocation2 + $0x50] sm:$0xff] %vm23204_vm0, %v1796_v15  ;;  %v1795_v41 = vadd.f32 %v17799_v42, %v1654_v20  ;;  %v1669_v43 = vadd.f32 %v15917_v28, %v15867_v45  ;;  %23366 = vst [vmem:[#allocation7_spill] sm:$0xff] %v23365_v55  ;;  %v15876_v25 = vpop.f32.mrf.mxu0  ;;  %v607_v55 = vadd.s32 104, %v17736_v5 }
 0x104   : > { %16007 = vmatmul.mubr.msk.f32.gmra.mxu1 %vm23204_vm0, %v17841_v31  ;;  %v1663_v44 = vpop.f32.mrf.mxu1  ;;  %v17852_v46 = vld [vmem:[#allocation2 + $0x28] sm:$0xff]  ;;  %vm17924_vm6 = vcmp.ne.s32.totalorder %v700_v11, 0 }
 0x105   : > { %v17854_v47 = vld [vmem:[#allocation2 + $0x27] sm:$0xff]  ;;  %1827 = vst.msk [vmem:[#allocation2 + $0x48] sm:$0xff] %vm23204_vm0, %v1795_v41  ;;  %v1798_v49 = vadd.f32 %v17799_v42, %v1669_v43  ;;  %v1664_v50 = vadd.f32 %v1663_v44, %v1342_v53  ;;  %15959 = vmatprep.mubr.msk.f32.mxu0 %vm23204_vm0, %v17852_v46  ;;  %v17868_v54 = vld [vmem:[#allocation2 + $0x2f] sm:$0xff]  ;;  %v686_v53 = vand.u32 15, %v602_v40 }
 0x106   : > { %v1953_v45 = vsel %vm17843_vm3, %v17854_v47, 0.0  ;;  %v15920_v52 = vpop.f32.mrf.mxu1  ;;  %15960 = vmatmul.mubr.msk.f32.gmra.mxu0 %vm23204_vm0, %v17860_v51  ;;  %v17887_v6 = vld [vmem:[#allocation2 + $0x40] sm:$0xff] }
 0x107   : > { %16009 = vmatprep.mubr.msk.f32.mxu1 %vm23204_vm0, %v1953_v45  ;;  %1830 = vst.msk [vmem:[#allocation2 + $0x60] sm:$0xff] %vm23204_vm0, %v1798_v49  ;;  %v1797_v57 = vadd.f32 %v17799_v42, %v1664_v50  ;;  %v1679_v58 = vadd.f32 %v15920_v52, %v15870_v62  ;;  %23368 = vst [vmem:[#allocation9_spill] sm:$0xff] %v17887_v6  ;;  %vm17897_vm5 = vcmp.ne.s32.totalorder %v686_v53, 0  ;;  %v23374_v45 = vmov 0 }
 0x108   : > { %16010 = vmatmul.mubr.msk.f32.gmra.mxu1 %vm23204_vm0, %v17868_v54  ;;  %v1673_v59 = vpop.f32.mrf.mxu1  ;;  %v17879_v60 = vld [vmem:[#allocation2 + $0x38] sm:$0xff]  ;;  %v23370_v10 = vsel %vm17897_vm5, 4294967295, %v23369_v10  ;;  %v23375_v45 = vsel %vm17924_vm6, 4294967295, %v23374_v45  ;;  %v608_v53 = vadd.s32 112, %v17736_v5 }
 0x109   : > { %23367 = vst [vmem:[#allocation8_spill] sm:$0xff] %v17879_v60  ;;  %v17881_v0 = vld [vmem:[#allocation2 + $0x37] sm:$0xff]  ;;  %1829 = vst.msk [vmem:[#allocation2 + $0x58] sm:$0xff] %vm23204_vm0, %v1797_v57  ;;  %v1800_v1 = vadd.f32 %v17799_v42, %v1679_v58  ;;  %v1674_v2 = vadd.f32 %v1673_v59, %v1352_v14  ;;  %15962 = vmatprep.mubr.msk.f32.mxu0 %vm23204_vm0, %v17879_v60  ;;  %v17895_v9 = vld [vmem:[#allocation2 + $0x3f] sm:$0xff]  ;;  %v606_v14 = vadd.s32 96, %v17736_v5  ;;  %v1372_v58 = vpop.f32.mrf.mxu0 }
 0x10a   : > { %v1955_v62 = vsel %vm17870_vm4, %v17881_v0, 0.0  ;;  %v15923_v7 = vpop.f32.mrf.mxu1  ;;  %15963 = vmatmul.mubr.msk.f32.gmra.mxu0 %vm23204_vm0, %v17887_v6  ;;  %23371 = vst [vmem:[#allocation10_spill] sm:$0xff] %v23370_v10  ;;  %v17914_v44 = vld [vmem:[#allocation2 + $0x50] sm:$0xff]  ;;  %23376 = vst [vmem:[#allocation13_spill] sm:$0xff] %v23375_v45  ;;  %v3173_v6 = vsel %vm17742_vm1, %v17827_v13, 0.0  ;;  %v18252_v60 = vld [vmem:[#allocation2 + $0x19] sm:$0xff] }
 0x10b   : > { %16012 = vmatprep.mubr.msk.f32.mxu1 %vm23204_vm0, %v1955_v62  ;;  %1832 = vst.msk [vmem:[#allocation2 + $0x70] sm:$0xff] %vm23204_vm0, %v1800_v1  ;;  %v1799_v15 = vadd.f32 %v17799_v42, %v1674_v2  ;;  %v1689_v20 = vadd.f32 %v15923_v7, %v15873_v48  ;;  %23373 = vst [vmem:[#allocation12_spill] sm:$0xff] %v17914_v44  ;;  %v714_v52 = vand.u32 15, %v606_v14  ;;  %v23432_v13 = vmov 0 }
 0x10c   : > { %16013 = vmatmul.mubr.msk.f32.gmra.mxu1 %vm23204_vm0, %v17895_v9  ;;  %v1683_v28 = vpop.f32.mrf.mxu1  ;;  %v17906_v37 = vld [vmem:[#allocation2 + $0x48] sm:$0xff]  ;;  %v609_v10 = vadd.s32 120, %v17736_v5  ;;  %v611_v45 = vadd.s32 136, %v17736_v5 }
 0x10d   : > { %23372 = vst [vmem:[#allocation11_spill] sm:$0xff] %v17906_v37  ;;  %v17908_v40 = vld [vmem:[#allocation2 + $0x47] sm:$0xff]  ;;  %1831 = vst.msk [vmem:[#allocation2 + $0x68] sm:$0xff] %vm23204_vm0, %v1799_v15  ;;  %v1802_v41 = vadd.f32 %v17799_v42, %v1689_v20  ;;  %v1684_v43 = vadd.f32 %v1683_v28, %v1362_v61  ;;  %15965 = vmatprep.mubr.msk.f32.mxu0 %vm23204_vm0, %v17906_v37  ;;  %v17922_v50 = vld [vmem:[#allocation2 + $0x4f] sm:$0xff]  ;;  %vm17951_vm7 = vcmp.ne.s32.totalorder %v714_v52, 0  ;;  %v23379_v20 = vmov 0 }
 0x10e   : > { %v1957_v48 = vsel %vm17897_vm5, %v17908_v40, 0.0  ;;  %v15926_v49 = vpop.f32.mrf.mxu1  ;;  %15966 = vmatmul.mubr.msk.f32.gmra.mxu0 %vm23204_vm0, %v17914_v44  ;;  %v17941_v7 = vld [vmem:[#allocation2 + $0x60] sm:$0xff]  ;;  %v23380_v20 = vsel %vm17951_vm7, 4294967295, %v23379_v20  ;;  %v610_v28 = vadd.s32 128, %v17736_v5  ;;  %v2659_v44 = vld [vmem:[#allocation2 + $0x11] sm:$0xff] }
 0x10f   : > { %16015 = vmatprep.mubr.msk.f32.mxu1 %vm23204_vm0, %v1957_v48  ;;  %1834 = vst.msk [vmem:[#allocation2 + $0x80] sm:$0xff] %vm23204_vm0, %v1802_v41  ;;  %v1801_v56 = vadd.f32 %v17799_v42, %v1684_v43  ;;  %v1699_v57 = vadd.f32 %v15926_v49, %v15876_v25  ;;  %23378 = vst [vmem:[#allocation15_spill] sm:$0xff] %v17941_v7  ;;  %v728_v25 = vand.u32 15, %v608_v53 }
 0x110   : > { %16016 = vmatmul.mubr.msk.f32.gmra.mxu1 %vm23204_vm0, %v17922_v50  ;;  %v1693_v59 = vpop.f32.mrf.mxu1  ;;  %v17933_v61 = vld [vmem:[#allocation2 + $0x58] sm:$0xff]  ;;  %23381 = vst [vmem:[#allocation16_spill] sm:$0xff] %v23380_v20  ;;  %v613_v20 = vadd.s32 152, %v17736_v5 }
 0x111   : > { %23377 = vst [vmem:[#allocation14_spill] sm:$0xff] %v17933_v61  ;;  %v17935_v1 = vld [vmem:[#allocation2 + $0x57] sm:$0xff]  ;;  %1833 = vst.msk [vmem:[#allocation2 + $0x78] sm:$0xff] %vm23204_vm0, %v1801_v56  ;;  %v1804_v2 = vadd.f32 %v17799_v42, %v1699_v57  ;;  %v1694_v62 = vadd.f32 %v1693_v59, %v1372_v58  ;;  %15968 = vmatprep.mubr.msk.f32.mxu0 %vm23204_vm0, %v17933_v61  ;;  %v17949_v15 = vld [vmem:[#allocation2 + $0x5f] sm:$0xff]  ;;  %vm17980_vm8 = vcmp.ne.s32.totalorder %v728_v25, 0 }
 0x112   : > { %v1959_v11 = vsel %vm17924_vm6, %v17935_v1, 0.0  ;;  %v15929_v14 = vpop.f32.mrf.mxu1  ;;  %15969 = vmatmul.mubr.msk.f32.gmra.mxu0 %vm23204_vm0, %v17941_v7  ;;  %v17970_v57 = vld [vmem:[#allocation2 + $0x70] sm:$0xff] }
 0x113   : > { %16018 = vmatprep.mubr.msk.f32.mxu1 %vm23204_vm0, %v1959_v11  ;;  %1836 = vst.msk [vmem:[#allocation2 + $0x90] sm:$0xff] %vm23204_vm0, %v1804_v2  ;;  %v1803_v41 = vadd.f32 %v17799_v42, %v1694_v62  ;;  %v1709_v43 = vadd.f32 %v15929_v14, %v17764_v17  ;;  %23383 = vst [vmem:[#allocation18_spill] sm:$0xff] %v17970_v57  ;;  %v23384_v2 = vmov 0  ;;  %v612_v62 = vadd.s32 144, %v17736_v5 }
 0x114   : > { %16019 = vmatmul.mubr.msk.f32.gmra.mxu1 %vm23204_vm0, %v17949_v15  ;;  %v1703_v48 = vpop.f32.mrf.mxu1  ;;  %v17961_v49 = vld [vmem:[#allocation2 + $0x68] sm:$0xff]  ;;  %v23385_v2 = vsel %vm17980_vm8, 4294967295, %v23384_v2 }
 0x115   : > { %23382 = vst [vmem:[#allocation17_spill] sm:$0xff] %v17961_v49  ;;  %v17963_v56 = vld [vmem:[#allocation2 + $0x67] sm:$0xff]  ;;  %1835 = vst.msk [vmem:[#allocation2 + $0x88] sm:$0xff] %vm23204_vm0, %v1803_v41  ;;  %v1806_v52 = vadd.f32 %v17799_v42, %v1709_v43  ;;  %v1704_v53 = vadd.f32 %v1703_v48, %v17766_v18  ;;  %15971 = vmatprep.mubr.msk.f32.mxu0 %vm23204_vm0, %v17961_v49  ;;  %v17978_v59 = vld [vmem:[#allocation2 + $0x6f] sm:$0xff]  ;;  %v742_v18 = vand.u32 15, %v610_v28 }
 0x116   : > { %v1961_v17 = vsel %vm17951_vm7, %v17963_v56, 0.0  ;;  %v15932_v58 = vpop.f32.mrf.mxu1  ;;  %15972 = vmatmul.mubr.msk.f32.gmra.mxu0 %vm23204_vm0, %v17970_v57  ;;  %23386 = vst [vmem:[#allocation19_spill] sm:$0xff] %v23385_v2  ;;  %v615_v2 = vadd.s32 168, %v17736_v5 }
 0x117   : > { %16021 = vmatprep.mubr.msk.f32.mxu1 %vm23204_vm0, %v1961_v17  ;;  %1838 = vst.msk [vmem:[#allocation2 + $0xa0] sm:$0xff] %vm23204_vm0, %v1806_v52  ;;  %v1805_v11 = vadd.f32 %v17799_v42, %v1704_v53  ;;  %v1719_v14 = vadd.f32 %v15932_v58, %v17768_v19  ;;  %v17999_v52 = vld [vmem:[#allocation2 + $0x80] sm:$0xff]  ;;  %vm18009_vm9 = vcmp.ne.s32.totalorder %v742_v18, 0  ;;  %v23389_v58 = vmov 0 }
 0x118   : > { %16022 = vmatmul.mubr.msk.f32.gmra.mxu1 %vm23204_vm0, %v17978_v59  ;;  %v1713_v41 = vpop.f32.mrf.mxu1  ;;  %v17990_v43 = vld [vmem:[#allocation2 + $0x78] sm:$0xff]  ;;  %23388 = vst [vmem:[#allocation21_spill] sm:$0xff] %v17999_v52  ;;  %v23390_v58 = vsel %vm18009_vm9, 4294967295, %v23389_v58 }
 0x119   : > { %23387 = vst [vmem:[#allocation20_spill] sm:$0xff] %v17990_v43  ;;  %v17992_v48 = vld [vmem:[#allocation2 + $0x77] sm:$0xff]  ;;  %1837 = vst.msk [vmem:[#allocation2 + $0x98] sm:$0xff] %vm23204_vm0, %v1805_v11  ;;  %v1808_v25 = vadd.f32 %v17799_v42, %v1719_v14  ;;  %v1714_v28 = vadd.f32 %v1713_v41, %v17770_v21  ;;  %15974 = vmatprep.mubr.msk.f32.mxu0 %vm23204_vm0, %v17990_v43  ;;  %v18007_v17 = vld [vmem:[#allocation2 + $0x7f] sm:$0xff]  ;;  %v756_v21 = vand.u32 15, %v612_v62  ;;  %v614_v11 = vadd.s32 160, %v17736_v5 }
 0x11a   : > { %v1963_v19 = vsel %vm17980_vm8, %v17992_v48, 0.0  ;;  %v15935_v53 = vpop.f32.mrf.mxu1  ;;  %15975 = vmatmul.mubr.msk.f32.gmra.mxu0 %vm23204_vm0, %v17999_v52  ;;  %23391 = vst [vmem:[#allocation22_spill] sm:$0xff] %v23390_v58  ;;  %v617_v58 = vadd.s32 184, %v17736_v5 }
 0x11b   : > { %16024 = vmatprep.mubr.msk.f32.mxu1 %vm23204_vm0, %v1963_v19  ;;  %1840 = vst.msk [vmem:[#allocation2 + $0xb0] sm:$0xff] %vm23204_vm0, %v1808_v25  ;;  %v1807_v14 = vadd.f32 %v17799_v42, %v1714_v28  ;;  %v1729_v41 = vadd.f32 %v15935_v53, %v17772_v23  ;;  %v18028_v25 = vld [vmem:[#allocation2 + $0x90] sm:$0xff]  ;;  %vm18038_vm10 = vcmp.ne.s32.totalorder %v756_v21, 0 }
 0x11c   : > { %16025 = vmatmul.mubr.msk.f32.gmra.mxu1 %vm23204_vm0, %v18007_v17  ;;  %v1723_v3 = vpop.f32.mrf.mxu1  ;;  %v18019_v19 = vld [vmem:[#allocation2 + $0x88] sm:$0xff]  ;;  %23393 = vst [vmem:[#allocation24_spill] sm:$0xff] %v18028_v25 }
 0x11d   : > { %23392 = vst [vmem:[#allocation23_spill] sm:$0xff] %v18019_v19  ;;  %v18021_v52 = vld [vmem:[#allocation2 + $0x87] sm:$0xff]  ;;  %1839 = vst.msk [vmem:[#allocation2 + $0xa8] sm:$0xff] %vm23204_vm0, %v1807_v14  ;;  %v1810_v18 = vadd.f32 %v17799_v42, %v1729_v41  ;;  %v1724_v62 = vadd.f32 %v1723_v3, %v17774_v24  ;;  %15977 = vmatprep.mubr.msk.f32.mxu0 %vm23204_vm0, %v18019_v19  ;;  %v18036_v53 = vld [vmem:[#allocation2 + $0x8f] sm:$0xff]  ;;  %v23394_v14 = vmov 0  ;;  %v770_v3 = vand.u32 15, %v614_v11 }
 0x11e   : > { %v1965_v23 = vsel %vm18009_vm9, %v18021_v52, 0.0  ;;  %v15938_v28 = vpop.f32.mrf.mxu1  ;;  %15978 = vmatmul.mubr.msk.f32.gmra.mxu0 %vm23204_vm0, %v18028_v25  ;;  %v23395_v14 = vsel %vm18038_vm10, 4294967295, %v23394_v14  ;;  %v616_v24 = vadd.s32 176, %v17736_v5 }
 0x11f   : > { %16027 = vmatprep.mubr.msk.f32.mxu1 %vm23204_vm0, %v1965_v23  ;;  %23396 = vst [vmem:[#allocation25_spill] sm:$0xff] %v23395_v14  ;;  %1842 = vst.msk [vmem:[#allocation2 + $0xc0] sm:$0xff] %vm23204_vm0, %v1810_v18  ;;  %v1809_v41 = vadd.f32 %v17799_v42, %v1724_v62  ;;  %v1739_v19 = vadd.f32 %v15938_v28, %v17776_v26  ;;  %v18057_v18 = vld [vmem:[#allocation2 + $0xa0] sm:$0xff]  ;;  %vm18067_vm11 = vcmp.ne.s32.totalorder %v770_v3, 0  ;;  %v619_v14 = vadd.s32 200, %v17736_v5 }
 0x120   : > { %16028 = vmatmul.mubr.msk.f32.gmra.mxu1 %vm23204_vm0, %v18036_v53  ;;  %v1733_v25 = vpop.f32.mrf.mxu1  ;;  %v18048_v23 = vld [vmem:[#allocation2 + $0x98] sm:$0xff]  ;;  %23398 = vst [vmem:[#allocation27_spill] sm:$0xff] %v18057_v18 }
 0x121   : > { %23397 = vst [vmem:[#allocation26_spill] sm:$0xff] %v18048_v23  ;;  %v18050_v43 = vld [vmem:[#allocation2 + $0x97] sm:$0xff]  ;;  %1841 = vst.msk [vmem:[#allocation2 + $0xb8] sm:$0xff] %vm23204_vm0, %v1809_v41  ;;  %v1812_v21 = vadd.f32 %v17799_v42, %v1739_v19  ;;  %v1734_v11 = vadd.f32 %v1733_v25, %v17778_v27  ;;  %15980 = vmatprep.mubr.msk.f32.mxu0 %vm23204_vm0, %v18048_v23  ;;  %v18065_v28 = vld [vmem:[#allocation2 + $0x9f] sm:$0xff]  ;;  %v23399_v19 = vmov 0  ;;  %v784_v27 = vand.u32 15, %v616_v24 }
 0x122   : > { %v1967_v26 = vsel %vm18038_vm10, %v18050_v43, 0.0  ;;  %v15941_v62 = vpop.f32.mrf.mxu1  ;;  %15981 = vmatmul.mubr.msk.f32.gmra.mxu0 %vm23204_vm0, %v18057_v18  ;;  %v23400_v19 = vsel %vm18067_vm11, 4294967295, %v23399_v19  ;;  %v618_v25 = vadd.s32 192, %v17736_v5 }
 0x123   : > { %16030 = vmatprep.mubr.msk.f32.mxu1 %vm23204_vm0, %v1967_v26  ;;  %23401 = vst [vmem:[#allocation28_spill] sm:$0xff] %v23400_v19  ;;  %1844 = vst.msk [vmem:[#allocation2 + $0xd0] sm:$0xff] %vm23204_vm0, %v1812_v21  ;;  %v1811_v41 = vadd.f32 %v17799_v42, %v1734_v11  ;;  %v1749_v23 = vadd.f32 %v15941_v62, %v17780_v29  ;;  %v18086_v21 = vld [vmem:[#allocation2 + $0xb0] sm:$0xff]  ;;  %vm18096_vm12 = vcmp.ne.s32.totalorder %v784_v27, 0  ;;  %v621_v19 = vadd.s32 216, %v17736_v5 }
 0x124   : > { %16031 = vmatmul.mubr.msk.f32.gmra.mxu1 %vm23204_vm0, %v18065_v28  ;;  %v1743_v18 = vpop.f32.mrf.mxu1  ;;  %v18077_v26 = vld [vmem:[#allocation2 + $0xa8] sm:$0xff]  ;;  %23403 = vst [vmem:[#allocation30_spill] sm:$0xff] %v18086_v21 }
 0x125   : > { %23402 = vst [vmem:[#allocation29_spill] sm:$0xff] %v18077_v26  ;;  %v18079_v57 = vld [vmem:[#allocation2 + $0xa7] sm:$0xff]  ;;  %1843 = vst.msk [vmem:[#allocation2 + $0xc8] sm:$0xff] %vm23204_vm0, %v1811_v41  ;;  %v1814_v3 = vadd.f32 %v17799_v42, %v1749_v23  ;;  %v1744_v24 = vadd.f32 %v1743_v18, %v17782_v30  ;;  %15983 = vmatprep.mubr.msk.f32.mxu0 %vm23204_vm0, %v18077_v26  ;;  %v18094_v62 = vld [vmem:[#allocation2 + $0xaf] sm:$0xff]  ;;  %v23404_v23 = vmov 0  ;;  %v798_v30 = vand.u32 15, %v618_v25 }
 0x126   : > { %v1969_v29 = vsel %vm18067_vm11, %v18079_v57, 0.0  ;;  %v15944_v11 = vpop.f32.mrf.mxu1  ;;  %15984 = vmatmul.mubr.msk.f32.gmra.mxu0 %vm23204_vm0, %v18086_v21  ;;  %v23405_v23 = vsel %vm18096_vm12, 4294967295, %v23404_v23  ;;  %v620_v18 = vadd.s32 208, %v17736_v5 }
 0x127   : > { %16033 = vmatprep.mubr.msk.f32.mxu1 %vm23204_vm0, %v1969_v29  ;;  %23406 = vst [vmem:[#allocation31_spill] sm:$0xff] %v23405_v23  ;;  %1846 = vst.msk [vmem:[#allocation2 + $0xe0] sm:$0xff] %vm23204_vm0, %v1814_v3  ;;  %v1813_v41 = vadd.f32 %v17799_v42, %v1744_v24  ;;  %v1759_v26 = vadd.f32 %v15944_v11, %v17784_v32  ;;  %v18115_v3 = vld [vmem:[#allocation2 + $0xc0] sm:$0xff]  ;;  %vm18125_vm13 = vcmp.ne.s32.totalorder %v798_v30, 0  ;;  %v623_v23 = vadd.s32 232, %v17736_v5 }
 0x128   : > { %16034 = vmatmul.mubr.msk.f32.gmra.mxu1 %vm23204_vm0, %v18094_v62  ;;  %v1753_v21 = vpop.f32.mrf.mxu1  ;;  %v18106_v29 = vld [vmem:[#allocation2 + $0xb8] sm:$0xff]  ;;  %23408 = vst [vmem:[#allocation33_spill] sm:$0xff] %v18115_v3 }
 0x129   : > { %23407 = vst [vmem:[#allocation32_spill] sm:$0xff] %v18106_v29  ;;  %v18108_v49 = vld [vmem:[#allocation2 + $0xb7] sm:$0xff]  ;;  %1845 = vst.msk [vmem:[#allocation2 + $0xd8] sm:$0xff] %vm23204_vm0, %v1813_v41  ;;  %v1816_v27 = vadd.f32 %v17799_v42, %v1759_v26  ;;  %v1754_v25 = vadd.f32 %v1753_v21, %v17786_v33  ;;  %15986 = vmatprep.mubr.msk.f32.mxu0 %vm23204_vm0, %v18106_v29  ;;  %v18123_v11 = vld [vmem:[#allocation2 + $0xbf] sm:$0xff]  ;;  %v23409_v26 = vmov 0  ;;  %v812_v33 = vand.u32 15, %v620_v18 }
 0x12a   : > { %v1971_v32 = vsel %vm18096_vm12, %v18108_v49, 0.0  ;;  %v15947_v24 = vpop.f32.mrf.mxu1  ;;  %15987 = vmatmul.mubr.msk.f32.gmra.mxu0 %vm23204_vm0, %v18115_v3  ;;  %v23410_v26 = vsel %vm18125_vm13, 4294967295, %v23409_v26  ;;  %v622_v21 = vadd.s32 224, %v17736_v5 }
 0x12b   : > { %16036 = vmatprep.mubr.msk.f32.mxu1 %vm23204_vm0, %v1971_v32  ;;  %23411 = vst [vmem:[#allocation34_spill] sm:$0xff] %v23410_v26  ;;  %1848 = vst.msk [vmem:[#allocation2 + $0xf0] sm:$0xff] %vm23204_vm0, %v1816_v27  ;;  %v1815_v41 = vadd.f32 %v17799_v42, %v1754_v25  ;;  %v1769_v29 = vadd.f32 %v15947_v24, %v17788_v35  ;;  %v18144_v27 = vld [vmem:[#allocation2 + $0xd0] sm:$0xff]  ;;  %vm18154_vm14 = vcmp.ne.s32.totalorder %v812_v33, 0 }
 0x12c   : > { %16037 = vmatmul.mubr.msk.f32.gmra.mxu1 %vm23204_vm0, %v18123_v11  ;;  %v1763_v3 = vpop.f32.mrf.mxu1  ;;  %v18135_v32 = vld [vmem:[#allocation2 + $0xc8] sm:$0xff]  ;;  %23413 = vst [vmem:[#allocation36_spill] sm:$0xff] %v18144_v27 }
 0x12d   : > { %23412 = vst [vmem:[#allocation35_spill] sm:$0xff] %v18135_v32  ;;  %v18137_v7 = vld [vmem:[#allocation2 + $0xc7] sm:$0xff]  ;;  %1847 = vst.msk [vmem:[#allocation2 + $0xe8] sm:$0xff] %vm23204_vm0, %v1815_v41  ;;  %v1818_v30 = vadd.f32 %v17799_v42, %v1769_v29  ;;  %v1764_v18 = vadd.f32 %v1763_v3, %v17790_v36  ;;  %15989 = vmatprep.mubr.msk.f32.mxu0 %vm23204_vm0, %v18135_v32  ;;  %v18152_v24 = vld [vmem:[#allocation2 + $0xcf] sm:$0xff]  ;;  %v23414_v29 = vmov 0  ;;  %v826_v36 = vand.u32 15, %v622_v21 }
 0x12e   : > { %v1973_v35 = vsel %vm18125_vm13, %v18137_v7, 0.0  ;;  %v15950_v25 = vpop.f32.mrf.mxu1  ;;  %15990 = vmatmul.mubr.msk.f32.gmra.mxu0 %vm23204_vm0, %v18144_v27  ;;  %v23415_v29 = vsel %vm18154_vm14, 4294967295, %v23414_v29  ;;  %v624_v3 = vadd.s32 240, %v17736_v5 }
 0x12f   : > { %16039 = vmatprep.mubr.msk.f32.mxu1 %vm23204_vm0, %v1973_v35  ;;  %23416 = vst [vmem:[#allocation37_spill] sm:$0xff] %v23415_v29  ;;  %1850 = vst.msk [vmem:[#allocation2 + $0x100] sm:$0xff] %vm23204_vm0, %v1818_v30  ;;  %v1817_v41 = vadd.f32 %v17799_v42, %v1764_v18  ;;  %v1779_v32 = vadd.f32 %v15950_v25, %v17792_v38  ;;  %v18173_v30 = vld [vmem:[#allocation2 + $0xe0] sm:$0xff]  ;;  %vm18183_vm15 = vcmp.ne.s32.totalorder %v826_v36, 0 }
 0x130   : > { %16040 = vmatmul.mubr.msk.f32.gmra.mxu1 %vm23204_vm0, %v18152_v24  ;;  %v1773_v27 = vpop.f32.mrf.mxu1  ;;  %v18164_v35 = vld [vmem:[#allocation2 + $0xd8] sm:$0xff]  ;;  %23418 = vst [vmem:[#allocation39_spill] sm:$0xff] %v18173_v30 }
 0x131   : > { %23417 = vst [vmem:[#allocation38_spill] sm:$0xff] %v18164_v35  ;;  %v18166_v61 = vld [vmem:[#allocation2 + $0xd7] sm:$0xff]  ;;  %1849 = vst.msk [vmem:[#allocation2 + $0xf8] sm:$0xff] %vm23204_vm0, %v1817_v41  ;;  %v1820_v33 = vadd.f32 %v17799_v42, %v1779_v32  ;;  %v1774_v21 = vadd.f32 %v1773_v27, %v17794_v39  ;;  %15992 = vmatprep.mubr.msk.f32.mxu0 %vm23204_vm0, %v18164_v35  ;;  %v18181_v18 = vld [vmem:[#allocation2 + $0xdf] sm:$0xff]  ;;  %v23419_v32 = vmov 0  ;;  %v840_v39 = vand.u32 15, %v624_v3 }
 0x132   : > { %v1975_v38 = vsel %vm18154_vm14, %v18166_v61, 0.0  ;;  %15993 = vmatmul.mubr.msk.f32.gmra.mxu0 %vm23204_vm0, %v18173_v30  ;;  %v23420_v32 = vsel %vm18183_vm15, 4294967295, %v23419_v32  ;;  %v595_v27 = vadd.s32 8, %v17736_v5  ;;  %v18199_v36 = vld [vmem:[#allocation2 + $0xf0] sm:$0xff] }
 0x133   : > { %16042 = vmatprep.mubr.msk.f32.mxu1 %vm23204_vm0, %v1975_v38  ;;  %23421 = vst [vmem:[#allocation40_spill] sm:$0xff] %v23420_v32  ;;  %1852 = vst.msk [vmem:[#allocation2 + $0x110] sm:$0xff] %vm23204_vm0, %v1820_v33  ;;  %v1819_v25 = vadd.f32 %v17799_v42, %v1774_v21  ;;  %vm18209_vm14 = vcmp.ne.s32.totalorder %v840_v39, 0  ;;  %v23424_v33 = vmov 0  ;;  %v597_v38 = vadd.s32 24, %v17736_v5  ;;  %v2658_v35 = vld [vmem:[#allocation2 + $0x9] sm:$0xff] }
 0x134   : > { %16043 = vmatmul.mubr.msk.f32.gmra.mxu1 %vm23204_vm0, %v18181_v18  ;;  %v18192_v41 = vld [vmem:[#allocation2 + $0xe8] sm:$0xff]  ;;  %23423 = vst [vmem:[#allocation42_spill] sm:$0xff] %v18199_v36  ;;  %v23425_v33 = vsel %vm18209_vm14, 4294967295, %v23424_v33  ;;  %v637_v21 = vand.u32 15, %v595_v27 }
 0x135   : > { %23422 = vst [vmem:[#allocation41_spill] sm:$0xff] %v18192_v41  ;;  %v18194_v30 = vld [vmem:[#allocation2 + $0xe7] sm:$0xff]  ;;  %1851 = vst.msk [vmem:[#allocation2 + $0x108] sm:$0xff] %vm23204_vm0, %v1819_v25  ;;  %15995 = vmatprep.mubr.msk.f32.mxu0 %vm23204_vm0, %v18192_v41  ;;  %v18207_v42 = vld [vmem:[#allocation2 + $0xef] sm:$0xff]  ;;  %v651_v37 = vand.u32 15, %v597_v38 }
 0x136   : > { %v1977_v3 = vsel %vm18183_vm15, %v18194_v30, 0.0  ;;  %15996 = vmatmul.mubr.msk.f32.gmra.mxu0 %vm23204_vm0, %v18199_v36  ;;  %23426 = vst [vmem:[#allocation43_spill] sm:$0xff] %v23425_v33  ;;  %vm18232_vm15 = vcmp.ne.s32.totalorder %v637_v21, 15  ;;  %v23429_v36 = vmov 0  ;;  %v18249_v38 = vld [vmem:[%s23055_s5 + $0x30] sm:$0xff] }
 0x137   : > { %16045 = vmatprep.mubr.msk.f32.mxu1 %vm23204_vm0, %v1977_v3  ;;  %v18222_v3 = vld [vmem:[#allocation2 + $0x100] sm:$0xff]  ;;  %v23430_v36 = vsel %vm18232_vm15, 4294967295, %v23429_v36  ;;  %v2755_v21 = vsel %vm18232_vm15, %v2659_v44, 0.0  ;;  %v601_v44 = vadd.s32 56, %v17736_v5 }
 0x138   : > { %16046 = vmatmul.mubr.msk.f32.gmra.mxu1 %vm23204_vm0, %v18207_v42  ;;  %v18216_v25 = vld [vmem:[#allocation2 + $0xf8] sm:$0xff]  ;;  %23428 = vst [vmem:[#allocation45_spill] sm:$0xff] %v18222_v3  ;;  %23431 = vst [vmem:[#allocation46_spill] sm:$0xff] %v23430_v36 }
 0x139   : > { %23427 = vst [vmem:[#allocation44_spill] sm:$0xff] %v18216_v25  ;;  %v18218_v41 = vld [vmem:[#allocation2 + $0xf7] sm:$0xff]  ;;  %15998 = vmatprep.mubr.msk.f32.mxu0 %vm23204_vm0, %v18216_v25  ;;  %v18230_v27 = vld [vmem:[#allocation2 + $0xff] sm:$0xff]  ;;  %v599_v25 = vadd.s32 40, %v17736_v5 }
 0x13a   : > { %v1979_v39 = vsel %vm18209_vm14, %v18218_v41, 0.0  ;;  %15999 = vmatmul.mubr.msk.f32.gmra.mxu0 %vm23204_vm0, %v18222_v3  ;;  %v16005_v3 = vpop.f32.mrf.mxu1  ;;  %vm18254_vm14 = vcmp.ne.s32.totalorder %v651_v37, 15  ;;  %v3175_v37 = vsel %vm17818_vm2, %v17854_v47, 0.0  ;;  %v679_v47 = vand.u32 15, %v601_v44  ;;  %v18305_v44 = vld [vmem:[#allocation2 + $0x39] sm:$0xff]  ;;  %v5177_v36 = vld [vmem:[#allocation2 + $0x51] sm:$0xff] }
 0x13b   : > { %16048 = vmatprep.mubr.msk.f32.mxu1 %vm23204_vm0, %v1979_v39  ;;  %16053 = vmatprep.mubr.msk.f32.mxu0 %vm23204_vm0, %v2658_v35  ;;  %v15955_v39 = vpop.f32.mrf.mxu0  ;;  %v23433_v13 = vsel %vm18254_vm14, 4294967295, %v23432_v13  ;;  %v18258_v35 = vld [vmem:[#allocation2 + $0x21] sm:$0xff] }
 0x13c   : > { %16049 = vmatmul.mubr.msk.f32.gmra.mxu1 %vm23204_vm0, %v18230_v27  ;;  %23434 = vst [vmem:[#allocation47_spill] sm:$0xff] %v23433_v13  ;;  %v18261_v8 = vadd.f32 %v16005_v3, %v15955_v39  ;;  %v18289_v3 = vld [vmem:[#allocation2 + $0x31] sm:$0xff]  ;;  %v603_v39 = vadd.s32 72, %v17736_v5  ;;  %vm18307_vm2 = vcmp.ne.s32.totalorder %v679_v47, 15 }
 0x13d   : > { %16103 = vmatprep.mubr.msk.f32.mxu1 %vm23204_vm0, %v3173_v6  ;;  %v665_v6 = vand.u32 15, %v599_v25  ;;  %v18283_v25 = vld [vmem:[#allocation2 + $0x29] sm:$0xff] }
 0x13e   : > { %16054 = vmatmul.mubr.msk.f32.vlgmr.msra.gmra.mxu0 %vm23204_vm0, %v2755_v21  ;;  %23435 = vst [vmem:[#allocation48_spill] sm:$0xff] %v18261_v8  ;;  %v18269_v21 = vld [vmem:[%s23055_s5 + $0x38] sm:$0xff]  ;;  %v605_v8 = vadd.s32 88, %v17736_v5 }
 0x13f   : > { %16152 = vmatpush3.msra.mxu0 %v17761_v16  ;;  %16056 = vmatprep.mubr.msk.f32.mxu0 %vm23204_vm0, %v18252_v60  ;;  %v2757_v16 = vsel %vm18254_vm14, %v18258_v35, 0.0  ;;  %vm18285_vm1 = vcmp.ne.s32.totalorder %v665_v6, 15 }
 0x140   : > { %16104 = vmatmul.mubr.msk.f32.vlgmr.msra.gmra.mxu1 %vm23204_vm0, %v17841_v31  ;;  %16251 = vmatprep.subr.mxu0 %v18249_v38  ;;  %v23436_v31 = vmov 0  ;;  %v2759_v6 = vsel %vm18285_vm1, %v18289_v3, 0.0 }
 0x141   : > { %16106 = vmatprep.mubr.msk.f32.mxu1 %vm23204_vm0, %v3175_v37  ;;  %16202 = vmatpush3.msra.mxu1 %v17813_v63  ;;  %v23437_v31 = vsel %vm18285_vm1, 4294967295, %v23436_v31  ;;  %v3177_v63 = vsel %vm17843_vm3, %v17881_v0, 0.0  ;;  %v23439_v37 = vmov 0  ;;  %v3179_v0 = vsel %vm17870_vm4, %v17908_v40, 0.0 }
 0x142   : > { %16057 = vmatmul.mubr.msk.f32.gmra.mxu0 %vm23204_vm0, %v2757_v16  ;;  %23438 = vst [vmem:[#allocation49_spill] sm:$0xff] %v23437_v31  ;;  %16301 = vmatprep.subr.mxu1 %v18269_v21  ;;  %v23440_v37 = vsel %vm18307_vm2, 4294967295, %v23439_v37  ;;  %v18311_v16 = vld [vmem:[#allocation2 + $0x41] sm:$0xff]  ;;  %v3181_v40 = vsel %vm17897_vm5, %v17935_v1, 0.0  ;;  %v3183_v1 = vsel %vm17924_vm6, %v17963_v56, 0.0  ;;  %v3185_v56 = vsel %vm17951_vm7, %v17992_v48, 0.0 }
 0x143   : > { %16059 = vmatprep.mubr.msk.f32.mxu0 %vm23204_vm0, %v18283_v25  ;;  %23441 = vst [vmem:[#allocation50_spill] sm:$0xff] %v23440_v37  ;;  %v2761_v47 = vsel %vm18307_vm2, %v18311_v16, 0.0  ;;  %v3187_v48 = vsel %vm17980_vm8, %v18021_v52, 0.0  ;;  %v3189_v52 = vsel %vm18009_vm9, %v18050_v43, 0.0  ;;  %v3191_v43 = vsel %vm18038_vm10, %v18079_v57, 0.0  ;;  %v5183_v37 = vld [vmem:[#allocation2 + $0x81] sm:$0xff] }
 0x144   : > { %16107 = vmatmul.mubr.msk.f32.gmra.mxu1 %vm23204_vm0, %v17868_v54  ;;  %v693_v54 = vand.u32 15, %v603_v39  ;;  %v18326_v39 = vld [vmem:[#allocation2 + $0x49] sm:$0xff]  ;;  %v3193_v57 = vsel %vm18067_vm11, %v18108_v49, 0.0  ;;  %v3195_v49 = vsel %vm18096_vm12, %v18137_v7, 0.0  ;;  %v3197_v7 = vsel %vm18125_vm13, %v18166_v61, 0.0 }
 0x145   : > { %16109 = vmatprep.mubr.msk.f32.mxu1 %vm23204_vm0, %v3177_v63  ;;  %v23442_v63 = vmov 0  ;;  %vm23472_vm13 = vnez %v23415_v29  ;;  %v18560_v29 = vld [vmem:[#allocation2 + $0x101] sm:$0xff] }
 0x146   : > { %16060 = vmatmul.mubr.msk.f32.gmra.mxu0 %vm23204_vm0, %v2759_v6  ;;  %vm18328_vm3 = vcmp.ne.s32.totalorder %v693_v54, 15  ;;  %v18332_v6 = vld [vmem:[#allocation2 + $0x51] sm:$0xff]  ;;  %v3199_v61 = vsel %vm23472_vm13, %v18194_v30, 0.0  ;;  %vm23476_vm13 = vnez %v23420_v32 }
 0x147   : > { %16062 = vmatprep.mubr.msk.f32.mxu0 %vm23204_vm0, %v18305_v44  ;;  %v23443_v63 = vsel %vm18328_vm3, 4294967295, %v23442_v63  ;;  %v2763_v54 = vsel %vm18328_vm3, %v18332_v6, 0.0 }
 0x148   : > { %16110 = vmatmul.mubr.msk.f32.gmra.mxu1 %vm23204_vm0, %v17895_v9  ;;  %23444 = vst [vmem:[#allocation51_spill] sm:$0xff] %v23443_v63  ;;  %v707_v9 = vand.u32 15, %v605_v8  ;;  %v18347_v8 = vld [vmem:[#allocation2 + $0x59] sm:$0xff]  ;;  %v5185_v63 = vld [vmem:[#allocation2 + $0x91] sm:$0xff] }
 0x149   : > { %16112 = vmatprep.mubr.msk.f32.mxu1 %vm23204_vm0, %v3179_v0  ;;  %v23445_v0 = vmov 0 }
 0x14a   : > { %16063 = vmatmul.mubr.msk.f32.gmra.mxu0 %vm23204_vm0, %v2761_v47  ;;  %vm18349_vm4 = vcmp.ne.s32.totalorder %v707_v9, 15  ;;  %v18353_v47 = vld [vmem:[#allocation2 + $0x61] sm:$0xff] }
 0x14b   : > { %16065 = vmatprep.mubr.msk.f32.mxu0 %vm23204_vm0, %v18326_v39  ;;  %v23446_v0 = vsel %vm18349_vm4, 4294967295, %v23445_v0  ;;  %v2765_v9 = vsel %vm18349_vm4, %v18353_v47, 0.0 }
 0x14c   : > { %16113 = vmatmul.mubr.msk.f32.gmra.mxu1 %vm23204_vm0, %v17922_v50  ;;  %23447 = vst [vmem:[#allocation52_spill] sm:$0xff] %v23446_v0  ;;  %v721_v50 = vand.u32 15, %v607_v55  ;;  %v18368_v55 = vld [vmem:[#allocation2 + $0x69] sm:$0xff]  ;;  %v5187_v0 = vld [vmem:[#allocation2 + $0xa1] sm:$0xff] }
 0x14d   : > { %16115 = vmatprep.mubr.msk.f32.mxu1 %vm23204_vm0, %v3181_v40  ;;  %v23448_v40 = vmov 0 }
 0x14e   : > { %16066 = vmatmul.mubr.msk.f32.gmra.mxu0 %vm23204_vm0, %v2763_v54  ;;  %vm18370_vm5 = vcmp.ne.s32.totalorder %v721_v50, 15  ;;  %v18374_v54 = vld [vmem:[#allocation2 + $0x71] sm:$0xff] }
 0x14f   : > { %16068 = vmatprep.mubr.msk.f32.mxu0 %vm23204_vm0, %v18347_v8  ;;  %v23449_v40 = vsel %vm18370_vm5, 4294967295, %v23448_v40  ;;  %v2767_v50 = vsel %vm18370_vm5, %v18374_v54, 0.0 }
 0x150   : > { %16116 = vmatmul.mubr.msk.f32.gmra.mxu1 %vm23204_vm0, %v17949_v15  ;;  %23450 = vst [vmem:[#allocation53_spill] sm:$0xff] %v23449_v40  ;;  %v735_v15 = vand.u32 15, %v609_v10  ;;  %v18389_v10 = vld [vmem:[#allocation2 + $0x79] sm:$0xff]  ;;  %v5189_v40 = vld [vmem:[#allocation2 + $0xb1] sm:$0xff] }
 0x151   : > { %16118 = vmatprep.mubr.msk.f32.mxu1 %vm23204_vm0, %v3183_v1  ;;  %v23451_v1 = vmov 0 }
 0x152   : > { %16069 = vmatmul.mubr.msk.f32.gmra.mxu0 %vm23204_vm0, %v2765_v9  ;;  %vm18391_vm6 = vcmp.ne.s32.totalorder %v735_v15, 15  ;;  %v18395_v9 = vld [vmem:[#allocation2 + $0x81] sm:$0xff] }
 0x153   : > { %16071 = vmatprep.mubr.msk.f32.mxu0 %vm23204_vm0, %v18368_v55  ;;  %v23452_v1 = vsel %vm18391_vm6, 4294967295, %v23451_v1  ;;  %v2769_v15 = vsel %vm18391_vm6, %v18395_v9, 0.0 }
 0x154   : > { %16119 = vmatmul.mubr.msk.f32.gmra.mxu1 %vm23204_vm0, %v17978_v59  ;;  %23453 = vst [vmem:[#allocation54_spill] sm:$0xff] %v23452_v1  ;;  %v749_v59 = vand.u32 15, %v611_v45  ;;  %v18410_v45 = vld [vmem:[#allocation2 + $0x89] sm:$0xff]  ;;  %v5191_v1 = vld [vmem:[#allocation2 + $0xc1] sm:$0xff] }
 0x155   : > { %16121 = vmatprep.mubr.msk.f32.mxu1 %vm23204_vm0, %v3185_v56  ;;  %v23454_v56 = vmov 0 }
 0x156   : > { %16072 = vmatmul.mubr.msk.f32.gmra.mxu0 %vm23204_vm0, %v2767_v50  ;;  %vm18412_vm7 = vcmp.ne.s32.totalorder %v749_v59, 15  ;;  %v18416_v50 = vld [vmem:[#allocation2 + $0x91] sm:$0xff] }
 0x157   : > { %16074 = vmatprep.mubr.msk.f32.mxu0 %vm23204_vm0, %v18389_v10  ;;  %v23455_v56 = vsel %vm18412_vm7, 4294967295, %v23454_v56  ;;  %v2771_v59 = vsel %vm18412_vm7, %v18416_v50, 0.0 }
 0x158   : > { %16122 = vmatmul.mubr.msk.f32.gmra.mxu1 %vm23204_vm0, %v18007_v17  ;;  %23456 = vst [vmem:[#allocation55_spill] sm:$0xff] %v23455_v56  ;;  %v763_v17 = vand.u32 15, %v613_v20  ;;  %v18431_v20 = vld [vmem:[#allocation2 + $0x99] sm:$0xff] }
 0x159   : > { %16124 = vmatprep.mubr.msk.f32.mxu1 %vm23204_vm0, %v3187_v48  ;;  %v23457_v48 = vmov 0 }
 0x15a   : > { %16075 = vmatmul.mubr.msk.f32.gmra.mxu0 %vm23204_vm0, %v2769_v15  ;;  %vm18433_vm8 = vcmp.ne.s32.totalorder %v763_v17, 15  ;;  %v18437_v15 = vld [vmem:[#allocation2 + $0xa1] sm:$0xff] }
 0x15b   : > { %16077 = vmatprep.mubr.msk.f32.mxu0 %vm23204_vm0, %v18410_v45  ;;  %v23458_v48 = vsel %vm18433_vm8, 4294967295, %v23457_v48  ;;  %v2773_v17 = vsel %vm18433_vm8, %v18437_v15, 0.0 }
 0x15c   : > { %16125 = vmatmul.mubr.msk.f32.gmra.mxu1 %vm23204_vm0, %v18036_v53  ;;  %23459 = vst [vmem:[#allocation56_spill] sm:$0xff] %v23458_v48  ;;  %v777_v53 = vand.u32 15, %v615_v2  ;;  %v18452_v2 = vld [vmem:[#allocation2 + $0xa9] sm:$0xff]  ;;  %v5195_v48 = vld [vmem:[#allocation2 + $0xe1] sm:$0xff] }
 0x15d   : > { %16127 = vmatprep.mubr.msk.f32.mxu1 %vm23204_vm0, %v3189_v52  ;;  %v23460_v52 = vmov 0 }
 0x15e   : > { %16078 = vmatmul.mubr.msk.f32.gmra.mxu0 %vm23204_vm0, %v2771_v59  ;;  %vm18454_vm9 = vcmp.ne.s32.totalorder %v777_v53, 15  ;;  %v18458_v59 = vld [vmem:[#allocation2 + $0xb1] sm:$0xff] }
 0x15f   : > { %16080 = vmatprep.mubr.msk.f32.mxu0 %vm23204_vm0, %v18431_v20  ;;  %v23461_v52 = vsel %vm18454_vm9, 4294967295, %v23460_v52  ;;  %v2775_v53 = vsel %vm18454_vm9, %v18458_v59, 0.0 }
 0x160   : > { %16128 = vmatmul.mubr.msk.f32.gmra.mxu1 %vm23204_vm0, %v18065_v28  ;;  %23462 = vst [vmem:[#allocation57_spill] sm:$0xff] %v23461_v52  ;;  %v791_v28 = vand.u32 15, %v617_v58  ;;  %v18473_v58 = vld [vmem:[#allocation2 + $0xb9] sm:$0xff] }
 0x161   : > { %16130 = vmatprep.mubr.msk.f32.mxu1 %vm23204_vm0, %v3191_v43  ;;  %v23463_v43 = vmov 0 }
 0x162   : > { %16081 = vmatmul.mubr.msk.f32.gmra.mxu0 %vm23204_vm0, %v2773_v17  ;;  %vm18475_vm10 = vcmp.ne.s32.totalorder %v791_v28, 15  ;;  %v18479_v17 = vld [vmem:[#allocation2 + $0xc1] sm:$0xff] }
 0x163   : > { %16083 = vmatprep.mubr.msk.f32.mxu0 %vm23204_vm0, %v18452_v2  ;;  %v23464_v43 = vsel %vm18475_vm10, 4294967295, %v23463_v43  ;;  %v2777_v28 = vsel %vm18475_vm10, %v18479_v17, 0.0 }
 0x164   : > { %16131 = vmatmul.mubr.msk.f32.gmra.mxu1 %vm23204_vm0, %v18094_v62  ;;  %23465 = vst [vmem:[#allocation58_spill] sm:$0xff] %v23464_v43  ;;  %v805_v62 = vand.u32 15, %v619_v14  ;;  %v18494_v14 = vld [vmem:[#allocation2 + $0xc9] sm:$0xff] }
 0x165   : > { %16133 = vmatprep.mubr.msk.f32.mxu1 %vm23204_vm0, %v3193_v57  ;;  %v23466_v57 = vmov 0 }
 0x166   : > { %16084 = vmatmul.mubr.msk.f32.gmra.mxu0 %vm23204_vm0, %v2775_v53  ;;  %vm18496_vm11 = vcmp.ne.s32.totalorder %v805_v62, 15  ;;  %v18500_v53 = vld [vmem:[#allocation2 + $0xd1] sm:$0xff] }
 0x167   : > { %16086 = vmatprep.mubr.msk.f32.mxu0 %vm23204_vm0, %v18473_v58  ;;  %v23467_v57 = vsel %vm18496_vm11, 4294967295, %v23466_v57  ;;  %v2779_v62 = vsel %vm18496_vm11, %v18500_v53, 0.0 }
 0x168   : > { %16134 = vmatmul.mubr.msk.f32.gmra.mxu1 %vm23204_vm0, %v18123_v11  ;;  %23468 = vst [vmem:[#allocation59_spill] sm:$0xff] %v23467_v57  ;;  %v819_v11 = vand.u32 15, %v621_v19  ;;  %v18515_v19 = vld [vmem:[#allocation2 + $0xd9] sm:$0xff] }
 0x169   : > { %16136 = vmatprep.mubr.msk.f32.mxu1 %vm23204_vm0, %v3195_v49  ;;  %v23469_v49 = vmov 0 }
 0x16a   : > { %16087 = vmatmul.mubr.msk.f32.gmra.mxu0 %vm23204_vm0, %v2777_v28  ;;  %vm18517_vm12 = vcmp.ne.s32.totalorder %v819_v11, 15  ;;  %v18521_v28 = vld [vmem:[#allocation2 + $0xe1] sm:$0xff] }
 0x16b   : > { %16089 = vmatprep.mubr.msk.f32.mxu0 %vm23204_vm0, %v18494_v14  ;;  %v23470_v49 = vsel %vm18517_vm12, 4294967295, %v23469_v49  ;;  %v2781_v11 = vsel %vm18517_vm12, %v18521_v28, 0.0 }
 0x16c   : > { %16137 = vmatmul.mubr.msk.f32.gmra.mxu1 %vm23204_vm0, %v18152_v24  ;;  %23471 = vst [vmem:[#allocation60_spill] sm:$0xff] %v23470_v49  ;;  %v833_v24 = vand.u32 15, %v623_v23  ;;  %v18536_v23 = vld [vmem:[#allocation2 + $0xe9] sm:$0xff] }
 0x16d   : > { %16139 = vmatprep.mubr.msk.f32.mxu1 %vm23204_vm0, %v3197_v7  ;;  %v625_v7 = vadd.s32 248, %v17736_v5  ;;  %v3201_v5 = vsel %vm23476_vm13, %v18218_v41, 0.0  ;;  %vm23477_vm13 = vnez %v23425_v33  ;;  %v5173_v33 = vld [vmem:[#allocation2 + $0x31] sm:$0xff] }
 0x16e   : > { %16090 = vmatmul.mubr.msk.f32.gmra.mxu0 %vm23204_vm0, %v2779_v62  ;;  %vm18538_vm11 = vcmp.ne.s32.totalorder %v833_v24, 15  ;;  %v23473_v62 = vmov 0 }
 0x16f   : > { %16092 = vmatprep.mubr.msk.f32.mxu0 %vm23204_vm0, %v18515_v19  ;;  %v23474_v62 = vsel %vm18538_vm11, 4294967295, %v23473_v62  ;;  %v847_v30 = vand.u32 15, %v625_v7 }
 0x170   : > { %16140 = vmatmul.mubr.msk.f32.gmra.mxu1 %vm23204_vm0, %v18181_v18  ;;  %23475 = vst [vmem:[#allocation61_spill] sm:$0xff] %v23474_v62  ;;  %v18542_v18 = vld [vmem:[#allocation2 + $0xf1] sm:$0xff] }
 0x171   : > { %16142 = vmatprep.mubr.msk.f32.mxu1 %vm23204_vm0, %v3199_v61  ;;  %v2783_v24 = vsel %vm18538_vm11, %v18542_v18, 0.0  ;;  %v18555_v61 = vld [vmem:[#allocation2 + $0x107] sm:$0xff]  ;;  %vm18569_vm12 = vcmp.ne.s32.totalorder %v847_v30, 15  ;;  %v23491_v30 = vld [vmem:[#allocation23_spill] sm:$0xff] }
 0x172   : > { %16093 = vmatmul.mubr.msk.f32.gmra.mxu0 %vm23204_vm0, %v2781_v11  ;;  %v18558_v11 = vld [vmem:[#allocation2 + $0xf9] sm:$0xff]  ;;  %v3203_v41 = vsel %vm23477_vm13, %v18555_v61, 0.0  ;;  %v2785_v7 = vsel %vm18569_vm12, %v18560_v29, 0.0 }
 0x173   : > { %16095 = vmatprep.mubr.msk.f32.mxu0 %vm23204_vm0, %v18536_v23 }
 0x174   : > { %16143 = vmatmul.mubr.msk.f32.gmra.mxu1 %vm23204_vm0, %v18207_v42  ;;  %v23478_v42 = vmov 0 }
 0x175   : > { %16145 = vmatprep.mubr.msk.f32.mxu1 %vm23204_vm0, %v3201_v5  ;;  %v23479_v42 = vsel %vm18569_vm12, 4294967295, %v23478_v42  ;;  %v18578_v5 = vld [vmem:[#allocation2 + $0x10f] sm:$0xff] }
 0x176   : > { %16096 = vmatmul.mubr.msk.f32.gmra.mxu0 %vm23204_vm0, %v2783_v24  ;;  %23480 = vst [vmem:[#allocation62_spill] sm:$0xff] %v23479_v42  ;;  %v23493_v24 = vld [vmem:[#allocation26_spill] sm:$0xff] }
 0x177   : > { %16098 = vmatprep.mubr.msk.f32.mxu0 %vm23204_vm0, %v18558_v11 }
 0x178   : > { %16146 = vmatmul.mubr.msk.f32.gmra.mxu1 %vm23204_vm0, %v18230_v27  ;;  %v18589_v27 = vld [vmem:[%s23055_s5 + $0x40] sm:$0xff] }
 0x179   : > { %16148 = vmatprep.mubr.msk.f32.mxu1 %vm23204_vm0, %v3203_v41  ;;  %v23495_v41 = vld [vmem:[#allocation29_spill] sm:$0xff] }
 0x17a   : > { %16099 = vmatmul.mubr.msk.f32.gmra.mxu0 %vm23204_vm0, %v2785_v7  ;;  %v23497_v7 = vld [vmem:[#allocation32_spill] sm:$0xff] }
 0x17b   : > { %16153 = vmatprep.mubr.msk.f32.mxu0 %vm23204_vm0, %v17825_v12  ;;  %v3980_v12 = vsel %vm18232_vm15, %v18258_v35, 0.0  ;;  %v23484_v35 = vld [vmem:[#allocation12_spill] sm:$0xff] }
 0x17c   : > { %16149 = vmatmul.mubr.msk.f32.gmra.mxu1 %vm23204_vm0, %v18578_v5 }
 0x17d   : > { %16203 = vmatprep.mubr.msk.f32.mxu1 %vm23204_vm0, %v18252_v60  ;;  %v23482_v60 = vld [vmem:[#allocation9_spill] sm:$0xff] }
 0x17e   : > { %16154 = vmatmul.mubr.msk.f32.vlgmr.msra.gmra.mxu0 %vm23204_vm0, %v17833_v22  ;;  %v23481_v22 = vld [vmem:[#allocation8_spill] sm:$0xff] }
 0x17f   : > { %16252 = vmatpush3.msra.mxu0 %v18249_v38  ;;  %16156 = vmatprep.mubr.msk.f32.mxu0 %vm23204_vm0, %v17852_v46  ;;  %v3982_v46 = vsel %vm18254_vm14, %v18289_v3, 0.0  ;;  %v23483_v38 = vld [vmem:[#allocation11_spill] sm:$0xff] }
 0x180   : > { %16204 = vmatmul.mubr.msk.f32.vlgmr.msra.gmra.mxu1 %vm23204_vm0, %v3980_v12  ;;  %16351 = vmatprep.subr.mxu0 %v18589_v27  ;;  %v23486_v3 = vld [vmem:[#allocation15_spill] sm:$0xff] }
 0x181   : > { %16206 = vmatprep.mubr.msk.f32.mxu1 %vm23204_vm0, %v18283_v25  ;;  %16302 = vmatpush3.msra.mxu1 %v18269_v21  ;;  %v23485_v21 = vld [vmem:[#allocation14_spill] sm:$0xff]  ;;  %v3986_v25 = vsel %vm18307_vm2, %v18332_v6, 0.0  ;;  %v23489_v6 = vld [vmem:[#allocation20_spill] sm:$0xff]  ;;  %v23499_v12 = vld [vmem:[#allocation35_spill] sm:$0xff] }
 0x182   : > { %16157 = vmatmul.mubr.msk.f32.gmra.mxu0 %vm23204_vm0, %v17860_v51  ;;  %v3984_v51 = vsel %vm18285_vm1, %v18311_v16, 0.0  ;;  %v3988_v16 = vsel %vm18328_vm3, %v18353_v47, 0.0  ;;  %v23490_v47 = vld [vmem:[#allocation21_spill] sm:$0xff] }
 0x183   : > { %16159 = vmatprep.mubr.msk.f32.mxu0 %vm23204_vm0, %v23481_v22  ;;  %v23501_v22 = vld [vmem:[#allocation38_spill] sm:$0xff] }
 0x184   : > { %16207 = vmatmul.mubr.msk.f32.gmra.mxu1 %vm23204_vm0, %v3982_v46  ;;  %v23503_v46 = vld [vmem:[#allocation41_spill] sm:$0xff] }
 0x185   : > { %16209 = vmatprep.mubr.msk.f32.mxu1 %vm23204_vm0, %v18305_v44  ;;  %v23487_v44 = vld [vmem:[#allocation17_spill] sm:$0xff] }
 0x186   : > { %16160 = vmatmul.mubr.msk.f32.gmra.mxu0 %vm23204_vm0, %v23482_v60  ;;  %v23506_v60 = vld [vmem:[#allocation44_spill] sm:$0xff] }
 0x187   : > { %16162 = vmatprep.mubr.msk.f32.mxu0 %vm23204_vm0, %v23483_v38  ;;  %v18736_v38 = vld [vmem:[#allocation2 + $0x108] sm:$0xff] }
 0x188   : > { %16210 = vmatmul.mubr.msk.f32.gmra.mxu1 %vm23204_vm0, %v3984_v51  ;;  %v4366_v51 = vld [vmem:[#allocation2 + $0x27] sm:$0xff] }
 0x189   : > { %16212 = vmatprep.mubr.msk.f32.mxu1 %vm23204_vm0, %v18326_v39  ;;  %v23488_v39 = vld [vmem:[#allocation18_spill] sm:$0xff] }
 0x18a   : > { %16163 = vmatmul.mubr.msk.f32.gmra.mxu0 %vm23204_vm0, %v23484_v35  ;;  %v18746_v35 = vld [vmem:[#allocation2 + $0x111] sm:$0xff] }
 0x18b   : > { %16165 = vmatprep.mubr.msk.f32.mxu0 %vm23204_vm0, %v23485_v21  ;;  %v23509_v21 = vld [vmem:[#allocation4_spill] sm:$0xff] }
 0x18c   : > { %16213 = vmatmul.mubr.msk.f32.gmra.mxu1 %vm23204_vm0, %v3986_v25 }
 0x18d   : > { %16215 = vmatprep.mubr.msk.f32.mxu1 %vm23204_vm0, %v18347_v8  ;;  %v3990_v8 = vsel %vm18349_vm4, %v18374_v54, 0.0  ;;  %v23492_v54 = vld [vmem:[#allocation24_spill] sm:$0xff] }
 0x18e   : > { %16166 = vmatmul.mubr.msk.f32.gmra.mxu0 %vm23204_vm0, %v23486_v3  ;;  %v4368_v3 = vld [vmem:[#allocation2 + $0x37] sm:$0xff] }
 0x18f   : > { %16168 = vmatprep.mubr.msk.f32.mxu0 %vm23204_vm0, %v23487_v44  ;;  %v4785_v44 = vld [vmem:[#allocation2 + $0x28] sm:$0xff] }
 0x190   : > { %16216 = vmatmul.mubr.msk.f32.gmra.mxu1 %vm23204_vm0, %v3988_v16  ;;  %v4367_v16 = vld [vmem:[#allocation2 + $0x2f] sm:$0xff] }
 0x191   : > { %16218 = vmatprep.mubr.msk.f32.mxu1 %vm23204_vm0, %v18368_v55  ;;  %v3992_v55 = vsel %vm18370_vm5, %v18395_v9, 0.0  ;;  %v23494_v9 = vld [vmem:[#allocation27_spill] sm:$0xff] }
 0x192   : > { %16169 = vmatmul.mubr.msk.f32.gmra.mxu0 %vm23204_vm0, %v23488_v39 }
 0x193   : > { %16171 = vmatprep.mubr.msk.f32.mxu0 %vm23204_vm0, %v23489_v6  ;;  %v4786_v6 = vld [vmem:[#allocation2 + $0x30] sm:$0xff] }
 0x194   : > { %16219 = vmatmul.mubr.msk.f32.gmra.mxu1 %vm23204_vm0, %v3990_v8  ;;  %v4370_v8 = vld [vmem:[#allocation2 + $0x47] sm:$0xff] }
 0x195   : > { %16221 = vmatprep.mubr.msk.f32.mxu1 %vm23204_vm0, %v18389_v10  ;;  %v3994_v10 = vsel %vm18391_vm6, %v18416_v50, 0.0  ;;  %v23496_v50 = vld [vmem:[#allocation30_spill] sm:$0xff] }
 0x196   : > { %16172 = vmatmul.mubr.msk.f32.gmra.mxu0 %vm23204_vm0, %v23490_v47  ;;  %v18767_v47 = vpop.f32.mrf.mxu0 }
 0x197   : > { %16174 = vmatprep.mubr.msk.f32.mxu0 %vm23204_vm0, %v23491_v30  ;;  %v4787_v30 = vld [vmem:[#allocation2 + $0x38] sm:$0xff] }
 0x198   : > { %16222 = vmatmul.mubr.msk.f32.gmra.mxu1 %vm23204_vm0, %v3992_v55  ;;  %v18770_v55 = vpop.f32.mrf.mxu1 }
 0x199   : > { %16224 = vmatprep.mubr.msk.f32.mxu1 %vm23204_vm0, %v18410_v45  ;;  %v3996_v45 = vsel %vm18412_vm7, %v18437_v15, 0.0  ;;  %v23498_v15 = vld [vmem:[#allocation33_spill] sm:$0xff] }
 0x19a   : > { %16175 = vmatmul.mubr.msk.f32.gmra.mxu0 %vm23204_vm0, %v23492_v54  ;;  %v4369_v54 = vld [vmem:[#allocation2 + $0x3f] sm:$0xff] }
 0x19b   : > { %16177 = vmatprep.mubr.msk.f32.mxu0 %vm23204_vm0, %v23493_v24 }
 0x19c   : > { %16225 = vmatmul.mubr.msk.f32.gmra.mxu1 %vm23204_vm0, %v3994_v10 }
 0x19d   : > { %16227 = vmatprep.mubr.msk.f32.mxu1 %vm23204_vm0, %v18431_v20  ;;  %v3998_v20 = vsel %vm18433_vm8, %v18458_v59, 0.0  ;;  %v23500_v59 = vld [vmem:[#allocation36_spill] sm:$0xff] }
 0x19e   : > { %16178 = vmatmul.mubr.msk.f32.gmra.mxu0 %vm23204_vm0, %v23494_v9  ;;  %v4788_v9 = vld [vmem:[#allocation2 + $0x40] sm:$0xff] }
 0x19f   : > { %16180 = vmatprep.mubr.msk.f32.mxu0 %vm23204_vm0, %v23495_v41  ;;  %v4372_v41 = vld [vmem:[#allocation2 + $0x57] sm:$0xff] }
 0x1a0   : > { %16228 = vmatmul.mubr.msk.f32.gmra.mxu1 %vm23204_vm0, %v3996_v45 }
 0x1a1   : > { %16230 = vmatprep.mubr.msk.f32.mxu1 %vm23204_vm0, %v18452_v2  ;;  %v4000_v2 = vsel %vm18454_vm9, %v18479_v17, 0.0  ;;  %v23502_v17 = vld [vmem:[#allocation39_spill] sm:$0xff]  ;;  %vm23504_vm9 = vnez %v23467_v57  ;;  %v5203_v57 = vld [vmem:[#allocation2 + $0x121] sm:$0xff] }
 0x1a2   : > { %16181 = vmatmul.mubr.msk.f32.gmra.mxu0 %vm23204_vm0, %v23496_v50 }
 0x1a3   : > { %16183 = vmatprep.mubr.msk.f32.mxu0 %vm23204_vm0, %v23497_v7  ;;  %v4789_v7 = vld [vmem:[#allocation2 + $0x48] sm:$0xff] }
 0x1a4   : > { %16231 = vmatmul.mubr.msk.f32.gmra.mxu1 %vm23204_vm0, %v3998_v20 }
 0x1a5   : > { %16233 = vmatprep.mubr.msk.f32.mxu1 %vm23204_vm0, %v18473_v58  ;;  %v4002_v58 = vsel %vm18475_vm10, %v18500_v53, 0.0  ;;  %v23505_v53 = vld [vmem:[#allocation42_spill] sm:$0xff]  ;;  %vm23507_vm10 = vnez %v23470_v49 }
 0x1a6   : > { %16184 = vmatmul.mubr.msk.f32.gmra.mxu0 %vm23204_vm0, %v23498_v15  ;;  %v4371_v15 = vld [vmem:[#allocation2 + $0x4f] sm:$0xff] }
 0x1a7   : > { %16186 = vmatprep.mubr.msk.f32.mxu0 %vm23204_vm0, %v23499_v12 }
 0x1a8   : > { %16234 = vmatmul.mubr.msk.f32.gmra.mxu1 %vm23204_vm0, %v4000_v2 }
 0x1a9   : > { %16236 = vmatprep.mubr.msk.f32.mxu1 %vm23204_vm0, %v18494_v14  ;;  %v4004_v14 = vsel %vm23504_vm9, %v18521_v28, 0.0  ;;  %v23508_v28 = vld [vmem:[#allocation45_spill] sm:$0xff] }
 0x1aa   : > { %16187 = vmatmul.mubr.msk.f32.gmra.mxu0 %vm23204_vm0, %v23500_v59  ;;  %v23513_v59 = vld [vmem:[#allocation7_spill] sm:$0xff] }
 0x1ab   : > { %16189 = vmatprep.mubr.msk.f32.mxu0 %vm23204_vm0, %v23501_v22 }
 0x1ac   : > { %16237 = vmatmul.mubr.msk.f32.gmra.mxu1 %vm23204_vm0, %v4002_v58 }
 0x1ad   : > { %16239 = vmatprep.mubr.msk.f32.mxu1 %vm23204_vm0, %v18515_v19  ;;  %v4006_v19 = vsel %vm23507_vm10, %v18542_v18, 0.0  ;;  %v18744_v18 = vld [vmem:[#allocation2 + $0x109] sm:$0xff]  ;;  %vm23510_vm10 = vnez %v23509_v21  ;;  %v4393_v21 = vld [vmem:[#allocation2 + $0xff] sm:$0xff] }
 0x1ae   : > { %16190 = vmatmul.mubr.msk.f32.gmra.mxu0 %vm23204_vm0, %v23502_v17  ;;  %v4398_v25 = vsel %vm23510_vm10, %v4366_v51, 0.0  ;;  %v4790_v17 = vld [vmem:[#allocation2 + $0x50] sm:$0xff] }
 0x1af   : > { %16192 = vmatprep.mubr.msk.f32.mxu0 %vm23204_vm0, %v23503_v46  ;;  %v4374_v46 = vld [vmem:[#allocation2 + $0x67] sm:$0xff] }
 0x1b0   : > { %16240 = vmatmul.mubr.msk.f32.gmra.mxu1 %vm23204_vm0, %v4004_v14 }
 0x1b1   : > { %16242 = vmatprep.mubr.msk.f32.mxu1 %vm23204_vm0, %v18536_v23  ;;  %v4008_v23 = vsel %vm18538_vm11, %v18560_v29, 0.0  ;;  %v4010_v29 = vsel %vm18569_vm12, %v18746_v35, 0.0  ;;  %vm23511_vm11 = vnez %v23359_v4 }
 0x1b2   : > { %16193 = vmatmul.mubr.msk.f32.gmra.mxu0 %vm23204_vm0, %v23505_v53  ;;  %v4400_v39 = vsel %vm23511_vm11, %v4368_v3, 0.0  ;;  %vm23512_vm11 = vnez %v23362_v34 }
 0x1b3   : > { %16195 = vmatprep.mubr.msk.f32.mxu0 %vm23204_vm0, %v23506_v60  ;;  %v4791_v60 = vld [vmem:[#allocation2 + $0x58] sm:$0xff] }
 0x1b4   : > { %16243 = vmatmul.mubr.msk.f32.gmra.mxu1 %vm23204_vm0, %v4006_v19 }
 0x1b5   : > { %16245 = vmatprep.mubr.msk.f32.mxu1 %vm23204_vm0, %v18558_v11  ;;  %v18750_v11 = vld [vmem:[#allocation2 + $0x110] sm:$0xff] }
 0x1b6   : > { %16196 = vmatmul.mubr.msk.f32.gmra.mxu0 %vm23204_vm0, %v23508_v28  ;;  %v4373_v28 = vld [vmem:[#allocation2 + $0x5f] sm:$0xff] }
 0x1b7   : > { %16198 = vmatprep.mubr.msk.f32.mxu0 %vm23204_vm0, %v18736_v38 }
 0x1b8   : > { %16246 = vmatmul.mubr.msk.f32.gmra.mxu1 %vm23204_vm0, %v4008_v23 }
 0x1b9   : > { %16248 = vmatprep.mubr.msk.f32.mxu1 %vm23204_vm0, %v18744_v18 }
 0x1ba   : > { %16199 = vmatmul.mubr.msk.f32.gmra.mxu0 %vm23204_vm0, %v18750_v11 }
 0x1bb   : > { %16253 = vmatprep.mubr.msk.f32.mxu0 %vm23204_vm0, %v4398_v25  ;;  %v23515_v25 = vld [vmem:[#allocation10_spill] sm:$0xff] }
 0x1bc   : > { %16249 = vmatmul.mubr.msk.f32.gmra.mxu1 %vm23204_vm0, %v4010_v29 }
 0x1bd   : > { %16303 = vmatprep.mubr.msk.f32.mxu1 %vm23204_vm0, %v4785_v44  ;;  %v4792_v44 = vld [vmem:[#allocation2 + $0x60] sm:$0xff] }
 0x1be   : > { %16254 = vmatmul.mubr.msk.f32.vlgmr.msra.gmra.mxu0 %vm23204_vm0, %v4367_v16  ;;  %v4376_v16 = vld [vmem:[#allocation2 + $0x77] sm:$0xff] }
 0x1bf   : > { %16352 = vmatpush3.msra.mxu0 %v18589_v27  ;;  %16256 = vmatprep.mubr.msk.f32.mxu0 %vm23204_vm0, %v4400_v39  ;;  %v4402_v27 = vsel %vm23512_vm11, %v4370_v8, 0.0  ;;  %vm23514_vm11 = vnez %v23513_v59  ;;  %v4793_v8 = vld [vmem:[#allocation2 + $0x68] sm:$0xff] }
 0x1c0   : > { %16304 = vmatmul.mubr.msk.f32.vlgmr.msra.gmra.mxu1 %vm23204_vm0, %v4786_v6  ;;  %v4404_v22 = vsel %vm23514_vm11, %v4372_v41, 0.0  ;;  %vm23516_vm11 = vnez %v23515_v25 }
 0x1c1   : > { %16306 = vmatprep.mubr.msk.f32.mxu1 %vm23204_vm0, %v4787_v30  ;;  %v4406_v29 = vsel %vm23516_vm11, %v4374_v46, 0.0 }
 0x1c2   : > { %v15958_v24 = vpop.f32.mrf.mxu0  ;;  %16257 = vmatmul.mubr.msk.f32.gmra.mxu0 %vm23204_vm0, %v4369_v54  ;;  %v4375_v54 = vld [vmem:[#allocation2 + $0x6f] sm:$0xff] }
 0x1c3   : > { %16259 = vmatprep.mubr.msk.f32.mxu0 %vm23204_vm0, %v4402_v27 }
 0x1c4   : > { %v16008_v10 = vpop.f32.mrf.mxu1  ;;  %16307 = vmatmul.mubr.msk.f32.gmra.mxu1 %vm23204_vm0, %v4788_v9  ;;  %v2188_v50 = vpop.f32.mrf.mxu0 }
 0x1c5   : > { %v18777_v45 = vadd.f32 %v16008_v10, %v15958_v24  ;;  %16309 = vmatprep.mubr.msk.f32.mxu1 %vm23204_vm0, %v4789_v7  ;;  %v23517_v10 = vld [vmem:[#allocation13_spill] sm:$0xff] }
 0x1c6   : > { %v2509_v20 = vpop.f32.mrf.mxu1  ;;  %v15961_v2 = vpop.f32.mrf.mxu0  ;;  %16260 = vmatmul.mubr.msk.f32.gmra.mxu0 %vm23204_vm0, %v4371_v15  ;;  %vm23518_vm11 = vnez %v23517_v10  ;;  %v4378_v7 = vld [vmem:[#allocation2 + $0x87] sm:$0xff] }
 0x1c7   : > { %v18781_v12 = vadd.f32 %v2509_v20, %v2188_v50  ;;  %16262 = vmatprep.mubr.msk.f32.mxu0 %vm23204_vm0, %v4404_v22  ;;  %v4408_v9 = vsel %vm23518_vm11, %v4376_v16, 0.0  ;;  %v4794_v50 = vld [vmem:[#allocation2 + $0x70] sm:$0xff] }
 0x1c8   : > { %v16011_v58 = vpop.f32.mrf.mxu1  ;;  %16310 = vmatmul.mubr.msk.f32.gmra.mxu1 %vm23204_vm0, %v4790_v17  ;;  %v2198_v53 = vpop.f32.mrf.mxu0 }
 0x1c9   : > { %v18787_v14 = vadd.f32 %v16011_v58, %v15961_v2  ;;  %16312 = vmatprep.mubr.msk.f32.mxu1 %vm23204_vm0, %v4791_v60  ;;  %v4795_v2 = vld [vmem:[#allocation2 + $0x78] sm:$0xff] }
 0x1ca   : > { %v2519_v19 = vpop.f32.mrf.mxu1  ;;  %v15964_v51 = vpop.f32.mrf.mxu0  ;;  %16263 = vmatmul.mubr.msk.f32.gmra.mxu0 %vm23204_vm0, %v4373_v28  ;;  %v4377_v58 = vld [vmem:[#allocation2 + $0x7f] sm:$0xff] }
 0x1cb   : > { %v18791_v23 = vadd.f32 %v2519_v19, %v2198_v53  ;;  %16265 = vmatprep.mubr.msk.f32.mxu0 %vm23204_vm0, %v4406_v29  ;;  %v23519_v53 = vld [vmem:[#allocation16_spill] sm:$0xff] }
 0x1cc   : > { %v16014_v3 = vpop.f32.mrf.mxu1  ;;  %16313 = vmatmul.mubr.msk.f32.gmra.mxu1 %vm23204_vm0, %v4792_v44  ;;  %v2208_v6 = vpop.f32.mrf.mxu0  ;;  %vm23520_vm11 = vnez %v23519_v53  ;;  %v4796_v28 = vld [vmem:[#allocation2 + $0x80] sm:$0xff]  ;;  %v4797_v44 = vld [vmem:[#allocation2 + $0x88] sm:$0xff] }
 0x1cd   : > { %v18797_v39 = vadd.f32 %v16014_v3, %v15964_v51  ;;  %16315 = vmatprep.mubr.msk.f32.mxu1 %vm23204_vm0, %v4793_v8  ;;  %v4410_v60 = vsel %vm23520_vm11, %v4378_v7, 0.0  ;;  %v4380_v51 = vld [vmem:[#allocation2 + $0x97] sm:$0xff] }
 0x1ce   : > { %v2529_v30 = vpop.f32.mrf.mxu1  ;;  %v15967_v27 = vpop.f32.mrf.mxu0  ;;  %16266 = vmatmul.mubr.msk.f32.gmra.mxu0 %vm23204_vm0, %v4375_v54  ;;  %v23521_v54 = vld [vmem:[#allocation19_spill] sm:$0xff] }
 0x1cf   : > { %v18801_v24 = vadd.f32 %v2529_v30, %v2208_v6  ;;  %16268 = vmatprep.mubr.msk.f32.mxu0 %vm23204_vm0, %v4408_v9  ;;  %v4379_v6 = vld [vmem:[#allocation2 + $0x8f] sm:$0xff]  ;;  %vm23522_vm11 = vnez %v23521_v54 }
 0x1d0   : > { %v16017_v41 = vpop.f32.mrf.mxu1  ;;  %16316 = vmatmul.mubr.msk.f32.gmra.mxu1 %vm23204_vm0, %v4794_v50  ;;  %v2218_v15 = vpop.f32.mrf.mxu0  ;;  %v4382_v50 = vld [vmem:[#allocation2 + $0xa7] sm:$0xff] }
 0x1d1   : > { %v18807_v20 = vadd.f32 %v16017_v41, %v15967_v27  ;;  %16318 = vmatprep.mubr.msk.f32.mxu1 %vm23204_vm0, %v4795_v2  ;;  %v4412_v27 = vsel %vm23522_vm11, %v4380_v51, 0.0  ;;  %v4798_v41 = vld [vmem:[#allocation2 + $0x90] sm:$0xff]  ;;  %v4799_v2 = vld [vmem:[#allocation2 + $0x98] sm:$0xff] }
 0x1d2   : > { %v2539_v22 = vpop.f32.mrf.mxu1  ;;  %v15970_v46 = vpop.f32.mrf.mxu0  ;;  %16269 = vmatmul.mubr.msk.f32.gmra.mxu0 %vm23204_vm0, %v4377_v58  ;;  %v4381_v58 = vld [vmem:[#allocation2 + $0x9f] sm:$0xff] }
 0x1d3   : > { %v18811_v17 = vadd.f32 %v2539_v22, %v2218_v15  ;;  %16271 = vmatprep.mubr.msk.f32.mxu0 %vm23204_vm0, %v4410_v60 }
 0x1d4   : > { %v16020_v19 = vpop.f32.mrf.mxu1  ;;  %16319 = vmatmul.mubr.msk.f32.gmra.mxu1 %vm23204_vm0, %v4796_v28  ;;  %v2228_v3 = vpop.f32.mrf.mxu0 }
 0x1d5   : > { %v18817_v29 = vadd.f32 %v16020_v19, %v15970_v46  ;;  %16321 = vmatprep.mubr.msk.f32.mxu1 %vm23204_vm0, %v4797_v44  ;;  %v23523_v19 = vld [vmem:[#allocation22_spill] sm:$0xff] }
 0x1d6   : > { %v2549_v16 = vpop.f32.mrf.mxu1  ;;  %v15973_v30 = vpop.f32.mrf.mxu0  ;;  %16272 = vmatmul.mubr.msk.f32.gmra.mxu0 %vm23204_vm0, %v4379_v6  ;;  %vm23524_vm11 = vnez %v23523_v19  ;;  %v4384_v44 = vld [vmem:[#allocation2 + $0xb7] sm:$0xff] }
 0x1d7   : > { %v18821_v8 = vadd.f32 %v2549_v16, %v2228_v3  ;;  %16274 = vmatprep.mubr.msk.f32.mxu0 %vm23204_vm0, %v4412_v27  ;;  %v4414_v28 = vsel %vm23524_vm11, %v4382_v50, 0.0  ;;  %v4800_v3 = vld [vmem:[#allocation2 + $0xa0] sm:$0xff]  ;;  %v23525_v50 = vld [vmem:[#allocation25_spill] sm:$0xff] }
 0x1d8   : > { %v16023_v9 = vpop.f32.mrf.mxu1  ;;  %16322 = vmatmul.mubr.msk.f32.gmra.mxu1 %vm23204_vm0, %v4798_v41  ;;  %v2238_v15 = vpop.f32.mrf.mxu0  ;;  %vm23526_vm11 = vnez %v23525_v50 }
 0x1d9   : > { %v18827_v7 = vadd.f32 %v16023_v9, %v15973_v30  ;;  %16324 = vmatprep.mubr.msk.f32.mxu1 %vm23204_vm0, %v4799_v2  ;;  %v4801_v30 = vld [vmem:[#allocation2 + $0xa8] sm:$0xff]  ;;  %v4416_v2 = vsel %vm23526_vm11, %v4384_v44, 0.0  ;;  %v23529_v44 = vld [vmem:[#allocation28_spill] sm:$0xff] }
 0x1da   : > { %v2559_v22 = vpop.f32.mrf.mxu1  ;;  %v15976_v60 = vpop.f32.mrf.mxu0  ;;  %16275 = vmatmul.mubr.msk.f32.gmra.mxu0 %vm23204_vm0, %v4381_v58  ;;  %v4383_v9 = vld [vmem:[#allocation2 + $0xaf] sm:$0xff]  ;;  %vm23530_vm11 = vnez %v23529_v44 }
 0x1db   : > { %v18831_v46 = vadd.f32 %v2559_v22, %v2238_v15  ;;  %16277 = vmatprep.mubr.msk.f32.mxu0 %vm23204_vm0, %v4414_v28  ;;  %v4802_v58 = vld [vmem:[#allocation2 + $0xb0] sm:$0xff] }
 0x1dc   : > { %v16026_v51 = vpop.f32.mrf.mxu1  ;;  %16325 = vmatmul.mubr.msk.f32.gmra.mxu1 %vm23204_vm0, %v4800_v3  ;;  %v2248_v6 = vpop.f32.mrf.mxu0  ;;  %v4803_v3 = vld [vmem:[#allocation2 + $0xb8] sm:$0xff] }
 0x1dd   : > { %v18837_v16 = vadd.f32 %v16026_v51, %v15976_v60  ;;  %16327 = vmatprep.mubr.msk.f32.mxu1 %vm23204_vm0, %v4801_v30  ;;  %v4386_v60 = vld [vmem:[#allocation2 + $0xc7] sm:$0xff]  ;;  %v4385_v30 = vld [vmem:[#allocation2 + $0xbf] sm:$0xff] }
 0x1de   : > { %v2569_v27 = vpop.f32.mrf.mxu1  ;;  %v15979_v15 = vpop.f32.mrf.mxu0  ;;  %16278 = vmatmul.mubr.msk.f32.gmra.mxu0 %vm23204_vm0, %v4383_v9  ;;  %v4418_v9 = vsel %vm23530_vm11, %v4386_v60, 0.0  ;;  %v23533_v60 = vld [vmem:[#allocation31_spill] sm:$0xff] }
 0x1df   : > { %v18841_v41 = vadd.f32 %v2569_v27, %v2248_v6  ;;  %16280 = vmatprep.mubr.msk.f32.mxu0 %vm23204_vm0, %v4416_v2  ;;  %vm23534_vm11 = vnez %v23533_v60 }
 0x1e0   : > { %v16029_v22 = vpop.f32.mrf.mxu1  ;;  %16328 = vmatmul.mubr.msk.f32.gmra.mxu1 %vm23204_vm0, %v4802_v58  ;;  %v18850_v51 = vpop.f32.mrf.mxu0 }
 0x1e1   : > { %v18847_v28 = vadd.f32 %v16029_v22, %v15979_v15  ;;  %23527 = vst [vmem:[#allocation8_spill] sm:$0xff] %v18850_v51  ;;  %16330 = vmatprep.mubr.msk.f32.mxu1 %vm23204_vm0, %v4803_v3  ;;  %v4804_v15 = vld [vmem:[#allocation2 + $0xc0] sm:$0xff]  ;;  %v4388_v22 = vld [vmem:[#allocation2 + $0xd7] sm:$0xff]  ;;  %v4805_v3 = vld [vmem:[#allocation2 + $0xc8] sm:$0xff] }
 0x1e2   : > { %v18853_v6 = vpop.f32.mrf.mxu1  ;;  %v15982_v27 = vpop.f32.mrf.mxu0  ;;  %16281 = vmatmul.mubr.msk.f32.gmra.mxu0 %vm23204_vm0, %v4385_v30  ;;  %v4387_v30 = vld [vmem:[#allocation2 + $0xcf] sm:$0xff] }
 0x1e3   : > { %23528 = vst [vmem:[#allocation9_spill] sm:$0xff] %v18853_v6  ;;  %16283 = vmatprep.mubr.msk.f32.mxu0 %vm23204_vm0, %v4418_v9  ;;  %v4420_v9 = vsel %vm23534_vm11, %v4388_v22, 0.0  ;;  %vm23537_vm11 = vnez %v23410_v26 }
 0x1e4   : > { %v16032_v2 = vpop.f32.mrf.mxu1  ;;  %16331 = vmatmul.mubr.msk.f32.gmra.mxu1 %vm23204_vm0, %v4804_v15  ;;  %v18862_v50 = vpop.f32.mrf.mxu0 }
 0x1e5   : > { %v18859_v58 = vadd.f32 %v16032_v2, %v15982_v27  ;;  %23531 = vst [vmem:[#allocation11_spill] sm:$0xff] %v18862_v50  ;;  %16333 = vmatprep.mubr.msk.f32.mxu1 %vm23204_vm0, %v4805_v3  ;;  %v4806_v27 = vld [vmem:[#allocation2 + $0xd0] sm:$0xff]  ;;  %v4390_v2 = vld [vmem:[#allocation2 + $0xe7] sm:$0xff]  ;;  %v4807_v3 = vld [vmem:[#allocation2 + $0xd8] sm:$0xff] }
 0x1e6   : > { %v18865_v19 = vpop.f32.mrf.mxu1  ;;  %v15985_v54 = vpop.f32.mrf.mxu0  ;;  %16284 = vmatmul.mubr.msk.f32.gmra.mxu0 %vm23204_vm0, %v4387_v30  ;;  %v4389_v30 = vld [vmem:[#allocation2 + $0xdf] sm:$0xff]  ;;  %v4422_v22 = vsel %vm23537_vm11, %v4390_v2, 0.0  ;;  %v23540_v2 = vld [vmem:[#allocation37_spill] sm:$0xff] }
 0x1e7   : > { %23532 = vst [vmem:[#allocation12_spill] sm:$0xff] %v18865_v19  ;;  %16286 = vmatprep.mubr.msk.f32.mxu0 %vm23204_vm0, %v4420_v9  ;;  %vm23541_vm11 = vnez %v23540_v2 }
 0x1e8   : > { %v16035_v44 = vpop.f32.mrf.mxu1  ;;  %16334 = vmatmul.mubr.msk.f32.gmra.mxu1 %vm23204_vm0, %v4806_v27  ;;  %v18874_v53 = vpop.f32.mrf.mxu0 }
 0x1e9   : > { %v18871_v15 = vadd.f32 %v16035_v44, %v15985_v54  ;;  %23535 = vst [vmem:[#allocation14_spill] sm:$0xff] %v18874_v53  ;;  %16336 = vmatprep.mubr.msk.f32.mxu1 %vm23204_vm0, %v4807_v3  ;;  %v4808_v54 = vld [vmem:[#allocation2 + $0xe0] sm:$0xff]  ;;  %v4392_v44 = vld [vmem:[#allocation2 + $0xf7] sm:$0xff]  ;;  %v4809_v3 = vld [vmem:[#allocation2 + $0xe8] sm:$0xff] }
 0x1ea   : > { %v18877_v10 = vpop.f32.mrf.mxu1  ;;  %v15988_v25 = vpop.f32.mrf.mxu0  ;;  %16287 = vmatmul.mubr.msk.f32.gmra.mxu0 %vm23204_vm0, %v4389_v30  ;;  %v4391_v30 = vld [vmem:[#allocation2 + $0xef] sm:$0xff] }
 0x1eb   : > { %23536 = vst [vmem:[#allocation15_spill] sm:$0xff] %v18877_v10  ;;  %16289 = vmatprep.mubr.msk.f32.mxu0 %vm23204_vm0, %v4422_v22  ;;  %v4424_v22 = vsel %vm23541_vm11, %v4392_v44, 0.0  ;;  %vm23544_vm11 = vnez %v23420_v32 }
 0x1ec   : > { %v16038_v9 = vpop.f32.mrf.mxu1  ;;  %16337 = vmatmul.mubr.msk.f32.gmra.mxu1 %vm23204_vm0, %v4808_v54  ;;  %v18886_v60 = vpop.f32.mrf.mxu0  ;;  %v4426_v44 = vsel %vm23544_vm11, %v18555_v61, 0.0 }
 0x1ed   : > { %v18883_v27 = vadd.f32 %v16038_v9, %v15988_v25  ;;  %23538 = vst [vmem:[#allocation17_spill] sm:$0xff] %v18886_v60  ;;  %16339 = vmatprep.mubr.msk.f32.mxu1 %vm23204_vm0, %v4809_v3  ;;  %v4810_v25 = vld [vmem:[#allocation2 + $0xf0] sm:$0xff]  ;;  %v4811_v3 = vld [vmem:[#allocation2 + $0xf8] sm:$0xff] }
 0x1ee   : > { %v18889_v59 = vpop.f32.mrf.mxu1  ;;  %v15991_v34 = vpop.f32.mrf.mxu0  ;;  %16290 = vmatmul.mubr.msk.f32.gmra.mxu0 %vm23204_vm0, %v4391_v30 }
 0x1ef   : > { %23539 = vst [vmem:[#allocation18_spill] sm:$0xff] %v18889_v59  ;;  %16292 = vmatprep.mubr.msk.f32.mxu0 %vm23204_vm0, %v4424_v22 }
 0x1f0   : > { %v16041_v26 = vpop.f32.mrf.mxu1  ;;  %16340 = vmatmul.mubr.msk.f32.gmra.mxu1 %vm23204_vm0, %v4810_v25  ;;  %v18898_v54 = vpop.f32.mrf.mxu0 }
 0x1f1   : > { %v18895_v9 = vadd.f32 %v16041_v26, %v15991_v34  ;;  %23542 = vst [vmem:[#allocation20_spill] sm:$0xff] %v18898_v54  ;;  %16342 = vmatprep.mubr.msk.f32.mxu1 %vm23204_vm0, %v4811_v3  ;;  %v4812_v34 = vld [vmem:[#allocation2 + $0x100] sm:$0xff]  ;;  %v4396_v26 = vld [vmem:[#allocation2 + $0x117] sm:$0xff] }
 0x1f2   : > { %v18901_v4 = vpop.f32.mrf.mxu1  ;;  %v15994_v30 = vpop.f32.mrf.mxu0  ;;  %16293 = vmatmul.mubr.msk.f32.gmra.mxu0 %vm23204_vm0, %v4393_v21  ;;  %v4428_v61 = vsel %vm23477_vm13, %v4396_v26, 0.0  ;;  %v5172_v26 = vld [vmem:[#allocation2 + $0x29] sm:$0xff]  ;;  %v5179_v54 = vld [vmem:[#allocation2 + $0x61] sm:$0xff] }
 0x1f3   : > { %23543 = vst [vmem:[#allocation21_spill] sm:$0xff] %v18901_v4  ;;  %16295 = vmatprep.mubr.msk.f32.mxu0 %vm23204_vm0, %v4426_v44  ;;  %v4815_v44 = vld [vmem:[#allocation2 + $0x118] sm:$0xff] }
 0x1f4   : > { %v16044_v22 = vpop.f32.mrf.mxu1  ;;  %16343 = vmatmul.mubr.msk.f32.gmra.mxu1 %vm23204_vm0, %v4812_v34  ;;  %v18911_v3 = vpop.f32.mrf.mxu0 }
 0x1f5   : > { %v18908_v25 = vadd.f32 %v16044_v22, %v15994_v30  ;;  %23545 = vst [vmem:[#allocation23_spill] sm:$0xff] %v18911_v3  ;;  %16345 = vmatprep.mubr.msk.f32.mxu1 %vm23204_vm0, %v18736_v38  ;;  %v4397_v30 = vld [vmem:[#allocation2 + $0x11f] sm:$0xff] }
 0x1f6   : > { %v18915_v2 = vpop.f32.mrf.mxu1  ;;  %v15997_v21 = vpop.f32.mrf.mxu0  ;;  %16296 = vmatmul.mubr.msk.f32.gmra.mxu0 %vm23204_vm0, %v18578_v5  ;;  %v4816_v5 = vld [vmem:[#allocation2 + $0x120] sm:$0xff] }
 0x1f7   : > { %23546 = vst [vmem:[#allocation24_spill] sm:$0xff] %v18915_v2  ;;  %16298 = vmatprep.mubr.msk.f32.mxu0 %vm23204_vm0, %v4428_v61  ;;  %v5205_v61 = vsel %vm18232_vm15, %v5173_v33, 0.0 }
 0x1f8   : > { %v16047_v32 = vpop.f32.mrf.mxu1  ;;  %16346 = vmatmul.mubr.msk.f32.gmra.mxu1 %vm23204_vm0, %v18750_v11  ;;  %v18926_v38 = vpop.f32.mrf.mxu0 }
 0x1f9   : > { %v18922_v22 = vadd.f32 %v16047_v32, %v15997_v21  ;;  %23547 = vst [vmem:[#allocation26_spill] sm:$0xff] %v18926_v38  ;;  %16348 = vmatprep.mubr.msk.f32.mxu1 %vm23204_vm0, %v4815_v44  ;;  %v23551_v38 = vld [vmem:[#allocation48_spill] sm:$0xff] }
 0x1fa   : > { %v18928_v34 = vpop.f32.mrf.mxu1  ;;  %v16000_v2 = vpop.f32.mrf.mxu0  ;;  %16299 = vmatmul.mubr.msk.f32.gmra.mxu0 %vm23204_vm0, %v4397_v30  ;;  %v5174_v30 = vld [vmem:[#allocation2 + $0x39] sm:$0xff] }
 0x1fb   : > { %23548 = vst [vmem:[#allocation27_spill] sm:$0xff] %v18928_v34  ;;  %16353 = vmatprep.mubr.msk.f32.mxu0 %vm23204_vm0, %v5172_v26  ;;  %v5175_v34 = vld [vmem:[#allocation2 + $0x41] sm:$0xff] }
 0x1fc   : > { %v16050_v3 = vpop.f32.mrf.mxu1  ;;  %v18935_v21 = vpop.f32.mrf.mxu0  ;;  %16349 = vmatmul.mubr.msk.f32.gmra.mxu1 %vm23204_vm0, %v4816_v5  ;;  %v5207_v5 = vsel %vm18254_vm14, %v5175_v34, 0.0  ;;  %v5209_v34 = vsel %vm18285_vm1, %v5177_v36, 0.0 }
 0x1fd   : > { %v18933_v32 = vadd.f32 %v16050_v3, %v16000_v2  ;;  %23549 = vst [vmem:[#allocation29_spill] sm:$0xff] %v18935_v21 }
 0x1fe   : > { %v18938_v11 = vpop.f32.mrf.mxu1  ;;  %v16055_v44 = vpop.f32.mrf.mxu0  ;;  %16354 = vmatmul.mubr.msk.f32.vlgmr.msra.gmra.mxu0 %vm23204_vm0, %v5205_v61  ;;  %v5176_v61 = vld [vmem:[#allocation2 + $0x49] sm:$0xff] }
 0x1ff   : > { %23550 = vst [vmem:[#allocation30_spill] sm:$0xff] %v18938_v11  ;;  %v3110_v4 = vadd.f32 %v16055_v44, %v23551_v38  ;;  %16356 = vmatprep.mubr.msk.f32.mxu0 %vm23204_vm0, %v5174_v30 }
 0x200   : > { %v16105_v2 = vpop.f32.mrf.mxu1  ;;  %v18945_v3 = vpop.f32.mrf.mxu0 }
 0x201   : > { %v18947_v26 = vadd.f32 %v16105_v2, %v3110_v4 }
 0x202   : > { %v18951_v11 = vpop.f32.mrf.mxu1  ;;  %v16058_v33 = vpop.f32.mrf.mxu0  ;;  %16357 = vmatmul.mubr.msk.f32.gmra.mxu0 %vm23204_vm0, %v5207_v5  ;;  %v5178_v5 = vld [vmem:[#allocation2 + $0x59] sm:$0xff] }
 0x203   : > { %v3112_v21 = vadd.f32 %v16058_v33, %v18777_v45  ;;  %16359 = vmatprep.mubr.msk.f32.mxu0 %vm23204_vm0, %v5176_v61 }
 0x204   : > { %v16108_v38 = vpop.f32.mrf.mxu1  ;;  %v2960_v44 = vpop.f32.mrf.mxu0 }
 0x205   : > { %v18956_v30 = vadd.f32 %v16108_v38, %v3112_v21  ;;  %v18959_v4 = vadd.f32 %v2960_v44, %v18781_v12  ;;  %v5630_v21 = vld [vmem:[%s23057_s7] sm:$0xff]  ;;  %v5211_v38 = vsel %vm18307_vm2, %v5179_v54, 0.0 }
 0x206   : > { %v18963_v2 = vpop.f32.mrf.mxu1  ;;  %v16061_v13 = vpop.f32.mrf.mxu0  ;;  %16360 = vmatmul.mubr.msk.f32.gmra.mxu0 %vm23204_vm0, %v5209_v34  ;;  %16401 = vmatprep.subr.mxu1 %v5630_v21  ;;  %v5181_v34 = vld [vmem:[#allocation2 + $0x71] sm:$0xff] }
 0x207   : > { %v3114_v45 = vadd.f32 %v16061_v13, %v18787_v14  ;;  %16362 = vmatprep.mubr.msk.f32.mxu0 %vm23204_vm0, %v5178_v5  ;;  %16402 = vmatpush3.msra.mxu1 %v5630_v21  ;;  %v5180_v14 = vld [vmem:[#allocation2 + $0x69] sm:$0xff]  ;;  %v5213_v54 = vsel %vm18328_vm3, %v5181_v34, 0.0  ;;  %v5215_v34 = vsel %vm18349_vm4, %v5183_v37, 0.0  ;;  %v5217_v37 = vsel %vm18370_vm5, %v5185_v63, 0.0 }
 0x208   : > { %v16111_v12 = vpop.f32.mrf.mxu1  ;;  %v2970_v33 = vpop.f32.mrf.mxu0  ;;  %v5219_v63 = vsel %vm18391_vm6, %v5187_v0, 0.0  ;;  %v5221_v0 = vsel %vm18412_vm7, %v5189_v40, 0.0  ;;  %vm23557_vm7 = vnez %v23461_v52  ;;  %v5197_v52 = vld [vmem:[#allocation2 + $0xf1] sm:$0xff]  ;;  %vm23761_vm6 = vcmask 15360  }
 0x209   : > { %v18971_v61 = vadd.f32 %v16111_v12, %v3114_v45  ;;  %v18974_v36 = vadd.f32 %v2970_v33, %v18791_v23 }
 0x20a   : > { %v18978_v44 = vpop.f32.mrf.mxu1  ;;  %v16064_v13 = vpop.f32.mrf.mxu0  ;;  %16363 = vmatmul.mubr.msk.f32.gmra.mxu0 %vm23204_vm0, %v5211_v38  ;;  %v5182_v38 = vld [vmem:[#allocation2 + $0x79] sm:$0xff] }
 0x20b   : > { %v3116_v5 = vadd.f32 %v16064_v13, %v18797_v39  ;;  %16365 = vmatprep.mubr.msk.f32.mxu0 %vm23204_vm0, %v5180_v14 }
 0x20c   : > { %v16114_v45 = vpop.f32.mrf.mxu1  ;;  %v2980_v12 = vpop.f32.mrf.mxu0 }
 0x20d   : > { %v18983_v31 = vadd.f32 %v16114_v45, %v3116_v5  ;;  %v18986_v23 = vadd.f32 %v2980_v12, %v18801_v24 }
 0x20e   : > { %v18990_v21 = vpop.f32.mrf.mxu1  ;;  %v16067_v33 = vpop.f32.mrf.mxu0  ;;  %16366 = vmatmul.mubr.msk.f32.gmra.mxu0 %vm23204_vm0, %v5213_v54  ;;  %v5184_v54 = vld [vmem:[#allocation2 + $0x89] sm:$0xff] }
 0x20f   : > { %v3118_v39 = vadd.f32 %v16067_v33, %v18807_v20  ;;  %16368 = vmatprep.mubr.msk.f32.mxu0 %vm23204_vm0, %v5182_v38 }
 0x210   : > { %v16117_v13 = vpop.f32.mrf.mxu1  ;;  %v2990_v14 = vpop.f32.mrf.mxu0 }
 0x211   : > { %v18995_v5 = vadd.f32 %v16117_v13, %v3118_v39  ;;  %v18998_v24 = vadd.f32 %v2990_v14, %v18811_v17 }
 0x212   : > { %v19002_v45 = vpop.f32.mrf.mxu1  ;;  %v16070_v12 = vpop.f32.mrf.mxu0  ;;  %16369 = vmatmul.mubr.msk.f32.gmra.mxu0 %vm23204_vm0, %v5215_v34  ;;  %v5186_v34 = vld [vmem:[#allocation2 + $0x99] sm:$0xff] }
 0x213   : > { %v3120_v20 = vadd.f32 %v16070_v12, %v18817_v29  ;;  %16371 = vmatprep.mubr.msk.f32.mxu0 %vm23204_vm0, %v5184_v54 }
 0x214   : > { %v16120_v33 = vpop.f32.mrf.mxu1  ;;  %v3000_v38 = vpop.f32.mrf.mxu0 }
 0x215   : > { %v19007_v39 = vadd.f32 %v16120_v33, %v3120_v20  ;;  %v19010_v17 = vadd.f32 %v3000_v38, %v18821_v8 }
 0x216   : > { %v19014_v13 = vpop.f32.mrf.mxu1  ;;  %v16073_v14 = vpop.f32.mrf.mxu0  ;;  %16372 = vmatmul.mubr.msk.f32.gmra.mxu0 %vm23204_vm0, %v5217_v37  ;;  %v5188_v37 = vld [vmem:[#allocation2 + $0xa9] sm:$0xff] }
 0x217   : > { %v3122_v29 = vadd.f32 %v16073_v14, %v18827_v7  ;;  %16374 = vmatprep.mubr.msk.f32.mxu0 %vm23204_vm0, %v5186_v34 }
 0x218   : > { %v16123_v12 = vpop.f32.mrf.mxu1  ;;  %v3010_v54 = vpop.f32.mrf.mxu0 }
 0x219   : > { %v19019_v20 = vadd.f32 %v16123_v12, %v3122_v29  ;;  %v19022_v8 = vadd.f32 %v3010_v54, %v18831_v46 }
 0x21a   : > { %v19026_v33 = vpop.f32.mrf.mxu1  ;;  %v16076_v38 = vpop.f32.mrf.mxu0  ;;  %16375 = vmatmul.mubr.msk.f32.gmra.mxu0 %vm23204_vm0, %v5219_v63  ;;  %v5190_v63 = vld [vmem:[#allocation2 + $0xb9] sm:$0xff] }
 0x21b   : > { %v3124_v7 = vadd.f32 %v16076_v38, %v18837_v16  ;;  %16377 = vmatprep.mubr.msk.f32.mxu0 %vm23204_vm0, %v5188_v37 }
 0x21c   : > { %v16126_v14 = vpop.f32.mrf.mxu1  ;;  %v3020_v34 = vpop.f32.mrf.mxu0 }
 0x21d   : > { %v19031_v29 = vadd.f32 %v16126_v14, %v3124_v7  ;;  %v19034_v46 = vadd.f32 %v3020_v34, %v18841_v41  ;;  %v5223_v41 = vsel %vm18433_vm8, %v5191_v1, 0.0  ;;  %v5192_v34 = vld [vmem:[#allocation2 + $0xc9] sm:$0xff]  ;;  %vm23560_vm8 = vnez %v23464_v43  ;;  %v5199_v43 = vld [vmem:[#allocation2 + $0x101] sm:$0xff] }
 0x21e   : > { %v19038_v12 = vpop.f32.mrf.mxu1  ;;  %v16079_v54 = vpop.f32.mrf.mxu0  ;;  %16378 = vmatmul.mubr.msk.f32.gmra.mxu0 %vm23204_vm0, %v5221_v0  ;;  %v5193_v0 = vld [vmem:[#allocation2 + $0xd1] sm:$0xff] }
 0x21f   : > { %23552 = vst [vmem:[#allocation32_spill] sm:$0xff] %v19034_v46  ;;  %23553 = vst [vmem:[#allocation33_spill] sm:$0xff] %v19038_v12  ;;  %v3126_v16 = vadd.f32 %v16079_v54, %v18847_v28  ;;  %16380 = vmatprep.mubr.msk.f32.mxu0 %vm23204_vm0, %v5190_v63 }
 0x220   : > { %v16129_v38 = vpop.f32.mrf.mxu1  ;;  %v19043_v37 = vpop.f32.mrf.mxu0 }
 0x221   : > { %23554 = vst [vmem:[#allocation35_spill] sm:$0xff] %v19043_v37  ;;  %v19045_v7 = vadd.f32 %v16129_v38, %v3126_v16  ;;  %v5225_v16 = vsel %vm23557_vm7, %v5193_v0, 0.0 }
 0x222   : > { %v19049_v40 = vpop.f32.mrf.mxu1  ;;  %v16082_v14 = vpop.f32.mrf.mxu0  ;;  %16381 = vmatmul.mubr.msk.f32.gmra.mxu0 %vm23204_vm0, %v5223_v41  ;;  %v5194_v41 = vld [vmem:[#allocation2 + $0xd9] sm:$0xff] }
 0x223   : > { %23555 = vst [vmem:[#allocation36_spill] sm:$0xff] %v19049_v40  ;;  %v3128_v56 = vadd.f32 %v16082_v14, %v18859_v58  ;;  %16383 = vmatprep.mubr.msk.f32.mxu0 %vm23204_vm0, %v5192_v34 }
 0x224   : > { %v16132_v28 = vpop.f32.mrf.mxu1  ;;  %v19054_v54 = vpop.f32.mrf.mxu0 }
 0x225   : > { %23556 = vst [vmem:[#allocation38_spill] sm:$0xff] %v19054_v54  ;;  %v19056_v63 = vadd.f32 %v16132_v28, %v3128_v56  ;;  %v5227_v56 = vsel %vm23560_vm8, %v5195_v48, 0.0  ;;  %vm23565_vm8 = vnez %v23470_v49 }
 0x226   : > { %v19060_v1 = vpop.f32.mrf.mxu1  ;;  %v16085_v38 = vpop.f32.mrf.mxu0  ;;  %16384 = vmatmul.mubr.msk.f32.gmra.mxu0 %vm23204_vm0, %v5225_v16  ;;  %v5196_v16 = vld [vmem:[#allocation2 + $0xe9] sm:$0xff] }
 0x227   : > { %23558 = vst [vmem:[#allocation39_spill] sm:$0xff] %v19060_v1  ;;  %v3130_v59 = vadd.f32 %v16085_v38, %v18871_v15  ;;  %16386 = vmatprep.mubr.msk.f32.mxu0 %vm23204_vm0, %v5194_v41 }
 0x228   : > { %v16135_v58 = vpop.f32.mrf.mxu1  ;;  %v19065_v14 = vpop.f32.mrf.mxu0 }
 0x229   : > { %23559 = vst [vmem:[#allocation41_spill] sm:$0xff] %v19065_v14  ;;  %v19067_v34 = vadd.f32 %v16135_v58, %v3130_v59  ;;  %v5229_v59 = vsel %vm23504_vm9, %v5197_v52, 0.0 }
 0x22a   : > { %v19071_v0 = vpop.f32.mrf.mxu1  ;;  %v16088_v28 = vpop.f32.mrf.mxu0  ;;  %16387 = vmatmul.mubr.msk.f32.gmra.mxu0 %vm23204_vm0, %v5227_v56  ;;  %v5198_v56 = vld [vmem:[#allocation2 + $0xf9] sm:$0xff] }
 0x22b   : > { %23561 = vst [vmem:[#allocation42_spill] sm:$0xff] %v19071_v0  ;;  %v3132_v60 = vadd.f32 %v16088_v28, %v18883_v27  ;;  %16389 = vmatprep.mubr.msk.f32.mxu0 %vm23204_vm0, %v5196_v16 }
 0x22c   : > { %v16138_v15 = vpop.f32.mrf.mxu1  ;;  %v19076_v38 = vpop.f32.mrf.mxu0 }
 0x22d   : > { %23562 = vst [vmem:[#allocation44_spill] sm:$0xff] %v19076_v38  ;;  %v19078_v41 = vadd.f32 %v16138_v15, %v3132_v60  ;;  %v5231_v60 = vsel %vm23565_vm8, %v5199_v43, 0.0  ;;  %vm23568_vm8 = vnez %v23474_v62 }
 0x22e   : > { %v19082_v48 = vpop.f32.mrf.mxu1  ;;  %v16091_v58 = vpop.f32.mrf.mxu0  ;;  %16390 = vmatmul.mubr.msk.f32.gmra.mxu0 %vm23204_vm0, %v5229_v59  ;;  %v5233_v43 = vsel %vm23568_vm8, %v18746_v35, 0.0 }
 0x22f   : > { %23563 = vst [vmem:[#allocation45_spill] sm:$0xff] %v19082_v48  ;;  %v3134_v0 = vadd.f32 %v16091_v58, %v18895_v9  ;;  %16392 = vmatprep.mubr.msk.f32.mxu0 %vm23204_vm0, %v5198_v56  ;;  %v5202_v56 = vld [vmem:[#allocation2 + $0x119] sm:$0xff] }
 0x230   : > { %v16141_v27 = vpop.f32.mrf.mxu1  ;;  %v19087_v28 = vpop.f32.mrf.mxu0 }
 0x231   : > { %23564 = vst [vmem:[#allocation48_spill] sm:$0xff] %v19087_v28  ;;  %v19089_v16 = vadd.f32 %v16141_v27, %v3134_v0 }
 0x232   : > { %v19093_v52 = vpop.f32.mrf.mxu1  ;;  %v16094_v15 = vpop.f32.mrf.mxu0  ;;  %16393 = vmatmul.mubr.msk.f32.gmra.mxu0 %vm23204_vm0, %v5231_v60 }
 0x233   : > { %23566 = vst [vmem:[#allocation63_spill] sm:$0xff] %v19093_v52  ;;  %v3136_v59 = vadd.f32 %v16094_v15, %v18908_v25  ;;  %16395 = vmatprep.mubr.msk.f32.mxu0 %vm23204_vm0, %v18744_v18  ;;  %v5235_v18 = vsel %vm18569_vm12, %v5203_v57, 0.0  ;;  %vm23207_vm12 = vcmask 15360  }
 0x234   : > { %v16144_v9 = vpop.f32.mrf.mxu1  ;;  %v19099_v58 = vpop.f32.mrf.mxu0 }
 0x235   : > { %23567 = vst [vmem:[#allocation64_spill] sm:$0xff] %v19099_v58  ;;  %v19101_v0 = vadd.f32 %v16144_v9, %v3136_v59 }
 0x236   : > { %v19106_v27 = vpop.f32.mrf.mxu1  ;;  %v16097_v49 = vpop.f32.mrf.mxu0  ;;  %16396 = vmatmul.mubr.msk.f32.gmra.mxu0 %vm23204_vm0, %v5233_v43 }
 0x237   : > { %23569 = vst [vmem:[#allocation65_spill] sm:$0xff] %v19106_v27  ;;  %v3138_v25 = vadd.f32 %v16097_v49, %v18922_v22  ;;  %16398 = vmatprep.mubr.msk.f32.mxu0 %vm23204_vm0, %v5202_v56 }
 0x238   : > { %v16147_v60 = vpop.f32.mrf.mxu1  ;;  %v19113_v15 = vpop.f32.mrf.mxu0 }
 0x239   : > { %23570 = vst [vmem:[#allocation66_spill] sm:$0xff] %v19113_v15  ;;  %v19115_v59 = vadd.f32 %v16147_v60, %v3138_v25 }
 0x23a   : > { %v19117_v9 = vpop.f32.mrf.mxu1  ;;  %v16100_v35 = vpop.f32.mrf.mxu0  ;;  %16399 = vmatmul.mubr.msk.f32.gmra.mxu0 %vm23204_vm0, %v5235_v18  ;;  %vm23208_vm0 = vcmask 1041408  }
 0x23b   : > { %23571 = vst [vmem:[#allocation67_spill] sm:$0xff] %v19117_v9  ;;  %v3140_v62 = vadd.f32 %v16100_v35, %v18933_v32 }
 0x23c   : > { %v16150_v43 = vpop.f32.mrf.mxu1  ;;  %v19121_v27 = vpop.f32.mrf.mxu0 }
 0x23d   : > { %23572 = vst [vmem:[#allocation68_spill] sm:$0xff] %v19121_v27  ;;  %v19123_v49 = vadd.f32 %v16150_v43, %v3140_v62 }
 0x23e   : > { %v19125_v22 = vpop.f32.mrf.mxu1  ;;  %v16155_v57 = vpop.f32.mrf.mxu0 }
 0x23f   : > { %23573 = vst [vmem:[#allocation69_spill] sm:$0xff] %v19125_v22  ;;  %v19128_v56 = vadd.f32 %v16155_v57, %v18947_v26 }
 0x240   : > { %v19130_v25 = vpop.f32.mrf.mxu1  ;;  %v19132_v60 = vpop.f32.mrf.mxu0 }
 0x242   : > { %v19134_v42 = vpop.f32.mrf.mxu1  ;;  %v16158_v18 = vpop.f32.mrf.mxu0 }
 0x243   : > { %v19137_v32 = vadd.f32 %v16158_v18, %v18956_v30 }
 0x244   : > { %v19139_v35 = vpop.f32.mrf.mxu1  ;;  %v19141_v62 = vpop.f32.mrf.mxu0 }
 0x246   : > { %v19143_v43 = vpop.f32.mrf.mxu1  ;;  %v16161_v22 = vpop.f32.mrf.mxu0 }
 0x247   : > { %v19146_v26 = vadd.f32 %v16161_v22, %v18971_v61 }
 0x248   : > { %v19148_v57 = vpop.f32.mrf.mxu1  ;;  %v19150_v27 = vpop.f32.mrf.mxu0 }
 0x24a   : > { %v19152_v9 = vpop.f32.mrf.mxu1  ;;  %v16164_v15 = vpop.f32.mrf.mxu0 }
 0x24b   : > { %v19155_v30 = vadd.f32 %v16164_v15, %v18983_v31 }
 0x24c   : > { %v19157_v18 = vpop.f32.mrf.mxu1  ;;  %v19159_v58 = vpop.f32.mrf.mxu0 }
 0x24e   : > { %v19161_v52 = vpop.f32.mrf.mxu1  ;;  %v16167_v48 = vpop.f32.mrf.mxu0 }
 0x24f   : > { %v19164_v61 = vadd.f32 %v16167_v48, %v18995_v5 }
 0x250   : > { %v19166_v22 = vpop.f32.mrf.mxu1  ;;  %v19168_v28 = vpop.f32.mrf.mxu0 }
 0x252   : > { %v19170_v38 = vpop.f32.mrf.mxu1  ;;  %v16170_v1 = vpop.f32.mrf.mxu0 }
 0x253   : > { %v19173_v31 = vadd.f32 %v16170_v1, %v19007_v39 }
 0x254   : > { %v19175_v15 = vpop.f32.mrf.mxu1  ;;  %v19177_v14 = vpop.f32.mrf.mxu0 }
 0x255   : > { %23574 = vst [vmem:[#allocation70_spill] sm:$0xff] %v19173_v31  ;;  %23575 = vst [vmem:[#allocation71_spill] sm:$0xff] %v19175_v15 }
 0x256   : > { %v19179_v10 = vpop.f32.mrf.mxu1  ;;  %v16173_v53 = vpop.f32.mrf.mxu0 }
 0x257   : > { %23576 = vst [vmem:[#allocation72_spill] sm:$0xff] %v19179_v10  ;;  %v19182_v5 = vadd.f32 %v16173_v53, %v19019_v20 }
 0x258   : > { %v19184_v48 = vpop.f32.mrf.mxu1  ;;  %v19186_v54 = vpop.f32.mrf.mxu0 }
 0x259   : > { %23577 = vst [vmem:[#allocation73_spill] sm:$0xff] %v19182_v5  ;;  %23578 = vst [vmem:[#allocation74_spill] sm:$0xff] %v19184_v48 }
 0x25a   : > { %23579 = vst [vmem:[#allocation75_spill] sm:$0xff] %v19186_v54  ;;  %v19188_v40 = vpop.f32.mrf.mxu1  ;;  %v16176_v19 = vpop.f32.mrf.mxu0 }
 0x25b   : > { %23580 = vst [vmem:[#allocation76_spill] sm:$0xff] %v19188_v40  ;;  %v19191_v39 = vadd.f32 %v16176_v19, %v19031_v29 }
 0x25c   : > { %v19193_v1 = vpop.f32.mrf.mxu1  ;;  %v19195_v50 = vpop.f32.mrf.mxu0 }
 0x25d   : > { %23581 = vst [vmem:[#allocation77_spill] sm:$0xff] %v19191_v39  ;;  %23582 = vst [vmem:[#allocation78_spill] sm:$0xff] %v19193_v1 }
 0x25e   : > { %23583 = vst [vmem:[#allocation79_spill] sm:$0xff] %v19195_v50  ;;  %v19197_v12 = vpop.f32.mrf.mxu1  ;;  %v16179_v46 = vpop.f32.mrf.mxu0 }
 0x25f   : > { %23584 = vst [vmem:[#allocation80_spill] sm:$0xff] %v19197_v12  ;;  %v19200_v53 = vadd.f32 %v16179_v46, %v19045_v7 }
 0x260   : > { %v19202_v20 = vpop.f32.mrf.mxu1  ;;  %v19204_v48 = vpop.f32.mrf.mxu0 }
 0x261   : > { %23585 = vst [vmem:[#allocation81_spill] sm:$0xff] %v19200_v53  ;;  %23586 = vst [vmem:[#allocation82_spill] sm:$0xff] %v19202_v20 }
 0x262   : > { %23587 = vst [vmem:[#allocation83_spill] sm:$0xff] %v19204_v48  ;;  %v19206_v5 = vpop.f32.mrf.mxu1  ;;  %v16182_v40 = vpop.f32.mrf.mxu0 }
 0x263   : > { %23588 = vst [vmem:[#allocation84_spill] sm:$0xff] %v19206_v5  ;;  %v19209_v19 = vadd.f32 %v16182_v40, %v19056_v63 }
 0x264   : > { %v19211_v29 = vpop.f32.mrf.mxu1  ;;  %v19213_v1 = vpop.f32.mrf.mxu0 }
 0x265   : > { %23589 = vst [vmem:[#allocation85_spill] sm:$0xff] %v19209_v19  ;;  %23590 = vst [vmem:[#allocation86_spill] sm:$0xff] %v19211_v29 }
 0x266   : > { %23591 = vst [vmem:[#allocation87_spill] sm:$0xff] %v19213_v1  ;;  %v19215_v39 = vpop.f32.mrf.mxu1  ;;  %v16185_v12 = vpop.f32.mrf.mxu0 }
 0x267   : > { %23592 = vst [vmem:[#allocation88_spill] sm:$0xff] %v19215_v39  ;;  %v19218_v46 = vadd.f32 %v16185_v12, %v19067_v34 }
 0x268   : > { %v19220_v7 = vpop.f32.mrf.mxu1  ;;  %v19222_v20 = vpop.f32.mrf.mxu0 }
 0x269   : > { %23593 = vst [vmem:[#allocation89_spill] sm:$0xff] %v19218_v46  ;;  %23594 = vst [vmem:[#allocation90_spill] sm:$0xff] %v19220_v7 }
 0x26a   : > { %23595 = vst [vmem:[#allocation91_spill] sm:$0xff] %v19222_v20  ;;  %v19224_v53 = vpop.f32.mrf.mxu1  ;;  %v16188_v5 = vpop.f32.mrf.mxu0 }
 0x26b   : > { %23596 = vst [vmem:[#allocation92_spill] sm:$0xff] %v19224_v53  ;;  %v19227_v40 = vadd.f32 %v16188_v5, %v19078_v41 }
 0x26c   : > { %v19229_v63 = vpop.f32.mrf.mxu1  ;;  %v19231_v29 = vpop.f32.mrf.mxu0 }
 0x26d   : > { %23597 = vst [vmem:[#allocation93_spill] sm:$0xff] %v19227_v40  ;;  %23598 = vst [vmem:[#allocation94_spill] sm:$0xff] %v19229_v63 }
 0x26e   : > { %23599 = vst [vmem:[#allocation95_spill] sm:$0xff] %v19231_v29  ;;  %v19233_v19 = vpop.f32.mrf.mxu1  ;;  %v16191_v39 = vpop.f32.mrf.mxu0 }
 0x26f   : > { %23600 = vst [vmem:[#allocation96_spill] sm:$0xff] %v19233_v19  ;;  %v19236_v12 = vadd.f32 %v16191_v39, %v19089_v16 }
 0x270   : > { %v19238_v34 = vpop.f32.mrf.mxu1  ;;  %v19240_v7 = vpop.f32.mrf.mxu0 }
 0x271   : > { %23601 = vst [vmem:[#allocation97_spill] sm:$0xff] %v19236_v12  ;;  %23602 = vst [vmem:[#allocation98_spill] sm:$0xff] %v19238_v34 }
 0x272   : > { %23603 = vst [vmem:[#allocation99_spill] sm:$0xff] %v19240_v7  ;;  %v19242_v46 = vpop.f32.mrf.mxu1  ;;  %v16194_v53 = vpop.f32.mrf.mxu0 }
 0x273   : > { %23604 = vst [vmem:[#allocation100_spill] sm:$0xff] %v19242_v46  ;;  %v19245_v41 = vadd.f32 %v16194_v53, %v19101_v0 }
 0x274   : > { %v19247_v5 = vpop.f32.mrf.mxu1  ;;  %v19249_v63 = vpop.f32.mrf.mxu0 }
 0x275   : > { %23605 = vst [vmem:[#allocation101_spill] sm:$0xff] %v19245_v41  ;;  %23606 = vst [vmem:[#allocation102_spill] sm:$0xff] %v19247_v5 }
 0x276   : > { %23607 = vst [vmem:[#allocation103_spill] sm:$0xff] %v19249_v63  ;;  %v19251_v40 = vpop.f32.mrf.mxu1  ;;  %v16197_v19 = vpop.f32.mrf.mxu0 }
 0x277   : > { %23608 = vst [vmem:[#allocation104_spill] sm:$0xff] %v19251_v40  ;;  %v19254_v16 = vadd.f32 %v16197_v19, %v19115_v59 }
 0x278   : > { %v19256_v39 = vpop.f32.mrf.mxu1  ;;  %v19258_v34 = vpop.f32.mrf.mxu0 }
 0x279   : > { %23609 = vst [vmem:[#allocation105_spill] sm:$0xff] %v19254_v16  ;;  %23610 = vst [vmem:[#allocation106_spill] sm:$0xff] %v19256_v39 }
 0x27a   : > { %23611 = vst [vmem:[#allocation107_spill] sm:$0xff] %v19258_v34  ;;  %v19260_v12 = vpop.f32.mrf.mxu1  ;;  %v16200_v46 = vpop.f32.mrf.mxu0 }
 0x27b   : > { %23612 = vst [vmem:[#allocation108_spill] sm:$0xff] %v19260_v12  ;;  %v19263_v0 = vadd.f32 %v16200_v46, %v19123_v49  ;;  %v14186_v49 = vld [vmem:[%s23059_s9 + $0x2] sm:$0x3]  ;;  %v23617_v46 = vmov 0.0  }
 0x27c   : > { %v19265_v53 = vpop.f32.mrf.mxu1  ;;  %v19267_v5 = vpop.f32.mrf.mxu0  ;;  %16451 = vmatprep.subr.msk.mxu0 %vm23208_vm0, %v14186_v49  ;;  %559 = vst.msk [vmem:[#allocation3 + $0x20] sm:$0xff] %vm23207_vm12, %v23617_v46  ;;  %555 = vst.msk [vmem:[#allocation3] sm:$0xff] %vm23207_vm12, %v23617_v46 }
 0x27d   : > { %23613 = vst [vmem:[#allocation109_spill] sm:$0xff] %v19263_v0  ;;  %23614 = vst [vmem:[#allocation110_spill] sm:$0xff] %v19265_v53  ;;  %16452 = vmatpush3.msk.msra.mxu0 %vm23208_vm0, %v14186_v49 }
 0x27e   : > { %23615 = vst [vmem:[#allocation111_spill] sm:$0xff] %v19267_v5  ;;  %v19269_v41 = vpop.f32.mrf.mxu1  ;;  %v19271_v40 = vpop.f32.mrf.mxu0  ;;  %556 = vst.msk [vmem:[#allocation3 + $0x8] sm:$0xff] %vm23207_vm12, %v23617_v46 }
 0x27f   : > { %23616 = vst [vmem:[#allocation112_spill] sm:$0xff] %v19269_v41  ;;  %557 = vst.msk [vmem:[#allocation3 + $0x10] sm:$0xff] %vm23207_vm12, %v23617_v46 }
 0x280   : > { %v19273_v59 = vpop.f32.mrf.mxu1  ;;  %v19275_v19 = vpop.f32.mrf.mxu0  ;;  %558 = vst.msk [vmem:[#allocation3 + $0x18] sm:$0xff] %vm23207_vm12, %v23617_v46  ;;  %560 = vst.msk [vmem:[#allocation3 + $0x28] sm:$0xff] %vm23207_vm12, %v23617_v46 }
 0x281   : > { %561 = vst.msk [vmem:[#allocation3 + $0x30] sm:$0xff] %vm23207_vm12, %v23617_v46  ;;  %562 = vst.msk [vmem:[#allocation3 + $0x38] sm:$0xff] %vm23207_vm12, %v23617_v46 }
 0x282   : > { %v19277_v39 = vpop.f32.mrf.mxu1  ;;  %v19279_v16 = vpop.f32.mrf.mxu0  ;;  %563 = vst.msk [vmem:[#allocation3 + $0x40] sm:$0xff] %vm23207_vm12, %v23617_v46  ;;  %564 = vst.msk [vmem:[#allocation3 + $0x48] sm:$0xff] %vm23207_vm12, %v23617_v46 }
 0x283   : > { %565 = vst.msk [vmem:[#allocation3 + $0x50] sm:$0xff] %vm23207_vm12, %v23617_v46  ;;  %566 = vst.msk [vmem:[#allocation3 + $0x58] sm:$0xff] %vm23207_vm12, %v23617_v46 }
 0x284   : > { %567 = vst.msk [vmem:[#allocation3 + $0x60] sm:$0xff] %vm23207_vm12, %v23617_v46  ;;  %568 = vst.msk [vmem:[#allocation3 + $0x68] sm:$0xff] %vm23207_vm12, %v23617_v46  ;;  %v19361_v41 = vpop.f32.mrf.mxu1  ;;  %v19363_v53 = vpop.f32.mrf.mxu0 }
 0x285   : > { %569 = vst.msk [vmem:[#allocation3 + $0x70] sm:$0xff] %vm23207_vm12, %v23617_v46  ;;  %570 = vst.msk [vmem:[#allocation3 + $0x78] sm:$0xff] %vm23207_vm12, %v23617_v46 }
 0x286   : > { %571 = vst.msk [vmem:[#allocation3 + $0x80] sm:$0xff] %vm23207_vm12, %v23617_v46  ;;  %572 = vst.msk [vmem:[#allocation3 + $0x88] sm:$0xff] %vm23207_vm12, %v23617_v46  ;;  %v19366_v0 = vpop.f32.mrf.mxu0  ;;  %v19368_v5 = vpop.f32.mrf.mxu1 }
 0x287   : > { %573 = vst.msk [vmem:[#allocation3 + $0x90] sm:$0xff] %vm23207_vm12, %v23617_v46  ;;  %574 = vst.msk [vmem:[#allocation3 + $0x98] sm:$0xff] %vm23207_vm12, %v23617_v46 }
 0x288   : > { %575 = vst.msk [vmem:[#allocation3 + $0xa0] sm:$0xff] %vm23207_vm12, %v23617_v46  ;;  %576 = vst.msk [vmem:[#allocation3 + $0xa8] sm:$0xff] %vm23207_vm12, %v23617_v46  ;;  %v19370_v12 = vpop.f32.mrf.mxu0  ;;  %v19374_v63 = vpop.f32.mrf.mxu1 }
 0x289   : > { %577 = vst.msk [vmem:[#allocation3 + $0xb0] sm:$0xff] %vm23207_vm12, %v23617_v46  ;;  %578 = vst.msk [vmem:[#allocation3 + $0xb8] sm:$0xff] %vm23207_vm12, %v23617_v46 }
 0x28a   : > { %579 = vst.msk [vmem:[#allocation3 + $0xc0] sm:$0xff] %vm23207_vm12, %v23617_v46  ;;  %580 = vst.msk [vmem:[#allocation3 + $0xc8] sm:$0xff] %vm23207_vm12, %v23617_v46  ;;  %v19372_v34 = vpop.f32.mrf.mxu0 }
 0x28b   : > { %581 = vst.msk [vmem:[#allocation3 + $0xd0] sm:$0xff] %vm23207_vm12, %v23617_v46  ;;  %582 = vst.msk [vmem:[#allocation3 + $0xd8] sm:$0xff] %vm23207_vm12, %v23617_v46 }
 0x28c   : > { %583 = vst.msk [vmem:[#allocation3 + $0xe0] sm:$0xff] %vm23207_vm12, %v23617_v46  ;;  %584 = vst.msk [vmem:[#allocation3 + $0xe8] sm:$0xff] %vm23207_vm12, %v23617_v46  ;;  %v19376_v7 = vpop.f32.mrf.mxu0 }
 0x28d   : > { %585 = vst.msk [vmem:[#allocation3 + $0xf0] sm:$0xff] %vm23207_vm12, %v23617_v46  ;;  %586 = vst.msk [vmem:[#allocation3 + $0xf8] sm:$0xff] %vm23207_vm12, %v23617_v46 }
 0x28e   : > { %587 = vst.msk [vmem:[#allocation3 + $0x100] sm:$0xff] %vm23207_vm12, %v23617_v46  ;;  %588 = vst.msk [vmem:[#allocation3 + $0x108] sm:$0xff] %vm23207_vm12, %v23617_v46  ;;  %v19378_v29 = vpop.f32.mrf.mxu0 }
 0x28f   : > { %589 = vst.msk [vmem:[#allocation3 + $0x110] sm:$0xff] %vm23207_vm12, %v23617_v46  ;;  %590 = vst.msk [vmem:[#allocation3 + $0x118] sm:$0xff] %vm23207_vm12, %v23617_v46 }
 0x290   : > { %591 = vst.msk [vmem:[#allocation3 + $0x120] sm:$0xff] %vm23207_vm12, %v23617_v46  ;;  %592 = vst.msk [vmem:[#allocation3 + $0x128] sm:$0xff] %vm23207_vm12, %v23617_v46  ;;  %v19380_v46 = vpop.f32.mrf.mxu1  ;;  %v19382_v20 = vpop.f32.mrf.mxu0  ;;  %vm23641_vm12 = vcmask 64512  }
 0x291   : > { %23618 = vst [vmem:[#allocation113_spill] sm:$0xff] %v19382_v20  ;;  %vm23642_vm0 = vmmov %vm23641_vm12 }
 0x292   : > { %v19384_v1 = vpop.f32.mrf.mxu0  ;;  %v19386_v49 = vpop.f32.mrf.mxu1  ;;  %vm23755_vm8 = vmmov %vm23642_vm0 }
 0x293   : > { %23619 = vst [vmem:[#allocation114_spill] sm:$0xff] %v19384_v1  ;;  %vm23757_vm9 = vmmov %vm23642_vm0 }
 0x294   : > { %v19388_v48 = vpop.f32.mrf.mxu0  ;;  %v19392_v37 = vpop.f32.mrf.mxu1  ;;  %vm23759_vm7 = vmmov %vm23642_vm0 }
 0x295   : > { %23620 = vst [vmem:[#allocation115_spill] sm:$0xff] %v19388_v48  ;;  %23622 = vst [vmem:[#allocation117_spill] sm:$0xff] %v19392_v37 }
 0x296   : > { %v19390_v50 = vpop.f32.mrf.mxu0  ;;  %v19398_v15 = vpop.f32.mrf.mxu1 }
 0x297   : > { %23621 = vst [vmem:[#allocation116_spill] sm:$0xff] %v19390_v50  ;;  %23625 = vst [vmem:[#allocation120_spill] sm:$0xff] %v19398_v15 }
 0x298   : > { %v19394_v54 = vpop.f32.mrf.mxu0  ;;  %v19404_v51 = vpop.f32.mrf.mxu1 }
 0x299   : > { %23623 = vst [vmem:[#allocation118_spill] sm:$0xff] %v19394_v54  ;;  %23628 = vst [vmem:[#allocation123_spill] sm:$0xff] %v19404_v51 }
 0x29a   : > { %v19396_v10 = vpop.f32.mrf.mxu0  ;;  %v19410_v48 = vpop.f32.mrf.mxu1 }
 0x29b   : > { %23624 = vst [vmem:[#allocation119_spill] sm:$0xff] %v19396_v10  ;;  %23631 = vst [vmem:[#allocation126_spill] sm:$0xff] %v19410_v48 }
 0x29c   : > { %v19400_v31 = vpop.f32.mrf.mxu0  ;;  %v19416_v54 = vpop.f32.mrf.mxu1 }
 0x29d   : > { %23626 = vst [vmem:[#allocation121_spill] sm:$0xff] %v19400_v31  ;;  %23634 = vst [vmem:[#allocation129_spill] sm:$0xff] %v19416_v54 }
 0x29e   : > { %v19402_v6 = vpop.f32.mrf.mxu0  ;;  %v19422_v31 = vpop.f32.mrf.mxu1 }
 0x29f   : > { %23627 = vst [vmem:[#allocation122_spill] sm:$0xff] %v19402_v6  ;;  %23637 = vst [vmem:[#allocation132_spill] sm:$0xff] %v19422_v31 }
 0x2a0   : > { %v19406_v1 = vpop.f32.mrf.mxu0 }
 0x2a1   : > { %23629 = vst [vmem:[#allocation124_spill] sm:$0xff] %v19406_v1  ;;  %v2500_v1 = vadd.f32 %v18770_v55, %v18767_v47  ;;  %v3530_v47 = vadd.f32 %v18963_v2, %v18959_v4  ;;  %v4335_v55 = vadd.f32 %v19130_v25, %v19128_v56  ;;  %v4337_v2 = vadd.f32 %v19139_v35, %v19137_v32 }
 0x2a2   : > { %v19408_v20 = vpop.f32.mrf.mxu0  ;;  %v4339_v35 = vadd.f32 %v19148_v57, %v19146_v26  ;;  %v3536_v26 = vadd.f32 %v19002_v45, %v18998_v24 }
 0x2a3   : > { %23630 = vst [vmem:[#allocation125_spill] sm:$0xff] %v19408_v20  ;;  %v3109_v48 = vadd.f32 %v18945_v3, %v2500_v1 }
 0x2a4   : > { %v19412_v50 = vpop.f32.mrf.mxu0 }
 0x2a5   : > { %23632 = vst [vmem:[#allocation127_spill] sm:$0xff] %v19412_v50  ;;  %v19431_v50 = vpop.f32.mrf.mxu1 }
 0x2a6   : > { %v19414_v37 = vpop.f32.mrf.mxu0 }
 0x2a7   : > { %23633 = vst [vmem:[#allocation128_spill] sm:$0xff] %v19414_v37 }
 0x2a8   : > { %v19418_v10 = vpop.f32.mrf.mxu0 }
 0x2a9   : > { %23635 = vst [vmem:[#allocation130_spill] sm:$0xff] %v19418_v10  ;;  %v3528_v10 = vadd.f32 %v18951_v11, %v3109_v48  ;;  %v3917_v48 = vadd.f32 %v19141_v62, %v3530_v47  ;;  %v4756_v62 = vadd.f32 %v19279_v16, %v4337_v2  ;;  %v19484_v16 = vld [vmem:[%s23056_s6] ss:$0 sm:$0xff] }
 0x2aa   : > { %v19420_v15 = vpop.f32.mrf.mxu0 }
 0x2ab   : > { %23636 = vst [vmem:[#allocation131_spill] sm:$0xff] %v19420_v15  ;;  %v19438_v15 = vpop.f32.mrf.mxu1 }
 0x2ac   : > { %v19424_v6 = vpop.f32.mrf.mxu0 }
 0x2ad   : > { %23638 = vst [vmem:[#allocation133_spill] sm:$0xff] %v19424_v6  ;;  %v3915_v6 = vadd.f32 %v19132_v60, %v3528_v10  ;;  %v19449_v3 = vpop.f32.mrf.mxu1  ;;  %v3532_v10 = vadd.f32 %v18978_v44, %v18974_v36  ;;  %v3534_v36 = vadd.f32 %v18990_v21, %v18986_v23  ;;  %v5143_v21 = vadd.f32 %v19361_v41, %v4756_v62 }
 0x2ae   : > { %v19428_v20 = vpop.f32.mrf.mxu0 }
 0x2af   : > { %v4334_v11 = vadd.f32 %v19134_v42, %v3915_v6  ;;  %v19463_v56 = vpop.f32.mrf.mxu1  ;;  %v4336_v42 = vadd.f32 %v19143_v43, %v3917_v48  ;;  %v3919_v6 = vadd.f32 %v19150_v27, %v3532_v10  ;;  %v3923_v10 = vadd.f32 %v19168_v28, %v3536_v26 }
 0x2b0   : > { %v19433_v37 = vpop.f32.mrf.mxu0  ;;  %v4343_v28 = vadd.f32 %v19166_v22, %v19164_v61  ;;  %v3540_v61 = vadd.f32 %v19026_v33, %v19022_v8  ;;  %v23644_v22 = vld [vmem:[#allocation117_spill] sm:$0xff]  ;;  %v23651_v33 = vld [vmem:[#allocation75_spill] sm:$0xff] }
 0x2b1   : > { %v4753_v4 = vadd.f32 %v19275_v19, %v4334_v11  ;;  %v4755_v32 = vadd.f32 %v19363_v53, %v4336_v42  ;;  %v19477_v19 = vpop.f32.mrf.mxu1  ;;  %v4338_v27 = vadd.f32 %v19152_v9, %v3919_v6  ;;  %v4342_v6 = vadd.f32 %v19170_v38, %v3923_v10  ;;  %v23658_v10 = vld [vmem:[#allocation123_spill] sm:$0xff] }
 0x2b2   : > { %v19435_v54 = vpop.f32.mrf.mxu0 }
 0x2b3   : > { %23639 = vst [vmem:[#allocation134_spill] sm:$0xff] %v19435_v54  ;;  %v5140_v44 = vadd.f32 %v19277_v39, %v4753_v4  ;;  %v4758_v39 = vadd.f32 %v19366_v0, %v4339_v35  ;;  %v5142_v57 = vadd.f32 %v19368_v5, %v4755_v32  ;;  %v4757_v9 = vadd.f32 %v19370_v12, %v4338_v27  ;;  %v23648_v35 = vld [vmem:[#allocation70_spill] sm:$0xff] }
 0x2b4   : > { %v19440_v31 = vpop.f32.mrf.mxu0 }
 0x2b5   : > { %23640 = vst [vmem:[#allocation135_spill] sm:$0xff] %v19440_v31  ;;  %v4754_v31 = vadd.f32 %v19271_v40, %v4335_v55  ;;  %v19495_v55 = vpop.f32.mrf.mxu1  ;;  %v5145_v45 = vadd.f32 %v19374_v63, %v4758_v39 }
 0x2b6   : > { %v19443_v51 = vpop.f32.mrf.mxu0 }
 0x2b7   : > { %v5141_v60 = vadd.f32 %v19273_v59, %v4754_v31  ;;  %v3921_v31 = vadd.f32 %v19159_v58, %v3534_v36  ;;  %v4341_v59 = vadd.f32 %v19157_v18, %v19155_v30  ;;  %v3538_v30 = vadd.f32 %v19014_v13, %v19010_v17  ;;  %v19511_v2 = vpop.f32.mrf.mxu1 }
 0x2b8   : > { %v19451_v1 = vpop.f32.mrf.mxu0  ;;  %v5144_v18 = vadd.f32 %v19380_v46, %v4757_v9 }
 0x2b9   : > { %v4340_v0 = vadd.f32 %v19161_v52, %v3921_v31  ;;  %v4760_v12 = vadd.f32 %v19372_v34, %v4341_v59 }
 0x2ba   : > { %v19456_v54 = vpop.f32.mrf.mxu0 }
 0x2bb   : > { %v4759_v4 = vadd.f32 %v19376_v7, %v4340_v0  ;;  %v5147_v13 = vadd.f32 %v19386_v49, %v4760_v12  ;;  %v4762_v7 = vadd.f32 %v19378_v29, %v4343_v28 }
 0x2bc   : > { %v19465_v25 = vpop.f32.mrf.mxu0 }
 0x2bd   : > { %v5146_v62 = vadd.f32 %v23644_v22, %v4759_v4  ;;  %v23666_v22 = vld [vmem:[#allocation36_spill] sm:$0xff] }
 0x2be   : > { %v16355_v40 = vpop.f32.mrf.mxu0 }
 0x2bf   : > { %v5560_v43 = vadd.f32 %v16355_v40, %v5141_v60  ;;  %v3925_v60 = vadd.f32 %v19177_v14, %v3538_v30  ;;  %v23645_v40 = vld [vmem:[#allocation113_spill] sm:$0xff]  ;;  %v23646_v14 = vld [vmem:[#allocation8_spill] sm:$0xff] }
 0x2c0   : > { %v5400_v47 = vpop.f32.mrf.mxu0  ;;  %v4761_v36 = vadd.f32 %v23645_v40, %v4342_v6  ;;  %v23660_v30 = vld [vmem:[#allocation73_spill] sm:$0xff]  ;;  %v23663_v6 = vld [vmem:[#allocation12_spill] sm:$0xff]  ;;  %v23667_v40 = vld [vmem:[#allocation126_spill] sm:$0xff] }
 0x2c1   : > { %v5559_v23 = vadd.f32 %v5400_v47, %v5140_v44  ;;  %v5599_v11 = vadd.f32 %v19484_v16, %v5560_v43  ;;  %v23647_v44 = vld [vmem:[#allocation9_spill] sm:$0xff]  ;;  %v23649_v43 = vld [vmem:[#allocation71_spill] sm:$0xff]  ;;  %v19529_v47 = vpop.f32.mrf.mxu1 }
 0x2c2   : > { %v16358_v53 = vpop.f32.mrf.mxu0  ;;  %v2580_v32 = vadd.f32 %v23647_v44, %v23646_v14  ;;  %v4345_v49 = vadd.f32 %v23649_v43, %v23648_v35  ;;  %v23671_v43 = vld [vmem:[#allocation129_spill] sm:$0xff] }
 0x2c3   : > { %v5598_v58 = vadd.f32 %v19484_v16, %v5559_v23  ;;  %v5562_v41 = vadd.f32 %v16358_v53, %v5143_v21  ;;  %v23650_v23 = vld [vmem:[#allocation72_spill] sm:$0xff]  ;;  %v3927_v21 = vadd.f32 %v23651_v33, %v3540_v61  ;;  %v23652_v53 = vld [vmem:[#allocation35_spill] sm:$0xff] }
 0x2c4   : > { %v5410_v48 = vpop.f32.mrf.mxu0  ;;  %v4344_v8 = vadd.f32 %v23650_v23, %v3925_v60  ;;  %v3125_v26 = vadd.f32 %v23652_v53, %v2580_v32  ;;  %v23670_v32 = vld [vmem:[#allocation38_spill] sm:$0xff] }
 0x2c5   : > { %v5561_v24 = vadd.f32 %v5410_v48, %v5142_v57  ;;  %16403 = vmatprep.mubr.msk.f32.mxu1 %vm23641_vm12, %v5598_v58  ;;  %v5601_v63 = vadd.f32 %v19484_v16, %v5562_v41  ;;  %vm23643_vm12 = vmmov %vm23642_vm0  ;;  %v23653_v57 = vld [vmem:[#allocation120_spill] sm:$0xff]  ;;  %v23654_v58 = vld [vmem:[#allocation114_spill] sm:$0xff] }
 0x2c6   : > { %v16361_v5 = vpop.f32.mrf.mxu0  ;;  %16404 = vmatmul.mubr.msk.f32.vlgmr.msra.gmra.mxu1 %vm23642_vm0, %v5599_v11  ;;  %v5149_v9 = vadd.f32 %v23653_v57, %v4762_v7  ;;  %v4764_v59 = vadd.f32 %v23654_v58, %v4345_v49  ;;  %v23656_v41 = vld [vmem:[#allocation32_spill] sm:$0xff]  ;;  %v23657_v48 = vld [vmem:[#allocation33_spill] sm:$0xff]  ;;  %v23665_v7 = vld [vmem:[#allocation79_spill] sm:$0xff] }
 0x2c7   : > { %v5600_v52 = vadd.f32 %v19484_v16, %v5561_v24  ;;  %v5564_v34 = vadd.f32 %v16361_v5, %v5145_v45  ;;  %v3542_v0 = vadd.f32 %v23657_v48, %v23656_v41  ;;  %v5148_v24 = vadd.f32 %v23658_v10, %v4761_v36  ;;  %v23659_v45 = vld [vmem:[#allocation115_spill] sm:$0xff]  ;;  %v23673_v23 = vld [vmem:[#allocation14_spill] sm:$0xff]  ;;  %v23679_v10 = vld [vmem:[#allocation41_spill] sm:$0xff] }
 0x2c8   : > { %v5420_v42 = vpop.f32.mrf.mxu0  ;;  %v4763_v12 = vadd.f32 %v23659_v45, %v4344_v8  ;;  %v5151_v36 = vadd.f32 %v23667_v40, %v4764_v59  ;;  %v23674_v8 = vld [vmem:[#allocation15_spill] sm:$0xff]  ;;  %v23677_v59 = vld [vmem:[#allocation80_spill] sm:$0xff]  ;;  %v23688_v40 = vld [vmem:[#allocation18_spill] sm:$0xff] }
 0x2c9   : > { %v5563_v17 = vadd.f32 %v5420_v42, %v5144_v18  ;;  %16406 = vmatprep.mubr.msk.f32.mxu1 %vm23642_vm0, %v5600_v52  ;;  %v5603_v29 = vadd.f32 %v19484_v16, %v5564_v34  ;;  %v23661_v18 = vld [vmem:[#allocation74_spill] sm:$0xff]  ;;  %v19546_v52 = vpop.f32.mrf.mxu1  ;;  %v23662_v42 = vld [vmem:[#allocation11_spill] sm:$0xff]  ;;  %v2600_v33 = vadd.f32 %v23674_v8, %v23673_v23  ;;  %v23680_v45 = vld [vmem:[#allocation132_spill] sm:$0xff] }
 0x2ca   : > { %v16364_v46 = vpop.f32.mrf.mxu0  ;;  %16407 = vmatmul.mubr.msk.f32.gmra.mxu1 %vm23643_vm12, %v5601_v63  ;;  %vm23655_vm12 = vmmov %vm23642_vm0  ;;  %v4347_v4 = vadd.f32 %v23661_v18, %v23660_v30  ;;  %v2590_v60 = vadd.f32 %v23663_v6, %v23662_v42  ;;  %v5150_v49 = vadd.f32 %v23671_v43, %v4763_v12  ;;  %v23678_v41 = vld [vmem:[#allocation83_spill] sm:$0xff]  ;;  %v23694_v23 = vld [vmem:[#allocation44_spill] sm:$0xff] }
 0x2cb   : > { %v5602_v38 = vadd.f32 %v19484_v16, %v5563_v17  ;;  %v5566_v27 = vadd.f32 %v16364_v46, %v5147_v13  ;;  %v23664_v17 = vld [vmem:[#allocation76_spill] sm:$0xff]  ;;  %v3929_v46 = vadd.f32 %v23665_v7, %v3542_v0 }
 0x2cc   : > { %v5430_v31 = vpop.f32.mrf.mxu0  ;;  %v4346_v13 = vadd.f32 %v23664_v17, %v3927_v21  ;;  %v3127_v35 = vadd.f32 %v23670_v32, %v2590_v60  ;;  %v23675_v21 = vld [vmem:[#allocation77_spill] sm:$0xff]  ;;  %v23686_v17 = vld [vmem:[#allocation82_spill] sm:$0xff] }
 0x2cd   : > { %v5565_v39 = vadd.f32 %v5430_v31, %v5146_v62  ;;  %16409 = vmatprep.mubr.msk.f32.mxu1 %vm23642_vm0, %v5602_v38  ;;  %v5605_v28 = vadd.f32 %v19484_v16, %v5566_v27  ;;  %v3544_v62 = vadd.f32 %v23666_v22, %v3125_v26  ;;  %v23668_v38 = vld [vmem:[#allocation116_spill] sm:$0xff]  ;;  %v19566_v26 = vpop.f32.mrf.mxu1  ;;  %v23685_v60 = vld [vmem:[#allocation81_spill] sm:$0xff] }
 0x2ce   : > { %v16367_v11 = vpop.f32.mrf.mxu0  ;;  %16410 = vmatmul.mubr.msk.f32.gmra.mxu1 %vm23655_vm12, %v5603_v29  ;;  %v4766_v14 = vadd.f32 %v23668_v38, %v4347_v4  ;;  %vm23669_vm12 = vmmov %vm23642_vm0  ;;  %v23672_v29 = vld [vmem:[#allocation118_spill] sm:$0xff]  ;;  %v23683_v4 = vld [vmem:[#allocation39_spill] sm:$0xff] }
 0x2cf   : > { %v5604_v5 = vadd.f32 %v19484_v16, %v5565_v39  ;;  %v5568_v63 = vadd.f32 %v16367_v11, %v5149_v9  ;;  %v4765_v27 = vadd.f32 %v23672_v29, %v4346_v13  ;;  %v23676_v39 = vld [vmem:[#allocation78_spill] sm:$0xff]  ;;  %v4348_v11 = vadd.f32 %v23677_v59, %v3929_v46  ;;  %v19582_v7 = vpop.f32.mrf.mxu1  ;;  %v23689_v38 = vld [vmem:[#allocation84_spill] sm:$0xff]  ;;  %v23698_v59 = vld [vmem:[#allocation85_spill] sm:$0xff] }
 0x2d0   : > { %v5440_v34 = vpop.f32.mrf.mxu0  ;;  %v4349_v53 = vadd.f32 %v23676_v39, %v23675_v21  ;;  %v3931_v48 = vadd.f32 %v23678_v41, %v3544_v62  ;;  %v5153_v12 = vadd.f32 %v23680_v45, %v4766_v14  ;;  %v4351_v13 = vadd.f32 %v23686_v17, %v23685_v60  ;;  %v23687_v62 = vld [vmem:[#allocation17_spill] sm:$0xff]  ;;  %v23692_v29 = vld [vmem:[#allocation122_spill] sm:$0xff]  ;;  %v23695_v21 = vld [vmem:[#allocation124_spill] sm:$0xff] }
 0x2d1   : > { %v5567_v61 = vadd.f32 %v5440_v34, %v5148_v24  ;;  %16412 = vmatprep.mubr.msk.f32.mxu1 %vm23642_vm0, %v5604_v5  ;;  %v5607_v57 = vadd.f32 %v19484_v16, %v5568_v63  ;;  %v3129_v24 = vadd.f32 %v23679_v10, %v2600_v33  ;;  %v23681_v5 = vld [vmem:[#allocation119_spill] sm:$0xff]  ;;  %v5152_v63 = vadd.f32 %v19431_v50, %v4765_v27  ;;  %v23684_v34 = vld [vmem:[#allocation121_spill] sm:$0xff] }
 0x2d2   : > { %v16370_v44 = vpop.f32.mrf.mxu0  ;;  %16413 = vmatmul.mubr.msk.f32.gmra.mxu1 %vm23669_vm12, %v5605_v28  ;;  %v4768_v30 = vadd.f32 %v23681_v5, %v4349_v53  ;;  %vm23682_vm12 = vmmov %vm23642_vm0  ;;  %v3546_v28 = vadd.f32 %v23683_v4, %v3127_v35  ;;  %v4767_v42 = vadd.f32 %v23684_v34, %v4348_v11  ;;  %v4350_v14 = vadd.f32 %v23689_v38, %v3931_v48  ;;  %v23691_v35 = vld [vmem:[#allocation42_spill] sm:$0xff]  ;;  %v23706_v17 = vld [vmem:[#allocation127_spill] sm:$0xff] }
 0x2d3   : > { %v5606_v31 = vadd.f32 %v19484_v16, %v5567_v61  ;;  %v5570_v9 = vadd.f32 %v16370_v44, %v5151_v36  ;;  %v2610_v36 = vadd.f32 %v23688_v40, %v23687_v62  ;;  %v23690_v44 = vld [vmem:[#allocation87_spill] sm:$0xff]  ;;  %v3548_v43 = vadd.f32 %v23691_v35, %v3129_v24  ;;  %v23699_v11 = vld [vmem:[#allocation86_spill] sm:$0xff]  ;;  %v23700_v24 = vld [vmem:[#allocation88_spill] sm:$0xff] }
 0x2d4   : > { %v5450_v58 = vpop.f32.mrf.mxu0  ;;  %v3933_v50 = vadd.f32 %v23690_v44, %v3546_v28  ;;  %v4770_v27 = vadd.f32 %v23692_v29, %v4351_v13  ;;  %v5154_v33 = vadd.f32 %v19449_v3, %v4767_v42  ;;  %v4769_v39 = vadd.f32 %v23695_v21, %v4350_v14  ;;  %v23703_v28 = vld [vmem:[#allocation125_spill] sm:$0xff]  ;;  %v23709_v14 = vld [vmem:[#allocation23_spill] sm:$0xff]  ;;  %v23710_v44 = vld [vmem:[#allocation24_spill] sm:$0xff] }
 0x2d5   : > { %v5569_v0 = vadd.f32 %v5450_v58, %v5150_v49  ;;  %16415 = vmatprep.mubr.msk.f32.mxu1 %vm23642_vm0, %v5606_v31  ;;  %v5609_v46 = vadd.f32 %v19484_v16, %v5570_v9  ;;  %v5155_v49 = vadd.f32 %v19438_v15, %v4768_v30  ;;  %v3131_v8 = vadd.f32 %v23694_v23, %v2610_v36  ;;  %v23697_v9 = vld [vmem:[#allocation21_spill] sm:$0xff]  ;;  %v19602_v15 = vpop.f32.mrf.mxu1  ;;  %v23702_v30 = vld [vmem:[#allocation48_spill] sm:$0xff]  ;;  %v23713_v29 = vld [vmem:[#allocation63_spill] sm:$0xff] }
 0x2d6   : > { %v16373_v18 = vpop.f32.mrf.mxu0  ;;  %16416 = vmatmul.mubr.msk.f32.gmra.mxu1 %vm23682_vm12, %v5607_v57  ;;  %vm23693_vm12 = vmmov %vm23642_vm0  ;;  %v23696_v57 = vld [vmem:[#allocation20_spill] sm:$0xff]  ;;  %v4353_v41 = vadd.f32 %v23699_v11, %v23698_v59  ;;  %v4352_v45 = vadd.f32 %v23700_v24, %v3933_v50  ;;  %v5157_v4 = vadd.f32 %v19463_v56, %v4770_v27  ;;  %v23705_v42 = vld [vmem:[#allocation45_spill] sm:$0xff]  ;;  %v5156_v60 = vadd.f32 %v19477_v19, %v4769_v39 }
 0x2d7   : > { %v5608_v6 = vadd.f32 %v19484_v16, %v5569_v0  ;;  %v5572_v61 = vadd.f32 %v16373_v18, %v5153_v12  ;;  %v2620_v58 = vadd.f32 %v23697_v9, %v23696_v57  ;;  %v23701_v12 = vld [vmem:[#allocation91_spill] sm:$0xff]  ;;  %v19618_v40 = vpop.f32.mrf.mxu1  ;;  %v2630_v50 = vadd.f32 %v23710_v44, %v23709_v14  ;;  %v23714_v23 = vld [vmem:[#allocation128_spill] sm:$0xff]  ;;  %v23717_v57 = vld [vmem:[#allocation130_spill] sm:$0xff] }
 0x2d8   : > { %v5460_v22 = vpop.f32.mrf.mxu0  ;;  %v3935_v3 = vadd.f32 %v23701_v12, %v3548_v43  ;;  %v4771_v13 = vadd.f32 %v23706_v17, %v4352_v45  ;;  %v23712_v43 = vld [vmem:[#allocation95_spill] sm:$0xff]  ;;  %v23716_v21 = vld [vmem:[#allocation64_spill] sm:$0xff]  ;;  %v23718_v59 = vld [vmem:[#allocation26_spill] sm:$0xff] }
 0x2d9   : > { %v5571_v32 = vadd.f32 %v5460_v22, %v5152_v63  ;;  %16418 = vmatprep.mubr.msk.f32.mxu1 %vm23642_vm0, %v5608_v6  ;;  %v5611_v48 = vadd.f32 %v19484_v16, %v5572_v61  ;;  %v3133_v18 = vadd.f32 %v23702_v30, %v2620_v58  ;;  %v4772_v63 = vadd.f32 %v23703_v28, %v4353_v41  ;;  %v23707_v61 = vld [vmem:[#allocation89_spill] sm:$0xff]  ;;  %v23708_v22 = vld [vmem:[#allocation90_spill] sm:$0xff]  ;;  %v23719_v11 = vld [vmem:[#allocation27_spill] sm:$0xff] }
 0x2da   : > { %v16376_v31 = vpop.f32.mrf.mxu0  ;;  %16419 = vmatmul.mubr.msk.f32.gmra.mxu1 %vm23693_vm12, %v5609_v46  ;;  %vm23704_vm12 = vmmov %vm23642_vm0  ;;  %v3550_v6 = vadd.f32 %v23705_v42, %v3131_v8  ;;  %v4355_v62 = vadd.f32 %v23708_v22, %v23707_v61  ;;  %v3135_v39 = vadd.f32 %v23716_v21, %v2630_v50  ;;  %v2640_v41 = vadd.f32 %v23719_v11, %v23718_v59  ;;  %v23723_v30 = vld [vmem:[#allocation99_spill] sm:$0xff]  ;;  %v23731_v50 = vld [vmem:[#allocation29_spill] sm:$0xff] }
 0x2db   : > { %v5610_v53 = vadd.f32 %v19484_v16, %v5571_v32  ;;  %v5574_v0 = vadd.f32 %v16376_v31, %v5155_v49  ;;  %v23711_v32 = vld [vmem:[#allocation92_spill] sm:$0xff]  ;;  %v3552_v27 = vadd.f32 %v23713_v29, %v3133_v18  ;;  %v5159_v31 = vadd.f32 %v19495_v55, %v4772_v63  ;;  %v16344_v55 = vpop.f32.mrf.mxu1  ;;  %v23739_v59 = vld [vmem:[#allocation102_spill] sm:$0xff] }
 0x2dc   : > { %v5470_v10 = vpop.f32.mrf.mxu0  ;;  %v4354_v35 = vadd.f32 %v23711_v32, %v3935_v3  ;;  %v3937_v19 = vadd.f32 %v23712_v43, %v3550_v6  ;;  %v4774_v8 = vadd.f32 %v23714_v23, %v4355_v62  ;;  %v23722_v3 = vld [vmem:[#allocation96_spill] sm:$0xff]  ;;  %v23729_v62 = vld [vmem:[#allocation97_spill] sm:$0xff]  ;;  %v23732_v32 = vld [vmem:[#allocation30_spill] sm:$0xff] }
 0x2dd   : > { %v5573_v5 = vadd.f32 %v5470_v10, %v5154_v33  ;;  %16421 = vmatprep.mubr.msk.f32.mxu1 %vm23642_vm0, %v5610_v53  ;;  %v5613_v56 = vadd.f32 %v19484_v16, %v5574_v0  ;;  %v5158_v53 = vadd.f32 %v19511_v2, %v4771_v13  ;;  %v23721_v0 = vld [vmem:[#allocation94_spill] sm:$0xff]  ;;  %v3939_v18 = vadd.f32 %v23723_v30, %v3552_v27  ;;  %v23733_v43 = vld [vmem:[#allocation100_spill] sm:$0xff]  ;;  %v23735_v27 = vld [vmem:[#allocation67_spill] sm:$0xff] }
 0x2de   : > { %v16379_v34 = vpop.f32.mrf.mxu0  ;;  %16422 = vmatmul.mubr.msk.f32.gmra.mxu1 %vm23704_vm12, %v5611_v48  ;;  %vm23715_vm12 = vmmov %vm23642_vm0  ;;  %v4773_v9 = vadd.f32 %v23717_v57, %v4354_v35  ;;  %v23720_v48 = vld [vmem:[#allocation93_spill] sm:$0xff]  ;;  %v5161_v63 = vadd.f32 %v19529_v47, %v4774_v8  ;;  %v2650_v35 = vadd.f32 %v23732_v32, %v23731_v50  ;;  %v23737_v21 = vld [vmem:[#allocation68_spill] sm:$0xff] }
 0x2df   : > { %v5612_v46 = vadd.f32 %v19484_v16, %v5573_v5  ;;  %v5576_v36 = vadd.f32 %v16379_v34, %v5157_v4  ;;  %v4357_v10 = vadd.f32 %v23721_v0, %v23720_v48  ;;  %v4356_v5 = vadd.f32 %v23722_v3, %v3937_v19  ;;  %v23724_v4 = vld [vmem:[#allocation66_spill] sm:$0xff]  ;;  %v23725_v34 = vld [vmem:[#allocation131_spill] sm:$0xff]  ;;  %v23744_v30 = vld [vmem:[#allocation69_spill] sm:$0xff] }
 0x2e0   : > { %v5480_v38 = vpop.f32.mrf.mxu0  ;;  %v3137_v28 = vadd.f32 %v23724_v4, %v2640_v41  ;;  %v5160_v13 = vadd.f32 %v19546_v52, %v4773_v9  ;;  %v4358_v19 = vadd.f32 %v23733_v43, %v3939_v18  ;;  %v23745_v4 = vld [vmem:[#allocation135_spill] sm:$0xff]  ;;  %v23751_v32 = vld [vmem:[#allocation109_spill] sm:$0xff] }
 0x2e1   : > { %v5575_v49 = vadd.f32 %v5480_v38, %v5156_v60  ;;  %16424 = vmatprep.mubr.msk.f32.mxu1 %vm23642_vm0, %v5612_v46  ;;  %v5615_v24 = vadd.f32 %v19484_v16, %v5576_v36  ;;  %v4776_v42 = vadd.f32 %v23725_v34, %v4357_v10  ;;  %v23727_v60 = vld [vmem:[#allocation65_spill] sm:$0xff]  ;;  %v5111_v38 = vpop.f32.mrf.mxu1 }
 0x2e2   : > { %v16382_v33 = vpop.f32.mrf.mxu0  ;;  %16425 = vmatmul.mubr.msk.f32.gmra.mxu1 %vm23715_vm12, %v5613_v56  ;;  %vm23726_vm12 = vmmov %vm23642_vm0  ;;  %v3554_v17 = vadd.f32 %v23727_v60, %v3135_v39  ;;  %v23728_v46 = vld [vmem:[#allocation133_spill] sm:$0xff]  ;;  %v23730_v56 = vld [vmem:[#allocation98_spill] sm:$0xff]  ;;  %v3139_v39 = vadd.f32 %v23737_v21, %v2650_v35  ;;  %v4777_v57 = vadd.f32 %v19433_v37, %v4358_v19 }
 0x2e3   : > { %v5614_v58 = vadd.f32 %v19484_v16, %v5575_v49  ;;  %v5578_v45 = vadd.f32 %v16382_v33, %v5159_v31  ;;  %v4775_v61 = vadd.f32 %v23728_v46, %v4356_v5  ;;  %v4359_v36 = vadd.f32 %v23730_v56, %v23729_v62  ;;  %v23734_v49 = vld [vmem:[#allocation103_spill] sm:$0xff]  ;;  %v16347_v41 = vpop.f32.mrf.mxu1  ;;  %v23742_v37 = vld [vmem:[#allocation134_spill] sm:$0xff]  ;;  %v23746_v34 = vld [vmem:[#allocation105_spill] sm:$0xff] }
 0x2e4   : > { %v5490_v12 = vpop.f32.mrf.mxu0  ;;  %v3941_v29 = vadd.f32 %v23734_v49, %v3554_v17  ;;  %v3556_v31 = vadd.f32 %v23735_v27, %v3137_v28  ;;  %v5163_v23 = vadd.f32 %v19566_v26, %v4776_v42  ;;  %v3558_v18 = vadd.f32 %v23744_v30, %v3139_v39  ;;  %v23747_v42 = vld [vmem:[#allocation106_spill] sm:$0xff]  ;;  %v23748_v46 = vld [vmem:[#allocation108_spill] sm:$0xff]  ;;  %v19732_v30 = vld [vmem:[%s23059_s9 + $0x8] sm:$0x3] }
 0x2e5   : > { %v5577_v2 = vadd.f32 %v5490_v12, %v5158_v53  ;;  %16427 = vmatprep.mubr.msk.f32.mxu1 %vm23642_vm0, %v5614_v58  ;;  %v5617_v14 = vadd.f32 %v19484_v16, %v5578_v45  ;;  %v4778_v8 = vadd.f32 %v19428_v20, %v4359_v36  ;;  %v5162_v53 = vadd.f32 %v19582_v7, %v4775_v61  ;;  %v23738_v58 = vld [vmem:[#allocation101_spill] sm:$0xff]  ;;  %v23740_v20 = vld [vmem:[#allocation104_spill] sm:$0xff]  ;;  %v5121_v60 = vpop.f32.mrf.mxu1  ;;  %v23752_v35 = vld [vmem:[#allocation110_spill] sm:$0xff] }
 0x2e6   : > { %v16385_v6 = vpop.f32.mrf.mxu0  ;;  %16428 = vmatmul.mubr.msk.f32.gmra.mxu1 %vm23726_vm12, %v5615_v24  ;;  %vm23736_vm12 = vmmov %vm23642_vm0  ;;  %v4361_v11 = vadd.f32 %v23739_v59, %v23738_v58  ;;  %v4360_v10 = vadd.f32 %v23740_v20, %v3941_v29  ;;  %v23741_v24 = vld [vmem:[#allocation107_spill] sm:$0xff]  ;;  %v4365_v43 = vadd.f32 %v23752_v35, %v23751_v32  ;;  %v23753_v27 = vld [vmem:[#allocation112_spill] sm:$0xff] }
 0x2e7   : > { %v5616_v22 = vadd.f32 %v19484_v16, %v5577_v2  ;;  %v5580_v47 = vadd.f32 %v16385_v6, %v5161_v63  ;;  %v3943_v45 = vadd.f32 %v23741_v24, %v3556_v31  ;;  %v5165_v7 = vadd.f32 %v19602_v15, %v4778_v8  ;;  %v16350_v19 = vpop.f32.mrf.mxu1  ;;  %v6056_v24 = vld [vmem:[#allocation3 + $0x8] sm:$0xff] }
 0x2e8   : > { %v5500_v44 = vpop.f32.mrf.mxu0  ;;  %v4780_v3 = vadd.f32 %v23742_v37, %v4361_v11  ;;  %v5164_v2 = vadd.f32 %v19618_v40, %v4777_v57  ;;  %v4779_v28 = vadd.f32 %v23745_v4, %v4360_v10  ;;  %v4363_v6 = vadd.f32 %v23747_v42, %v23746_v34  ;;  %v6055_v10 = vld [vmem:[%s23059_s9] sm:$0x3]  ;;  %16453 = vmatprep.mubr.msk.f32.mxu0 %vm23761_vm6, %v6056_v24 }
 0x2e9   : > { %v5579_v52 = vadd.f32 %v5500_v44, %v5160_v13  ;;  %16430 = vmatprep.mubr.msk.f32.mxu1 %vm23642_vm0, %v5616_v22  ;;  %v5619_v48 = vadd.f32 %v19484_v16, %v5580_v47  ;;  %v4362_v61 = vadd.f32 %v23748_v46, %v3943_v45  ;;  %v23749_v22 = vld [vmem:[#allocation111_spill] sm:$0xff]  ;;  %v5131_v21 = vpop.f32.mrf.mxu1 }
 0x2ea   : > { %v16388_v33 = vpop.f32.mrf.mxu0  ;;  %16431 = vmatmul.mubr.msk.f32.gmra.mxu1 %vm23736_vm12, %v5617_v14  ;;  %vm23743_vm12 = vmmov %vm23642_vm0  ;;  %v3945_v62 = vadd.f32 %v23749_v22, %v3558_v18  ;;  %v5167_v40 = vadd.f32 %v16344_v55, %v4780_v3  ;;  %v4782_v36 = vadd.f32 %v19443_v51, %v4363_v6  ;;  %v5166_v47 = vadd.f32 %v5111_v38, %v4779_v28  ;;  %v5991_v45 = vld [vmem:[#allocation3 + $0x7] sm:$0xff]  ;;  %v5992_v37 = vld [vmem:[#allocation3 + $0xf] sm:$0xff] }
 0x2eb   : > { %v5618_v9 = vadd.f32 %v19484_v16, %v5579_v52  ;;  %v5582_v26 = vadd.f32 %v16388_v33, %v5163_v23  ;;  %v4781_v44 = vadd.f32 %v19451_v1, %v4362_v61  ;;  %v4784_v38 = vadd.f32 %v19456_v54, %v4365_v43  ;;  %v14253_v3 = vld [vmem:[%s23059_s9 + $0x4] sm:$0x3]  ;;  %v19740_v18 = vld [vmem:[%s23058_s8] ss:$0 sm:$0xff] }
 0x2ec   : > { %v5510_v0 = vpop.f32.mrf.mxu0  ;;  %v4364_v55 = vadd.f32 %v23753_v27, %v3945_v62  ;;  %v5169_v51 = vadd.f32 %v16347_v41, %v4782_v36 }
 0x2ed   : > { %v5581_v12 = vadd.f32 %v5510_v0, %v5162_v53  ;;  %16433 = vmatprep.mubr.msk.f32.mxu1 %vm23642_vm0, %v5618_v9  ;;  %v5621_v17 = vadd.f32 %v19484_v16, %v5582_v26  ;;  %v5168_v1 = vadd.f32 %v5121_v60, %v4781_v44  ;;  %v5171_v58 = vadd.f32 %v16350_v19, %v4784_v38 }
 0x2ee   : > { %v16391_v5 = vpop.f32.mrf.mxu0  ;;  %16434 = vmatmul.mubr.msk.f32.gmra.mxu1 %vm23743_vm12, %v5619_v48  ;;  %vm23750_vm12 = vmmov %vm23642_vm0  ;;  %v4783_v8 = vadd.f32 %v19465_v25, %v4364_v55 }
 0x2ef   : > { %v5620_v63 = vadd.f32 %v19484_v16, %v5581_v12  ;;  %v5584_v15 = vadd.f32 %v16391_v5, %v5165_v7  ;;  %v6023_v7 = vsel %vm23510_vm10, %v5991_v45, 0.0  ;;  %v14287_v5 = vld [vmem:[%s23059_s9 + $0x6] sm:$0x3] }
 0x2f0   : > { %v5520_v13 = vpop.f32.mrf.mxu0  ;;  %v5170_v54 = vadd.f32 %v5131_v21, %v4783_v8  ;;  %v23792_v21 = vld [vmem:[#allocation7_spill] sm:$0xff] }
 0x2f1   : > { %v5583_v56 = vadd.f32 %v5520_v13, %v5164_v2  ;;  %16436 = vmatprep.mubr.msk.f32.mxu1 %vm23642_vm0, %v5620_v63  ;;  %v5623_v49 = vadd.f32 %v19484_v16, %v5584_v15  ;;  %v19752_v15 = vld [vmem:[%s23059_s9 + $0xa] sm:$0x3] }
 0x2f2   : > { %v16394_v14 = vpop.f32.mrf.mxu0  ;;  %16437 = vmatmul.mubr.msk.f32.gmra.mxu1 %vm23750_vm12, %v5621_v17  ;;  %vm23754_vm12 = vmmov %vm23642_vm0 }
 0x2f3   : > { %v5622_v50 = vadd.f32 %v19484_v16, %v5583_v56  ;;  %v5586_v29 = vadd.f32 %v16394_v14, %v5167_v40  ;;  %v23777_v14 = vld [vmem:[#allocation5_spill] sm:$0xff] }
 0x2f4   : > { %v5530_v52 = vpop.f32.mrf.mxu0 }
 0x2f5   : > { %v5585_v31 = vadd.f32 %v5530_v52, %v5166_v47  ;;  %16439 = vmatprep.mubr.msk.f32.mxu1 %vm23642_vm0, %v5622_v50  ;;  %v5625_v39 = vadd.f32 %v19484_v16, %v5586_v29  ;;  %v23784_v52 = vld [vmem:[#allocation6_spill] sm:$0xff] }
 0x2f6   : > { %v16397_v23 = vpop.f32.mrf.mxu0  ;;  %16440 = vmatmul.mubr.msk.f32.gmra.mxu1 %vm23754_vm12, %v5623_v49  ;;  %vm23756_vm12 = vmmov %vm23642_vm0 }
 0x2f7   : > { %v5624_v33 = vadd.f32 %v19484_v16, %v5585_v31  ;;  %v5588_v53 = vadd.f32 %v16397_v23, %v5169_v51 }
 0x2f8   : > { %v5540_v57 = vpop.f32.mrf.mxu0 }
 0x2f9   : > { %v5587_v9 = vadd.f32 %v5540_v57, %v5168_v1  ;;  %16442 = vmatprep.mubr.msk.f32.mxu1 %vm23755_vm8, %v5624_v33  ;;  %v5627_v41 = vadd.f32 %v19484_v16, %v5588_v53  ;;  %vm23758_vm8 = vmmov %vm23642_vm0 }
 0x2fa   : > { %v16400_v59 = vpop.f32.mrf.mxu0  ;;  %16443 = vmatmul.mubr.msk.f32.gmra.mxu1 %vm23642_vm0, %v5625_v39  ;;  %vm23760_vm0 = vcmask 1041408  }
 0x2fb   : > { %v5626_v11 = vadd.f32 %v19484_v16, %v5587_v9  ;;  %v5590_v25 = vadd.f32 %v16400_v59, %v5171_v58  ;;  %16501 = vmatprep.subr.msk.mxu1 %vm23760_vm0, %v6055_v10  ;;  %16551 = vmatprep.subr.msk.mxu0 %vm23760_vm0, %v14253_v3 }
 0x2fc   : > { %v5550_v48 = vpop.f32.mrf.mxu0 }
 0x2fd   : > { %v5589_v26 = vadd.f32 %v5550_v48, %v5170_v54  ;;  %16445 = vmatprep.mubr.msk.f32.mxu1 %vm23756_vm12, %v5626_v11  ;;  %v5629_v20 = vadd.f32 %v19484_v16, %v5590_v25  ;;  %vm23764_vm12 = vmmov %vm23761_vm6  ;;  %v23799_v25 = vld [vmem:[#allocation10_spill] sm:$0xff] }
 0x2fe   : > { %16446 = vmatmul.mubr.msk.f32.gmra.mxu1 %vm23757_vm9, %v5627_v41  ;;  %vm23763_vm9 = vmmov %vm23760_vm0 }
 0x2ff   : > { %v5628_v0 = vadd.f32 %v19484_v16, %v5589_v26  ;;  %16502 = vmatpush3.msk.msra.mxu1 %vm23763_vm9, %v6055_v10  ;;  %v6057_v16 = vld [vmem:[#allocation3 + $0x10] sm:$0xff]  ;;  %vm23768_vm9 = vmmov %vm23760_vm0 }
 0x300   : > { %16601 = vmatprep.subr.msk.mxu1 %vm23768_vm9, %v14287_v5 }
 0x301   : > { %16448 = vmatprep.mubr.msk.f32.mxu1 %vm23758_vm8, %v5628_v0  ;;  %vm23766_vm8 = vmmov %vm23761_vm6 }
 0x302   : > { %16449 = vmatmul.mubr.msk.f32.gmra.mxu1 %vm23759_vm7, %v5629_v20  ;;  %vm23765_vm7 = vmmov %vm23761_vm6 }
 0x303   : > { %16503 = vmatprep.mubr.msk.f32.mxu1 %vm23764_vm12, %v6023_v7  ;;  %16454 = vmatmul.mubr.msk.f32.vlgmr.msra.gmra.mxu0 %vm23765_vm7, %v6057_v16  ;;  %vm23767_vm6 = vmmov %vm23760_vm0 }
 0x304   : > { %16552 = vmatpush3.msk.msra.mxu0 %vm23767_vm6, %v14253_v3  ;;  %vm23769_vm12 = vmmov %vm23760_vm0 }
 0x305   : > { %vm23770_vm7 = vmmov %vm23760_vm0 }
 0x306   : > { %16504 = vmatmul.mubr.msk.f32.vlgmr.msra.gmra.mxu1 %vm23766_vm8, %v5992_v37  ;;  %16651 = vmatprep.subr.msk.mxu0 %vm23770_vm7, %v19732_v30  ;;  %vm23771_vm0 = vmmov %vm23766_vm8  ;;  %v23809_v37 = vld [vmem:[#allocation13_spill] sm:$0xff] }
 0x307   : > { %16602 = vmatpush3.msk.msra.mxu1 %vm23769_vm12, %v14287_v5  ;;  %vm23772_vm6 = vmmov %vm23771_vm0 }
 0x308   : > { %vm23773_vm9 = vmmov %vm23771_vm0 }
 0x309   : > { %vm23774_vm12 = vmmov %vm23770_vm7 }
 0x30a   : > { %16701 = vmatprep.subr.msk.mxu1 %vm23774_vm12, %v19752_v15  ;;  %vm23775_vm7 = vmmov %vm23771_vm0 }
 0x30b   : > { %vm23780_vm12 = vmmov %vm23771_vm0 }
 0x30c   : > { %vm23790_vm5 = vmmov %vm23771_vm0 }
 0x30d   : > { %vm23798_vm4 = vmmov %vm23771_vm0 }
 0x30e   : > { %vm23806_vm3 = vmmov %vm23771_vm0 }
 0x386   : > { %v16405_v2 = vpop.f32.mrf.mxu1 }
 0x387   : > { %v5806_v4 = vadd.f32 %v16405_v2, %v19740_v18 }
 0x388   : > { %v5800_v28 = vpop.f32.mrf.mxu1 }
 0x389   : > { %5960 = vst.msk [vmem:[#allocation3 + $0x20] sm:$0xff] %vm23766_vm8, %v5806_v4  ;;  %v5801_v63 = vadd.f32 %v19740_v18, %v5800_v28  ;;  %vm23776_vm8 = vmmov %vm23771_vm0 }
 0x38a   : > { %v16408_v34 = vpop.f32.mrf.mxu1 }
 0x38b   : > { %5959 = vst.msk [vmem:[#allocation3 + $0x18] sm:$0xff] %vm23771_vm0, %v5801_v63  ;;  %v5816_v42 = vadd.f32 %v16408_v34, %v19740_v18 }
 0x38c   : > { %v5810_v6 = vpop.f32.mrf.mxu1 }
 0x38d   : > { %5962 = vst.msk [vmem:[#allocation3 + $0x30] sm:$0xff] %vm23772_vm6, %v5816_v42  ;;  %v5811_v60 = vadd.f32 %v19740_v18, %v5810_v6  ;;  %vm23778_vm6 = vnez %v23777_v14 }
 0x38e   : > { %v16411_v17 = vpop.f32.mrf.mxu1 }
 0x38f   : > { %5961 = vst.msk [vmem:[#allocation3 + $0x28] sm:$0xff] %vm23773_vm9, %v5811_v60  ;;  %v5826_v13 = vadd.f32 %v16411_v17, %v19740_v18  ;;  %vm23779_vm9 = vmmov %vm23771_vm0  ;;  %v23819_v60 = vld [vmem:[#allocation16_spill] sm:$0xff] }
 0x390   : > { %v5820_v46 = vpop.f32.mrf.mxu1  ;;  %v19768_v36 = vld [vmem:[#allocation3 + $0x20] sm:$0xff] }
 0x391   : > { %5964 = vst.msk [vmem:[#allocation3 + $0x40] sm:$0xff] %vm23775_vm7, %v5826_v13  ;;  %v5821_v61 = vadd.f32 %v19740_v18, %v5820_v46  ;;  %vm23781_vm7 = vmmov %vm23771_vm0 }
 0x392   : > { %v16414_v22 = vpop.f32.mrf.mxu1  ;;  %v19760_v62 = vld [vmem:[#allocation3 + $0x18] sm:$0xff] }
 0x393   : > { %v19762_v56 = vld [vmem:[#allocation3 + $0x17] sm:$0xff]  ;;  %5963 = vst.msk [vmem:[#allocation3 + $0x38] sm:$0xff] %vm23776_vm8, %v5821_v61  ;;  %v5836_v40 = vadd.f32 %v16414_v22, %v19740_v18  ;;  %16456 = vmatprep.mubr.msk.f32.mxu0 %vm23771_vm0, %v19760_v62  ;;  %v19776_v50 = vld [vmem:[#allocation3 + $0x1f] sm:$0xff]  ;;  %vm23782_vm8 = vmmov %vm23771_vm0 }
 0x394   : > { %v6025_v47 = vsel %vm23778_vm6, %v19762_v56, 0.0  ;;  %v5830_v44 = vpop.f32.mrf.mxu1  ;;  %16457 = vmatmul.mubr.msk.f32.gmra.mxu0 %vm23779_vm9, %v19768_v36  ;;  %vm23783_vm9 = vmmov %vm23771_vm0  ;;  %v19790_v29 = vld [vmem:[#allocation3 + $0x30] sm:$0xff] }
 0x395   : > { %16506 = vmatprep.mubr.msk.f32.mxu1 %vm23780_vm12, %v6025_v47  ;;  %5966 = vst.msk [vmem:[#allocation3 + $0x50] sm:$0xff] %vm23781_vm7, %v5836_v40  ;;  %v5831_v32 = vadd.f32 %v19740_v18, %v5830_v44  ;;  %vm23785_vm12 = vnez %v23784_v52  ;;  %vm23786_vm7 = vmmov %vm23771_vm0 }
 0x396   : > { %16507 = vmatmul.mubr.msk.f32.gmra.mxu1 %vm23782_vm8, %v19776_v50  ;;  %v16417_v35 = vpop.f32.mrf.mxu1  ;;  %v19782_v43 = vld [vmem:[#allocation3 + $0x28] sm:$0xff]  ;;  %vm23787_vm8 = vmmov %vm23771_vm0 }
 0x397   : > { %v19784_v19 = vld [vmem:[#allocation3 + $0x27] sm:$0xff]  ;;  %5965 = vst.msk [vmem:[#allocation3 + $0x48] sm:$0xff] %vm23771_vm0, %v5831_v32  ;;  %v5846_v49 = vadd.f32 %v16417_v35, %v19740_v18  ;;  %16459 = vmatprep.mubr.msk.f32.mxu0 %vm23783_vm9, %v19782_v43  ;;  %v19798_v31 = vld [vmem:[#allocation3 + $0x2f] sm:$0xff]  ;;  %vm23788_vm9 = vmmov %vm23771_vm0 }
 0x398   : > { %v6027_v27 = vsel %vm23785_vm12, %v19784_v19, 0.0  ;;  %v5840_v55 = vpop.f32.mrf.mxu1  ;;  %16460 = vmatmul.mubr.msk.f32.gmra.mxu0 %vm23786_vm7, %v19790_v29  ;;  %vm23791_vm7 = vmmov %vm23771_vm0  ;;  %v19812_v33 = vld [vmem:[#allocation3 + $0x40] sm:$0xff]  ;;  %v23829_v35 = vld [vmem:[#allocation19_spill] sm:$0xff] }
 0x399   : > { %16509 = vmatprep.mubr.msk.f32.mxu1 %vm23787_vm8, %v6027_v27  ;;  %5968 = vst.msk [vmem:[#allocation3 + $0x60] sm:$0xff] %vm23771_vm0, %v5846_v49  ;;  %v5841_v51 = vadd.f32 %v19740_v18, %v5840_v55  ;;  %vm23793_vm8 = vnez %v23792_v21 }
 0x39a   : > { %16510 = vmatmul.mubr.msk.f32.gmra.mxu1 %vm23788_vm9, %v19798_v31  ;;  %v16420_v38 = vpop.f32.mrf.mxu1  ;;  %v19804_v23 = vld [vmem:[#allocation3 + $0x38] sm:$0xff]  ;;  %vm23794_vm9 = vmmov %vm23771_vm0 }
 0x39b   : > { %v19806_v1 = vld [vmem:[#allocation3 + $0x37] sm:$0xff]  ;;  %5967 = vst.msk [vmem:[#allocation3 + $0x58] sm:$0xff] %vm23790_vm5, %v5841_v51  ;;  %v5856_v8 = vadd.f32 %v16420_v38, %v19740_v18  ;;  %16462 = vmatprep.mubr.msk.f32.mxu0 %vm23791_vm7, %v19804_v23  ;;  %v19820_v57 = vld [vmem:[#allocation3 + $0x3f] sm:$0xff]  ;;  %vm23795_vm5 = vmmov %vm23771_vm0 }
 0x39c   : > { %23789 = vst [vmem:[#allocation117_spill] sm:$0xff] %v19806_v1  ;;  %v6029_v39 = vsel %vm23793_vm8, %v19806_v1, 0.0  ;;  %v5850_v53 = vpop.f32.mrf.mxu1  ;;  %16463 = vmatmul.mubr.msk.f32.gmra.mxu0 %vm23771_vm0, %v19812_v33  ;;  %vm23796_vm7 = vmmov %vm23771_vm0  ;;  %v19834_v41 = vld [vmem:[#allocation3 + $0x50] sm:$0xff] }
 0x39d   : > { %16512 = vmatprep.mubr.msk.f32.mxu1 %vm23794_vm9, %v6029_v39  ;;  %5970 = vst.msk [vmem:[#allocation3 + $0x70] sm:$0xff] %vm23795_vm5, %v5856_v8  ;;  %v5851_v9 = vadd.f32 %v19740_v18, %v5850_v53  ;;  %vm23800_vm9 = vnez %v23799_v25  ;;  %vm23801_vm5 = vmmov %vm23771_vm0  ;;  %v20127_v14 = vld [vmem:[#allocation3 + $0x31] sm:$0xff] }
 0x39e   : > { %16513 = vmatmul.mubr.msk.f32.gmra.mxu1 %vm23796_vm7, %v19820_v57  ;;  %v16423_v58 = vpop.f32.mrf.mxu1  ;;  %v19826_v59 = vld [vmem:[#allocation3 + $0x48] sm:$0xff]  ;;  %vm23802_vm7 = vmmov %vm23771_vm0 }
 0x39f   : > { %v19828_v54 = vld [vmem:[#allocation3 + $0x47] sm:$0xff]  ;;  %5969 = vst.msk [vmem:[#allocation3 + $0x68] sm:$0xff] %vm23798_vm4, %v5851_v9  ;;  %v5866_v11 = vadd.f32 %v16423_v58, %v19740_v18  ;;  %16465 = vmatprep.mubr.msk.f32.mxu0 %vm23771_vm0, %v19826_v59  ;;  %v19842_v0 = vld [vmem:[#allocation3 + $0x4f] sm:$0xff]  ;;  %vm23803_vm4 = vmmov %vm23771_vm0 }
 0x3a0   : > { %23797 = vst [vmem:[#allocation113_spill] sm:$0xff] %v19828_v54  ;;  %v6031_v48 = vsel %vm23800_vm9, %v19828_v54, 0.0  ;;  %v5860_v26 = vpop.f32.mrf.mxu1  ;;  %16466 = vmatmul.mubr.msk.f32.gmra.mxu0 %vm23801_vm5, %v19834_v41  ;;  %vm23807_vm5 = vmmov %vm23771_vm0  ;;  %v19856_v16 = vld [vmem:[#allocation3 + $0x60] sm:$0xff] }
 0x3a1   : > { %16515 = vmatprep.mubr.msk.f32.mxu1 %vm23802_vm7, %v6031_v48  ;;  %5972 = vst.msk [vmem:[#allocation3 + $0x80] sm:$0xff] %vm23803_vm4, %v5866_v11  ;;  %v5861_v20 = vadd.f32 %v19740_v18, %v5860_v26  ;;  %23808 = vst [vmem:[#allocation70_spill] sm:$0xff] %v19856_v16  ;;  %vm23810_vm7 = vnez %v23809_v37  ;;  %v23839_v58 = vld [vmem:[#allocation22_spill] sm:$0xff] }
 0x3a2   : > { %16516 = vmatmul.mubr.msk.f32.gmra.mxu1 %vm23771_vm0, %v19842_v0  ;;  %v16426_v10 = vpop.f32.mrf.mxu1  ;;  %v19848_v24 = vld [vmem:[#allocation3 + $0x58] sm:$0xff]  ;;  %vm23811_vm4 = vmmov %vm23771_vm0 }
 0x3a3   : > { %23804 = vst [vmem:[#allocation8_spill] sm:$0xff] %v19848_v24  ;;  %v19850_v45 = vld [vmem:[#allocation3 + $0x57] sm:$0xff]  ;;  %5971 = vst.msk [vmem:[#allocation3 + $0x78] sm:$0xff] %vm23806_vm3, %v5861_v20  ;;  %v5876_v7 = vadd.f32 %v16426_v10, %v19740_v18  ;;  %16468 = vmatprep.mubr.msk.f32.mxu0 %vm23807_vm5, %v19848_v24  ;;  %v19864_v2 = vld [vmem:[#allocation3 + $0x5f] sm:$0xff] }
 0x3a4   : > { %23805 = vst [vmem:[#allocation9_spill] sm:$0xff] %v19850_v45  ;;  %v6033_v3 = vsel %vm23810_vm7, %v19850_v45, 0.0  ;;  %v5870_v5 = vpop.f32.mrf.mxu1  ;;  %16469 = vmatmul.mubr.msk.f32.gmra.mxu0 %vm23811_vm4, %v19856_v16  ;;  %vm23812_vm3 = vmmov %vm23771_vm0  ;;  %v19878_v6 = vld [vmem:[#allocation3 + $0x70] sm:$0xff]  ;;  %v20098_v24 = vld [vmem:[#allocation3 + $0x21] sm:$0xff] }
 0x3a5   : > { %16518 = vmatprep.mubr.msk.f32.mxu1 %vm23771_vm0, %v6033_v3  ;;  %5974 = vst.msk [vmem:[#allocation3 + $0x90] sm:$0xff] %vm23812_vm3, %v5876_v7  ;;  %v5871_v4 = vadd.f32 %v19740_v18, %v5870_v5  ;;  %vm23813_vm5 = vmmov %vm23771_vm0  ;;  %v20161_v52 = vld [vmem:[#allocation3 + $0x51] sm:$0xff]  ;;  %v20175_v21 = vld [vmem:[#allocation3 + $0x59] sm:$0xff] }
 0x3a6   : > { %16519 = vmatmul.mubr.msk.f32.gmra.mxu1 %vm23813_vm5, %v19864_v2  ;;  %v16429_v28 = vpop.f32.mrf.mxu1  ;;  %v19870_v63 = vld [vmem:[#allocation3 + $0x68] sm:$0xff]  ;;  %vm23816_vm7 = vmmov %vm23771_vm0  ;;  %23818 = vst [vmem:[#allocation75_spill] sm:$0xff] %v19878_v6 }
 0x3a7   : > { %23814 = vst [vmem:[#allocation71_spill] sm:$0xff] %v19870_v63  ;;  %v19872_v34 = vld [vmem:[#allocation3 + $0x67] sm:$0xff]  ;;  %5973 = vst.msk [vmem:[#allocation3 + $0x88] sm:$0xff] %vm23816_vm7, %v5871_v4  ;;  %v5886_v42 = vadd.f32 %v16429_v28, %v19740_v18  ;;  %v19886_v46 = vld [vmem:[#allocation3 + $0x6f] sm:$0xff] }
 0x3a8   : > { %23815 = vst [vmem:[#allocation72_spill] sm:$0xff] %v19872_v34  ;;  %vm23817_vm4 = vmmov %vm23771_vm0  ;;  %vm23820_vm0 = vnez %v23819_v60  ;;  %v5880_v13 = vpop.f32.mrf.mxu1  ;;  %v19900_v32 = vld [vmem:[#allocation3 + $0x80] sm:$0xff]  ;;  %v23848_v28 = vld [vmem:[#allocation25_spill] sm:$0xff] }
 0x3a9   : > { %16471 = vmatprep.mubr.msk.f32.mxu0 %vm23817_vm4, %v19870_v63  ;;  %v6035_v17 = vsel %vm23820_vm0, %v19872_v34, 0.0  ;;  %vm23821_vm5 = vmmov %vm23812_vm3  ;;  %v5881_v61 = vadd.f32 %v19740_v18, %v5880_v13  ;;  %23828 = vst [vmem:[#allocation114_spill] sm:$0xff] %v19900_v32  ;;  %v9212_v63 = vld [vmem:[#allocation3 + $0x51] sm:$0xff] }
 0x3aa   : > { %16472 = vmatmul.mubr.msk.f32.gmra.mxu0 %vm23812_vm3, %v19878_v6  ;;  %16521 = vmatprep.mubr.msk.f32.mxu1 %vm23821_vm5, %v6035_v17  ;;  %vm23822_vm7 = vmmov %vm23812_vm3  ;;  %v16432_v22 = vpop.f32.mrf.mxu1  ;;  %v19892_v40 = vld [vmem:[#allocation3 + $0x78] sm:$0xff]  ;;  %vm23830_vm5 = vnez %v23829_v35 }
 0x3ab   : > { %5976 = vst.msk [vmem:[#allocation3 + $0xa0] sm:$0xff] %vm23822_vm7, %v5886_v42  ;;  %vm23823_vm4 = vmmov %vm23812_vm3  ;;  %v19894_v47 = vld [vmem:[#allocation3 + $0x77] sm:$0xff]  ;;  %v5896_v44 = vadd.f32 %v16432_v22, %v19740_v18  ;;  %v19908_v55 = vld [vmem:[#allocation3 + $0x7f] sm:$0xff] }
 0x3ac   : > { %16522 = vmatmul.mubr.msk.f32.gmra.mxu1 %vm23823_vm4, %v19886_v46  ;;  %23824 = vst [vmem:[#allocation35_spill] sm:$0xff] %v19892_v40  ;;  %23825 = vst [vmem:[#allocation120_spill] sm:$0xff] %v19894_v47  ;;  %v6037_v49 = vsel %vm23830_vm5, %v19894_v47, 0.0  ;;  %v5890_v27 = vpop.f32.mrf.mxu1  ;;  %v19922_v9 = vld [vmem:[#allocation3 + $0x90] sm:$0xff] }
 0x3ad   : > { %vm23826_vm0 = vmmov %vm23812_vm3  ;;  %v5891_v51 = vadd.f32 %v19740_v18, %v5890_v27  ;;  %23838 = vst [vmem:[#allocation123_spill] sm:$0xff] %v19922_v9  ;;  %v6740_v6 = vld [vmem:[#allocation3 + $0x11] sm:$0xff] }
 0x3ae   : > { %5975 = vst.msk [vmem:[#allocation3 + $0x98] sm:$0xff] %vm23826_vm0, %v5881_v61  ;;  %vm23827_vm3 = vmmov %vm23826_vm0  ;;  %v16435_v38 = vpop.f32.mrf.mxu1  ;;  %v19914_v8 = vld [vmem:[#allocation3 + $0x88] sm:$0xff]  ;;  %v6772_v16 = vsel %vm18232_vm15, %v6740_v6, 0.0 }
 0x3af   : > { %16474 = vmatprep.mubr.msk.f32.mxu0 %vm23827_vm3, %v19892_v40  ;;  %vm23831_vm7 = vmmov %vm23826_vm0  ;;  %5978 = vst.msk [vmem:[#allocation3 + $0xb0] sm:$0xff] %vm23826_vm0, %v5896_v44  ;;  %v19916_v39 = vld [vmem:[#allocation3 + $0x87] sm:$0xff]  ;;  %v5906_v53 = vadd.f32 %v16435_v38, %v19740_v18  ;;  %v19930_v26 = vld [vmem:[#allocation3 + $0x8f] sm:$0xff] }
 0x3b0   : > { %16475 = vmatmul.mubr.msk.f32.gmra.mxu0 %vm23831_vm7, %v19900_v32  ;;  %vm23832_vm4 = vmmov %vm23826_vm0  ;;  %23834 = vst [vmem:[#allocation32_spill] sm:$0xff] %v19914_v8  ;;  %v5900_v48 = vpop.f32.mrf.mxu1  ;;  %v23858_v38 = vld [vmem:[#allocation28_spill] sm:$0xff]  ;;  %v23904_v40 = vld [vmem:[#allocation43_spill] sm:$0xff] }
 0x3b1   : > { %16524 = vmatprep.mubr.msk.f32.mxu1 %vm23832_vm4, %v6037_v49  ;;  %vm23833_vm3 = vmmov %vm23826_vm0  ;;  %23835 = vst [vmem:[#allocation33_spill] sm:$0xff] %v19916_v39  ;;  %vm23840_vm4 = vnez %v23839_v58  ;;  %v5901_v20 = vadd.f32 %v19740_v18, %v5900_v48 }
 0x3b2   : > { %16525 = vmatmul.mubr.msk.f32.gmra.mxu1 %vm23833_vm3, %v19908_v55  ;;  %vm23836_vm5 = vmmov %vm23826_vm0  ;;  %v6039_v11 = vsel %vm23840_vm4, %v19916_v39, 0.0  ;;  %v16438_v10 = vpop.f32.mrf.mxu1  ;;  %v19944_v4 = vld [vmem:[#allocation3 + $0xa0] sm:$0xff] }
 0x3b3   : > { %5977 = vst.msk [vmem:[#allocation3 + $0xa8] sm:$0xff] %vm23836_vm5, %v5891_v51  ;;  %vm23837_vm7 = vmmov %vm23826_vm0  ;;  %v5916_v5 = vadd.f32 %v16438_v10, %v19740_v18 }
 0x3b4   : > { %16477 = vmatprep.mubr.msk.f32.mxu0 %vm23837_vm7, %v19914_v8  ;;  %vm23841_vm3 = vmmov %vm23826_vm0  ;;  %23847 = vst [vmem:[#allocation74_spill] sm:$0xff] %v19944_v4  ;;  %v5910_v17 = vpop.f32.mrf.mxu1 }
 0x3b5   : > { %16478 = vmatmul.mubr.msk.f32.gmra.mxu0 %vm23826_vm0, %v19922_v9  ;;  %16527 = vmatprep.mubr.msk.f32.mxu1 %vm23841_vm3, %v6039_v11  ;;  %vm23842_vm5 = vmmov %vm23826_vm0  ;;  %v19936_v7 = vld [vmem:[#allocation3 + $0x98] sm:$0xff]  ;;  %vm23849_vm3 = vnez %v23848_v28  ;;  %v5911_v61 = vadd.f32 %v19740_v18, %v5910_v17 }
 0x3b6   : > { %5980 = vst.msk [vmem:[#allocation3 + $0xc0] sm:$0xff] %vm23842_vm5, %v5906_v53  ;;  %vm23843_vm7 = vmmov %vm23826_vm0  ;;  %v19938_v3 = vld [vmem:[#allocation3 + $0x97] sm:$0xff]  ;;  %16480 = vmatprep.mubr.msk.f32.mxu0 %vm23826_vm0, %v19936_v7  ;;  %v19952_v13 = vld [vmem:[#allocation3 + $0x9f] sm:$0xff]  ;;  %v16441_v22 = vpop.f32.mrf.mxu1 }
 0x3b7   : > { %16528 = vmatmul.mubr.msk.f32.gmra.mxu1 %vm23843_vm7, %v19930_v26  ;;  %23844 = vst [vmem:[#allocation115_spill] sm:$0xff] %v19936_v7  ;;  %23845 = vst [vmem:[#allocation73_spill] sm:$0xff] %v19938_v3  ;;  %v6041_v42 = vsel %vm23849_vm3, %v19938_v3, 0.0  ;;  %v5926_v27 = vadd.f32 %v16441_v22, %v19740_v18  ;;  %v19966_v51 = vld [vmem:[#allocation3 + $0xb0] sm:$0xff]  ;;  %v23868_v22 = vld [vmem:[#allocation31_spill] sm:$0xff] }
 0x3b8   : > { %vm23846_vm4 = vmmov %vm23826_vm0  ;;  %23857 = vst [vmem:[#allocation76_spill] sm:$0xff] %v19966_v51  ;;  %v5920_v11 = vpop.f32.mrf.mxu1 }
 0x3b9   : > { %5979 = vst.msk [vmem:[#allocation3 + $0xb8] sm:$0xff] %vm23846_vm4, %v5901_v20  ;;  %vm23850_vm5 = vmmov %vm23826_vm0  ;;  %v5921_v20 = vadd.f32 %v19740_v18, %v5920_v11 }
 0x3ba   : > { %16481 = vmatmul.mubr.msk.f32.gmra.mxu0 %vm23850_vm5, %v19944_v4  ;;  %vm23851_vm7 = vmmov %vm23826_vm0  ;;  %v19958_v44 = vld [vmem:[#allocation3 + $0xa8] sm:$0xff]  ;;  %v16444_v10 = vpop.f32.mrf.mxu1 }
 0x3bb   : > { %16530 = vmatprep.mubr.msk.f32.mxu1 %vm23851_vm7, %v6041_v42  ;;  %vm23852_vm4 = vmmov %vm23826_vm0  ;;  %23853 = vst [vmem:[#allocation11_spill] sm:$0xff] %v19958_v44  ;;  %v19960_v49 = vld [vmem:[#allocation3 + $0xa7] sm:$0xff]  ;;  %vm23859_vm7 = vnez %v23858_v38  ;;  %v19974_v48 = vld [vmem:[#allocation3 + $0xaf] sm:$0xff]  ;;  %v5936_v17 = vadd.f32 %v16444_v10, %v19740_v18 }
 0x3bc   : > { %5982 = vst.msk [vmem:[#allocation3 + $0xd0] sm:$0xff] %vm23852_vm4, %v5916_v5  ;;  %16531 = vmatmul.mubr.msk.f32.gmra.mxu1 %vm23826_vm0, %v19952_v13  ;;  %23854 = vst [vmem:[#allocation12_spill] sm:$0xff] %v19960_v49  ;;  %v6043_v53 = vsel %vm23859_vm7, %v19960_v49, 0.0 }
 0x3bd   : > { %vm23855_vm3 = vmmov %vm23826_vm0  ;;  %16533 = vmatprep.mubr.msk.f32.mxu1 %vm23826_vm0, %v6043_v53  ;;  %v5930_v53 = vpop.f32.mrf.mxu1 }
 0x3be   : > { %5981 = vst.msk [vmem:[#allocation3 + $0xc8] sm:$0xff] %vm23855_vm3, %v5911_v61  ;;  %vm23856_vm5 = vmmov %vm23826_vm0  ;;  %v19988_v61 = vld [vmem:[#allocation3 + $0xc0] sm:$0xff] }
 0x3bf   : > { %16483 = vmatprep.mubr.msk.f32.mxu0 %vm23856_vm5, %v19958_v44  ;;  %vm23860_vm4 = vmmov %vm23826_vm0  ;;  %23867 = vst [vmem:[#allocation126_spill] sm:$0xff] %v19988_v61  ;;  %v16447_v10 = vpop.f32.mrf.mxu1 }
 0x3c0   : > { %16484 = vmatmul.mubr.msk.f32.gmra.mxu0 %vm23860_vm4, %v19966_v51  ;;  %vm23861_vm3 = vmmov %vm23826_vm0  ;;  %v19980_v5 = vld [vmem:[#allocation3 + $0xb8] sm:$0xff] }
 0x3c1   : > { %5984 = vst.msk [vmem:[#allocation3 + $0xe0] sm:$0xff] %vm23861_vm3, %v5926_v27  ;;  %vm23862_vm5 = vmmov %vm23826_vm0  ;;  %v19982_v42 = vld [vmem:[#allocation3 + $0xb7] sm:$0xff]  ;;  %v19996_v11 = vld [vmem:[#allocation3 + $0xbf] sm:$0xff]  ;;  %v5940_v44 = vpop.f32.mrf.mxu1 }
 0x3c2   : > { %16534 = vmatmul.mubr.msk.f32.gmra.mxu1 %vm23862_vm5, %v19974_v48  ;;  %23863 = vst [vmem:[#allocation79_spill] sm:$0xff] %v19980_v5  ;;  %23864 = vst [vmem:[#allocation36_spill] sm:$0xff] %v19982_v42 }
 0x3c3   : > { %vm23865_vm7 = vmmov %vm23826_vm0  ;;  %v16455_v6 = vpop.f32.mrf.mxu0 }
 0x3c4   : > { %5983 = vst.msk [vmem:[#allocation3 + $0xd8] sm:$0xff] %vm23865_vm7, %v5921_v20  ;;  %vm23866_vm4 = vmmov %vm23826_vm0  ;;  %vm23869_vm0 = vnez %v23868_v22  ;;  %v5931_v20 = vadd.f32 %v19740_v18, %v5930_v53 }
 0x3c5   : > { %16486 = vmatprep.mubr.msk.f32.mxu0 %vm23866_vm4, %v19980_v5  ;;  %v6045_v27 = vsel %vm23869_vm0, %v19982_v42, 0.0  ;;  %vm23870_vm5 = vmmov %vm23861_vm3  ;;  %v20002_v5 = vld [vmem:[#allocation3 + $0xc8] sm:$0xff] }
 0x3c6   : > { %16487 = vmatmul.mubr.msk.f32.gmra.mxu0 %vm23861_vm3, %v19988_v61  ;;  %16536 = vmatprep.mubr.msk.f32.mxu1 %vm23870_vm5, %v6045_v27  ;;  %vm23871_vm7 = vmmov %vm23861_vm3  ;;  %23873 = vst [vmem:[#allocation116_spill] sm:$0xff] %v20002_v5  ;;  %v20004_v51 = vld [vmem:[#allocation3 + $0xc7] sm:$0xff]  ;;  %v5946_v61 = vadd.f32 %v16447_v10, %v19740_v18  ;;  %v20010_v27 = vld [vmem:[#allocation3 + $0xd0] sm:$0xff]  ;;  %v16450_v10 = vpop.f32.mrf.mxu1 }
 0x3c7   : > { %5986 = vst.msk [vmem:[#allocation3 + $0xf0] sm:$0xff] %vm23871_vm7, %v5936_v17  ;;  %vm23872_vm4 = vmmov %vm23861_vm3  ;;  %v23878_v17 = vld [vmem:[#allocation34_spill] sm:$0xff]  ;;  %v20018_v4 = vld [vmem:[#allocation3 + $0xcf] sm:$0xff] }
 0x3c8   : > { %16537 = vmatmul.mubr.msk.f32.gmra.mxu1 %vm23872_vm4, %v19996_v11  ;;  %23874 = vst [vmem:[#allocation38_spill] sm:$0xff] %v20004_v51  ;;  %vm23875_vm0 = vmmov %vm23861_vm3  ;;  %vm23879_vm5 = vnez %v23878_v17  ;;  %v5950_v9 = vpop.f32.mrf.mxu1 }
 0x3c9   : > { %5985 = vst.msk [vmem:[#allocation3 + $0xe8] sm:$0xff] %vm23875_vm0, %v5931_v20  ;;  %vm23876_vm3 = vmmov %vm23875_vm0  ;;  %v6047_v53 = vsel %vm23879_vm5, %v20004_v51, 0.0  ;;  %v5941_v20 = vadd.f32 %v19740_v18, %v5940_v44 }
 0x3ca   : > { %16489 = vmatprep.mubr.msk.f32.mxu0 %vm23876_vm3, %v20002_v5  ;;  %23877 = vst [vmem:[#allocation129_spill] sm:$0xff] %v20010_v27  ;;  %vm23880_vm7 = vmmov %vm23875_vm0 }
 0x3cb   : > { %16490 = vmatmul.mubr.msk.f32.gmra.mxu0 %vm23880_vm7, %v20010_v27  ;;  %vm23881_vm4 = vmmov %vm23875_vm0  ;;  %5988 = vst.msk [vmem:[#allocation3 + $0x100] sm:$0xff] %vm23875_vm0, %v5946_v61  ;;  %v20024_v5 = vld [vmem:[#allocation3 + $0xd8] sm:$0xff]  ;;  %v5956_v27 = vadd.f32 %v16450_v10, %v19740_v18 }
 0x3cc   : > { %16539 = vmatprep.mubr.msk.f32.mxu1 %vm23881_vm4, %v6047_v53  ;;  %vm23882_vm3 = vmmov %vm23875_vm0  ;;  %23883 = vst [vmem:[#allocation118_spill] sm:$0xff] %v20024_v5  ;;  %v20026_v7 = vld [vmem:[#allocation3 + $0xd7] sm:$0xff]  ;;  %v20032_v53 = vld [vmem:[#allocation3 + $0xe0] sm:$0xff] }
 0x3cd   : > { %16540 = vmatmul.mubr.msk.f32.gmra.mxu1 %vm23882_vm3, %v20018_v4  ;;  %23884 = vst [vmem:[#allocation14_spill] sm:$0xff] %v20026_v7  ;;  %vm23885_vm5 = vmmov %vm23875_vm0  ;;  %v23888_v61 = vld [vmem:[#allocation37_spill] sm:$0xff] }
 0x3ce   : > { %5987 = vst.msk [vmem:[#allocation3 + $0xf8] sm:$0xff] %vm23885_vm5, %v5941_v20  ;;  %vm23886_vm7 = vmmov %vm23875_vm0  ;;  %vm23889_vm4 = vnez %v23888_v61  ;;  %v20040_v8 = vld [vmem:[#allocation3 + $0xdf] sm:$0xff]  ;;  %v5951_v20 = vadd.f32 %v19740_v18, %v5950_v9 }
 0x3cf   : > { %16492 = vmatprep.mubr.msk.f32.mxu0 %vm23886_vm7, %v20024_v5  ;;  %23887 = vst [vmem:[#allocation15_spill] sm:$0xff] %v20032_v53  ;;  %v6049_v44 = vsel %vm23889_vm4, %v20026_v7, 0.0  ;;  %vm23890_vm3 = vmmov %vm23875_vm0 }
 0x3d0   : > { %16493 = vmatmul.mubr.msk.f32.gmra.mxu0 %vm23875_vm0, %v20032_v53  ;;  %16542 = vmatprep.mubr.msk.f32.mxu1 %vm23890_vm3, %v6049_v44  ;;  %vm23891_vm5 = vmmov %vm23875_vm0  ;;  %v20046_v10 = vld [vmem:[#allocation3 + $0xe8] sm:$0xff]  ;;  %v20053_v53 = vld [vmem:[#allocation3 + $0xf0] sm:$0xff] }
 0x3d1   : > { %5990 = vst.msk [vmem:[#allocation3 + $0x110] sm:$0xff] %vm23891_vm5, %v5956_v27  ;;  %vm23892_vm7 = vmmov %vm23875_vm0  ;;  %v20048_v5 = vld [vmem:[#allocation3 + $0xe7] sm:$0xff]  ;;  %v23898_v44 = vld [vmem:[#allocation40_spill] sm:$0xff] }
 0x3d2   : > { %16543 = vmatmul.mubr.msk.f32.gmra.mxu1 %vm23892_vm7, %v20040_v8  ;;  %23893 = vst [vmem:[#allocation77_spill] sm:$0xff] %v20046_v10  ;;  %23894 = vst [vmem:[#allocation78_spill] sm:$0xff] %v20048_v5  ;;  %v6051_v27 = vsel %vm23544_vm11, %v20048_v5, 0.0  ;;  %v20061_v18 = vld [vmem:[#allocation3 + $0xef] sm:$0xff]  ;;  %v20071_v32 = vld [vmem:[#allocation3 + $0x100] sm:$0xff] }
 0x3d3   : > { %vm23895_vm4 = vmmov %vm23875_vm0  ;;  %23897 = vst [vmem:[#allocation80_spill] sm:$0xff] %v20053_v53 }
 0x3d4   : > { %5989 = vst.msk [vmem:[#allocation3 + $0x108] sm:$0xff] %vm23895_vm4, %v5951_v20  ;;  %vm23896_vm9 = vmmov %vm23875_vm0 }
 0x3d5   : > { %16495 = vmatprep.mubr.msk.f32.mxu0 %vm23896_vm9, %v20046_v10  ;;  %vm23899_vm3 = vmmov %vm23875_vm0  ;;  %v20065_v9 = vld [vmem:[#allocation3 + $0xf8] sm:$0xff]  ;;  %v6739_v10 = vld [vmem:[#allocation3 + $0x9] sm:$0xff]  ;;  %23903 = vst [vmem:[#allocation41_spill] sm:$0xff] %v20071_v32 }
 0x3d6   : > { %16496 = vmatmul.mubr.msk.f32.gmra.mxu0 %vm23875_vm0, %v20053_v53  ;;  %16545 = vmatprep.mubr.msk.f32.mxu1 %vm23899_vm3, %v6051_v27  ;;  %vm23900_vm5 = vmmov %vm23875_vm0  ;;  %23901 = vst [vmem:[#allocation83_spill] sm:$0xff] %v20065_v9  ;;  %v20067_v20 = vld [vmem:[#allocation3 + $0xf7] sm:$0xff]  ;;  %v20079_v27 = vld [vmem:[#allocation3 + $0xff] sm:$0xff] }
 0x3d7   : > { %16546 = vmatmul.mubr.msk.f32.gmra.mxu1 %vm23900_vm5, %v20061_v18  ;;  %vm23902_vm9 = vmmov %vm23875_vm0  ;;  %v6053_v53 = vsel %vm23477_vm13, %v20067_v20, 0.0 }
 0x3d8   : > { %16498 = vmatprep.mubr.msk.f32.mxu0 %vm23902_vm9, %v20065_v9  ;;  %vm23905_vm4 = vmmov %vm23875_vm0  ;;  %v7193_v9 = vsel %vm23510_vm10, %v19762_v56, 0.0  ;;  %v20107_v56 = vld [vmem:[%s23059_s9 + $0xe] sm:$0x3] }
 0x3d9   : > { %vm23906_vm7 = vmmov %vm23875_vm0 }
 0x3da   : > { %16499 = vmatmul.mubr.msk.f32.gmra.mxu0 %vm23905_vm4, %v20071_v32  ;;  %16548 = vmatprep.mubr.msk.f32.mxu1 %vm23906_vm7, %v6053_v53  ;;  %vm23907_vm3 = vmmov %vm23875_vm0  ;;  %v20093_v53 = vld [vmem:[%s23059_s9 + $0xc] sm:$0x3]  ;;  %vm23911_vm4 = vcmask 1041408  }
 0x3db   : > { %16549 = vmatmul.mubr.msk.f32.gmra.mxu1 %vm23875_vm0, %v20079_v27  ;;  %16553 = vmatprep.mubr.msk.f32.mxu0 %vm23907_vm3, %v6739_v10  ;;  %vm23908_vm5 = vmmov %vm23875_vm0  ;;  %v20096_v32 = vld [vmem:[#allocation3 + $0x19] sm:$0xff] }
 0x3dc   : > { %16603 = vmatprep.mubr.msk.f32.mxu1 %vm23908_vm5, %v7193_v9  ;;  %vm23910_vm9 = vmmov %vm23875_vm0  ;;  %v6774_v9 = vsel %vm18254_vm14, %v20098_v24, 0.0 }
 0x3dd   : > { %vm23912_vm7 = vmmov %vm23875_vm0 }
 0x3de   : > { %16554 = vmatmul.mubr.msk.f32.vlgmr.msra.gmra.mxu0 %vm23910_vm9, %v6772_v16  ;;  %v7195_v16 = vsel %vm23778_vm6, %v19784_v19, 0.0  ;;  %vm23913_vm3 = vmmov %vm23911_vm4 }
 0x3df   : > { %16652 = vmatpush3.msk.msra.mxu0 %vm23911_vm4, %v19732_v30  ;;  %16556 = vmatprep.mubr.msk.f32.mxu0 %vm23912_vm7, %v20096_v32  ;;  %v16505_v30 = vpop.f32.mrf.mxu1  ;;  %vm23914_vm5 = vmmov %vm23875_vm0 }
 0x3e0   : > { %16604 = vmatmul.mubr.msk.f32.vlgmr.msra.gmra.mxu1 %vm23875_vm0, %v19776_v50  ;;  %16751 = vmatprep.subr.msk.mxu0 %vm23913_vm3, %v20093_v53  ;;  %vm23916_vm9 = vmmov %vm23913_vm3  ;;  %v20122_v12 = vadd.f32 %v16505_v30, %v16455_v6  ;;  %v20125_v50 = vld [vmem:[#allocation3 + $0x29] sm:$0xff]  ;;  %v6776_v6 = vsel %vm18285_vm1, %v20127_v14, 0.0  ;;  %v20143_v30 = vld [vmem:[#allocation3 + $0x39] sm:$0xff] }
 0x3e1   : > { %16606 = vmatprep.mubr.msk.f32.mxu1 %vm23914_vm5, %v7195_v16  ;;  %16702 = vmatpush3.msk.msra.mxu1 %vm23916_vm9, %v19752_v15  ;;  %vm23918_vm4 = vmmov %vm23875_vm0  ;;  %v7197_v15 = vsel %vm23785_vm12, %v19806_v1, 0.0  ;;  %v20339_v1 = vld [vmem:[#allocation3 + $0x101] sm:$0xff] }
 0x3e2   : > { %23917 = vst [vmem:[#allocation132_spill] sm:$0xff] %v20122_v12  ;;  %16557 = vmatmul.mubr.msk.f32.gmra.mxu0 %vm23918_vm4, %v6774_v9  ;;  %vm23919_vm7 = vmmov %vm23913_vm3  ;;  %v20145_v9 = vld [vmem:[#allocation3 + $0x41] sm:$0xff]  ;;  %v20159_v12 = vld [vmem:[#allocation3 + $0x49] sm:$0xff] }
 0x3e3   : > { %16801 = vmatprep.subr.msk.mxu1 %vm23919_vm7, %v20107_v56  ;;  %16559 = vmatprep.mubr.msk.f32.mxu0 %vm23875_vm0, %v20125_v50  ;;  %vm23920_vm3 = vmmov %vm23875_vm0  ;;  %v9218_v16 = vld [vmem:[#allocation3 + $0x81] sm:$0xff] }
 0x3e4   : > { %16607 = vmatmul.mubr.msk.f32.gmra.mxu1 %vm23920_vm3, %v19798_v31  ;;  %vm23921_vm5 = vmmov %vm23875_vm0  ;;  %v7199_v31 = vsel %vm23793_vm8, %v19828_v54, 0.0  ;;  %v20177_v54 = vld [vmem:[#allocation3 + $0x61] sm:$0xff] }
 0x3e5   : > { %16609 = vmatprep.mubr.msk.f32.mxu1 %vm23921_vm5, %v7197_v15  ;;  %vm23923_vm9 = vmmov %vm23875_vm0 }
 0x3e6   : > { %16560 = vmatmul.mubr.msk.f32.gmra.mxu0 %vm23923_vm9, %v6776_v6  ;;  %vm23924_vm4 = vmmov %vm23875_vm0  ;;  %v6778_v6 = vsel %vm18307_vm2, %v20145_v9, 0.0 }
 0x3e7   : > { %16562 = vmatprep.mubr.msk.f32.mxu0 %vm23924_vm4, %v20143_v30  ;;  %vm23925_vm7 = vmmov %vm23875_vm0  ;;  %vm23930_vm4 = vnez %v23799_v25  ;;  %v20191_v25 = vld [vmem:[#allocation3 + $0x69] sm:$0xff] }
 0x3e8   : > { %16610 = vmatmul.mubr.msk.f32.gmra.mxu1 %vm23925_vm7, %v19820_v57  ;;  %vm23927_vm3 = vmmov %vm23875_vm0  ;;  %v7201_v57 = vsel %vm23930_vm4, %v19850_v45, 0.0  ;;  %vm23936_vm4 = vnez %v23809_v37  ;;  %v20193_v45 = vld [vmem:[#allocation3 + $0x71] sm:$0xff]  ;;  %v20207_v37 = vld [vmem:[#allocation3 + $0x79] sm:$0xff] }
 0x3e9   : > { %16612 = vmatprep.mubr.msk.f32.mxu1 %vm23875_vm0, %v7199_v31  ;;  %vm23928_vm5 = vmmov %vm23875_vm0  ;;  %v23932_v31 = vld [vmem:[#allocation51_spill] sm:$0xff] }
 0x3ea   : > { %16563 = vmatmul.mubr.msk.f32.gmra.mxu0 %vm23927_vm3, %v6778_v6  ;;  %vm23929_vm9 = vmmov %vm23875_vm0 }
 0x3eb   : > { %16565 = vmatprep.mubr.msk.f32.mxu0 %vm23928_vm5, %v20159_v12  ;;  %vm23931_vm7 = vmmov %vm23875_vm0  ;;  %vm23933_vm0 = vnez %v23932_v31  ;;  %v9220_v31 = vld [vmem:[#allocation3 + $0x91] sm:$0xff] }
 0x3ec   : > { %16613 = vmatmul.mubr.msk.f32.gmra.mxu1 %vm23929_vm9, %v19842_v0  ;;  %v6780_v6 = vsel %vm23933_vm0, %v20161_v52, 0.0  ;;  %vm23934_vm5 = vmmov %vm23927_vm3  ;;  %v7203_v0 = vsel %vm23936_vm4, %v19872_v34, 0.0  ;;  %vm23942_vm4 = vnez %v23819_v60  ;;  %v20209_v34 = vld [vmem:[#allocation3 + $0x81] sm:$0xff]  ;;  %v20223_v60 = vld [vmem:[#allocation3 + $0x89] sm:$0xff] }
 0x3ed   : > { %16615 = vmatprep.mubr.msk.f32.mxu1 %vm23931_vm7, %v7201_v57  ;;  %vm23935_vm9 = vmmov %vm23927_vm3  ;;  %v23938_v57 = vld [vmem:[#allocation52_spill] sm:$0xff] }
 0x3ee   : > { %16566 = vmatmul.mubr.msk.f32.gmra.mxu0 %vm23927_vm3, %v6780_v6  ;;  %vm23937_vm7 = vmmov %vm23927_vm3  ;;  %vm23939_vm8 = vnez %v23938_v57  ;;  %v9222_v57 = vld [vmem:[#allocation3 + $0xa1] sm:$0xff] }
 0x3ef   : > { %16568 = vmatprep.mubr.msk.f32.mxu0 %vm23934_vm5, %v20175_v21  ;;  %v6782_v6 = vsel %vm23939_vm8, %v20177_v54, 0.0  ;;  %vm23940_vm5 = vmmov %vm23927_vm3 }
 0x3f0   : > { %16616 = vmatmul.mubr.msk.f32.gmra.mxu1 %vm23935_vm9, %v19864_v2  ;;  %vm23941_vm9 = vmmov %vm23927_vm3  ;;  %v7205_v2 = vsel %vm23942_vm4, %v19894_v47, 0.0  ;;  %vm23948_vm4 = vnez %v23829_v35  ;;  %v20225_v47 = vld [vmem:[#allocation3 + $0x91] sm:$0xff]  ;;  %v20239_v35 = vld [vmem:[#allocation3 + $0x99] sm:$0xff] }
 0x3f1   : > { %16618 = vmatprep.mubr.msk.f32.mxu1 %vm23937_vm7, %v7203_v0  ;;  %vm23943_vm7 = vmmov %vm23927_vm3  ;;  %v23944_v0 = vld [vmem:[#allocation53_spill] sm:$0xff] }
 0x3f2   : > { %16569 = vmatmul.mubr.msk.f32.gmra.mxu0 %vm23927_vm3, %v6782_v6  ;;  %vm23945_vm12 = vnez %v23944_v0 }
 0x3f3   : > { %16571 = vmatprep.mubr.msk.f32.mxu0 %vm23940_vm5, %v20191_v25  ;;  %v6784_v6 = vsel %vm23945_vm12, %v20193_v45, 0.0  ;;  %vm23946_vm5 = vmmov %vm23927_vm3 }
 0x3f4   : > { %16619 = vmatmul.mubr.msk.f32.gmra.mxu1 %vm23941_vm9, %v19886_v46  ;;  %vm23947_vm9 = vmmov %vm23927_vm3  ;;  %v7207_v46 = vsel %vm23948_vm4, %v19916_v39, 0.0  ;;  %vm23954_vm4 = vnez %v23839_v58  ;;  %v20241_v39 = vld [vmem:[#allocation3 + $0xa1] sm:$0xff]  ;;  %v20255_v58 = vld [vmem:[#allocation3 + $0xa9] sm:$0xff] }
 0x3f5   : > { %16621 = vmatprep.mubr.msk.f32.mxu1 %vm23943_vm7, %v7205_v2  ;;  %vm23949_vm7 = vmmov %vm23927_vm3  ;;  %v23950_v2 = vld [vmem:[#allocation54_spill] sm:$0xff] }
 0x3f6   : > { %16572 = vmatmul.mubr.msk.f32.gmra.mxu0 %vm23927_vm3, %v6784_v6  ;;  %vm23951_vm6 = vnez %v23950_v2 }
 0x3f7   : > { %16574 = vmatprep.mubr.msk.f32.mxu0 %vm23946_vm5, %v20207_v37  ;;  %v6786_v6 = vsel %vm23951_vm6, %v20209_v34, 0.0  ;;  %vm23952_vm5 = vmmov %vm23927_vm3 }
 0x3f8   : > { %16622 = vmatmul.mubr.msk.f32.gmra.mxu1 %vm23947_vm9, %v19908_v55  ;;  %vm23953_vm9 = vmmov %vm23927_vm3  ;;  %v7209_v55 = vsel %vm23954_vm4, %v19938_v3, 0.0  ;;  %vm23960_vm4 = vnez %v23848_v28  ;;  %v20257_v3 = vld [vmem:[#allocation3 + $0xb1] sm:$0xff]  ;;  %v20271_v28 = vld [vmem:[#allocation3 + $0xb9] sm:$0xff] }
 0x3f9   : > { %16624 = vmatprep.mubr.msk.f32.mxu1 %vm23949_vm7, %v7207_v46  ;;  %vm23955_vm7 = vmmov %vm23927_vm3  ;;  %v23956_v46 = vld [vmem:[#allocation55_spill] sm:$0xff] }
 0x3fa   : > { %16575 = vmatmul.mubr.msk.f32.gmra.mxu0 %vm23927_vm3, %v6786_v6  ;;  %vm23957_vm10 = vnez %v23956_v46 }
 0x3fb   : > { %16577 = vmatprep.mubr.msk.f32.mxu0 %vm23952_vm5, %v20223_v60  ;;  %v6788_v6 = vsel %vm23957_vm10, %v20225_v47, 0.0  ;;  %vm23958_vm5 = vmmov %vm23927_vm3 }
 0x3fc   : > { %16625 = vmatmul.mubr.msk.f32.gmra.mxu1 %vm23953_vm9, %v19930_v26  ;;  %vm23959_vm9 = vmmov %vm23927_vm3  ;;  %v7211_v26 = vsel %vm23960_vm4, %v19960_v49, 0.0  ;;  %vm23966_vm4 = vnez %v23858_v38  ;;  %v20273_v49 = vld [vmem:[#allocation3 + $0xc1] sm:$0xff]  ;;  %v20287_v38 = vld [vmem:[#allocation3 + $0xc9] sm:$0xff] }
 0x3fd   : > { %16627 = vmatprep.mubr.msk.f32.mxu1 %vm23955_vm7, %v7209_v55  ;;  %vm23961_vm7 = vmmov %vm23927_vm3  ;;  %v23962_v55 = vld [vmem:[#allocation56_spill] sm:$0xff] }
 0x3fe   : > { %16578 = vmatmul.mubr.msk.f32.gmra.mxu0 %vm23927_vm3, %v6788_v6  ;;  %vm23963_vm10 = vnez %v23962_v55 }
 0x3ff   : > { %16580 = vmatprep.mubr.msk.f32.mxu0 %vm23958_vm5, %v20239_v35  ;;  %v6790_v6 = vsel %vm23963_vm10, %v20241_v39, 0.0  ;;  %vm23964_vm5 = vmmov %vm23927_vm3 }
 0x400   : > { %16628 = vmatmul.mubr.msk.f32.gmra.mxu1 %vm23959_vm9, %v19952_v13  ;;  %vm23965_vm9 = vmmov %vm23927_vm3  ;;  %v7213_v13 = vsel %vm23966_vm4, %v19982_v42, 0.0  ;;  %vm23972_vm4 = vnez %v23868_v22  ;;  %v20289_v42 = vld [vmem:[#allocation3 + $0xd1] sm:$0xff]  ;;  %v20303_v22 = vld [vmem:[#allocation3 + $0xd9] sm:$0xff] }
 0x401   : > { %16630 = vmatprep.mubr.msk.f32.mxu1 %vm23961_vm7, %v7211_v26  ;;  %vm23967_vm7 = vmmov %vm23927_vm3  ;;  %v23968_v26 = vld [vmem:[#allocation57_spill] sm:$0xff] }
 0x402   : > { %16581 = vmatmul.mubr.msk.f32.gmra.mxu0 %vm23927_vm3, %v6790_v6  ;;  %vm23969_vm10 = vnez %v23968_v26 }
 0x403   : > { %16583 = vmatprep.mubr.msk.f32.mxu0 %vm23964_vm5, %v20255_v58  ;;  %v6792_v6 = vsel %vm23969_vm10, %v20257_v3, 0.0  ;;  %vm23970_vm5 = vmmov %vm23927_vm3 }
 0x404   : > { %16631 = vmatmul.mubr.msk.f32.gmra.mxu1 %vm23965_vm9, %v19974_v48  ;;  %vm23971_vm9 = vmmov %vm23927_vm3  ;;  %v7215_v48 = vsel %vm23972_vm4, %v20004_v51, 0.0  ;;  %vm23978_vm4 = vnez %v23878_v17  ;;  %v20305_v51 = vld [vmem:[#allocation3 + $0xe1] sm:$0xff]  ;;  %v20319_v17 = vld [vmem:[#allocation3 + $0xe9] sm:$0xff] }
 0x405   : > { %16633 = vmatprep.mubr.msk.f32.mxu1 %vm23967_vm7, %v7213_v13  ;;  %vm23973_vm7 = vmmov %vm23927_vm3  ;;  %v23974_v13 = vld [vmem:[#allocation58_spill] sm:$0xff] }
 0x406   : > { %16584 = vmatmul.mubr.msk.f32.gmra.mxu0 %vm23927_vm3, %v6792_v6  ;;  %vm23975_vm10 = vnez %v23974_v13 }
 0x407   : > { %16586 = vmatprep.mubr.msk.f32.mxu0 %vm23970_vm5, %v20271_v28  ;;  %v6794_v6 = vsel %vm23975_vm10, %v20273_v49, 0.0  ;;  %vm23976_vm5 = vmmov %vm23927_vm3 }
 0x408   : > { %16634 = vmatmul.mubr.msk.f32.gmra.mxu1 %vm23971_vm9, %v19996_v11  ;;  %vm23977_vm9 = vmmov %vm23927_vm3  ;;  %v7217_v11 = vsel %vm23978_vm4, %v20026_v7, 0.0  ;;  %vm23984_vm4 = vnez %v23888_v61  ;;  %v20321_v7 = vld [vmem:[#allocation3 + $0xf1] sm:$0xff]  ;;  %v20334_v61 = vld [vmem:[#allocation3 + $0x107] sm:$0xff] }
 0x409   : > { %16636 = vmatprep.mubr.msk.f32.mxu1 %vm23973_vm7, %v7215_v48  ;;  %vm23979_vm7 = vmmov %vm23927_vm3  ;;  %v23980_v48 = vld [vmem:[#allocation59_spill] sm:$0xff] }
 0x40a   : > { %16587 = vmatmul.mubr.msk.f32.gmra.mxu0 %vm23927_vm3, %v6794_v6  ;;  %vm23981_vm10 = vnez %v23980_v48 }
 0x40b   : > { %16589 = vmatprep.mubr.msk.f32.mxu0 %vm23976_vm5, %v20287_v38  ;;  %v6796_v6 = vsel %vm23981_vm10, %v20289_v42, 0.0  ;;  %vm23982_vm5 = vmmov %vm23927_vm3 }
 0x40c   : > { %16637 = vmatmul.mubr.msk.f32.gmra.mxu1 %vm23977_vm9, %v20018_v4  ;;  %vm23983_vm9 = vmmov %vm23927_vm3  ;;  %v7219_v4 = vsel %vm23984_vm4, %v20048_v5, 0.0  ;;  %v20337_v5 = vld [vmem:[#allocation3 + $0xf9] sm:$0xff] }
 0x40d   : > { %16639 = vmatprep.mubr.msk.f32.mxu1 %vm23979_vm7, %v7217_v11  ;;  %vm23985_vm7 = vmmov %vm23927_vm3  ;;  %v23986_v11 = vld [vmem:[#allocation60_spill] sm:$0xff] }
 0x40e   : > { %16590 = vmatmul.mubr.msk.f32.gmra.mxu0 %vm23927_vm3, %v6796_v6  ;;  %vm23987_vm10 = vnez %v23986_v11 }
 0x40f   : > { %16592 = vmatprep.mubr.msk.f32.mxu0 %vm23982_vm5, %v20303_v22  ;;  %v6798_v6 = vsel %vm23987_vm10, %v20305_v51, 0.0  ;;  %vm23988_vm5 = vmmov %vm23927_vm3 }
 0x410   : > { %16640 = vmatmul.mubr.msk.f32.gmra.mxu1 %vm23983_vm9, %v20040_v8  ;;  %vm23989_vm9 = vmmov %vm23927_vm3  ;;  %v7221_v8 = vsel %vm23544_vm11, %v20067_v20, 0.0  ;;  %v23996_v20 = vld [vmem:[#allocation62_spill] sm:$0xff] }
 0x411   : > { %16642 = vmatprep.mubr.msk.f32.mxu1 %vm23985_vm7, %v7219_v4  ;;  %vm23990_vm7 = vmmov %vm23927_vm3  ;;  %v23991_v4 = vld [vmem:[#allocation61_spill] sm:$0xff]  ;;  %vm23997_vm11 = vnez %v23996_v20 }
 0x412   : > { %16593 = vmatmul.mubr.msk.f32.gmra.mxu0 %vm23927_vm3, %v6798_v6  ;;  %vm23992_vm4 = vnez %v23991_v4 }
 0x413   : > { %16595 = vmatprep.mubr.msk.f32.mxu0 %vm23988_vm5, %v20319_v17  ;;  %v6800_v6 = vsel %vm23992_vm4, %v20321_v7, 0.0  ;;  %vm23993_vm5 = vmmov %vm23927_vm3 }
 0x414   : > { %16643 = vmatmul.mubr.msk.f32.gmra.mxu1 %vm23989_vm9, %v20061_v18  ;;  %vm23994_vm9 = vmmov %vm23927_vm3  ;;  %v7223_v18 = vsel %vm23477_vm13, %v20334_v61, 0.0 }
 0x415   : > { %16645 = vmatprep.mubr.msk.f32.mxu1 %vm23990_vm7, %v7221_v8  ;;  %vm23995_vm7 = vmmov %vm23927_vm3  ;;  %v6802_v8 = vsel %vm23997_vm11, %v20339_v1, 0.0 }
 0x416   : > { %16596 = vmatmul.mubr.msk.f32.gmra.mxu0 %vm23927_vm3, %v6800_v6  ;;  %v20353_v6 = vld [vmem:[#allocation3 + $0x10f] sm:$0xff]  ;;  %vm23998_vm4 = vmmov %vm23927_vm3 }
 0x417   : > { %16598 = vmatprep.mubr.msk.f32.mxu0 %vm23993_vm5, %v20337_v5  ;;  %vm23999_vm5 = vmmov %vm23927_vm3 }
 0x418   : > { %16646 = vmatmul.mubr.msk.f32.gmra.mxu1 %vm23994_vm9, %v20079_v27  ;;  %vm24000_vm9 = vmmov %vm23927_vm3  ;;  %v20364_v27 = vld [vmem:[%s23059_s9 + $0x10] sm:$0x3] }
 0x419   : > { %16648 = vmatprep.mubr.msk.f32.mxu1 %vm23995_vm7, %v7223_v18  ;;  %vm24001_vm7 = vmmov %vm23927_vm3  ;;  %v20514_v18 = vld [vmem:[#allocation3 + $0x108] sm:$0xff] }
 0x41a   : > { %16599 = vmatmul.mubr.msk.f32.gmra.mxu0 %vm23927_vm3, %v6802_v8  ;;  %vm24002_vm3 = vcmask 1041408   ;;  %vm24003_vm13 = vmmov %vm23998_vm4  ;;  %v20524_v8 = vld [vmem:[#allocation3 + $0x111] sm:$0xff] }
 0x41b   : > { %16653 = vmatprep.mubr.msk.f32.mxu0 %vm23998_vm4, %v19760_v62  ;;  %v8006_v62 = vsel %vm18232_vm15, %v20098_v24, 0.0  ;;  %v24035_v24 = vld [vmem:[#allocation123_spill] sm:$0xff] }
 0x41c   : > { %16649 = vmatmul.mubr.msk.f32.gmra.mxu1 %vm23999_vm5, %v20353_v6  ;;  %vm24004_vm5 = vmmov %vm24002_vm3 }
 0x41d   : > { %16703 = vmatprep.mubr.msk.f32.mxu1 %vm24000_vm9, %v20096_v32  ;;  %vm24005_vm9 = vmmov %vm23998_vm4  ;;  %v24042_v32 = vld [vmem:[#allocation11_spill] sm:$0xff] }
 0x41e   : > { %16654 = vmatmul.mubr.msk.f32.vlgmr.msra.gmra.mxu0 %vm24001_vm7, %v19768_v36  ;;  %vm24006_vm7 = vmmov %vm24002_vm3  ;;  %v8008_v36 = vsel %vm18254_vm14, %v20127_v14, 0.0  ;;  %v24015_v14 = vld [vmem:[#allocation8_spill] sm:$0xff] }
 0x41f   : > { %16752 = vmatpush3.msk.msra.mxu0 %vm24002_vm3, %v20093_v53  ;;  %16656 = vmatprep.mubr.msk.f32.mxu0 %vm24003_vm13, %v19782_v43  ;;  %vm24007_vm3 = vmmov %vm23998_vm4  ;;  %v8010_v43 = vsel %vm18285_vm1, %v20145_v9, 0.0  ;;  %v24048_v53 = vld [vmem:[#allocation79_spill] sm:$0xff] }
 0x420   : > { %16704 = vmatmul.mubr.msk.f32.vlgmr.msra.gmra.mxu1 %vm23998_vm4, %v8006_v62  ;;  %16851 = vmatprep.subr.msk.mxu0 %vm24004_vm5, %v20364_v27  ;;  %vm24008_vm13 = vmmov %vm24007_vm3  ;;  %v24074_v9 = vld [vmem:[#allocation83_spill] sm:$0xff]  ;;  %v24083_v62 = vld [vmem:[#allocation4_spill] sm:$0xff] }
 0x421   : > { %16706 = vmatprep.mubr.msk.f32.mxu1 %vm24005_vm9, %v20125_v50  ;;  %16802 = vmatpush3.msk.msra.mxu1 %vm24006_vm7, %v20107_v56  ;;  %vm24009_vm4 = vmmov %vm24007_vm3  ;;  %v24055_v56 = vld [vmem:[#allocation116_spill] sm:$0xff]  ;;  %v24061_v50 = vld [vmem:[#allocation118_spill] sm:$0xff] }
 0x422   : > { %16657 = vmatmul.mubr.msk.f32.gmra.mxu0 %vm24007_vm3, %v19790_v29  ;;  %vm24010_vm5 = vmmov %vm24007_vm3  ;;  %v8012_v29 = vsel %vm18307_vm2, %v20161_v52, 0.0  ;;  %v24024_v52 = vld [vmem:[#allocation75_spill] sm:$0xff] }
 0x423   : > { %16659 = vmatprep.mubr.msk.f32.mxu0 %vm24008_vm13, %v19804_v23  ;;  %vm24011_vm9 = vmmov %vm24007_vm3  ;;  %v24019_v23 = vld [vmem:[#allocation70_spill] sm:$0xff] }
 0x424   : > { %16707 = vmatmul.mubr.msk.f32.gmra.mxu1 %vm24009_vm4, %v8008_v36  ;;  %vm24012_vm7 = vmmov %vm24007_vm3 }
 0x425   : > { %16709 = vmatprep.mubr.msk.f32.mxu1 %vm24010_vm5, %v20143_v30  ;;  %vm24013_vm13 = vmmov %vm24007_vm3  ;;  %v24068_v30 = vld [vmem:[#allocation77_spill] sm:$0xff] }
 0x426   : > { %16660 = vmatmul.mubr.msk.f32.gmra.mxu0 %vm24011_vm9, %v19812_v33  ;;  %vm24014_vm4 = vmmov %vm24007_vm3  ;;  %v24020_v33 = vld [vmem:[#allocation71_spill] sm:$0xff] }
 0x427   : > { %16662 = vmatprep.mubr.msk.f32.mxu0 %vm24012_vm7, %v19826_v59  ;;  %vm24016_vm5 = vmmov %vm24007_vm3  ;;  %v24026_v59 = vld [vmem:[#allocation35_spill] sm:$0xff] }
 0x428   : > { %16710 = vmatmul.mubr.msk.f32.gmra.mxu1 %vm24007_vm3, %v8010_v43  ;;  %vm24017_vm9 = vmmov %vm24007_vm3  ;;  %v8817_v43 = vld [vmem:[#allocation3 + $0x28] sm:$0xff] }
 0x429   : > { %16712 = vmatprep.mubr.msk.f32.mxu1 %vm24013_vm13, %v20159_v12  ;;  %vm24018_vm7 = vmmov %vm24007_vm3  ;;  %v8014_v12 = vsel %vm23933_vm0, %v20177_v54, 0.0  ;;  %v24029_v54 = vld [vmem:[#allocation114_spill] sm:$0xff] }
 0x42a   : > { %16663 = vmatmul.mubr.msk.f32.gmra.mxu0 %vm24014_vm4, %v19834_v41  ;;  %vm24021_vm13 = vmmov %vm24007_vm3  ;;  %v24031_v41 = vld [vmem:[#allocation32_spill] sm:$0xff] }
 0x42b   : > { %16665 = vmatprep.mubr.msk.f32.mxu0 %vm24016_vm5, %v24015_v14  ;;  %vm24022_vm4 = vmmov %vm24007_vm3  ;;  %v8396_v14 = vld [vmem:[#allocation3 + $0x2f] sm:$0xff] }
 0x42c   : > { %16713 = vmatmul.mubr.msk.f32.gmra.mxu1 %vm24017_vm9, %v8012_v29  ;;  %vm24023_vm5 = vmmov %vm24007_vm3  ;;  %v24089_v29 = vld [vmem:[#allocation117_spill] sm:$0xff] }
 0x42d   : > { %16715 = vmatprep.mubr.msk.f32.mxu1 %vm24018_vm7, %v20175_v21  ;;  %vm24025_vm9 = vmmov %vm24007_vm3  ;;  %v8016_v21 = vsel %vm23939_vm8, %v20193_v45, 0.0  ;;  %v24036_v45 = vld [vmem:[#allocation115_spill] sm:$0xff] }
 0x42e   : > { %16666 = vmatmul.mubr.msk.f32.gmra.mxu0 %vm24007_vm3, %v24019_v23  ;;  %vm24027_vm7 = vmmov %vm24007_vm3  ;;  %v24090_v23 = vld [vmem:[#allocation5_spill] sm:$0xff] }
 0x42f   : > { %16668 = vmatprep.mubr.msk.f32.mxu0 %vm24021_vm13, %v24020_v33  ;;  %vm24028_vm13 = vmmov %vm24007_vm3 }
 0x430   : > { %16716 = vmatmul.mubr.msk.f32.gmra.mxu1 %vm24022_vm4, %v8014_v12  ;;  %vm24030_vm4 = vmmov %vm24007_vm3  ;;  %v20548_v12 = vpop.f32.mrf.mxu0 }
 0x431   : > { %16718 = vmatprep.mubr.msk.f32.mxu1 %vm24023_vm5, %v20191_v25  ;;  %vm24032_vm5 = vmmov %vm24007_vm3  ;;  %v8018_v25 = vsel %vm23945_vm12, %v20209_v34, 0.0  ;;  %v24040_v34 = vld [vmem:[#allocation74_spill] sm:$0xff] }
 0x432   : > { %16669 = vmatmul.mubr.msk.f32.gmra.mxu0 %vm24025_vm9, %v24024_v52  ;;  %vm24033_vm9 = vmmov %vm24007_vm3  ;;  %v8819_v52 = vld [vmem:[#allocation3 + $0x38] sm:$0xff] }
 0x433   : > { %16671 = vmatprep.mubr.msk.f32.mxu0 %vm24027_vm7, %v24026_v59  ;;  %vm24034_vm7 = vmmov %vm24007_vm3  ;;  %v20551_v59 = vpop.f32.mrf.mxu1 }
 0x434   : > { %16719 = vmatmul.mubr.msk.f32.gmra.mxu1 %vm24007_vm3, %v8016_v21  ;;  %v8398_v21 = vld [vmem:[#allocation3 + $0x3f] sm:$0xff] }
 0x435   : > { %16721 = vmatprep.mubr.msk.f32.mxu1 %vm24028_vm13, %v20207_v37  ;;  %vm24037_vm13 = vmmov %vm24007_vm3  ;;  %v8020_v37 = vsel %vm23951_vm6, %v20225_v47, 0.0  ;;  %v24047_v47 = vld [vmem:[#allocation76_spill] sm:$0xff] }
 0x436   : > { %16672 = vmatmul.mubr.msk.f32.gmra.mxu0 %vm24030_vm4, %v24029_v54  ;;  %vm24038_vm4 = vmmov %vm24007_vm3 }
 0x437   : > { %16674 = vmatprep.mubr.msk.f32.mxu0 %vm24032_vm5, %v24031_v41  ;;  %vm24039_vm5 = vmmov %vm24007_vm3  ;;  %v24096_v41 = vld [vmem:[#allocation113_spill] sm:$0xff] }
 0x438   : > { %16722 = vmatmul.mubr.msk.f32.gmra.mxu1 %vm24033_vm9, %v8018_v25  ;;  %vm24041_vm9 = vmmov %vm24007_vm3  ;;  %v24097_v25 = vld [vmem:[#allocation6_spill] sm:$0xff] }
 0x439   : > { %16724 = vmatprep.mubr.msk.f32.mxu1 %vm24034_vm7, %v20223_v60  ;;  %vm24043_vm7 = vmmov %vm24007_vm3 }
 0x43a   : > { %16675 = vmatmul.mubr.msk.f32.gmra.mxu0 %vm24007_vm3, %v24035_v24  ;;  %vm24044_vm3 = vnez %v23956_v46  ;;  %vm24046_vm12 = vmmov %vm24038_vm4 }
 0x43b   : > { %16677 = vmatprep.mubr.msk.f32.mxu0 %vm24037_vm13, %v24036_v45  ;;  %v8022_v60 = vsel %vm24044_vm3, %v20241_v39, 0.0  ;;  %vm24045_vm13 = vmmov %vm24038_vm4  ;;  %v24053_v39 = vld [vmem:[#allocation126_spill] sm:$0xff] }
 0x43c   : > { %16725 = vmatmul.mubr.msk.f32.gmra.mxu1 %vm24038_vm4, %v8020_v37  ;;  %vm24052_vm6 = vmmov %vm24038_vm4  ;;  %v8820_v45 = vld [vmem:[#allocation3 + $0x40] sm:$0xff] }
 0x43d   : > { %16727 = vmatprep.mubr.msk.f32.mxu1 %vm24039_vm5, %v20239_v35  ;;  %vm24049_vm5 = vmmov %vm24038_vm4 }
 0x43e   : > { %16678 = vmatmul.mubr.msk.f32.gmra.mxu0 %vm24041_vm9, %v24040_v34  ;;  %vm24050_vm9 = vnez %v23962_v55  ;;  %vm24058_vm3 = vmmov %vm24049_vm5 }
 0x43f   : > { %16680 = vmatprep.mubr.msk.f32.mxu0 %vm24043_vm7, %v24042_v32  ;;  %v8024_v35 = vsel %vm24050_vm9, %v20257_v3, 0.0  ;;  %vm24051_vm7 = vmmov %vm24038_vm4  ;;  %v24059_v3 = vld [vmem:[#allocation129_spill] sm:$0xff]  ;;  %v8821_v32 = vld [vmem:[#allocation3 + $0x48] sm:$0xff] }
 0x440   : > { %16728 = vmatmul.mubr.msk.f32.gmra.mxu1 %vm24045_vm13, %v8022_v60  ;;  %vm24054_vm13 = vmmov %vm24038_vm4 }
 0x441   : > { %16730 = vmatprep.mubr.msk.f32.mxu1 %vm24046_vm12, %v20255_v58  ;;  %vm24056_vm12 = vmmov %vm24038_vm4 }
 0x442   : > { %16681 = vmatmul.mubr.msk.f32.gmra.mxu0 %vm24038_vm4, %v24047_v47  ;;  %vm24057_vm4 = vnez %v23968_v26  ;;  %vm24065_vm9 = vmmov %vm24058_vm3  ;;  %v8400_v47 = vld [vmem:[#allocation3 + $0x4f] sm:$0xff] }
 0x443   : > { %16683 = vmatprep.mubr.msk.f32.mxu0 %vm24049_vm5, %v24048_v53  ;;  %v8026_v58 = vsel %vm24057_vm4, %v20273_v49, 0.0  ;;  %v24066_v49 = vld [vmem:[#allocation15_spill] sm:$0xff]  ;;  %vm24071_vm4 = vmmov %vm24058_vm3 }
 0x444   : > { %16731 = vmatmul.mubr.msk.f32.gmra.mxu1 %vm24051_vm7, %v8024_v35  ;;  %vm24060_vm7 = vmmov %vm24058_vm3 }
 0x445   : > { %16733 = vmatprep.mubr.msk.f32.mxu1 %vm24052_vm6, %v20271_v28  ;;  %vm24062_vm6 = vmmov %vm24058_vm3 }
 0x446   : > { %16684 = vmatmul.mubr.msk.f32.gmra.mxu0 %vm24054_vm13, %v24053_v39  ;;  %vm24063_vm13 = vnez %v23974_v13  ;;  %v24102_v39 = vld [vmem:[#allocation9_spill] sm:$0xff]  ;;  %v9234_v13 = vld [vmem:[#allocation3 + $0x101] sm:$0xff] }
 0x447   : > { %16686 = vmatprep.mubr.msk.f32.mxu0 %vm24056_vm12, %v24055_v56  ;;  %v8028_v28 = vsel %vm24063_vm13, %v20289_v42, 0.0  ;;  %vm24064_vm12 = vmmov %vm24058_vm3  ;;  %v24072_v42 = vld [vmem:[#allocation80_spill] sm:$0xff]  ;;  %v24103_v56 = vld [vmem:[#allocation7_spill] sm:$0xff] }
 0x448   : > { %16734 = vmatmul.mubr.msk.f32.gmra.mxu1 %vm24049_vm5, %v8026_v58  ;;  %vm24067_vm5 = vmmov %vm24058_vm3 }
 0x449   : > { %16736 = vmatprep.mubr.msk.f32.mxu1 %vm24058_vm3, %v20287_v38 }
 0x44a   : > { %16687 = vmatmul.mubr.msk.f32.gmra.mxu0 %vm24060_vm7, %v24059_v3  ;;  %vm24069_vm7 = vnez %v23980_v48  ;;  %v9238_v48 = vld [vmem:[#allocation3 + $0x121] sm:$0xff] }
 0x44b   : > { %16689 = vmatprep.mubr.msk.f32.mxu0 %vm24062_vm6, %v24061_v50  ;;  %v8030_v38 = vsel %vm24069_vm7, %v20305_v51, 0.0  ;;  %vm24070_vm6 = vmmov %vm24058_vm3  ;;  %v24077_v51 = vld [vmem:[#allocation41_spill] sm:$0xff]  ;;  %v8822_v50 = vld [vmem:[#allocation3 + $0x50] sm:$0xff] }
 0x44c   : > { %16737 = vmatmul.mubr.msk.f32.gmra.mxu1 %vm24064_vm12, %v8028_v28  ;;  %vm24073_vm12 = vmmov %vm24058_vm3 }
 0x44d   : > { %16739 = vmatprep.mubr.msk.f32.mxu1 %vm24065_vm9, %v20303_v22  ;;  %vm24075_vm9 = vmmov %vm24058_vm3  ;;  %v8032_v22 = vsel %vm23987_vm10, %v20321_v7, 0.0  ;;  %v20522_v7 = vld [vmem:[#allocation3 + $0x109] sm:$0xff] }
 0x44e   : > { %16690 = vmatmul.mubr.msk.f32.gmra.mxu0 %vm24067_vm5, %v24066_v49  ;;  %vm24076_vm5 = vmmov %vm24058_vm3 }
 0x44f   : > { %16692 = vmatprep.mubr.msk.f32.mxu0 %vm24058_vm3, %v24068_v30  ;;  %v8823_v30 = vld [vmem:[#allocation3 + $0x58] sm:$0xff] }
 0x450   : > { %16740 = vmatmul.mubr.msk.f32.gmra.mxu1 %vm24070_vm6, %v8030_v38  ;;  %vm24078_vm6 = vmmov %vm24058_vm3 }
 0x451   : > { %16742 = vmatprep.mubr.msk.f32.mxu1 %vm24071_vm4, %v20319_v17  ;;  %vm24079_vm4 = vmmov %vm24058_vm3 }
 0x452   : > { %16693 = vmatmul.mubr.msk.f32.gmra.mxu0 %vm24073_vm12, %v24072_v42  ;;  %vm24080_vm12 = vnez %v23991_v4  ;;  %v8402_v42 = vld [vmem:[#allocation3 + $0x5f] sm:$0xff] }
 0x453   : > { %16695 = vmatprep.mubr.msk.f32.mxu0 %vm24075_vm9, %v24074_v9  ;;  %v8034_v17 = vsel %vm24080_vm12, %v20339_v1, 0.0  ;;  %vm24081_vm9 = vmmov %vm24058_vm3  ;;  %v8036_v1 = vsel %vm23997_vm11, %v20524_v8, 0.0 }
 0x454   : > { %16743 = vmatmul.mubr.msk.f32.gmra.mxu1 %vm24076_vm5, %v8032_v22  ;;  %vm24082_vm5 = vmmov %vm24058_vm3  ;;  %v16458_v54 = vpop.f32.mrf.mxu0 }
 0x455   : > { %16745 = vmatprep.mubr.msk.f32.mxu1 %vm24058_vm3, %v20337_v5  ;;  %v20528_v5 = vld [vmem:[#allocation3 + $0x110] sm:$0xff]  ;;  %vm24087_vm12 = vmmov %vm24058_vm3 }
 0x456   : > { %16696 = vmatmul.mubr.msk.f32.gmra.mxu0 %vm24078_vm6, %v24077_v51  ;;  %vm24084_vm6 = vnez %v24083_v62  ;;  %v16508_v24 = vpop.f32.mrf.mxu1  ;;  %v6266_v34 = vpop.f32.mrf.mxu0  ;;  %v24108_v51 = vld [vmem:[#allocation72_spill] sm:$0xff]  ;;  %v8422_v62 = vld [vmem:[#allocation3 + $0xff] sm:$0xff] }
 0x457   : > { %16698 = vmatprep.mubr.msk.f32.mxu0 %vm24079_vm4, %v20514_v18  ;;  %v8427_v36 = vsel %vm24084_vm6, %v19784_v19, 0.0  ;;  %vm24085_vm4 = vmmov %vm24058_vm3  ;;  %vm24092_vm6 = vcmask 1041408   ;;  %v8818_v19 = vld [vmem:[#allocation3 + $0x30] sm:$0xff]  ;;  %v20559_v37 = vadd.f32 %v16508_v24, %v16458_v54 }
 0x458   : > { %16746 = vmatmul.mubr.msk.f32.gmra.mxu1 %vm24081_vm9, %v8034_v17  ;;  %vm24086_vm9 = vmmov %vm24058_vm3  ;;  %v6590_v60 = vpop.f32.mrf.mxu1  ;;  %v16461_v35 = vpop.f32.mrf.mxu0  ;;  %v24109_v17 = vld [vmem:[#allocation10_spill] sm:$0xff] }
 0x459   : > { %16748 = vmatprep.mubr.msk.f32.mxu1 %vm24082_vm5, %v20522_v7  ;;  %vm24088_vm5 = vmmov %vm24058_vm3  ;;  %v20563_v53 = vadd.f32 %v6590_v60, %v6266_v34  ;;  %v8826_v34 = vld [vmem:[#allocation3 + $0x70] sm:$0xff] }
 0x45a   : > { %16699 = vmatmul.mubr.msk.f32.gmra.mxu0 %vm24058_vm3, %v20528_v5  ;;  %vm24091_vm3 = vnez %v24090_v23  ;;  %vm24093_vm10 = vmmov %vm24085_vm4  ;;  %v16511_v3 = vpop.f32.mrf.mxu1  ;;  %v6276_v49 = vpop.f32.mrf.mxu0 }
 0x45b   : > { %16753 = vmatprep.mubr.msk.f32.mxu0 %vm24085_vm4, %v8427_v36  ;;  %v8429_v33 = vsel %vm24091_vm3, %v24089_v29, 0.0  ;;  %v20570_v28 = vadd.f32 %v16511_v3, %v16461_v35 }
 0x45c   : > { %16749 = vmatmul.mubr.msk.f32.gmra.mxu1 %vm24086_vm9, %v8036_v1  ;;  %vm24095_vm9 = vmmov %vm24085_vm4  ;;  %v6600_v38 = vpop.f32.mrf.mxu1  ;;  %v16464_v22 = vpop.f32.mrf.mxu0 }
 0x45d   : > { %16803 = vmatprep.mubr.msk.f32.mxu1 %vm24087_vm12, %v8817_v43  ;;  %vm24094_vm12 = vmmov %vm24085_vm4  ;;  %v20574_v9 = vadd.f32 %v6600_v38, %v6276_v49  ;;  %v8824_v43 = vld [vmem:[#allocation3 + $0x60] sm:$0xff]  ;;  %v24121_v49 = vld [vmem:[#allocation16_spill] sm:$0xff] }
 0x45e   : > { %16754 = vmatmul.mubr.msk.f32.vlgmr.msra.gmra.mxu0 %vm24088_vm5, %v8396_v14  ;;  %vm24098_vm5 = vnez %v24097_v25  ;;  %v16514_v1 = vpop.f32.mrf.mxu1  ;;  %v6286_v29 = vpop.f32.mrf.mxu0 }
 0x45f   : > { %16852 = vmatpush3.msk.msra.mxu0 %vm24092_vm6, %v20364_v27  ;;  %16756 = vmatprep.mubr.msk.f32.mxu0 %vm24093_vm10, %v8429_v33  ;;  %v8431_v27 = vsel %vm24098_vm5, %v24096_v41, 0.0  ;;  %vm24099_vm10 = vmmov %vm24085_vm4  ;;  %v20581_v14 = vadd.f32 %v16514_v1, %v16464_v22  ;;  %v8825_v33 = vld [vmem:[#allocation3 + $0x68] sm:$0xff]  ;;  %v24114_v41 = vld [vmem:[#allocation120_spill] sm:$0xff] }
 0x460   : > { %16804 = vmatmul.mubr.msk.f32.vlgmr.msra.gmra.mxu1 %vm24085_vm4, %v8818_v19  ;;  %vm24100_vm6 = vmmov %vm24085_vm4  ;;  %v6610_v19 = vpop.f32.mrf.mxu1  ;;  %v16467_v54 = vpop.f32.mrf.mxu0 }
 0x461   : > { %16806 = vmatprep.mubr.msk.f32.mxu1 %vm24094_vm12, %v8819_v52  ;;  %vm24101_vm12 = vmmov %vm24085_vm4  ;;  %v8404_v52 = vld [vmem:[#allocation3 + $0x6f] sm:$0xff] }
 0x462   : > { %16757 = vmatmul.mubr.msk.f32.gmra.mxu0 %vm24095_vm9, %v8398_v21  ;;  %vm24104_vm9 = vnez %v24103_v56  ;;  %v20585_v21 = vadd.f32 %v6610_v19, %v6286_v29  ;;  %v6296_v60 = vpop.f32.mrf.mxu0  ;;  %v24126_v19 = vld [vmem:[#allocation73_spill] sm:$0xff] }
 0x463   : > { %16759 = vmatprep.mubr.msk.f32.mxu0 %vm24099_vm10, %v8431_v27  ;;  %v8433_v58 = vsel %vm24104_vm9, %v24102_v39, 0.0  ;;  %vm24105_vm10 = vmmov %vm24085_vm4  ;;  %vm24110_vm9 = vnez %v24109_v17  ;;  %v24115_v27 = vld [vmem:[#allocation13_spill] sm:$0xff]  ;;  %v8841_v17 = vld [vmem:[#allocation3 + $0xe8] sm:$0xff] }
 0x464   : > { %16807 = vmatmul.mubr.msk.f32.gmra.mxu1 %vm24100_vm6, %v8820_v45  ;;  %vm24106_vm6 = vmmov %vm24085_vm4  ;;  %v8435_v36 = vsel %vm24110_vm9, %v24108_v51, 0.0  ;;  %vm24116_vm9 = vnez %v24115_v27  ;;  %v16517_v45 = vpop.f32.mrf.mxu1  ;;  %v8406_v39 = vld [vmem:[#allocation3 + $0x7f] sm:$0xff]  ;;  %v16470_v3 = vpop.f32.mrf.mxu0 }
 0x465   : > { %16809 = vmatprep.mubr.msk.f32.mxu1 %vm24085_vm4, %v8821_v32  ;;  %v8437_v24 = vsel %vm24116_vm9, %v24114_v41, 0.0  ;;  %v20592_v32 = vadd.f32 %v16517_v45, %v16467_v54  ;;  %vm24122_vm9 = vnez %v24121_v49 }
 0x466   : > { %16760 = vmatmul.mubr.msk.f32.gmra.mxu0 %vm24101_vm12, %v8400_v47  ;;  %vm24107_vm12 = vmmov %vm24085_vm4  ;;  %v8827_v47 = vld [vmem:[#allocation3 + $0x78] sm:$0xff]  ;;  %v6620_v35 = vpop.f32.mrf.mxu1  ;;  %v6306_v51 = vpop.f32.mrf.mxu0 }
 0x467   : > { %16762 = vmatprep.mubr.msk.f32.mxu0 %vm24105_vm10, %v8433_v58  ;;  %vm24111_vm10 = vmmov %vm24085_vm4  ;;  %v20596_v58 = vadd.f32 %v6620_v35, %v6296_v60  ;;  %v8831_v60 = vld [vmem:[#allocation3 + $0x98] sm:$0xff] }
 0x468   : > { %16810 = vmatmul.mubr.msk.f32.gmra.mxu1 %vm24106_vm6, %v8822_v50  ;;  %vm24112_vm6 = vmmov %vm24085_vm4  ;;  %v24120_v50 = vld [vmem:[#allocation33_spill] sm:$0xff]  ;;  %v16520_v38 = vpop.f32.mrf.mxu1 }
 0x469   : > { %16812 = vmatprep.mubr.msk.f32.mxu1 %vm24085_vm4, %v8823_v30  ;;  %v8439_v30 = vsel %vm24122_vm9, %v24120_v50, 0.0  ;;  %v20603_v22 = vadd.f32 %v16520_v38, %v16470_v3  ;;  %v8410_v35 = vld [vmem:[#allocation3 + $0x9f] sm:$0xff]  ;;  %v24132_v50 = vld [vmem:[#allocation12_spill] sm:$0xff] }
 0x46a   : > { %16763 = vmatmul.mubr.msk.f32.gmra.mxu0 %vm24107_vm12, %v8402_v42  ;;  %vm24113_vm12 = vmmov %vm24085_vm4  ;;  %v8828_v42 = vld [vmem:[#allocation3 + $0x80] sm:$0xff]  ;;  %v6630_v1 = vpop.f32.mrf.mxu1 }
 0x46b   : > { %16765 = vmatprep.mubr.msk.f32.mxu0 %vm24111_vm10, %v8435_v36  ;;  %vm24117_vm10 = vmmov %vm24085_vm4  ;;  %v8829_v36 = vld [vmem:[#allocation3 + $0x88] sm:$0xff]  ;;  %v20607_v29 = vadd.f32 %v6630_v1, %v6306_v51  ;;  %v8832_v51 = vld [vmem:[#allocation3 + $0xa0] sm:$0xff] }
 0x46c   : > { %16813 = vmatmul.mubr.msk.f32.gmra.mxu1 %vm24112_vm6, %v8824_v43  ;;  %vm24118_vm6 = vmmov %vm24085_vm4  ;;  %v8408_v43 = vld [vmem:[#allocation3 + $0x8f] sm:$0xff]  ;;  %v16523_v41 = vpop.f32.mrf.mxu1 }
 0x46d   : > { %16815 = vmatprep.mubr.msk.f32.mxu1 %vm24085_vm4, %v8825_v33  ;;  %v16473_v33 = vpop.f32.mrf.mxu0 }
 0x46e   : > { %16766 = vmatmul.mubr.msk.f32.gmra.mxu0 %vm24113_vm12, %v8404_v52  ;;  %vm24119_vm12 = vmmov %vm24085_vm4  ;;  %v24127_v52 = vld [vmem:[#allocation19_spill] sm:$0xff]  ;;  %v20614_v45 = vadd.f32 %v16523_v41, %v16473_v33 }
 0x46f   : > { %16768 = vmatprep.mubr.msk.f32.mxu0 %vm24117_vm10, %v8437_v24  ;;  %vm24123_vm10 = vmmov %vm24085_vm4  ;;  %vm24128_vm9 = vnez %v24127_v52  ;;  %v8830_v24 = vld [vmem:[#allocation3 + $0x90] sm:$0xff] }
 0x470   : > { %16816 = vmatmul.mubr.msk.f32.gmra.mxu1 %vm24118_vm6, %v8826_v34  ;;  %vm24124_vm6 = vmmov %vm24085_vm4  ;;  %v8441_v54 = vsel %vm24128_vm9, %v24126_v19, 0.0  ;;  %v6316_v34 = vpop.f32.mrf.mxu0  ;;  %v8412_v19 = vld [vmem:[#allocation3 + $0xaf] sm:$0xff] }
 0x471   : > { %16818 = vmatprep.mubr.msk.f32.mxu1 %vm24085_vm4, %v8827_v47  ;;  %v6640_v47 = vpop.f32.mrf.mxu1 }
 0x472   : > { %16769 = vmatmul.mubr.msk.f32.gmra.mxu0 %vm24119_vm12, %v8406_v39  ;;  %vm24125_vm12 = vmmov %vm24085_vm4  ;;  %v20618_v39 = vadd.f32 %v6640_v47, %v6316_v34  ;;  %v16476_v3 = vpop.f32.mrf.mxu0  ;;  %v24139_v34 = vld [vmem:[#allocation25_spill] sm:$0xff] }
 0x473   : > { %16771 = vmatprep.mubr.msk.f32.mxu0 %vm24123_vm10, %v8439_v30  ;;  %vm24129_vm10 = vmmov %vm24085_vm4  ;;  %v24133_v30 = vld [vmem:[#allocation22_spill] sm:$0xff] }
 0x474   : > { %16819 = vmatmul.mubr.msk.f32.gmra.mxu1 %vm24124_vm6, %v8828_v42  ;;  %vm24130_vm6 = vmmov %vm24085_vm4  ;;  %vm24134_vm9 = vnez %v24133_v30  ;;  %v16526_v42 = vpop.f32.mrf.mxu1  ;;  %v6326_v1 = vpop.f32.mrf.mxu0 }
 0x475   : > { %16821 = vmatprep.mubr.msk.f32.mxu1 %vm24085_vm4, %v8829_v36  ;;  %v8443_v38 = vsel %vm24134_vm9, %v24132_v50, 0.0  ;;  %v20625_v36 = vadd.f32 %v16526_v42, %v16476_v3  ;;  %vm24140_vm9 = vnez %v24139_v34 }
 0x476   : > { %16772 = vmatmul.mubr.msk.f32.gmra.mxu0 %vm24125_vm12, %v8408_v43  ;;  %vm24131_vm12 = vmmov %vm24085_vm4  ;;  %v8833_v43 = vld [vmem:[#allocation3 + $0xa8] sm:$0xff]  ;;  %v6650_v33 = vpop.f32.mrf.mxu1  ;;  %v16479_v41 = vpop.f32.mrf.mxu0 }
 0x477   : > { %16774 = vmatprep.mubr.msk.f32.mxu0 %vm24129_vm10, %v8441_v54  ;;  %vm24135_vm10 = vmmov %vm24085_vm4  ;;  %v20629_v54 = vadd.f32 %v6650_v33, %v6326_v1  ;;  %v24147_v33 = vld [vmem:[#allocation28_spill] sm:$0xff] }
 0x478   : > { %16822 = vmatmul.mubr.msk.f32.gmra.mxu1 %vm24130_vm6, %v8830_v24  ;;  %vm24136_vm6 = vmmov %vm24085_vm4  ;;  %v24138_v24 = vld [vmem:[#allocation36_spill] sm:$0xff]  ;;  %v16529_v47 = vpop.f32.mrf.mxu1  ;;  %v20639_v50 = vpop.f32.mrf.mxu0 }
 0x479   : > { %16824 = vmatprep.mubr.msk.f32.mxu1 %vm24085_vm4, %v8831_v60  ;;  %v8445_v60 = vsel %vm24140_vm9, %v24138_v24, 0.0  ;;  %v20636_v3 = vadd.f32 %v16529_v47, %v16479_v41  ;;  %24143 = vst [vmem:[#allocation119_spill] sm:$0xff] %v20639_v50  ;;  %vm24148_vm9 = vnez %v24147_v33  ;;  %v8836_v41 = vld [vmem:[#allocation3 + $0xc0] sm:$0xff]  ;;  %v24155_v33 = vld [vmem:[#allocation31_spill] sm:$0xff] }
 0x47a   : > { %16775 = vmatmul.mubr.msk.f32.gmra.mxu0 %vm24131_vm12, %v8410_v35  ;;  %vm24137_vm12 = vmmov %vm24085_vm4  ;;  %v8834_v35 = vld [vmem:[#allocation3 + $0xb0] sm:$0xff]  ;;  %v20642_v42 = vpop.f32.mrf.mxu1  ;;  %v16482_v1 = vpop.f32.mrf.mxu0 }
 0x47b   : > { %16777 = vmatprep.mubr.msk.f32.mxu0 %vm24135_vm10, %v8443_v38  ;;  %vm24141_vm10 = vmmov %vm24085_vm4  ;;  %v8835_v38 = vld [vmem:[#allocation3 + $0xb8] sm:$0xff]  ;;  %24144 = vst [vmem:[#allocation39_spill] sm:$0xff] %v20642_v42 }
 0x47c   : > { %16825 = vmatmul.mubr.msk.f32.gmra.mxu1 %vm24136_vm6, %v8832_v51  ;;  %vm24142_vm6 = vmmov %vm24085_vm4  ;;  %v8414_v51 = vld [vmem:[#allocation3 + $0xbf] sm:$0xff]  ;;  %v16532_v24 = vpop.f32.mrf.mxu1  ;;  %v20652_v47 = vpop.f32.mrf.mxu0 }
 0x47d   : > { %16827 = vmatprep.mubr.msk.f32.mxu1 %vm24085_vm4, %v8833_v43  ;;  %v24146_v43 = vld [vmem:[#allocation38_spill] sm:$0xff]  ;;  %24151 = vst [vmem:[#allocation121_spill] sm:$0xff] %v20652_v47 }
 0x47e   : > { %16778 = vmatmul.mubr.msk.f32.gmra.mxu0 %vm24137_vm12, %v8412_v19  ;;  %vm24145_vm12 = vmmov %vm24085_vm4  ;;  %v8447_v19 = vsel %vm24148_vm9, %v24146_v43, 0.0  ;;  %v24154_v43 = vld [vmem:[#allocation14_spill] sm:$0xff]  ;;  %vm24156_vm9 = vnez %v24155_v33 }
 0x47f   : > { %16780 = vmatprep.mubr.msk.f32.mxu0 %vm24141_vm10, %v8445_v60  ;;  %vm24149_vm10 = vmmov %vm24085_vm4  ;;  %v20649_v60 = vadd.f32 %v16532_v24, %v16482_v1  ;;  %v8838_v1 = vld [vmem:[#allocation3 + $0xd0] sm:$0xff]  ;;  %v24163_v33 = vld [vmem:[#allocation34_spill] sm:$0xff] }
 0x480   : > { %16828 = vmatmul.mubr.msk.f32.gmra.mxu1 %vm24142_vm6, %v8834_v35  ;;  %vm24150_vm6 = vmmov %vm24085_vm4  ;;  %v8837_v35 = vld [vmem:[#allocation3 + $0xc8] sm:$0xff]  ;;  %v16485_v34 = vpop.f32.mrf.mxu0 }
 0x481   : > { %16830 = vmatprep.mubr.msk.f32.mxu1 %vm24085_vm4, %v8835_v38  ;;  %v20655_v38 = vpop.f32.mrf.mxu1 }
 0x482   : > { %16781 = vmatmul.mubr.msk.f32.gmra.mxu0 %vm24145_vm12, %v8414_v51  ;;  %24152 = vst [vmem:[#allocation81_spill] sm:$0xff] %v20655_v38  ;;  %v8416_v51 = vld [vmem:[#allocation3 + $0xcf] sm:$0xff]  ;;  %vm24153_vm12 = vmmov %vm24085_vm4 }
 0x483   : > { %16783 = vmatprep.mubr.msk.f32.mxu0 %vm24149_vm10, %v8447_v19  ;;  %v8449_v19 = vsel %vm24156_vm9, %v24154_v43, 0.0  ;;  %v16535_v30 = vpop.f32.mrf.mxu1  ;;  %vm24157_vm10 = vmmov %vm24085_vm4  ;;  %v24162_v43 = vld [vmem:[#allocation78_spill] sm:$0xff]  ;;  %vm24164_vm9 = vnez %v24163_v33 }
 0x484   : > { %16831 = vmatmul.mubr.msk.f32.gmra.mxu1 %vm24150_vm6, %v8836_v41  ;;  %v20662_v24 = vadd.f32 %v16535_v30, %v16485_v34  ;;  %vm24158_vm6 = vmmov %vm24085_vm4  ;;  %v20665_v41 = vpop.f32.mrf.mxu0  ;;  %v8840_v30 = vld [vmem:[#allocation3 + $0xe0] sm:$0xff]  ;;  %v8421_v34 = vld [vmem:[#allocation3 + $0xf7] sm:$0xff] }
 0x485   : > { %16833 = vmatprep.mubr.msk.f32.mxu1 %vm24085_vm4, %v8837_v35  ;;  %24159 = vst [vmem:[#allocation82_spill] sm:$0xff] %v20665_v41  ;;  %v8839_v35 = vld [vmem:[#allocation3 + $0xd8] sm:$0xff]  ;;  %v20668_v52 = vpop.f32.mrf.mxu1 }
 0x486   : > { %16784 = vmatmul.mubr.msk.f32.gmra.mxu0 %vm24153_vm12, %v8416_v51  ;;  %24160 = vst [vmem:[#allocation17_spill] sm:$0xff] %v20668_v52  ;;  %v8418_v51 = vld [vmem:[#allocation3 + $0xdf] sm:$0xff]  ;;  %v16488_v49 = vpop.f32.mrf.mxu0  ;;  %vm24161_vm12 = vmmov %vm24085_vm4 }
 0x487   : > { %16786 = vmatprep.mubr.msk.f32.mxu0 %vm24157_vm10, %v8449_v19  ;;  %v8451_v19 = vsel %vm24164_vm9, %v24162_v43, 0.0  ;;  %vm24165_vm10 = vmmov %vm24085_vm4  ;;  %v24170_v43 = vld [vmem:[#allocation37_spill] sm:$0xff] }
 0x488   : > { %16834 = vmatmul.mubr.msk.f32.gmra.mxu1 %vm24158_vm6, %v8838_v1  ;;  %v16538_v27 = vpop.f32.mrf.mxu1  ;;  %vm24166_vm6 = vmmov %vm24085_vm4  ;;  %vm24171_vm9 = vnez %v24170_v43 }
 0x489   : > { %16836 = vmatprep.mubr.msk.f32.mxu1 %vm24085_vm4, %v8839_v35  ;;  %v20675_v1 = vadd.f32 %v16538_v27, %v16488_v49  ;;  %v20678_v35 = vpop.f32.mrf.mxu0  ;;  %v8842_v27 = vld [vmem:[#allocation3 + $0xf0] sm:$0xff] }
 0x48a   : > { %16787 = vmatmul.mubr.msk.f32.gmra.mxu0 %vm24161_vm12, %v8418_v51  ;;  %24167 = vst [vmem:[#allocation18_spill] sm:$0xff] %v20678_v35  ;;  %v20681_v56 = vpop.f32.mrf.mxu1  ;;  %v8420_v51 = vld [vmem:[#allocation3 + $0xef] sm:$0xff]  ;;  %vm24169_vm12 = vmmov %vm24085_vm4 }
 0x48b   : > { %16789 = vmatprep.mubr.msk.f32.mxu0 %vm24165_vm10, %v8451_v19  ;;  %24168 = vst [vmem:[#allocation84_spill] sm:$0xff] %v20681_v56  ;;  %v16491_v25 = vpop.f32.mrf.mxu0  ;;  %v8453_v19 = vsel %vm24171_vm9, %v8421_v34, 0.0  ;;  %vm24172_vm10 = vmmov %vm24085_vm4  ;;  %vm24177_vm9 = vnez %v23898_v44 }
 0x48c   : > { %16837 = vmatmul.mubr.msk.f32.gmra.mxu1 %vm24166_vm6, %v8840_v30  ;;  %vm24173_vm6 = vmmov %vm24085_vm4  ;;  %v8455_v34 = vsel %vm24177_vm9, %v20334_v61, 0.0  ;;  %vm24183_vm9 = vnez %v23904_v40  ;;  %v9208_v40 = vld [vmem:[#allocation3 + $0x31] sm:$0xff] }
 0x48d   : > { %16839 = vmatprep.mubr.msk.f32.mxu1 %vm24085_vm4, %v8841_v17  ;;  %v16541_v33 = vpop.f32.mrf.mxu1  ;;  %v20690_v30 = vpop.f32.mrf.mxu0  ;;  %v8843_v17 = vld [vmem:[#allocation3 + $0xf8] sm:$0xff] }
 0x48e   : > { %16790 = vmatmul.mubr.msk.f32.gmra.mxu0 %vm24169_vm12, %v8420_v51  ;;  %v20687_v49 = vadd.f32 %v16541_v33, %v16491_v25  ;;  %24174 = vst [vmem:[#allocation87_spill] sm:$0xff] %v20690_v30  ;;  %vm24176_vm12 = vmmov %vm24085_vm4  ;;  %v8844_v25 = vld [vmem:[#allocation3 + $0x100] sm:$0xff]  ;;  %v8425_v33 = vld [vmem:[#allocation3 + $0x117] sm:$0xff] }
 0x48f   : > { %16792 = vmatprep.mubr.msk.f32.mxu0 %vm24172_vm10, %v8453_v19  ;;  %v20693_v23 = vpop.f32.mrf.mxu1  ;;  %vm24178_vm10 = vmmov %vm24085_vm4  ;;  %v8457_v61 = vsel %vm24183_vm9, %v8425_v33, 0.0  ;;  %v9207_v33 = vld [vmem:[#allocation3 + $0x29] sm:$0xff]  ;;  %v9214_v30 = vld [vmem:[#allocation3 + $0x61] sm:$0xff] }
 0x490   : > { %16840 = vmatmul.mubr.msk.f32.gmra.mxu1 %vm24173_vm6, %v8842_v27  ;;  %24175 = vst [vmem:[#allocation42_spill] sm:$0xff] %v20693_v23  ;;  %v16494_v51 = vpop.f32.mrf.mxu0  ;;  %vm24179_vm6 = vmmov %vm24085_vm4 }
 0x491   : > { %16842 = vmatprep.mubr.msk.f32.mxu1 %vm24085_vm4, %v8843_v17 }
 0x492   : > { %16793 = vmatmul.mubr.msk.f32.gmra.mxu0 %vm24176_vm12, %v8422_v62  ;;  %v16544_v19 = vpop.f32.mrf.mxu1  ;;  %v20703_v17 = vpop.f32.mrf.mxu0  ;;  %vm24182_vm12 = vmmov %vm24085_vm4 }
 0x493   : > { %16795 = vmatprep.mubr.msk.f32.mxu0 %vm24178_vm10, %v8455_v34  ;;  %v20700_v27 = vadd.f32 %v16544_v19, %v16494_v51  ;;  %24180 = vst [vmem:[#allocation122_spill] sm:$0xff] %v20703_v17  ;;  %v8847_v34 = vld [vmem:[#allocation3 + $0x118] sm:$0xff]  ;;  %vm24184_vm10 = vmmov %vm24085_vm4 }
 0x494   : > { %16843 = vmatmul.mubr.msk.f32.gmra.mxu1 %vm24179_vm6, %v8844_v25  ;;  %v20707_v43 = vpop.f32.mrf.mxu1  ;;  %v8426_v51 = vld [vmem:[#allocation3 + $0x11f] sm:$0xff]  ;;  %vm24185_vm6 = vmmov %vm24085_vm4 }
 0x495   : > { %16845 = vmatprep.mubr.msk.f32.mxu1 %vm24085_vm4, %v20514_v18  ;;  %24181 = vst [vmem:[#allocation44_spill] sm:$0xff] %v20707_v43 }
 0x496   : > { %v16497_v62 = vpop.f32.mrf.mxu0  ;;  %16796 = vmatmul.mubr.msk.f32.gmra.mxu0 %vm24182_vm12, %v20353_v6  ;;  %v8848_v6 = vld [vmem:[#allocation3 + $0x120] sm:$0xff]  ;;  %vm24188_vm12 = vmmov %vm24085_vm4 }
 0x497   : > { %v16547_v44 = vpop.f32.mrf.mxu1  ;;  %16798 = vmatprep.mubr.msk.f32.mxu0 %vm24184_vm10, %v8457_v61  ;;  %vm24189_vm10 = vmmov %vm24085_vm4  ;;  %v9240_v61 = vsel %vm18232_vm15, %v9208_v40, 0.0 }
 0x498   : > { %v20714_v19 = vadd.f32 %v16547_v44, %v16497_v62  ;;  %16846 = vmatmul.mubr.msk.f32.gmra.mxu1 %vm24185_vm6, %v20528_v5  ;;  %v20718_v18 = vpop.f32.mrf.mxu0  ;;  %vm24191_vm6 = vmmov %vm24085_vm4 }
 0x499   : > { %24186 = vst [vmem:[#allocation124_spill] sm:$0xff] %v20718_v18  ;;  %v20720_v25 = vpop.f32.mrf.mxu1  ;;  %16848 = vmatprep.mubr.msk.f32.mxu1 %vm24085_vm4, %v8847_v34  ;;  %v24193_v18 = vld [vmem:[#allocation132_spill] sm:$0xff] }
 0x49a   : > { %24187 = vst [vmem:[#allocation20_spill] sm:$0xff] %v20720_v25  ;;  %v16500_v43 = vpop.f32.mrf.mxu0  ;;  %16799 = vmatmul.mubr.msk.f32.gmra.mxu0 %vm24188_vm12, %v8426_v51  ;;  %v9209_v51 = vld [vmem:[#allocation3 + $0x39] sm:$0xff]  ;;  %v9210_v25 = vld [vmem:[#allocation3 + $0x41] sm:$0xff]  ;;  %vm24194_vm12 = vmmov %vm24085_vm4 }
 0x49b   : > { %v16550_v17 = vpop.f32.mrf.mxu1  ;;  %16853 = vmatprep.mubr.msk.f32.mxu0 %vm24189_vm10, %v9207_v33  ;;  %vm24195_vm10 = vmmov %vm24085_vm4 }
 0x49c   : > { %v20725_v44 = vadd.f32 %v16550_v17, %v16500_v43  ;;  %v20727_v62 = vpop.f32.mrf.mxu0  ;;  %16849 = vmatmul.mubr.msk.f32.gmra.mxu1 %vm24191_vm6, %v8848_v6  ;;  %v9242_v6 = vsel %vm18254_vm14, %v9210_v25, 0.0  ;;  %vm24196_vm6 = vmmov %vm24085_vm4  ;;  %v9244_v25 = vsel %vm18285_vm1, %v9212_v63, 0.0 }
 0x49d   : > { %24190 = vst [vmem:[#allocation21_spill] sm:$0xff] %v20727_v62  ;;  %v20730_v5 = vpop.f32.mrf.mxu1 }
 0x49e   : > { %24192 = vst [vmem:[#allocation85_spill] sm:$0xff] %v20730_v5  ;;  %v16555_v34 = vpop.f32.mrf.mxu0  ;;  %16854 = vmatmul.mubr.msk.f32.vlgmr.msra.gmra.mxu0 %vm24085_vm4, %v9240_v61  ;;  %v9211_v61 = vld [vmem:[#allocation3 + $0x49] sm:$0xff] }
 0x49f   : > { %v7130_v23 = vadd.f32 %v16555_v34, %v24193_v18  ;;  %16856 = vmatprep.mubr.msk.f32.mxu0 %vm24194_vm12, %v9209_v51  ;;  %vm24197_vm12 = vmmov %vm24085_vm4 }
 0x4a0   : > { %v16605_v43 = vpop.f32.mrf.mxu1  ;;  %v20737_v17 = vpop.f32.mrf.mxu0 }
 0x4a1   : > { %v20739_v33 = vadd.f32 %v16605_v43, %v7130_v23 }
 0x4a2   : > { %v20743_v5 = vpop.f32.mrf.mxu1  ;;  %v16558_v40 = vpop.f32.mrf.mxu0  ;;  %16857 = vmatmul.mubr.msk.f32.gmra.mxu0 %vm24195_vm10, %v9242_v6  ;;  %v9213_v6 = vld [vmem:[#allocation3 + $0x59] sm:$0xff]  ;;  %vm24198_vm10 = vcmask 1041408  }
 0x4a3   : > { %v7132_v62 = vadd.f32 %v16558_v40, %v20559_v37  ;;  %16859 = vmatprep.mubr.msk.f32.mxu0 %vm24196_vm6, %v9211_v61  ;;  %vm24199_vm6 = vmmov %vm24198_vm10 }
 0x4a4   : > { %v16608_v18 = vpop.f32.mrf.mxu1  ;;  %v6980_v34 = vpop.f32.mrf.mxu0 }
 0x4a5   : > { %v20748_v51 = vadd.f32 %v16608_v18, %v7132_v62  ;;  %v20751_v23 = vadd.f32 %v6980_v34, %v20563_v53  ;;  %v9668_v62 = vld [vmem:[%s23061_s11] sm:$0x3]  ;;  %v9246_v18 = vsel %vm18307_vm2, %v9214_v30, 0.0 }
 0x4a6   : > { %v20755_v43 = vpop.f32.mrf.mxu1  ;;  %v16561_v10 = vpop.f32.mrf.mxu0  ;;  %16860 = vmatmul.mubr.msk.f32.gmra.mxu0 %vm24085_vm4, %v9244_v25  ;;  %16901 = vmatprep.subr.msk.mxu1 %vm24198_vm10, %v9668_v62  ;;  %v9215_v34 = vld [vmem:[#allocation3 + $0x69] sm:$0xff]  ;;  %v9216_v25 = vld [vmem:[#allocation3 + $0x71] sm:$0xff]  ;;  %vm24201_vm10 = vmmov %vm24085_vm4 }
 0x4a7   : > { %v7134_v37 = vadd.f32 %v16561_v10, %v20570_v28  ;;  %16862 = vmatprep.mubr.msk.f32.mxu0 %vm24197_vm12, %v9213_v6  ;;  %16902 = vmatpush3.msk.msra.mxu1 %vm24199_vm6, %v9668_v62  ;;  %vm24200_vm12 = vmmov %vm24085_vm4  ;;  %v9248_v30 = vsel %vm23933_vm0, %v9216_v25, 0.0  ;;  %v9250_v25 = vsel %vm23939_vm8, %v9218_v16, 0.0 }
 0x4a8   : > { %v16611_v53 = vpop.f32.mrf.mxu1  ;;  %v6990_v40 = vpop.f32.mrf.mxu0  ;;  %vm24202_vm6 = vmmov %vm24085_vm4 }
 0x4a9   : > { %v20764_v63 = vadd.f32 %v16611_v53, %v7134_v37  ;;  %v20767_v61 = vadd.f32 %v6990_v40, %v20574_v9 }
 0x4aa   : > { %v20772_v10 = vpop.f32.mrf.mxu1  ;;  %v16564_v28 = vpop.f32.mrf.mxu0  ;;  %16863 = vmatmul.mubr.msk.f32.gmra.mxu0 %vm24085_vm4, %v9246_v18  ;;  %v9217_v18 = vld [vmem:[#allocation3 + $0x79] sm:$0xff] }
 0x4ab   : > { %v7136_v6 = vadd.f32 %v16564_v28, %v20581_v14  ;;  %16865 = vmatprep.mubr.msk.f32.mxu0 %vm24200_vm12, %v9215_v34  ;;  %vm24203_vm12 = vmmov %vm24085_vm4 }
 0x4ac   : > { %v16614_v37 = vpop.f32.mrf.mxu1  ;;  %v7000_v53 = vpop.f32.mrf.mxu0 }
 0x4ad   : > { %v20777_v9 = vadd.f32 %v16614_v37, %v7136_v6  ;;  %v20780_v40 = vadd.f32 %v7000_v53, %v20585_v21 }
 0x4ae   : > { %v20784_v62 = vpop.f32.mrf.mxu1  ;;  %v16567_v15 = vpop.f32.mrf.mxu0  ;;  %16866 = vmatmul.mubr.msk.f32.gmra.mxu0 %vm24201_vm10, %v9248_v30  ;;  %v9219_v30 = vld [vmem:[#allocation3 + $0x89] sm:$0xff]  ;;  %vm24204_vm10 = vnez %v23944_v0  ;;  %v9224_v0 = vld [vmem:[#allocation3 + $0xb1] sm:$0xff] }
 0x4af   : > { %v7138_v14 = vadd.f32 %v16567_v15, %v20592_v32  ;;  %16868 = vmatprep.mubr.msk.f32.mxu0 %vm24202_vm6, %v9217_v18  ;;  %v9252_v16 = vsel %vm24204_vm10, %v9220_v31, 0.0  ;;  %vm24205_vm6 = vmmov %vm24085_vm4  ;;  %vm24213_vm10 = vnez %v23962_v55  ;;  %v9230_v55 = vld [vmem:[#allocation3 + $0xe1] sm:$0xff] }
 0x4b0   : > { %v16617_v28 = vpop.f32.mrf.mxu1  ;;  %v7010_v34 = vpop.f32.mrf.mxu0 }
 0x4b1   : > { %v20789_v6 = vadd.f32 %v16617_v28, %v7138_v14  ;;  %v20792_v21 = vadd.f32 %v7010_v34, %v20596_v58 }
 0x4b2   : > { %v20796_v37 = vpop.f32.mrf.mxu1  ;;  %v16570_v53 = vpop.f32.mrf.mxu0  ;;  %16869 = vmatmul.mubr.msk.f32.gmra.mxu0 %vm24085_vm4, %v9250_v25  ;;  %v9221_v25 = vld [vmem:[#allocation3 + $0x99] sm:$0xff] }
 0x4b3   : > { %v7140_v15 = vadd.f32 %v16570_v53, %v20603_v22  ;;  %16871 = vmatprep.mubr.msk.f32.mxu0 %vm24203_vm12, %v9219_v30  ;;  %vm24206_vm12 = vnez %v23950_v2  ;;  %v9226_v2 = vld [vmem:[#allocation3 + $0xc1] sm:$0xff] }
 0x4b4   : > { %v16620_v32 = vpop.f32.mrf.mxu1  ;;  %v7020_v18 = vpop.f32.mrf.mxu0  ;;  %v9254_v31 = vsel %vm24206_vm12, %v9222_v57, 0.0  ;;  %vm24209_vm12 = vnez %v23956_v46 }
 0x4b5   : > { %v20801_v14 = vadd.f32 %v16620_v32, %v7140_v15  ;;  %v20804_v58 = vadd.f32 %v7020_v18, %v20607_v29  ;;  %v9256_v57 = vsel %vm24209_vm12, %v9224_v0, 0.0  ;;  %vm24215_vm12 = vmmov %vm24085_vm4 }
 0x4b6   : > { %v20808_v28 = vpop.f32.mrf.mxu1  ;;  %v16573_v34 = vpop.f32.mrf.mxu0  ;;  %16872 = vmatmul.mubr.msk.f32.gmra.mxu0 %vm24205_vm6, %v9252_v16  ;;  %vm24207_vm6 = vmmov %vm24085_vm4  ;;  %v9223_v16 = vld [vmem:[#allocation3 + $0xa9] sm:$0xff] }
 0x4b7   : > { %v7142_v22 = vadd.f32 %v16573_v34, %v20614_v45  ;;  %16874 = vmatprep.mubr.msk.f32.mxu0 %vm24085_vm4, %v9221_v25 }
 0x4b8   : > { %v16623_v53 = vpop.f32.mrf.mxu1  ;;  %v7030_v30 = vpop.f32.mrf.mxu0 }
 0x4b9   : > { %v20813_v15 = vadd.f32 %v16623_v53, %v7142_v22  ;;  %v20816_v29 = vadd.f32 %v7030_v30, %v20618_v39 }
 0x4ba   : > { %v20820_v32 = vpop.f32.mrf.mxu1  ;;  %v16576_v18 = vpop.f32.mrf.mxu0  ;;  %16875 = vmatmul.mubr.msk.f32.gmra.mxu0 %vm24207_vm6, %v9254_v31  ;;  %vm24211_vm6 = vmmov %vm24085_vm4  ;;  %v9225_v31 = vld [vmem:[#allocation3 + $0xb9] sm:$0xff] }
 0x4bb   : > { %v7144_v45 = vadd.f32 %v16576_v18, %v20625_v36  ;;  %16877 = vmatprep.mubr.msk.f32.mxu0 %vm24085_vm4, %v9223_v16 }
 0x4bc   : > { %v16626_v34 = vpop.f32.mrf.mxu1  ;;  %v7040_v25 = vpop.f32.mrf.mxu0 }
 0x4bd   : > { %v20825_v22 = vadd.f32 %v16626_v34, %v7144_v45  ;;  %v20828_v39 = vadd.f32 %v7040_v25, %v20629_v54  ;;  %v9258_v54 = vsel %vm24213_vm10, %v9226_v2, 0.0  ;;  %v9227_v25 = vld [vmem:[#allocation3 + $0xc9] sm:$0xff] }
 0x4be   : > { %v20832_v53 = vpop.f32.mrf.mxu1  ;;  %v16579_v30 = vpop.f32.mrf.mxu0  ;;  %16878 = vmatmul.mubr.msk.f32.gmra.mxu0 %vm24211_vm6, %v9256_v57  ;;  %v9228_v57 = vld [vmem:[#allocation3 + $0xd1] sm:$0xff]  ;;  %vm24216_vm6 = vmmov %vm24085_vm4 }
 0x4bf   : > { %24208 = vst [vmem:[#allocation86_spill] sm:$0xff] %v20828_v39  ;;  %24210 = vst [vmem:[#allocation88_spill] sm:$0xff] %v20832_v53  ;;  %v7146_v36 = vadd.f32 %v16579_v30, %v20636_v3  ;;  %16880 = vmatprep.mubr.msk.f32.mxu0 %vm24085_vm4, %v9225_v31  ;;  %vm24218_vm4 = vnez %v23968_v26  ;;  %v9232_v26 = vld [vmem:[#allocation3 + $0xf1] sm:$0xff] }
 0x4c0   : > { %v16629_v18 = vpop.f32.mrf.mxu1  ;;  %v20837_v16 = vpop.f32.mrf.mxu0  ;;  %vm24220_vm10 = vmmov %vm24216_vm6 }
 0x4c1   : > { %24212 = vst [vmem:[#allocation91_spill] sm:$0xff] %v20837_v16  ;;  %v20839_v45 = vadd.f32 %v16629_v18, %v7146_v36  ;;  %v9260_v36 = vsel %vm24218_vm4, %v9228_v57, 0.0 }
 0x4c2   : > { %v20843_v0 = vpop.f32.mrf.mxu1  ;;  %v16582_v34 = vpop.f32.mrf.mxu0  ;;  %16881 = vmatmul.mubr.msk.f32.gmra.mxu0 %vm24215_vm12, %v9258_v54  ;;  %v9229_v54 = vld [vmem:[#allocation3 + $0xd9] sm:$0xff]  ;;  %vm24221_vm12 = vmmov %vm24216_vm6 }
 0x4c3   : > { %24214 = vst [vmem:[#allocation48_spill] sm:$0xff] %v20843_v0  ;;  %v7148_v46 = vadd.f32 %v16582_v34, %v20649_v60  ;;  %16883 = vmatprep.mubr.msk.f32.mxu0 %vm24216_vm6, %v9227_v25 }
 0x4c4   : > { %v16632_v3 = vpop.f32.mrf.mxu1  ;;  %v20848_v30 = vpop.f32.mrf.mxu0 }
 0x4c5   : > { %24217 = vst [vmem:[#allocation125_spill] sm:$0xff] %v20848_v30  ;;  %v20850_v31 = vadd.f32 %v16632_v3, %v7148_v46  ;;  %v9262_v46 = vsel %vm24063_vm13, %v9230_v55, 0.0 }
 0x4c6   : > { %v20854_v2 = vpop.f32.mrf.mxu1  ;;  %v16585_v18 = vpop.f32.mrf.mxu0  ;;  %16884 = vmatmul.mubr.msk.f32.gmra.mxu0 %vm24220_vm10, %v9260_v36  ;;  %v9231_v36 = vld [vmem:[#allocation3 + $0xe9] sm:$0xff]  ;;  %vm24224_vm10 = vmmov %vm24216_vm6 }
 0x4c7   : > { %24219 = vst [vmem:[#allocation45_spill] sm:$0xff] %v20854_v2  ;;  %v7150_v56 = vadd.f32 %v16585_v18, %v20662_v24  ;;  %16886 = vmatprep.mubr.msk.f32.mxu0 %vm24221_vm12, %v9229_v54  ;;  %vm24227_vm12 = vmmov %vm24216_vm6 }
 0x4c8   : > { %v16635_v60 = vpop.f32.mrf.mxu1  ;;  %v20859_v34 = vpop.f32.mrf.mxu0 }
 0x4c9   : > { %24222 = vst [vmem:[#allocation127_spill] sm:$0xff] %v20859_v34  ;;  %v20861_v25 = vadd.f32 %v16635_v60, %v7150_v56  ;;  %v9264_v56 = vsel %vm24069_vm7, %v9232_v26, 0.0  ;;  %vm24231_vm7 = vmmov %vm24216_vm6 }
 0x4ca   : > { %v20865_v57 = vpop.f32.mrf.mxu1  ;;  %v16588_v3 = vpop.f32.mrf.mxu0  ;;  %16887 = vmatmul.mubr.msk.f32.gmra.mxu0 %vm24216_vm6, %v9262_v46  ;;  %v9233_v46 = vld [vmem:[#allocation3 + $0xf9] sm:$0xff] }
 0x4cb   : > { %24223 = vst [vmem:[#allocation89_spill] sm:$0xff] %v20865_v57  ;;  %v7152_v35 = vadd.f32 %v16588_v3, %v20675_v1  ;;  %16889 = vmatprep.mubr.msk.f32.mxu0 %vm24224_vm10, %v9231_v36  ;;  %vm24229_vm10 = vnez %v23986_v11 }
 0x4cc   : > { %v16638_v24 = vpop.f32.mrf.mxu1  ;;  %v20870_v18 = vpop.f32.mrf.mxu0 }
 0x4cd   : > { %24225 = vst [vmem:[#allocation90_spill] sm:$0xff] %v20870_v18  ;;  %v20872_v54 = vadd.f32 %v16638_v24, %v7152_v35  ;;  %v9266_v35 = vsel %vm24229_vm10, %v9234_v13, 0.0  ;;  %vm24236_vm10 = vmmov %vm24231_vm7 }
 0x4ce   : > { %v20876_v55 = vpop.f32.mrf.mxu1  ;;  %v16591_v60 = vpop.f32.mrf.mxu0  ;;  %16890 = vmatmul.mubr.msk.f32.gmra.mxu0 %vm24227_vm12, %v9264_v56  ;;  %vm24232_vm12 = vmmov %vm24216_vm6 }
 0x4cf   : > { %24226 = vst [vmem:[#allocation23_spill] sm:$0xff] %v20876_v55  ;;  %v7154_v57 = vadd.f32 %v16591_v60, %v20687_v49  ;;  %16892 = vmatprep.mubr.msk.f32.mxu0 %vm24216_vm6, %v9233_v46  ;;  %v9237_v46 = vld [vmem:[#allocation3 + $0x119] sm:$0xff]  ;;  %vm24234_vm6 = vnez %v23991_v4 }
 0x4d0   : > { %v16641_v1 = vpop.f32.mrf.mxu1  ;;  %v20881_v3 = vpop.f32.mrf.mxu0  ;;  %v9268_v13 = vsel %vm24234_vm6, %v20524_v8, 0.0  ;;  %vm24429_vm6 = vmmov %vm24231_vm7 }
 0x4d1   : > { %24228 = vst [vmem:[#allocation24_spill] sm:$0xff] %v20881_v3  ;;  %v20883_v36 = vadd.f32 %v16641_v1, %v7154_v57 }
 0x4d2   : > { %v20887_v26 = vpop.f32.mrf.mxu1  ;;  %v16594_v24 = vpop.f32.mrf.mxu0  ;;  %16893 = vmatmul.mubr.msk.f32.gmra.mxu0 %vm24231_vm7, %v9266_v35 }
 0x4d3   : > { %24230 = vst [vmem:[#allocation92_spill] sm:$0xff] %v20887_v26  ;;  %v7156_v56 = vadd.f32 %v16594_v24, %v20700_v27  ;;  %16895 = vmatprep.mubr.msk.f32.mxu0 %vm24232_vm12, %v20522_v7  ;;  %v9270_v7 = vsel %vm23997_vm11, %v9238_v48, 0.0  ;;  %vm24239_vm12 = vmmov %vm24231_vm7 }
 0x4d4   : > { %v16644_v49 = vpop.f32.mrf.mxu1  ;;  %v20893_v60 = vpop.f32.mrf.mxu0  ;;  %vm24427_vm11 = vmmov %vm24231_vm7 }
 0x4d5   : > { %24233 = vst [vmem:[#allocation95_spill] sm:$0xff] %v20893_v60  ;;  %v20895_v57 = vadd.f32 %v16644_v49, %v7156_v56 }
 0x4d6   : > { %v20900_v1 = vpop.f32.mrf.mxu1  ;;  %v16597_v11 = vpop.f32.mrf.mxu0  ;;  %16896 = vmatmul.mubr.msk.f32.gmra.mxu0 %vm24231_vm7, %v9268_v13 }
 0x4d7   : > { %24235 = vst [vmem:[#allocation63_spill] sm:$0xff] %v20900_v1  ;;  %v7158_v27 = vadd.f32 %v16597_v11, %v20714_v19  ;;  %16898 = vmatprep.mubr.msk.f32.mxu0 %vm24236_vm10, %v9237_v46  ;;  %vm24308_vm10 = vmmov %vm24231_vm7 }
 0x4d8   : > { %v16647_v35 = vpop.f32.mrf.mxu1  ;;  %v20907_v24 = vpop.f32.mrf.mxu0 }
 0x4d9   : > { %24237 = vst [vmem:[#allocation128_spill] sm:$0xff] %v20907_v24  ;;  %v20909_v56 = vadd.f32 %v16647_v35, %v7158_v27 }
 0x4da   : > { %v20911_v49 = vpop.f32.mrf.mxu1  ;;  %v16600_v8 = vpop.f32.mrf.mxu0  ;;  %16899 = vmatmul.mubr.msk.f32.gmra.mxu0 %vm24239_vm12, %v9270_v7  ;;  %vm24309_vm12 = vmmov %vm24231_vm7 }
 0x4db   : > { %24238 = vst [vmem:[#allocation64_spill] sm:$0xff] %v20911_v49  ;;  %v7160_v4 = vadd.f32 %v16600_v8, %v20725_v44 }
 0x4dc   : > { %v16650_v13 = vpop.f32.mrf.mxu1  ;;  %v20915_v1 = vpop.f32.mrf.mxu0 }
 0x4dd   : > { %24240 = vst [vmem:[#allocation130_spill] sm:$0xff] %v20915_v1  ;;  %v20917_v11 = vadd.f32 %v16650_v13, %v7160_v4 }
 0x4de   : > { %v20919_v19 = vpop.f32.mrf.mxu1  ;;  %v16655_v48 = vpop.f32.mrf.mxu0 }
 0x4df   : > { %24241 = vst [vmem:[#allocation26_spill] sm:$0xff] %v20919_v19  ;;  %v20922_v46 = vadd.f32 %v16655_v48, %v20739_v33 }
 0x4e0   : > { %v20924_v27 = vpop.f32.mrf.mxu1  ;;  %v20926_v35 = vpop.f32.mrf.mxu0 }
 0x4e2   : > { %v20928_v20 = vpop.f32.mrf.mxu1  ;;  %v16658_v7 = vpop.f32.mrf.mxu0 }
 0x4e3   : > { %v20931_v44 = vadd.f32 %v16658_v7, %v20748_v51 }
 0x4e4   : > { %v20933_v8 = vpop.f32.mrf.mxu1  ;;  %v20935_v4 = vpop.f32.mrf.mxu0 }
 0x4e6   : > { %v20937_v13 = vpop.f32.mrf.mxu1  ;;  %v16661_v19 = vpop.f32.mrf.mxu0 }
 0x4e7   : > { %v20940_v33 = vadd.f32 %v16661_v19, %v20764_v63 }
 0x4e8   : > { %v20942_v48 = vpop.f32.mrf.mxu1  ;;  %v20944_v1 = vpop.f32.mrf.mxu0 }
 0x4ea   : > { %v20946_v49 = vpop.f32.mrf.mxu1  ;;  %v16664_v24 = vpop.f32.mrf.mxu0 }
 0x4eb   : > { %v20949_v51 = vadd.f32 %v16664_v24, %v20777_v9 }
 0x4ec   : > { %v20951_v7 = vpop.f32.mrf.mxu1  ;;  %v20953_v60 = vpop.f32.mrf.mxu0 }
 0x4ee   : > { %v20955_v26 = vpop.f32.mrf.mxu1  ;;  %v16667_v55 = vpop.f32.mrf.mxu0 }
 0x4ef   : > { %v20958_v63 = vadd.f32 %v16667_v55, %v20789_v6 }
 0x4f0   : > { %v20960_v19 = vpop.f32.mrf.mxu1  ;;  %v20962_v3 = vpop.f32.mrf.mxu0 }
 0x4f2   : > { %v20964_v18 = vpop.f32.mrf.mxu1  ;;  %v16670_v2 = vpop.f32.mrf.mxu0 }
 0x4f3   : > { %v20967_v9 = vadd.f32 %v16670_v2, %v20801_v14 }
 0x4f4   : > { %v20969_v24 = vpop.f32.mrf.mxu1  ;;  %v20971_v34 = vpop.f32.mrf.mxu0 }
 0x4f5   : > { %24242 = vst [vmem:[#allocation27_spill] sm:$0xff] %v20967_v9  ;;  %24243 = vst [vmem:[#allocation93_spill] sm:$0xff] %v20969_v24 }
 0x4f6   : > { %v20973_v52 = vpop.f32.mrf.mxu1  ;;  %v16673_v41 = vpop.f32.mrf.mxu0 }
 0x4f7   : > { %24244 = vst [vmem:[#allocation94_spill] sm:$0xff] %v20973_v52  ;;  %v20976_v6 = vadd.f32 %v16673_v41, %v20813_v15 }
 0x4f8   : > { %v20978_v55 = vpop.f32.mrf.mxu1  ;;  %v20980_v30 = vpop.f32.mrf.mxu0 }
 0x4f9   : > { %24245 = vst [vmem:[#allocation96_spill] sm:$0xff] %v20976_v6  ;;  %24246 = vst [vmem:[#allocation99_spill] sm:$0xff] %v20978_v55 }
 0x4fa   : > { %24247 = vst [vmem:[#allocation66_spill] sm:$0xff] %v20980_v30  ;;  %v20982_v0 = vpop.f32.mrf.mxu1  ;;  %v16676_v38 = vpop.f32.mrf.mxu0 }
 0x4fb   : > { %24248 = vst [vmem:[#allocation131_spill] sm:$0xff] %v20982_v0  ;;  %v20985_v14 = vadd.f32 %v16676_v38, %v20825_v22 }
 0x4fc   : > { %v20987_v2 = vpop.f32.mrf.mxu1  ;;  %v20989_v47 = vpop.f32.mrf.mxu0 }
 0x4fd   : > { %24249 = vst [vmem:[#allocation65_spill] sm:$0xff] %v20985_v14  ;;  %24250 = vst [vmem:[#allocation133_spill] sm:$0xff] %v20987_v2 }
 0x4fe   : > { %24251 = vst [vmem:[#allocation97_spill] sm:$0xff] %v20989_v47  ;;  %v20991_v53 = vpop.f32.mrf.mxu1  ;;  %v16679_v39 = vpop.f32.mrf.mxu0 }
 0x4ff   : > { %24252 = vst [vmem:[#allocation98_spill] sm:$0xff] %v20991_v53  ;;  %v20994_v41 = vadd.f32 %v16679_v39, %v20839_v45 }
 0x500   : > { %v20996_v15 = vpop.f32.mrf.mxu1  ;;  %v20998_v55 = vpop.f32.mrf.mxu0 }
 0x501   : > { %24253 = vst [vmem:[#allocation29_spill] sm:$0xff] %v20994_v41  ;;  %24254 = vst [vmem:[#allocation30_spill] sm:$0xff] %v20996_v15 }
 0x502   : > { %24255 = vst [vmem:[#allocation100_spill] sm:$0xff] %v20998_v55  ;;  %v21000_v6 = vpop.f32.mrf.mxu1  ;;  %v16682_v0 = vpop.f32.mrf.mxu0 }
 0x503   : > { %24256 = vst [vmem:[#allocation103_spill] sm:$0xff] %v21000_v6  ;;  %v21003_v38 = vadd.f32 %v16682_v0, %v20850_v31 }
 0x504   : > { %v21005_v22 = vpop.f32.mrf.mxu1  ;;  %v21007_v2 = vpop.f32.mrf.mxu0 }
 0x505   : > { %24257 = vst [vmem:[#allocation67_spill] sm:$0xff] %v21003_v38  ;;  %24258 = vst [vmem:[#allocation68_spill] sm:$0xff] %v21005_v22 }
 0x506   : > { %24259 = vst [vmem:[#allocation101_spill] sm:$0xff] %v21007_v2  ;;  %v21009_v14 = vpop.f32.mrf.mxu1  ;;  %v16685_v53 = vpop.f32.mrf.mxu0 }
 0x507   : > { %24260 = vst [vmem:[#allocation102_spill] sm:$0xff] %v21009_v14  ;;  %v21012_v39 = vadd.f32 %v16685_v53, %v20861_v25 }
 0x508   : > { %v21014_v45 = vpop.f32.mrf.mxu1  ;;  %v21016_v15 = vpop.f32.mrf.mxu0 }
 0x509   : > { %24261 = vst [vmem:[#allocation104_spill] sm:$0xff] %v21012_v39  ;;  %24262 = vst [vmem:[#allocation107_spill] sm:$0xff] %v21014_v45 }
 0x50a   : > { %24263 = vst [vmem:[#allocation134_spill] sm:$0xff] %v21016_v15  ;;  %v21018_v41 = vpop.f32.mrf.mxu1  ;;  %v16688_v6 = vpop.f32.mrf.mxu0 }
 0x50b   : > { %24264 = vst [vmem:[#allocation69_spill] sm:$0xff] %v21018_v41  ;;  %v21021_v0 = vadd.f32 %v16688_v6, %v20872_v54 }
 0x50c   : > { %v21023_v31 = vpop.f32.mrf.mxu1  ;;  %v21025_v22 = vpop.f32.mrf.mxu0 }
 0x50d   : > { %24265 = vst [vmem:[#allocation135_spill] sm:$0xff] %v21021_v0  ;;  %24266 = vst [vmem:[#allocation105_spill] sm:$0xff] %v21023_v31 }
 0x50e   : > { %24267 = vst [vmem:[#allocation106_spill] sm:$0xff] %v21025_v22  ;;  %v21027_v38 = vpop.f32.mrf.mxu1  ;;  %v16691_v14 = vpop.f32.mrf.mxu0 }
 0x50f   : > { %24268 = vst [vmem:[#allocation108_spill] sm:$0xff] %v21027_v38  ;;  %v21030_v53 = vadd.f32 %v16691_v14, %v20883_v36 }
 0x510   : > { %v21032_v25 = vpop.f32.mrf.mxu1  ;;  %v21034_v45 = vpop.f32.mrf.mxu0 }
 0x511   : > { %24269 = vst [vmem:[#allocation111_spill] sm:$0xff] %v21030_v53  ;;  %24270 = vst [vmem:[#allocation109_spill] sm:$0xff] %v21032_v25 }
 0x512   : > { %24271 = vst [vmem:[#allocation110_spill] sm:$0xff] %v21034_v45  ;;  %v21036_v39 = vpop.f32.mrf.mxu1  ;;  %v16694_v41 = vpop.f32.mrf.mxu0 }
 0x513   : > { %24272 = vst [vmem:[#allocation112_spill] sm:$0xff] %v21036_v39  ;;  %v21039_v54 = vadd.f32 %v16694_v41, %v20895_v57 }
 0x514   : > { %v21041_v6 = vpop.f32.mrf.mxu1  ;;  %v21043_v31 = vpop.f32.mrf.mxu0 }
 0x515   : > { %24273 = vst [vmem:[#allocation8_spill] sm:$0xff] %v21039_v54  ;;  %24274 = vst [vmem:[#allocation70_spill] sm:$0xff] %v21041_v6 }
 0x516   : > { %24275 = vst [vmem:[#allocation71_spill] sm:$0xff] %v21043_v31  ;;  %v21045_v0 = vpop.f32.mrf.mxu1  ;;  %v16697_v38 = vpop.f32.mrf.mxu0 }
 0x517   : > { %24276 = vst [vmem:[#allocation75_spill] sm:$0xff] %v21045_v0  ;;  %v21048_v36 = vadd.f32 %v16697_v38, %v20909_v56 }
 0x518   : > { %v21050_v14 = vpop.f32.mrf.mxu1  ;;  %v21052_v25 = vpop.f32.mrf.mxu0 }
 0x519   : > { %24277 = vst [vmem:[#allocation35_spill] sm:$0xff] %v21048_v36  ;;  %24278 = vst [vmem:[#allocation114_spill] sm:$0xff] %v21050_v14 }
 0x51a   : > { %24279 = vst [vmem:[#allocation32_spill] sm:$0xff] %v21052_v25  ;;  %v21054_v53 = vpop.f32.mrf.mxu1  ;;  %v16700_v39 = vpop.f32.mrf.mxu0 }
 0x51b   : > { %24280 = vst [vmem:[#allocation123_spill] sm:$0xff] %v21054_v53  ;;  %v21057_v57 = vadd.f32 %v16700_v39, %v20917_v11  ;;  %v14526_v53 = vld [vmem:[%s23063_s13 + $0x8] sm:$0xff] }
 0x51c   : > { %v21059_v41 = vpop.f32.mrf.mxu1  ;;  %v21061_v6 = vpop.f32.mrf.mxu0  ;;  %16951 = vmatprep.subr.mxu0 %v14526_v53 }
 0x51d   : > { %24281 = vst [vmem:[#allocation115_spill] sm:$0xff] %v21057_v57  ;;  %24282 = vst [vmem:[#allocation74_spill] sm:$0xff] %v21059_v41  ;;  %16952 = vmatpush3.msra.mxu0 %v14526_v53 }
 0x51e   : > { %24283 = vst [vmem:[#allocation11_spill] sm:$0xff] %v21061_v6  ;;  %v21063_v54 = vpop.f32.mrf.mxu1  ;;  %v16755_v0 = vpop.f32.mrf.mxu0 }
 0x51f   : > { %24284 = vst [vmem:[#allocation76_spill] sm:$0xff] %v21063_v54 }
 0x520   : > { %v21065_v31 = vpop.f32.mrf.mxu1  ;;  %v8626_v56 = vpop.f32.mrf.mxu0 }
 0x522   : > { %v21067_v38 = vpop.f32.mrf.mxu1  ;;  %v21069_v14 = vpop.f32.mrf.mxu0 }
 0x524   : > { %v21074_v11 = vpop.f32.mrf.mxu1  ;;  %v21076_v39 = vpop.f32.mrf.mxu0 }
 0x526   : > { %v21078_v41 = vpop.f32.mrf.mxu0  ;;  %v21080_v54 = vpop.f32.mrf.mxu1 }
 0x528   : > { %v21082_v57 = vpop.f32.mrf.mxu0  ;;  %v21086_v36 = vpop.f32.mrf.mxu1 }
 0x52a   : > { %v21084_v6 = vpop.f32.mrf.mxu0  ;;  %v21092_v22 = vpop.f32.mrf.mxu1 }
 0x52c   : > { %v21088_v25 = vpop.f32.mrf.mxu0  ;;  %v21098_v53 = vpop.f32.mrf.mxu1 }
 0x52e   : > { %v21090_v45 = vpop.f32.mrf.mxu0  ;;  %v21104_v16 = vpop.f32.mrf.mxu1 }
 0x52f   : > { %24289 = vst [vmem:[#allocation118_spill] sm:$0xff] %v21104_v16 }
 0x530   : > { %v21094_v15 = vpop.f32.mrf.mxu0  ;;  %v21110_v24 = vpop.f32.mrf.mxu1 }
 0x531   : > { %24285 = vst [vmem:[#allocation79_spill] sm:$0xff] %v21094_v15  ;;  %24292 = vst [vmem:[#allocation80_spill] sm:$0xff] %v21110_v24 }
 0x532   : > { %v21096_v2 = vpop.f32.mrf.mxu0  ;;  %v21116_v50 = vpop.f32.mrf.mxu1 }
 0x533   : > { %24286 = vst [vmem:[#allocation126_spill] sm:$0xff] %v21096_v2  ;;  %24295 = vst [vmem:[#allocation117_spill] sm:$0xff] %v21116_v50 }
 0x534   : > { %v21100_v55 = vpop.f32.mrf.mxu0 }
 0x535   : > { %24287 = vst [vmem:[#allocation116_spill] sm:$0xff] %v21100_v55  ;;  %v21122_v55 = vpop.f32.mrf.mxu1 }
 0x536   : > { %v21102_v47 = vpop.f32.mrf.mxu0  ;;  %24298 = vst [vmem:[#allocation72_spill] sm:$0xff] %v21122_v55 }
 0x537   : > { %24288 = vst [vmem:[#allocation129_spill] sm:$0xff] %v21102_v47 }
 0x538   : > { %v21106_v30 = vpop.f32.mrf.mxu0 }
 0x539   : > { %24290 = vst [vmem:[#allocation15_spill] sm:$0xff] %v21106_v30  ;;  %v21128_v30 = vpop.f32.mrf.mxu1 }
 0x53a   : > { %v21108_v52 = vpop.f32.mrf.mxu0  ;;  %24301 = vst [vmem:[#allocation73_spill] sm:$0xff] %v21128_v30 }
 0x53b   : > { %24291 = vst [vmem:[#allocation77_spill] sm:$0xff] %v21108_v52 }
 0x53c   : > { %v21112_v9 = vpop.f32.mrf.mxu0 }
 0x53d   : > { %24293 = vst [vmem:[#allocation83_spill] sm:$0xff] %v21112_v9  ;;  %v21134_v9 = vpop.f32.mrf.mxu1 }
 0x53e   : > { %v21114_v42 = vpop.f32.mrf.mxu0  ;;  %24304 = vst [vmem:[#allocation38_spill] sm:$0xff] %v21134_v9 }
 0x53f   : > { %24294 = vst [vmem:[#allocation41_spill] sm:$0xff] %v21114_v42 }
 0x540   : > { %v21118_v2 = vpop.f32.mrf.mxu0 }
 0x541   : > { %24296 = vst [vmem:[#allocation113_spill] sm:$0xff] %v21118_v2  ;;  %v6581_v2 = vadd.f32 %v20551_v59, %v20548_v12  ;;  %v7553_v12 = vadd.f32 %v20755_v43, %v20751_v23  ;;  %v8364_v59 = vadd.f32 %v20924_v27, %v20922_v46  ;;  %v8366_v23 = vadd.f32 %v20933_v8, %v20931_v44 }
 0x542   : > { %v21120_v15 = vpop.f32.mrf.mxu0  ;;  %v8368_v8 = vadd.f32 %v20942_v48, %v20940_v33  ;;  %v7559_v33 = vadd.f32 %v20796_v37, %v20792_v21 }
 0x543   : > { %24297 = vst [vmem:[#allocation9_spill] sm:$0xff] %v21120_v15  ;;  %v7129_v55 = vadd.f32 %v20737_v17, %v6581_v2 }
 0x544   : > { %v21124_v47 = vpop.f32.mrf.mxu0 }
 0x545   : > { %24299 = vst [vmem:[#allocation120_spill] sm:$0xff] %v21124_v47  ;;  %v21143_v47 = vpop.f32.mrf.mxu1 }
 0x546   : > { %v21126_v16 = vpop.f32.mrf.mxu0 }
 0x547   : > { %24300 = vst [vmem:[#allocation33_spill] sm:$0xff] %v21126_v16 }
 0x548   : > { %v21130_v52 = vpop.f32.mrf.mxu0 }
 0x549   : > { %24302 = vst [vmem:[#allocation12_spill] sm:$0xff] %v21130_v52  ;;  %v7551_v52 = vadd.f32 %v20743_v5, %v7129_v55  ;;  %v7943_v55 = vadd.f32 %v20935_v4, %v7553_v12  ;;  %v8788_v4 = vadd.f32 %v21069_v14, %v8366_v23  ;;  %v8790_v14 = vadd.f32 %v21078_v41, %v8368_v8  ;;  %v24315_v8 = vld [vmem:[#allocation27_spill] sm:$0xff] }
 0x54a   : > { %v21132_v24 = vpop.f32.mrf.mxu0 }
 0x54b   : > { %24303 = vst [vmem:[#allocation36_spill] sm:$0xff] %v21132_v24  ;;  %v21150_v24 = vpop.f32.mrf.mxu1  ;;  %v8365_v27 = vadd.f32 %v20937_v13, %v7943_v55  ;;  %v9180_v37 = vadd.f32 %v21086_v36, %v8790_v14 }
 0x54c   : > { %v21136_v42 = vpop.f32.mrf.mxu0 }
 0x54d   : > { %24305 = vst [vmem:[#allocation14_spill] sm:$0xff] %v21136_v42  ;;  %v7941_v42 = vadd.f32 %v20926_v35, %v7551_v52  ;;  %v21161_v17 = vpop.f32.mrf.mxu1  ;;  %v7555_v52 = vadd.f32 %v20772_v10, %v20767_v61  ;;  %v7557_v61 = vadd.f32 %v20784_v62, %v20780_v40  ;;  %v8787_v44 = vadd.f32 %v21076_v39, %v8365_v27 }
 0x54e   : > { %v21140_v15 = vpop.f32.mrf.mxu0  ;;  %v9178_v62 = vadd.f32 %v21074_v11, %v8788_v4  ;;  %v8370_v39 = vadd.f32 %v20951_v7, %v20949_v51  ;;  %v7561_v51 = vadd.f32 %v20808_v28, %v20804_v58 }
 0x54f   : > { %v8363_v5 = vadd.f32 %v20928_v20, %v7941_v42  ;;  %v21173_v43 = vpop.f32.mrf.mxu1  ;;  %v7945_v20 = vadd.f32 %v20944_v1, %v7555_v52  ;;  %v9177_v48 = vadd.f32 %v21080_v54, %v8787_v44  ;;  %v7949_v52 = vadd.f32 %v20962_v3, %v7559_v33 }
 0x550   : > { %v21145_v16 = vpop.f32.mrf.mxu0  ;;  %v8792_v54 = vadd.f32 %v21084_v6, %v8370_v39  ;;  %v8372_v3 = vadd.f32 %v20960_v19, %v20958_v63  ;;  %v7563_v63 = vadd.f32 %v20820_v32, %v20816_v29  ;;  %v24311_v19 = vld [vmem:[#allocation118_spill] sm:$0xff] }
 0x551   : > { %v8785_v35 = vadd.f32 %v8626_v56, %v8363_v5  ;;  %v21187_v56 = vpop.f32.mrf.mxu1  ;;  %v8367_v1 = vadd.f32 %v20946_v49, %v7945_v20  ;;  %v8371_v20 = vadd.f32 %v20964_v18, %v7949_v52  ;;  %v24318_v32 = vld [vmem:[#allocation66_spill] sm:$0xff]  ;;  %v24325_v52 = vld [vmem:[#allocation117_spill] sm:$0xff] }
 0x552   : > { %v21147_v30 = vpop.f32.mrf.mxu0  ;;  %v9182_v28 = vadd.f32 %v21098_v53, %v8792_v54 }
 0x553   : > { %24306 = vst [vmem:[#allocation78_spill] sm:$0xff] %v21147_v30  ;;  %v8786_v30 = vadd.f32 %v16755_v0, %v8364_v59  ;;  %v9175_v10 = vadd.f32 %v21067_v38, %v8785_v35  ;;  %v8789_v49 = vadd.f32 %v21082_v57, %v8367_v1  ;;  %v21205_v59 = vpop.f32.mrf.mxu1 }
 0x554   : > { %v21152_v9 = vpop.f32.mrf.mxu0 }
 0x555   : > { %24307 = vst [vmem:[#allocation132_spill] sm:$0xff] %v21152_v9  ;;  %v9176_v42 = vadd.f32 %v21065_v31, %v8786_v30  ;;  %v7947_v30 = vadd.f32 %v20953_v60, %v7557_v61  ;;  %v21194_v31 = vld [vmem:[%s23060_s10] ss:$0 sm:$0xff]  ;;  %v9179_v7 = vadd.f32 %v21092_v22, %v8789_v49  ;;  %v21221_v23 = vpop.f32.mrf.mxu1  ;;  %v8794_v22 = vadd.f32 %v21090_v45, %v8372_v3 }
 0x556   : > { %v21155_v50 = vpop.f32.mrf.mxu0 }
 0x557   : > { %v8369_v41 = vadd.f32 %v20955_v26, %v7947_v30 }
 0x558   : > { %v21163_v2 = vpop.f32.mrf.mxu0 }
 0x559   : > { %v8791_v35 = vadd.f32 %v21088_v25, %v8369_v41 }
 0x55a   : > { %v21167_v9 = vpop.f32.mrf.mxu0 }
 0x55b   : > { %v9181_v4 = vadd.f32 %v24311_v19, %v8791_v35  ;;  %v24334_v19 = vld [vmem:[#allocation48_spill] sm:$0xff] }
 0x55c   : > { %v21175_v46 = vpop.f32.mrf.mxu0 }
 0x55e   : > { %v16855_v0 = vpop.f32.mrf.mxu0 }
 0x55f   : > { %v9598_v13 = vadd.f32 %v16855_v0, %v9176_v42  ;;  %v7951_v42 = vadd.f32 %v20971_v34, %v7561_v51  ;;  %v24312_v0 = vld [vmem:[#allocation79_spill] sm:$0xff]  ;;  %v24327_v51 = vld [vmem:[#allocation96_spill] sm:$0xff] }
 0x560   : > { %v9438_v12 = vpop.f32.mrf.mxu0  ;;  %v8793_v61 = vadd.f32 %v24312_v0, %v8371_v20  ;;  %v24313_v34 = vld [vmem:[#allocation119_spill] sm:$0xff]  ;;  %v24330_v20 = vld [vmem:[#allocation81_spill] sm:$0xff]  ;;  %v24335_v0 = vld [vmem:[#allocation72_spill] sm:$0xff] }
 0x561   : > { %v9597_v40 = vadd.f32 %v9438_v12, %v9175_v10  ;;  %v9637_v5 = vadd.f32 %v21194_v31, %v9598_v13  ;;  %v24314_v10 = vld [vmem:[#allocation39_spill] sm:$0xff]  ;;  %v24316_v13 = vld [vmem:[#allocation93_spill] sm:$0xff]  ;;  %v21239_v12 = vpop.f32.mrf.mxu1 }
 0x562   : > { %v16858_v38 = vpop.f32.mrf.mxu0  ;;  %v6661_v44 = vadd.f32 %v24314_v10, %v24313_v34  ;;  %v8374_v53 = vadd.f32 %v24316_v13, %v24315_v8  ;;  %v24338_v13 = vld [vmem:[#allocation73_spill] sm:$0xff] }
 0x563   : > { %v9636_v60 = vadd.f32 %v21194_v31, %v9597_v40  ;;  %v9600_v11 = vadd.f32 %v16858_v38, %v9178_v62  ;;  %v24317_v40 = vld [vmem:[#allocation94_spill] sm:$0xff]  ;;  %v7953_v62 = vadd.f32 %v24318_v32, %v7563_v63  ;;  %v24319_v38 = vld [vmem:[#allocation91_spill] sm:$0xff] }
 0x564   : > { %v9448_v55 = vpop.f32.mrf.mxu0  ;;  %v8373_v29 = vadd.f32 %v24317_v40, %v7951_v42  ;;  %v7145_v33 = vadd.f32 %v24319_v38, %v6661_v44  ;;  %v24337_v44 = vld [vmem:[#allocation125_spill] sm:$0xff]  ;;  %v24340_v40 = vld [vmem:[#allocation82_spill] sm:$0xff] }
 0x565   : > { %v9599_v21 = vadd.f32 %v9448_v55, %v9177_v48  ;;  %16903 = vmatprep.mubr.msk.f32.mxu1 %vm24308_vm10, %v9636_v60  ;;  %v9639_v36 = vadd.f32 %v21194_v31, %v9600_v11  ;;  %vm24310_vm10 = vmmov %vm24231_vm7  ;;  %v24320_v48 = vld [vmem:[#allocation80_spill] sm:$0xff]  ;;  %v24321_v60 = vld [vmem:[#allocation126_spill] sm:$0xff] }
 0x566   : > { %v16861_v57 = vpop.f32.mrf.mxu0  ;;  %16904 = vmatmul.mubr.msk.f32.vlgmr.msra.gmra.mxu1 %vm24231_vm7, %v9637_v5  ;;  %v9184_v49 = vadd.f32 %v24320_v48, %v8794_v22  ;;  %v8796_v39 = vadd.f32 %v24321_v60, %v8374_v53  ;;  %v24323_v11 = vld [vmem:[#allocation86_spill] sm:$0xff]  ;;  %v24324_v55 = vld [vmem:[#allocation88_spill] sm:$0xff]  ;;  %v24332_v22 = vld [vmem:[#allocation97_spill] sm:$0xff] }
 0x567   : > { %v9638_v26 = vadd.f32 %v21194_v31, %v9599_v21  ;;  %v9602_v6 = vadd.f32 %v16861_v57, %v9180_v37  ;;  %v7565_v41 = vadd.f32 %v24324_v55, %v24323_v11  ;;  %v9183_v21 = vadd.f32 %v24325_v52, %v8793_v61  ;;  %v24326_v37 = vld [vmem:[#allocation116_spill] sm:$0xff]  ;;  %v24347_v52 = vld [vmem:[#allocation127_spill] sm:$0xff] }
 0x568   : > { %v9458_v27 = vpop.f32.mrf.mxu0  ;;  %v8795_v54 = vadd.f32 %v24326_v37, %v8373_v29  ;;  %v9186_v61 = vadd.f32 %v24335_v0, %v8796_v39  ;;  %v24341_v29 = vld [vmem:[#allocation17_spill] sm:$0xff]  ;;  %v24344_v39 = vld [vmem:[#allocation98_spill] sm:$0xff]  ;;  %v24345_v11 = vld [vmem:[#allocation100_spill] sm:$0xff] }
 0x569   : > { %v9601_v58 = vadd.f32 %v9458_v27, %v9179_v7  ;;  %16906 = vmatprep.mubr.msk.f32.mxu1 %vm24309_vm12, %v9638_v26  ;;  %v9641_v45 = vadd.f32 %v21194_v31, %v9602_v6  ;;  %vm24322_vm12 = vmmov %vm24231_vm7  ;;  %v24328_v7 = vld [vmem:[#allocation99_spill] sm:$0xff]  ;;  %v21256_v26 = vpop.f32.mrf.mxu1  ;;  %v24329_v27 = vld [vmem:[#allocation121_spill] sm:$0xff]  ;;  %v6681_v32 = vadd.f32 %v24341_v29, %v24340_v40 }
 0x56a   : > { %v16864_v25 = vpop.f32.mrf.mxu0  ;;  %16907 = vmatmul.mubr.msk.f32.gmra.mxu1 %vm24310_vm10, %v9639_v36  ;;  %v8376_v35 = vadd.f32 %v24328_v7, %v24327_v51  ;;  %v6671_v42 = vadd.f32 %v24330_v20, %v24329_v27  ;;  %vm24333_vm10 = vmmov %vm24231_vm7  ;;  %v9185_v53 = vadd.f32 %v24338_v13, %v8795_v54  ;;  %v24348_v37 = vld [vmem:[#allocation38_spill] sm:$0xff]  ;;  %v24356_v0 = vld [vmem:[#allocation84_spill] sm:$0xff] }
 0x56b   : > { %v9640_v18 = vadd.f32 %v21194_v31, %v9601_v58  ;;  %v9604_v1 = vadd.f32 %v16864_v25, %v9182_v28  ;;  %v24331_v58 = vld [vmem:[#allocation131_spill] sm:$0xff]  ;;  %v7955_v25 = vadd.f32 %v24332_v22, %v7565_v41  ;;  %v24362_v40 = vld [vmem:[#allocation90_spill] sm:$0xff] }
 0x56c   : > { %v9468_v30 = vpop.f32.mrf.mxu0  ;;  %v8375_v28 = vadd.f32 %v24331_v58, %v7953_v62  ;;  %v7147_v8 = vadd.f32 %v24337_v44, %v6671_v42  ;;  %v24342_v62 = vld [vmem:[#allocation65_spill] sm:$0xff]  ;;  %v24354_v58 = vld [vmem:[#allocation30_spill] sm:$0xff] }
 0x56d   : > { %v9603_v14 = vadd.f32 %v9468_v30, %v9181_v4  ;;  %16909 = vmatprep.mubr.msk.f32.mxu1 %vm24231_vm7, %v9640_v18  ;;  %v9643_v3 = vadd.f32 %v21194_v31, %v9604_v1  ;;  %v7567_v4 = vadd.f32 %v24334_v19, %v7145_v33  ;;  %v24336_v18 = vld [vmem:[#allocation129_spill] sm:$0xff]  ;;  %v21276_v33 = vpop.f32.mrf.mxu1 }
 0x56e   : > { %v16867_v5 = vpop.f32.mrf.mxu0  ;;  %16910 = vmatmul.mubr.msk.f32.gmra.mxu1 %vm24322_vm12, %v9641_v45  ;;  %v8798_v34 = vadd.f32 %v24336_v18, %v8376_v35  ;;  %v24339_v45 = vld [vmem:[#allocation15_spill] sm:$0xff]  ;;  %vm24346_vm12 = vmmov %vm24231_vm7  ;;  %v24351_v35 = vld [vmem:[#allocation45_spill] sm:$0xff] }
 0x56f   : > { %v9642_v57 = vadd.f32 %v21194_v31, %v9603_v14  ;;  %v9606_v36 = vadd.f32 %v16867_v5, %v9184_v49  ;;  %v8797_v1 = vadd.f32 %v24339_v45, %v8375_v28  ;;  %v24343_v14 = vld [vmem:[#allocation133_spill] sm:$0xff]  ;;  %v8377_v5 = vadd.f32 %v24344_v39, %v7955_v25  ;;  %v21292_v22 = vpop.f32.mrf.mxu1  ;;  %v24357_v18 = vld [vmem:[#allocation103_spill] sm:$0xff] }
 0x570   : > { %v9478_v6 = vpop.f32.mrf.mxu0  ;;  %v8378_v38 = vadd.f32 %v24343_v14, %v24342_v62  ;;  %v7957_v55 = vadd.f32 %v24345_v11, %v7567_v4  ;;  %v9188_v54 = vadd.f32 %v24348_v37, %v8798_v34  ;;  %v24353_v42 = vld [vmem:[#allocation29_spill] sm:$0xff]  ;;  %v24355_v4 = vld [vmem:[#allocation18_spill] sm:$0xff]  ;;  %v24366_v39 = vld [vmem:[#allocation67_spill] sm:$0xff] }
 0x571   : > { %v9605_v63 = vadd.f32 %v9478_v6, %v9183_v21  ;;  %16912 = vmatprep.mubr.msk.f32.mxu1 %vm24333_vm10, %v9642_v57  ;;  %v9645_v48 = vadd.f32 %v21194_v31, %v9606_v36  ;;  %v7149_v21 = vadd.f32 %v24347_v52, %v6681_v32  ;;  %v24349_v57 = vld [vmem:[#allocation77_spill] sm:$0xff]  ;;  %vm24350_vm10 = vmmov %vm24231_vm7  ;;  %v9187_v36 = vadd.f32 %v21143_v47, %v8797_v1  ;;  %v24352_v6 = vld [vmem:[#allocation83_spill] sm:$0xff] }
 0x572   : > { %v16870_v10 = vpop.f32.mrf.mxu0  ;;  %16913 = vmatmul.mubr.msk.f32.gmra.mxu1 %vm24231_vm7, %v9643_v3  ;;  %v8800_v51 = vadd.f32 %v24349_v57, %v8378_v38  ;;  %v7569_v3 = vadd.f32 %v24351_v35, %v7147_v8  ;;  %v8799_v27 = vadd.f32 %v24352_v6, %v8377_v5  ;;  %v8380_v28 = vadd.f32 %v24354_v58, %v24353_v42  ;;  %v24359_v8 = vld [vmem:[#allocation89_spill] sm:$0xff]  ;;  %v24367_v5 = vld [vmem:[#allocation68_spill] sm:$0xff] }
 0x573   : > { %v9644_v30 = vadd.f32 %v21194_v31, %v9605_v63  ;;  %v9608_v49 = vadd.f32 %v16870_v10, %v9186_v61  ;;  %v6691_v61 = vadd.f32 %v24356_v0, %v24355_v4  ;;  %v8379_v34 = vadd.f32 %v24357_v18, %v7957_v55  ;;  %v24358_v10 = vld [vmem:[#allocation101_spill] sm:$0xff]  ;;  %v24374_v58 = vld [vmem:[#allocation120_spill] sm:$0xff] }
 0x574   : > { %v9488_v60 = vpop.f32.mrf.mxu0  ;;  %v7959_v47 = vadd.f32 %v24358_v10, %v7569_v3  ;;  %v7571_v13 = vadd.f32 %v24359_v8, %v7149_v21  ;;  %v24360_v45 = vld [vmem:[#allocation41_spill] sm:$0xff]  ;;  %v9189_v32 = vadd.f32 %v21161_v17, %v8799_v27  ;;  %v8382_v11 = vadd.f32 %v24367_v5, %v24366_v39  ;;  %v24368_v21 = vld [vmem:[#allocation102_spill] sm:$0xff]  ;;  %v24373_v27 = vld [vmem:[#allocation23_spill] sm:$0xff] }
 0x575   : > { %v9607_v41 = vadd.f32 %v9488_v60, %v9185_v53  ;;  %16915 = vmatprep.mubr.msk.f32.mxu1 %vm24346_vm12, %v9644_v30  ;;  %v9647_v25 = vadd.f32 %v21194_v31, %v9608_v49  ;;  %v9190_v53 = vadd.f32 %v21150_v24, %v8800_v51  ;;  %v8802_v1 = vadd.f32 %v24360_v45, %v8380_v28  ;;  %vm24361_vm12 = vmmov %vm24231_vm7  ;;  %v24363_v62 = vld [vmem:[#allocation113_spill] sm:$0xff]  ;;  %v24365_v49 = vld [vmem:[#allocation42_spill] sm:$0xff]  ;;  %v21312_v24 = vpop.f32.mrf.mxu1 }
 0x576   : > { %v16873_v7 = vpop.f32.mrf.mxu0  ;;  %16916 = vmatmul.mubr.msk.f32.gmra.mxu1 %vm24350_vm10, %v9645_v48  ;;  %v7151_v29 = vadd.f32 %v24362_v40, %v6691_v61  ;;  %v8801_v14 = vadd.f32 %v24363_v62, %v8379_v34  ;;  %v24364_v48 = vld [vmem:[#allocation87_spill] sm:$0xff]  ;;  %v8381_v37 = vadd.f32 %v24368_v21, %v7959_v47  ;;  %vm24370_vm10 = vmmov %vm24231_vm7  ;;  %v24371_v51 = vld [vmem:[#allocation24_spill] sm:$0xff] }
 0x577   : > { %v9646_v20 = vadd.f32 %v21194_v31, %v9607_v41  ;;  %v9610_v63 = vadd.f32 %v16873_v7, %v9188_v54  ;;  %v6701_v60 = vadd.f32 %v24365_v49, %v24364_v48  ;;  %v24369_v54 = vld [vmem:[#allocation134_spill] sm:$0xff]  ;;  %v9192_v35 = vadd.f32 %v21173_v43, %v8802_v1  ;;  %v24372_v3 = vld [vmem:[#allocation9_spill] sm:$0xff]  ;;  %v21328_v0 = vpop.f32.mrf.mxu1  ;;  %v24378_v10 = vld [vmem:[#allocation44_spill] sm:$0xff] }
 0x578   : > { %v9498_v19 = vpop.f32.mrf.mxu0  ;;  %v7961_v17 = vadd.f32 %v24369_v54, %v7571_v13  ;;  %v9191_v42 = vadd.f32 %v21187_v56, %v8801_v14  ;;  %v8803_v28 = vadd.f32 %v24374_v58, %v8381_v37  ;;  %v24377_v34 = vld [vmem:[#allocation122_spill] sm:$0xff]  ;;  %v24382_v45 = vld [vmem:[#allocation92_spill] sm:$0xff]  ;;  %v24383_v40 = vld [vmem:[#allocation33_spill] sm:$0xff] }
 0x579   : > { %v9609_v44 = vadd.f32 %v9498_v19, %v9187_v36  ;;  %16918 = vmatprep.mubr.msk.f32.mxu1 %vm24231_vm7, %v9646_v20  ;;  %v9649_v55 = vadd.f32 %v21194_v31, %v9610_v63  ;;  %v7153_v7 = vadd.f32 %v24371_v51, %v6701_v60  ;;  %v8804_v36 = vadd.f32 %v24372_v3, %v8382_v11  ;;  %v24375_v63 = vld [vmem:[#allocation104_spill] sm:$0xff]  ;;  %v24376_v19 = vld [vmem:[#allocation107_spill] sm:$0xff]  ;;  %v24380_v13 = vld [vmem:[#allocation106_spill] sm:$0xff] }
 0x57a   : > { %v16876_v30 = vpop.f32.mrf.mxu0  ;;  %16919 = vmatmul.mubr.msk.f32.gmra.mxu1 %vm24361_vm12, %v9647_v25  ;;  %v7573_v20 = vadd.f32 %v24373_v27, %v7151_v29  ;;  %v8384_v4 = vadd.f32 %v24376_v19, %v24375_v63  ;;  %v6711_v47 = vadd.f32 %v24378_v10, %v24377_v34  ;;  %vm24381_vm12 = vmmov %vm24231_vm7  ;;  %v24385_v62 = vld [vmem:[#allocation95_spill] sm:$0xff]  ;;  %v24386_v48 = vld [vmem:[#allocation12_spill] sm:$0xff] }
 0x57b   : > { %v9648_v38 = vadd.f32 %v21194_v31, %v9609_v44  ;;  %v9612_v41 = vadd.f32 %v16876_v30, %v9190_v53  ;;  %v24379_v44 = vld [vmem:[#allocation69_spill] sm:$0xff]  ;;  %v7575_v1 = vadd.f32 %v24382_v45, %v7153_v7  ;;  %v9194_v30 = vadd.f32 %v21205_v59, %v8804_v36  ;;  %v24387_v39 = vld [vmem:[#allocation124_spill] sm:$0xff]  ;;  %v16844_v59 = vpop.f32.mrf.mxu1  ;;  %v24392_v51 = vld [vmem:[#allocation110_spill] sm:$0xff] }
 0x57c   : > { %v9508_v52 = vpop.f32.mrf.mxu0  ;;  %v8383_v8 = vadd.f32 %v24379_v44, %v7961_v17  ;;  %v7963_v56 = vadd.f32 %v24380_v13, %v7573_v20  ;;  %v8806_v29 = vadd.f32 %v24383_v40, %v8384_v4  ;;  %v7155_v14 = vadd.f32 %v24385_v62, %v6711_v47  ;;  %v24388_v5 = vld [vmem:[#allocation20_spill] sm:$0xff]  ;;  %v24398_v4 = vld [vmem:[#allocation111_spill] sm:$0xff]  ;;  %v24400_v47 = vld [vmem:[#allocation21_spill] sm:$0xff] }
 0x57d   : > { %v9611_v57 = vadd.f32 %v9508_v52, %v9189_v32  ;;  %16921 = vmatprep.mubr.msk.f32.mxu1 %vm24370_vm10, %v9648_v38  ;;  %v9651_v43 = vadd.f32 %v21194_v31, %v9612_v41  ;;  %vm24384_vm10 = vmmov %vm24231_vm7  ;;  %v9193_v38 = vadd.f32 %v21221_v23, %v8803_v28  ;;  %v6721_v11 = vadd.f32 %v24388_v5, %v24387_v39  ;;  %v24390_v41 = vld [vmem:[#allocation105_spill] sm:$0xff]  ;;  %v24391_v17 = vld [vmem:[#allocation108_spill] sm:$0xff] }
 0x57e   : > { %v16879_v6 = vpop.f32.mrf.mxu0  ;;  %16922 = vmatmul.mubr.msk.f32.gmra.mxu1 %vm24231_vm7, %v9649_v55  ;;  %v8805_v49 = vadd.f32 %v24386_v48, %v8383_v8  ;;  %v24389_v55 = vld [vmem:[#allocation135_spill] sm:$0xff]  ;;  %v7965_v7 = vadd.f32 %v24392_v51, %v7575_v1  ;;  %v9196_v36 = vadd.f32 %v21239_v12, %v8806_v29  ;;  %v24401_v44 = vld [vmem:[#allocation85_spill] sm:$0xff]  ;;  %v24402_v13 = vld [vmem:[#allocation112_spill] sm:$0xff] }
 0x57f   : > { %v9650_v25 = vadd.f32 %v21194_v31, %v9611_v57  ;;  %v9614_v61 = vadd.f32 %v16879_v6, %v9192_v35  ;;  %v8386_v52 = vadd.f32 %v24390_v41, %v24389_v55  ;;  %v8385_v57 = vadd.f32 %v24391_v17, %v7963_v56  ;;  %v24393_v35 = vld [vmem:[#allocation128_spill] sm:$0xff]  ;;  %v24406_v62 = vld [vmem:[#allocation130_spill] sm:$0xff] }
 0x580   : > { %v9518_v18 = vpop.f32.mrf.mxu0  ;;  %v7157_v3 = vadd.f32 %v24393_v35, %v6721_v11  ;;  %v24394_v6 = vld [vmem:[#allocation36_spill] sm:$0xff]  ;;  %v9195_v28 = vadd.f32 %v21256_v26, %v8805_v49  ;;  %v6731_v8 = vadd.f32 %v24401_v44, %v24400_v47  ;;  %v8387_v56 = vadd.f32 %v24402_v13, %v7965_v7  ;;  %v24408_v39 = vld [vmem:[#allocation70_spill] sm:$0xff]  ;;  %v24421_v44 = vld [vmem:[#allocation115_spill] sm:$0xff] }
 0x581   : > { %v9613_v53 = vadd.f32 %v9518_v18, %v9191_v42  ;;  %16924 = vmatprep.mubr.msk.f32.mxu1 %vm24381_vm12, %v9650_v25  ;;  %v9653_v21 = vadd.f32 %v21194_v31, %v9614_v61  ;;  %v8808_v27 = vadd.f32 %v24394_v6, %v8386_v52  ;;  %vm24395_vm12 = vmmov %vm24231_vm7  ;;  %v24396_v42 = vld [vmem:[#allocation63_spill] sm:$0xff]  ;;  %v24397_v25 = vld [vmem:[#allocation14_spill] sm:$0xff]  ;;  %v9146_v18 = vpop.f32.mrf.mxu1 }
 0x582   : > { %v16882_v32 = vpop.f32.mrf.mxu0  ;;  %16925 = vmatmul.mubr.msk.f32.gmra.mxu1 %vm24384_vm10, %v9651_v43  ;;  %v7577_v58 = vadd.f32 %v24396_v42, %v7155_v14  ;;  %v8807_v63 = vadd.f32 %v24397_v25, %v8385_v57  ;;  %v24399_v43 = vld [vmem:[#allocation109_spill] sm:$0xff]  ;;  %vm24404_vm10 = vmmov %vm24231_vm7  ;;  %v24405_v1 = vld [vmem:[#allocation64_spill] sm:$0xff]  ;;  %v7159_v14 = vadd.f32 %v24406_v62, %v6731_v8  ;;  %v8809_v48 = vadd.f32 %v21145_v16, %v8387_v56 }
 0x583   : > { %v9652_v60 = vadd.f32 %v21194_v31, %v9613_v53  ;;  %v9616_v37 = vadd.f32 %v16882_v32, %v9194_v30  ;;  %v8388_v61 = vadd.f32 %v24399_v43, %v24398_v4  ;;  %v24403_v53 = vld [vmem:[#allocation71_spill] sm:$0xff]  ;;  %v7579_v30 = vadd.f32 %v24405_v1, %v7157_v3  ;;  %v16847_v11 = vpop.f32.mrf.mxu1  ;;  %v24412_v16 = vld [vmem:[#allocation78_spill] sm:$0xff]  ;;  %v24415_v35 = vld [vmem:[#allocation132_spill] sm:$0xff] }
 0x584   : > { %v9528_v54 = vpop.f32.mrf.mxu0  ;;  %v7967_v45 = vadd.f32 %v24403_v53, %v7577_v58  ;;  %v9198_v40 = vadd.f32 %v21276_v33, %v8808_v27  ;;  %v24414_v51 = vld [vmem:[#allocation26_spill] sm:$0xff]  ;;  %v24416_v6 = vld [vmem:[#allocation35_spill] sm:$0xff]  ;;  %v24423_v1 = vld [vmem:[#allocation76_spill] sm:$0xff] }
 0x585   : > { %v9615_v23 = vadd.f32 %v9528_v54, %v9193_v38  ;;  %16927 = vmatprep.mubr.msk.f32.mxu1 %vm24231_vm7, %v9652_v60  ;;  %v9655_v34 = vadd.f32 %v21194_v31, %v9616_v37  ;;  %v8810_v29 = vadd.f32 %v21140_v15, %v8388_v61  ;;  %v9197_v38 = vadd.f32 %v21292_v22, %v8807_v63  ;;  %v24407_v60 = vld [vmem:[#allocation8_spill] sm:$0xff]  ;;  %v24409_v15 = vld [vmem:[#allocation75_spill] sm:$0xff]  ;;  %v24417_v27 = vld [vmem:[#allocation114_spill] sm:$0xff]  ;;  %v9156_v42 = vpop.f32.mrf.mxu1 }
 0x586   : > { %v16885_v20 = vpop.f32.mrf.mxu0  ;;  %16928 = vmatmul.mubr.msk.f32.gmra.mxu1 %vm24395_vm12, %v9653_v21  ;;  %v8390_v5 = vadd.f32 %v24408_v39, %v24407_v60  ;;  %v8389_v52 = vadd.f32 %v24409_v15, %v7967_v45  ;;  %v24410_v21 = vld [vmem:[#allocation32_spill] sm:$0xff]  ;;  %vm24411_vm12 = vmmov %vm24231_vm7  ;;  %v7581_v7 = vadd.f32 %v24414_v51, %v7159_v14  ;;  %v24418_v25 = vld [vmem:[#allocation123_spill] sm:$0xff] }
 0x587   : > { %v9654_v19 = vadd.f32 %v21194_v31, %v9615_v23  ;;  %v9618_v12 = vadd.f32 %v16885_v20, %v9196_v36  ;;  %v7969_v37 = vadd.f32 %v24410_v21, %v7579_v30  ;;  %v9200_v22 = vadd.f32 %v21312_v24, %v8810_v29  ;;  %v24422_v8 = vld [vmem:[#allocation74_spill] sm:$0xff]  ;;  %v16850_v56 = vpop.f32.mrf.mxu1  ;;  %v10097_v21 = vld [vmem:[#allocation2 + $0x8] sm:$0xff]  ;;  %v21437_v51 = vld [vmem:[%s23063_s13 + $0x20] sm:$0xff] }
 0x588   : > { %v9538_v10 = vpop.f32.mrf.mxu0  ;;  %v8812_v17 = vadd.f32 %v24412_v16, %v8390_v5  ;;  %v9199_v23 = vadd.f32 %v21328_v0, %v8809_v48  ;;  %v8811_v3 = vadd.f32 %v24415_v35, %v8389_v52  ;;  %v8392_v20 = vadd.f32 %v24417_v27, %v24416_v6  ;;  %v10096_v52 = vld [vmem:[%s23063_s13] sm:$0xff]  ;;  %v10033_v16 = vld [vmem:[#allocation2 + $0xf] sm:$0xff] }
 0x589   : > { %v9617_v26 = vadd.f32 %v9538_v10, %v9195_v28  ;;  %16930 = vmatprep.mubr.msk.f32.mxu1 %vm24404_vm10, %v9654_v19  ;;  %v9657_v55 = vadd.f32 %v21194_v31, %v9618_v12  ;;  %vm24413_vm10 = vmmov %vm24231_vm7  ;;  %v8391_v63 = vadd.f32 %v24418_v25, %v7969_v37  ;;  %v24419_v19 = vld [vmem:[#allocation11_spill] sm:$0xff]  ;;  %v8394_v13 = vadd.f32 %v24422_v8, %v24421_v44  ;;  %v9166_v62 = vpop.f32.mrf.mxu1  ;;  %v10032_v37 = vld [vmem:[#allocation2 + $0x7] sm:$0xff] }
 0x58a   : > { %v16888_v32 = vpop.f32.mrf.mxu0  ;;  %16931 = vmatmul.mubr.msk.f32.gmra.mxu1 %vm24231_vm7, %v9655_v34  ;;  %v7971_v4 = vadd.f32 %v24419_v19, %v7581_v7  ;;  %v9202_v0 = vadd.f32 %v16844_v59, %v8812_v17  ;;  %v8814_v61 = vadd.f32 %v21155_v50, %v8392_v20  ;;  %v9201_v12 = vadd.f32 %v9146_v18, %v8811_v3  ;;  %v14591_v17 = vld [vmem:[%s23063_s13 + $0x10] sm:$0xff]  ;;  %v21443_v7 = vld [vmem:[%s23062_s12] ss:$0 sm:$0xff] }
 0x58b   : > { %v9656_v49 = vadd.f32 %v21194_v31, %v9617_v26  ;;  %v9620_v33 = vadd.f32 %v16888_v32, %v9198_v40  ;;  %v8813_v10 = vadd.f32 %v21163_v2, %v8391_v63  ;;  %v8816_v18 = vadd.f32 %v21167_v9, %v8394_v13  ;;  %17001 = vmatprep.subr.mxu1 %v10096_v52 }
 0x58c   : > { %v9548_v41 = vpop.f32.mrf.mxu0  ;;  %v8393_v59 = vadd.f32 %v24423_v1, %v7971_v4  ;;  %v9204_v50 = vadd.f32 %v16847_v11, %v8814_v61  ;;  %17002 = vmatpush3.msra.mxu1 %v10096_v52  ;;  %17051 = vmatprep.subr.mxu0 %v14591_v17 }
 0x58d   : > { %v9619_v54 = vadd.f32 %v9548_v41, %v9197_v38  ;;  %16933 = vmatprep.mubr.msk.f32.mxu1 %vm24411_vm12, %v9656_v49  ;;  %v9659_v58 = vadd.f32 %v21194_v31, %v9620_v33  ;;  %vm24420_vm12 = vmmov %vm24231_vm7  ;;  %v9203_v2 = vadd.f32 %v9156_v42, %v8813_v10  ;;  %v9206_v60 = vadd.f32 %v16850_v56, %v8816_v18 }
 0x58e   : > { %v16891_v57 = vpop.f32.mrf.mxu0  ;;  %16934 = vmatmul.mubr.msk.f32.gmra.mxu1 %vm24413_vm10, %v9657_v55  ;;  %vm24424_vm10 = vmmov %vm24231_vm7  ;;  %v8815_v29 = vadd.f32 %v21175_v46, %v8393_v59 }
 0x58f   : > { %v9658_v36 = vadd.f32 %v21194_v31, %v9619_v54  ;;  %v9622_v24 = vadd.f32 %v16891_v57, %v9200_v22  ;;  %v24431_v54 = vld [vmem:[#allocation4_spill] sm:$0xff]  ;;  %v14624_v57 = vld [vmem:[%s23063_s13 + $0x18] sm:$0xff] }
 0x590   : > { %v9558_v28 = vpop.f32.mrf.mxu0  ;;  %v9205_v9 = vadd.f32 %v9166_v62, %v8815_v29  ;;  %17101 = vmatprep.subr.mxu1 %v14624_v57  ;;  %v24454_v62 = vld [vmem:[#allocation7_spill] sm:$0xff] }
 0x591   : > { %v9621_v43 = vadd.f32 %v9558_v28, %v9199_v23  ;;  %16936 = vmatprep.mubr.msk.f32.mxu1 %vm24231_vm7, %v9658_v36  ;;  %v9661_v53 = vadd.f32 %v21194_v31, %v9622_v24  ;;  %v21455_v24 = vld [vmem:[%s23063_s13 + $0x28] sm:$0xff] }
 0x592   : > { %v16894_v34 = vpop.f32.mrf.mxu0  ;;  %16937 = vmatmul.mubr.msk.f32.gmra.mxu1 %vm24420_vm12, %v9659_v58  ;;  %vm24425_vm12 = vmmov %vm24231_vm7 }
 0x593   : > { %v9660_v47 = vadd.f32 %v21194_v31, %v9621_v43  ;;  %v9624_v45 = vadd.f32 %v16894_v34, %v9202_v0 }
 0x594   : > { %v9568_v26 = vpop.f32.mrf.mxu0 }
 0x595   : > { %v9623_v30 = vadd.f32 %v9568_v26, %v9201_v12  ;;  %16939 = vmatprep.mubr.msk.f32.mxu1 %vm24424_vm10, %v9660_v47  ;;  %v9663_v14 = vadd.f32 %v21194_v31, %v9624_v45  ;;  %vm24426_vm10 = vmmov %vm24231_vm7 }
 0x596   : > { %v16897_v40 = vpop.f32.mrf.mxu0  ;;  %16940 = vmatmul.mubr.msk.f32.gmra.mxu1 %vm24231_vm7, %v9661_v53 }
 0x597   : > { %v9662_v32 = vadd.f32 %v21194_v31, %v9623_v30  ;;  %v9626_v38 = vadd.f32 %v16897_v40, %v9204_v50 }
 0x598   : > { %v9578_v48 = vpop.f32.mrf.mxu0 }
 0x599   : > { %v9625_v49 = vadd.f32 %v9578_v48, %v9203_v2  ;;  %16942 = vmatprep.mubr.msk.f32.mxu1 %vm24425_vm12, %v9662_v32  ;;  %v9665_v11 = vadd.f32 %v21194_v31, %v9626_v38  ;;  %vm24428_vm12 = vmmov %vm24231_vm7 }
 0x59a   : > { %v16900_v39 = vpop.f32.mrf.mxu0  ;;  %16943 = vmatmul.mubr.msk.f32.gmra.mxu1 %vm24426_vm10, %v9663_v14  ;;  %vm24430_vm10 = vcmask 64512  }
 0x59b   : > { %v9664_v5 = vadd.f32 %v21194_v31, %v9625_v49  ;;  %v9628_v46 = vadd.f32 %v16900_v39, %v9206_v60  ;;  %16953 = vmatprep.mubr.msk.f32.mxu0 %vm24430_vm10, %v10097_v21 }
 0x59c   : > { %v9588_v55 = vpop.f32.mrf.mxu0 }
 0x59d   : > { %v9627_v33 = vadd.f32 %v9588_v55, %v9205_v9  ;;  %16945 = vmatprep.mubr.msk.f32.mxu1 %vm24231_vm7, %v9664_v5  ;;  %v9667_v15 = vadd.f32 %v21194_v31, %v9628_v46  ;;  %vm24432_vm7 = vnez %v24431_v54  ;;  %v24462_v46 = vld [vmem:[#allocation10_spill] sm:$0xff] }
 0x59e   : > { %16946 = vmatmul.mubr.msk.f32.gmra.mxu1 %vm24427_vm11, %v9665_v11  ;;  %v10064_v22 = vsel %vm24432_vm7, %v10032_v37, 0.0  ;;  %vm24433_vm11 = vmmov %vm24430_vm10 }
 0x59f   : > { %v9666_v41 = vadd.f32 %v21194_v31, %v9627_v33  ;;  %v10098_v31 = vld [vmem:[#allocation2 + $0x10] sm:$0xff] }
 0x5a1   : > { %16948 = vmatprep.mubr.msk.f32.mxu1 %vm24428_vm12, %v9666_v41 }
 0x5a2   : > { %16949 = vmatmul.mubr.msk.f32.gmra.mxu1 %vm24429_vm6, %v9667_v15  ;;  %vm24434_vm6 = vmmov %vm24430_vm10 }
 0x5a3   : > { %17003 = vmatprep.mubr.msk.f32.mxu1 %vm24433_vm11, %v10064_v22  ;;  %16954 = vmatmul.mubr.msk.f32.vlgmr.msra.gmra.mxu0 %vm24434_vm6, %v10098_v31  ;;  %vm24435_vm12 = vmmov %vm24434_vm6 }
 0x5a4   : > { %17052 = vmatpush3.msra.mxu0 %v14591_v17  ;;  %vm24436_vm10 = vmmov %vm24434_vm6 }
 0x5a5   : > { %17151 = vmatprep.subr.mxu0 %v21437_v51  ;;  %vm24437_vm11 = vmmov %vm24434_vm6 }
 0x5a6   : > { %17004 = vmatmul.mubr.msk.f32.vlgmr.msra.gmra.mxu1 %vm24435_vm12, %v10033_v16  ;;  %vm24438_vm12 = vmmov %vm24434_vm6  ;;  %v24472_v16 = vld [vmem:[#allocation13_spill] sm:$0xff] }
 0x5a7   : > { %17102 = vmatpush3.msra.mxu1 %v14624_v57  ;;  %vm24445_vm13 = vmmov %vm24434_vm6 }
 0x5a8   : > { %17201 = vmatprep.subr.mxu1 %v21455_v24  ;;  %vm24460_vm4 = vmmov %vm24434_vm6 }
 0x5a9   : > { %vm24469_vm8 = vmmov %vm24460_vm4 }
 0x626   : > { %v16905_v23 = vpop.f32.mrf.mxu1 }
 0x627   : > { %v9847_v35 = vadd.f32 %v16905_v23, %v21443_v7 }
 0x628   : > { %v9841_v3 = vpop.f32.mrf.mxu1 }
 0x629   : > { %10001 = vst.msk [vmem:[#allocation2 + $0x20] sm:$0xff] %vm24436_vm10, %v9847_v35  ;;  %v9842_v36 = vadd.f32 %v21443_v7, %v9841_v3  ;;  %vm24439_vm10 = vmmov %vm24434_vm6 }
 0x62a   : > { %v16908_v6 = vpop.f32.mrf.mxu1 }
 0x62b   : > { %10000 = vst.msk [vmem:[#allocation2 + $0x18] sm:$0xff] %vm24437_vm11, %v9842_v36  ;;  %v9857_v27 = vadd.f32 %v16908_v6, %v21443_v7  ;;  %vm24440_vm11 = vmmov %vm24434_vm6 }
 0x62c   : > { %v9851_v20 = vpop.f32.mrf.mxu1 }
 0x62d   : > { %10003 = vst.msk [vmem:[#allocation2 + $0x30] sm:$0xff] %vm24434_vm6, %v9857_v27  ;;  %v9852_v42 = vadd.f32 %v21443_v7, %v9851_v20 }
 0x62e   : > { %v16911_v58 = vpop.f32.mrf.mxu1 }
 0x62f   : > { %10002 = vst.msk [vmem:[#allocation2 + $0x28] sm:$0xff] %vm24438_vm12, %v9852_v42  ;;  %v9867_v28 = vadd.f32 %v16911_v58, %v21443_v7  ;;  %vm24442_vm12 = vmmov %vm24434_vm6  ;;  %v24481_v42 = vld [vmem:[#allocation16_spill] sm:$0xff] }
 0x630   : > { %v9861_v25 = vpop.f32.mrf.mxu1  ;;  %v21470_v61 = vld [vmem:[#allocation2 + $0x20] sm:$0xff] }
 0x631   : > { %10005 = vst.msk [vmem:[#allocation2 + $0x40] sm:$0xff] %vm24439_vm10, %v9867_v28  ;;  %v9862_v63 = vadd.f32 %v21443_v7, %v9861_v25  ;;  %vm24443_vm10 = vmmov %vm24434_vm6 }
 0x632   : > { %v16914_v19 = vpop.f32.mrf.mxu1  ;;  %v21462_v4 = vld [vmem:[#allocation2 + $0x18] sm:$0xff] }
 0x633   : > { %v21464_v43 = vld [vmem:[#allocation2 + $0x17] sm:$0xff]  ;;  %10004 = vst.msk [vmem:[#allocation2 + $0x38] sm:$0xff] %vm24440_vm11, %v9862_v63  ;;  %v9877_v0 = vadd.f32 %v16914_v19, %v21443_v7  ;;  %16956 = vmatprep.mubr.msk.f32.mxu0 %vm24434_vm6, %v21462_v4  ;;  %v21478_v47 = vld [vmem:[#allocation2 + $0x1f] sm:$0xff]  ;;  %vm24444_vm11 = vmmov %vm24434_vm6 }
 0x634   : > { %v10066_v12 = vsel %vm24091_vm3, %v21464_v43, 0.0  ;;  %v9871_v10 = vpop.f32.mrf.mxu1  ;;  %16957 = vmatmul.mubr.msk.f32.gmra.mxu0 %vm24442_vm12, %v21470_v61  ;;  %vm24446_vm12 = vmmov %vm24434_vm6  ;;  %v21492_v45 = vld [vmem:[#allocation2 + $0x30] sm:$0xff] }
 0x635   : > { %17006 = vmatprep.mubr.msk.f32.mxu1 %vm24443_vm10, %v10066_v12  ;;  %10007 = vst.msk [vmem:[#allocation2 + $0x50] sm:$0xff] %vm24444_vm11, %v9877_v0  ;;  %v9872_v44 = vadd.f32 %v21443_v7, %v9871_v10  ;;  %vm24448_vm10 = vmmov %vm24434_vm6 }
 0x636   : > { %17007 = vmatmul.mubr.msk.f32.gmra.mxu1 %vm24434_vm6, %v21478_v47  ;;  %v16917_v8 = vpop.f32.mrf.mxu1  ;;  %v21484_v13 = vld [vmem:[#allocation2 + $0x28] sm:$0xff]  ;;  %vm24449_vm11 = vmmov %vm24434_vm6 }
 0x637   : > { %v21486_v56 = vld [vmem:[#allocation2 + $0x27] sm:$0xff]  ;;  %10006 = vst.msk [vmem:[#allocation2 + $0x48] sm:$0xff] %vm24445_vm13, %v9872_v44  ;;  %v9887_v53 = vadd.f32 %v16917_v8, %v21443_v7  ;;  %16959 = vmatprep.mubr.msk.f32.mxu0 %vm24446_vm12, %v21484_v13  ;;  %v21500_v30 = vld [vmem:[#allocation2 + $0x2f] sm:$0xff]  ;;  %vm24450_vm13 = vmmov %vm24434_vm6 }
 0x638   : > { %v10068_v1 = vsel %vm24098_vm5, %v21486_v56, 0.0  ;;  %v9881_v59 = vpop.f32.mrf.mxu1  ;;  %16960 = vmatmul.mubr.msk.f32.gmra.mxu0 %vm24448_vm10, %v21492_v45  ;;  %vm24452_vm12 = vmmov %vm24434_vm6  ;;  %v21514_v32 = vld [vmem:[#allocation2 + $0x40] sm:$0xff]  ;;  %v24491_v8 = vld [vmem:[#allocation19_spill] sm:$0xff] }
 0x639   : > { %17009 = vmatprep.mubr.msk.f32.mxu1 %vm24449_vm11, %v10068_v1  ;;  %10009 = vst.msk [vmem:[#allocation2 + $0x60] sm:$0xff] %vm24450_vm13, %v9887_v53  ;;  %v9882_v50 = vadd.f32 %v21443_v7, %v9881_v59  ;;  %vm24453_vm10 = vmmov %vm24434_vm6  ;;  %vm24455_vm11 = vnez %v24454_v62 }
 0x63a   : > { %17010 = vmatmul.mubr.msk.f32.gmra.mxu1 %vm24434_vm6, %v21500_v30  ;;  %v16920_v18 = vpop.f32.mrf.mxu1  ;;  %v21506_v40 = vld [vmem:[#allocation2 + $0x38] sm:$0xff]  ;;  %vm24456_vm13 = vmmov %vm24434_vm6 }
 0x63b   : > { %v21508_v2 = vld [vmem:[#allocation2 + $0x37] sm:$0xff]  ;;  %10008 = vst.msk [vmem:[#allocation2 + $0x58] sm:$0xff] %vm24452_vm12, %v9882_v50  ;;  %v9897_v29 = vadd.f32 %v16920_v18, %v21443_v7  ;;  %16962 = vmatprep.mubr.msk.f32.mxu0 %vm24453_vm10, %v21506_v40  ;;  %v21522_v48 = vld [vmem:[#allocation2 + $0x3f] sm:$0xff]  ;;  %vm24457_vm12 = vmmov %vm24434_vm6 }
 0x63c   : > { %24451 = vst [vmem:[#allocation118_spill] sm:$0xff] %v21508_v2  ;;  %v10070_v14 = vsel %vm24455_vm11, %v21508_v2, 0.0  ;;  %v9891_v38 = vpop.f32.mrf.mxu1  ;;  %16963 = vmatmul.mubr.msk.f32.gmra.mxu0 %vm24456_vm13, %v21514_v32  ;;  %vm24458_vm10 = vmmov %vm24434_vm6  ;;  %v21536_v11 = vld [vmem:[#allocation2 + $0x50] sm:$0xff] }
 0x63d   : > { %17012 = vmatprep.mubr.msk.f32.mxu1 %vm24434_vm6, %v10070_v14  ;;  %10011 = vst.msk [vmem:[#allocation2 + $0x70] sm:$0xff] %vm24457_vm12, %v9897_v29  ;;  %v9892_v49 = vadd.f32 %v21443_v7, %v9891_v38  ;;  %vm24461_vm13 = vmmov %vm24460_vm4  ;;  %vm24463_vm6 = vnez %v24462_v46  ;;  %v21826_v34 = vld [vmem:[#allocation2 + $0x31] sm:$0xff] }
 0x63e   : > { %17013 = vmatmul.mubr.msk.f32.gmra.mxu1 %vm24458_vm10, %v21522_v48  ;;  %v16923_v60 = vpop.f32.mrf.mxu1  ;;  %v21528_v39 = vld [vmem:[#allocation2 + $0x48] sm:$0xff]  ;;  %vm24464_vm12 = vmmov %vm24460_vm4 }
 0x63f   : > { %v21530_v9 = vld [vmem:[#allocation2 + $0x47] sm:$0xff]  ;;  %10010 = vst.msk [vmem:[#allocation2 + $0x68] sm:$0xff] %vm24460_vm4, %v9892_v49  ;;  %v9907_v5 = vadd.f32 %v16923_v60, %v21443_v7  ;;  %16965 = vmatprep.mubr.msk.f32.mxu0 %vm24461_vm13, %v21528_v39  ;;  %vm24465_vm10 = vmmov %vm24460_vm4  ;;  %v21544_v41 = vld [vmem:[#allocation2 + $0x4f] sm:$0xff] }
 0x640   : > { %24459 = vst [vmem:[#allocation79_spill] sm:$0xff] %v21530_v9  ;;  %v10072_v55 = vsel %vm24463_vm6, %v21530_v9, 0.0  ;;  %v9901_v33 = vpop.f32.mrf.mxu1  ;;  %16966 = vmatmul.mubr.msk.f32.gmra.mxu0 %vm24464_vm12, %v21536_v11  ;;  %vm24466_vm13 = vmmov %vm24460_vm4  ;;  %v21558_v31 = vld [vmem:[#allocation2 + $0x60] sm:$0xff]  ;;  %v24501_v60 = vld [vmem:[#allocation22_spill] sm:$0xff] }
 0x641   : > { %17015 = vmatprep.mubr.msk.f32.mxu1 %vm24465_vm10, %v10072_v55  ;;  %10013 = vst.msk [vmem:[#allocation2 + $0x80] sm:$0xff] %vm24460_vm4, %v9907_v5  ;;  %v9902_v15 = vadd.f32 %v21443_v7, %v9901_v33  ;;  %vm24470_vm12 = vmmov %vm24460_vm4  ;;  %vm24473_vm10 = vnez %v24472_v16 }
 0x642   : > { %17016 = vmatmul.mubr.msk.f32.gmra.mxu1 %vm24466_vm13, %v21544_v41  ;;  %v16926_v52 = vpop.f32.mrf.mxu1  ;;  %v21550_v21 = vld [vmem:[#allocation2 + $0x58] sm:$0xff]  ;;  %24471 = vst [vmem:[#allocation27_spill] sm:$0xff] %v21558_v31  ;;  %vm24474_vm13 = vmmov %vm24460_vm4 }
 0x643   : > { %24467 = vst [vmem:[#allocation119_spill] sm:$0xff] %v21550_v21  ;;  %v21552_v37 = vld [vmem:[#allocation2 + $0x57] sm:$0xff]  ;;  %10012 = vst.msk [vmem:[#allocation2 + $0x78] sm:$0xff] %vm24469_vm8, %v9902_v15  ;;  %v9917_v22 = vadd.f32 %v16926_v52, %v21443_v7  ;;  %16968 = vmatprep.mubr.msk.f32.mxu0 %vm24470_vm12, %v21550_v21  ;;  %v21566_v23 = vld [vmem:[#allocation2 + $0x5f] sm:$0xff] }
 0x644   : > { %24468 = vst [vmem:[#allocation39_spill] sm:$0xff] %v21552_v37  ;;  %v10074_v17 = vsel %vm24473_vm10, %v21552_v37, 0.0  ;;  %v9911_v57 = vpop.f32.mrf.mxu1  ;;  %16969 = vmatmul.mubr.msk.f32.gmra.mxu0 %vm24460_vm4, %v21558_v31  ;;  %vm24475_vm8 = vmmov %vm24460_vm4  ;;  %v21580_v20 = vld [vmem:[#allocation2 + $0x70] sm:$0xff]  ;;  %v21800_v21 = vld [vmem:[#allocation2 + $0x21] sm:$0xff] }
 0x645   : > { %17018 = vmatprep.mubr.msk.f32.mxu1 %vm24474_vm13, %v10074_v17  ;;  %10015 = vst.msk [vmem:[#allocation2 + $0x90] sm:$0xff] %vm24475_vm8, %v9917_v22  ;;  %v9912_v35 = vadd.f32 %v21443_v7, %v9911_v57  ;;  %vm24476_vm12 = vmmov %vm24460_vm4  ;;  %vm24482_vm13 = vnez %v24481_v42  ;;  %v21859_v26 = vld [vmem:[#allocation2 + $0x51] sm:$0xff]  ;;  %v21873_v62 = vld [vmem:[#allocation2 + $0x59] sm:$0xff] }
 0x646   : > { %17019 = vmatmul.mubr.msk.f32.gmra.mxu1 %vm24476_vm12, %v21566_v23  ;;  %v16929_v3 = vpop.f32.mrf.mxu1  ;;  %v21572_v36 = vld [vmem:[#allocation2 + $0x68] sm:$0xff]  ;;  %vm24479_vm10 = vmmov %vm24460_vm4  ;;  %24480 = vst [vmem:[#allocation66_spill] sm:$0xff] %v21580_v20 }
 0x647   : > { %24477 = vst [vmem:[#allocation93_spill] sm:$0xff] %v21572_v36  ;;  %v21574_v6 = vld [vmem:[#allocation2 + $0x67] sm:$0xff]  ;;  %10014 = vst.msk [vmem:[#allocation2 + $0x88] sm:$0xff] %vm24479_vm10, %v9912_v35  ;;  %v9927_v27 = vadd.f32 %v16929_v3, %v21443_v7  ;;  %16971 = vmatprep.mubr.msk.f32.mxu0 %vm24460_vm4, %v21572_v36  ;;  %v21588_v25 = vld [vmem:[#allocation2 + $0x6f] sm:$0xff] }
 0x648   : > { %24478 = vst [vmem:[#allocation94_spill] sm:$0xff] %v21574_v6  ;;  %v10076_v58 = vsel %vm24482_vm13, %v21574_v6, 0.0  ;;  %v9921_v28 = vpop.f32.mrf.mxu1  ;;  %vm24483_vm8 = vmmov %vm24460_vm4  ;;  %v21602_v44 = vld [vmem:[#allocation2 + $0x80] sm:$0xff]  ;;  %v24511_v3 = vld [vmem:[#allocation25_spill] sm:$0xff] }
 0x649   : > { %16972 = vmatmul.mubr.msk.f32.gmra.mxu0 %vm24483_vm8, %v21580_v20  ;;  %vm24484_vm12 = vmmov %vm24460_vm4  ;;  %v9922_v63 = vadd.f32 %v21443_v7, %v9921_v28  ;;  %24490 = vst [vmem:[#allocation126_spill] sm:$0xff] %v21602_v44  ;;  %v10774_v20 = vld [vmem:[#allocation2 + $0x11] sm:$0xff]  ;;  %v21889_v46 = vld [vmem:[#allocation2 + $0x69] sm:$0xff] }
 0x64a   : > { %17021 = vmatprep.mubr.msk.f32.mxu1 %vm24484_vm12, %v10076_v58  ;;  %vm24485_vm10 = vmmov %vm24460_vm4  ;;  %v16932_v19 = vpop.f32.mrf.mxu1  ;;  %v21594_v0 = vld [vmem:[#allocation2 + $0x78] sm:$0xff]  ;;  %vm24492_vm12 = vnez %v24491_v8  ;;  %v24572_v36 = vld [vmem:[#allocation46_spill] sm:$0xff]  ;;  %v10806_v31 = vsel %vm18232_vm15, %v10774_v20, 0.0 }
 0x64b   : > { %10017 = vst.msk [vmem:[#allocation2 + $0xa0] sm:$0xff] %vm24485_vm10, %v9927_v27  ;;  %17022 = vmatmul.mubr.msk.f32.gmra.mxu1 %vm24460_vm4, %v21588_v25  ;;  %24486 = vst [vmem:[#allocation91_spill] sm:$0xff] %v21594_v0  ;;  %v21596_v12 = vld [vmem:[#allocation2 + $0x77] sm:$0xff]  ;;  %v9937_v10 = vadd.f32 %v16932_v19, %v21443_v7  ;;  %v21610_v59 = vld [vmem:[#allocation2 + $0x7f] sm:$0xff] }
 0x64c   : > { %24487 = vst [vmem:[#allocation80_spill] sm:$0xff] %v21596_v12  ;;  %vm24488_vm13 = vmmov %vm24460_vm4  ;;  %v10078_v53 = vsel %vm24492_vm12, %v21596_v12, 0.0  ;;  %v9931_v1 = vpop.f32.mrf.mxu1  ;;  %v21624_v49 = vld [vmem:[#allocation2 + $0x90] sm:$0xff] }
 0x64d   : > { %10016 = vst.msk [vmem:[#allocation2 + $0x98] sm:$0xff] %vm24488_vm13, %v9922_v63  ;;  %vm24489_vm8 = vmmov %vm24460_vm4  ;;  %17024 = vmatprep.mubr.msk.f32.mxu1 %vm24460_vm4, %v10078_v53  ;;  %v9932_v50 = vadd.f32 %v21443_v7, %v9931_v1 }
 0x64e   : > { %16974 = vmatprep.mubr.msk.f32.mxu0 %vm24489_vm8, %v21594_v0  ;;  %vm24493_vm10 = vmmov %vm24460_vm4  ;;  %v16935_v18 = vpop.f32.mrf.mxu1  ;;  %v21616_v29 = vld [vmem:[#allocation2 + $0x88] sm:$0xff]  ;;  %24500 = vst [vmem:[#allocation117_spill] sm:$0xff] %v21624_v49 }
 0x64f   : > { %16975 = vmatmul.mubr.msk.f32.gmra.mxu0 %vm24493_vm10, %v21602_v44  ;;  %vm24494_vm13 = vmmov %vm24460_vm4  ;;  %24496 = vst [vmem:[#allocation86_spill] sm:$0xff] %v21616_v29  ;;  %v21618_v14 = vld [vmem:[#allocation2 + $0x87] sm:$0xff]  ;;  %v9947_v38 = vadd.f32 %v16935_v18, %v21443_v7  ;;  %v21632_v33 = vld [vmem:[#allocation2 + $0x8f] sm:$0xff] }
 0x650   : > { %10019 = vst.msk [vmem:[#allocation2 + $0xb0] sm:$0xff] %vm24494_vm13, %v9937_v10  ;;  %vm24495_vm8 = vmmov %vm24460_vm4  ;;  %v9941_v55 = vpop.f32.mrf.mxu1  ;;  %v24521_v18 = vld [vmem:[#allocation28_spill] sm:$0xff]  ;;  %v13223_v0 = vld [vmem:[#allocation2 + $0x29] sm:$0xff] }
 0x651   : > { %17025 = vmatmul.mubr.msk.f32.gmra.mxu1 %vm24495_vm8, %v21610_v59  ;;  %24497 = vst [vmem:[#allocation88_spill] sm:$0xff] %v21618_v14  ;;  %vm24498_vm12 = vmmov %vm24460_vm4  ;;  %v9942_v15 = vadd.f32 %v21443_v7, %v9941_v55 }
 0x652   : > { %10018 = vst.msk [vmem:[#allocation2 + $0xa8] sm:$0xff] %vm24498_vm12, %v9932_v50  ;;  %vm24499_vm10 = vmmov %vm24460_vm4  ;;  %vm24502_vm4 = vnez %v24501_v60  ;;  %v16938_v52 = vpop.f32.mrf.mxu1  ;;  %v21646_v35 = vld [vmem:[#allocation2 + $0xa0] sm:$0xff] }
 0x653   : > { %16977 = vmatprep.mubr.msk.f32.mxu0 %vm24499_vm10, %v21616_v29  ;;  %v10080_v5 = vsel %vm24502_vm4, %v21618_v14, 0.0  ;;  %vm24503_vm13 = vmmov %vm24495_vm8  ;;  %v9957_v57 = vadd.f32 %v16938_v52, %v21443_v7  ;;  %24510 = vst [vmem:[#allocation99_spill] sm:$0xff] %v21646_v35 }
 0x654   : > { %16978 = vmatmul.mubr.msk.f32.gmra.mxu0 %vm24503_vm13, %v21624_v49  ;;  %17027 = vmatprep.mubr.msk.f32.mxu1 %vm24495_vm8, %v10080_v5  ;;  %vm24504_vm12 = vmmov %vm24495_vm8  ;;  %v21638_v22 = vld [vmem:[#allocation2 + $0x98] sm:$0xff]  ;;  %v9951_v58 = vpop.f32.mrf.mxu1 }
 0x655   : > { %10021 = vst.msk [vmem:[#allocation2 + $0xc0] sm:$0xff] %vm24504_vm12, %v9947_v38  ;;  %vm24505_vm10 = vmmov %vm24495_vm8  ;;  %v21640_v17 = vld [vmem:[#allocation2 + $0x97] sm:$0xff]  ;;  %v21654_v28 = vld [vmem:[#allocation2 + $0x9f] sm:$0xff]  ;;  %v9952_v63 = vadd.f32 %v21443_v7, %v9951_v58 }
 0x656   : > { %17028 = vmatmul.mubr.msk.f32.gmra.mxu1 %vm24505_vm10, %v21632_v33  ;;  %24506 = vst [vmem:[#allocation116_spill] sm:$0xff] %v21638_v22  ;;  %24507 = vst [vmem:[#allocation96_spill] sm:$0xff] %v21640_v17  ;;  %v16941_v19 = vpop.f32.mrf.mxu1 }
 0x657   : > { %vm24508_vm4 = vmmov %vm24495_vm8  ;;  %vm24512_vm8 = vnez %v24511_v3  ;;  %v9967_v1 = vadd.f32 %v16941_v19, %v21443_v7  ;;  %v21668_v50 = vld [vmem:[#allocation2 + $0xb0] sm:$0xff]  ;;  %v24530_v19 = vld [vmem:[#allocation31_spill] sm:$0xff] }
 0x658   : > { %10020 = vst.msk [vmem:[#allocation2 + $0xb8] sm:$0xff] %vm24508_vm4, %v9942_v15  ;;  %vm24509_vm13 = vmmov %vm24508_vm4  ;;  %v10082_v27 = vsel %vm24512_vm8, %v21640_v17, 0.0  ;;  %v9961_v5 = vpop.f32.mrf.mxu1 }
 0x659   : > { %16980 = vmatprep.mubr.msk.f32.mxu0 %vm24509_vm13, %v21638_v22  ;;  %vm24513_vm12 = vmmov %vm24508_vm4  ;;  %10023 = vst.msk [vmem:[#allocation2 + $0xd0] sm:$0xff] %vm24508_vm4, %v9957_v57  ;;  %v21660_v10 = vld [vmem:[#allocation2 + $0xa8] sm:$0xff]  ;;  %v9962_v15 = vadd.f32 %v21443_v7, %v9961_v5 }
 0x65a   : > { %16981 = vmatmul.mubr.msk.f32.gmra.mxu0 %vm24513_vm12, %v21646_v35  ;;  %vm24514_vm10 = vmmov %vm24508_vm4  ;;  %24516 = vst [vmem:[#allocation121_spill] sm:$0xff] %v21660_v10  ;;  %v21662_v53 = vld [vmem:[#allocation2 + $0xa7] sm:$0xff]  ;;  %v21676_v55 = vld [vmem:[#allocation2 + $0xaf] sm:$0xff]  ;;  %v16944_v52 = vpop.f32.mrf.mxu1 }
 0x65b   : > { %17030 = vmatprep.mubr.msk.f32.mxu1 %vm24514_vm10, %v10082_v27  ;;  %vm24515_vm13 = vmmov %vm24508_vm4  ;;  %24517 = vst [vmem:[#allocation81_spill] sm:$0xff] %v21662_v53  ;;  %vm24522_vm10 = vnez %v24521_v18  ;;  %v9977_v58 = vadd.f32 %v16944_v52, %v21443_v7 }
 0x65c   : > { %17031 = vmatmul.mubr.msk.f32.gmra.mxu1 %vm24515_vm13, %v21654_v28  ;;  %vm24518_vm8 = vmmov %vm24508_vm4  ;;  %24520 = vst [vmem:[#allocation131_spill] sm:$0xff] %v21668_v50  ;;  %v10084_v38 = vsel %vm24522_vm10, %v21662_v53, 0.0 }
 0x65d   : > { %10022 = vst.msk [vmem:[#allocation2 + $0xc8] sm:$0xff] %vm24518_vm8, %v9952_v63  ;;  %vm24519_vm12 = vmmov %vm24508_vm4  ;;  %v21690_v63 = vld [vmem:[#allocation2 + $0xc0] sm:$0xff] }
 0x65e   : > { %16983 = vmatprep.mubr.msk.f32.mxu0 %vm24519_vm12, %v21660_v10  ;;  %vm24523_vm13 = vmmov %vm24508_vm4  ;;  %24529 = vst [vmem:[#allocation72_spill] sm:$0xff] %v21690_v63 }
 0x65f   : > { %16984 = vmatmul.mubr.msk.f32.gmra.mxu0 %vm24508_vm4, %v21668_v50  ;;  %17033 = vmatprep.mubr.msk.f32.mxu1 %vm24523_vm13, %v10084_v38  ;;  %vm24524_vm8 = vmmov %vm24508_vm4  ;;  %v21682_v57 = vld [vmem:[#allocation2 + $0xb8] sm:$0xff]  ;;  %vm24531_vm13 = vnez %v24530_v19  ;;  %v9971_v38 = vpop.f32.mrf.mxu1 }
 0x660   : > { %10025 = vst.msk [vmem:[#allocation2 + $0xe0] sm:$0xff] %vm24524_vm8, %v9967_v1  ;;  %vm24525_vm12 = vmmov %vm24508_vm4  ;;  %v21684_v27 = vld [vmem:[#allocation2 + $0xb7] sm:$0xff]  ;;  %16986 = vmatprep.mubr.msk.f32.mxu0 %vm24508_vm4, %v21682_v57  ;;  %v21698_v5 = vld [vmem:[#allocation2 + $0xbf] sm:$0xff] }
 0x661   : > { %17034 = vmatmul.mubr.msk.f32.gmra.mxu1 %vm24525_vm12, %v21676_v55  ;;  %24526 = vst [vmem:[#allocation97_spill] sm:$0xff] %v21682_v57  ;;  %24527 = vst [vmem:[#allocation48_spill] sm:$0xff] %v21684_v27  ;;  %v10086_v1 = vsel %vm24531_vm13, %v21684_v27, 0.0  ;;  %v16947_v52 = vpop.f32.mrf.mxu1 }
 0x662   : > { %vm24528_vm10 = vmmov %vm24508_vm4 }
 0x663   : > { %10024 = vst.msk [vmem:[#allocation2 + $0xd8] sm:$0xff] %vm24528_vm10, %v9962_v15  ;;  %vm24532_vm8 = vmmov %vm24508_vm4  ;;  %v9972_v15 = vadd.f32 %v21443_v7, %v9971_v38  ;;  %v9981_v10 = vpop.f32.mrf.mxu1  ;;  %v16955_v20 = vpop.f32.mrf.mxu0 }
 0x664   : > { %16987 = vmatmul.mubr.msk.f32.gmra.mxu0 %vm24532_vm8, %v21690_v63  ;;  %vm24533_vm12 = vmmov %vm24508_vm4  ;;  %v21704_v57 = vld [vmem:[#allocation2 + $0xc8] sm:$0xff]  ;;  %v9987_v63 = vadd.f32 %v16947_v52, %v21443_v7 }
 0x665   : > { %17036 = vmatprep.mubr.msk.f32.mxu1 %vm24533_vm12, %v10086_v1  ;;  %vm24534_vm10 = vmmov %vm24508_vm4  ;;  %24535 = vst [vmem:[#allocation129_spill] sm:$0xff] %v21704_v57  ;;  %v21706_v50 = vld [vmem:[#allocation2 + $0xc7] sm:$0xff]  ;;  %v21712_v1 = vld [vmem:[#allocation2 + $0xd0] sm:$0xff]  ;;  %v16950_v52 = vpop.f32.mrf.mxu1 }
 0x666   : > { %10027 = vst.msk [vmem:[#allocation2 + $0xf0] sm:$0xff] %vm24534_vm10, %v9977_v58  ;;  %17037 = vmatmul.mubr.msk.f32.gmra.mxu1 %vm24508_vm4, %v21698_v5  ;;  %24536 = vst [vmem:[#allocation125_spill] sm:$0xff] %v21706_v50  ;;  %v24540_v58 = vld [vmem:[#allocation34_spill] sm:$0xff] }
 0x667   : > { %vm24537_vm13 = vmmov %vm24508_vm4  ;;  %24539 = vst [vmem:[#allocation73_spill] sm:$0xff] %v21712_v1  ;;  %vm24541_vm12 = vnez %v24540_v58  ;;  %v21720_v35 = vld [vmem:[#allocation2 + $0xcf] sm:$0xff]  ;;  %v9991_v49 = vpop.f32.mrf.mxu1 }
 0x668   : > { %10026 = vst.msk [vmem:[#allocation2 + $0xe8] sm:$0xff] %vm24537_vm13, %v9972_v15  ;;  %vm24538_vm8 = vmmov %vm24508_vm4  ;;  %v10088_v38 = vsel %vm24541_vm12, %v21706_v50, 0.0  ;;  %v9982_v15 = vadd.f32 %v21443_v7, %v9981_v10 }
 0x669   : > { %16989 = vmatprep.mubr.msk.f32.mxu0 %vm24538_vm8, %v21704_v57  ;;  %vm24542_vm10 = vmmov %vm24508_vm4  ;;  %17039 = vmatprep.mubr.msk.f32.mxu1 %vm24508_vm4, %v10088_v38  ;;  %v21734_v38 = vld [vmem:[#allocation2 + $0xe0] sm:$0xff] }
 0x66a   : > { %16990 = vmatmul.mubr.msk.f32.gmra.mxu0 %vm24542_vm10, %v21712_v1  ;;  %vm24543_vm13 = vmmov %vm24508_vm4  ;;  %v21726_v57 = vld [vmem:[#allocation2 + $0xd8] sm:$0xff]  ;;  %v9997_v1 = vadd.f32 %v16950_v52, %v21443_v7  ;;  %24549 = vst [vmem:[#allocation17_spill] sm:$0xff] %v21734_v38 }
 0x66b   : > { %10029 = vst.msk [vmem:[#allocation2 + $0x100] sm:$0xff] %vm24543_vm13, %v9987_v63  ;;  %vm24544_vm8 = vmmov %vm24508_vm4  ;;  %v21728_v22 = vld [vmem:[#allocation2 + $0xd7] sm:$0xff]  ;;  %v24550_v63 = vld [vmem:[#allocation37_spill] sm:$0xff] }
 0x66c   : > { %17040 = vmatmul.mubr.msk.f32.gmra.mxu1 %vm24544_vm8, %v21720_v35  ;;  %24545 = vst [vmem:[#allocation15_spill] sm:$0xff] %v21726_v57  ;;  %24546 = vst [vmem:[#allocation82_spill] sm:$0xff] %v21728_v22  ;;  %v21742_v29 = vld [vmem:[#allocation2 + $0xdf] sm:$0xff] }
 0x66d   : > { %vm24547_vm12 = vmmov %vm24508_vm4 }
 0x66e   : > { %10028 = vst.msk [vmem:[#allocation2 + $0xf8] sm:$0xff] %vm24547_vm12, %v9982_v15  ;;  %vm24548_vm10 = vmmov %vm24508_vm4  ;;  %vm24551_vm4 = vnez %v24550_v63  ;;  %v9992_v15 = vadd.f32 %v21443_v7, %v9991_v49 }
 0x66f   : > { %16992 = vmatprep.mubr.msk.f32.mxu0 %vm24548_vm10, %v21726_v57  ;;  %v10090_v10 = vsel %vm24551_vm4, %v21728_v22, 0.0  ;;  %vm24552_vm13 = vmmov %vm24544_vm8  ;;  %v21748_v52 = vld [vmem:[#allocation2 + $0xe8] sm:$0xff] }
 0x670   : > { %16993 = vmatmul.mubr.msk.f32.gmra.mxu0 %vm24552_vm13, %v21734_v38  ;;  %17042 = vmatprep.mubr.msk.f32.mxu1 %vm24544_vm8, %v10090_v10  ;;  %vm24553_vm12 = vmmov %vm24544_vm8  ;;  %24555 = vst [vmem:[#allocation65_spill] sm:$0xff] %v21748_v52  ;;  %v21750_v57 = vld [vmem:[#allocation2 + $0xe7] sm:$0xff]  ;;  %v21755_v38 = vld [vmem:[#allocation2 + $0xf0] sm:$0xff] }
 0x671   : > { %10031 = vst.msk [vmem:[#allocation2 + $0x110] sm:$0xff] %vm24553_vm12, %v9997_v1  ;;  %vm24554_vm10 = vmmov %vm24544_vm8  ;;  %v24560_v10 = vld [vmem:[#allocation40_spill] sm:$0xff]  ;;  %v21763_v7 = vld [vmem:[#allocation2 + $0xef] sm:$0xff] }
 0x672   : > { %17043 = vmatmul.mubr.msk.f32.gmra.mxu1 %vm24554_vm10, %v21742_v29  ;;  %24556 = vst [vmem:[#allocation133_spill] sm:$0xff] %v21750_v57  ;;  %vm24557_vm4 = vmmov %vm24544_vm8  ;;  %vm24561_vm13 = vnez %v24560_v10  ;;  %v21773_v44 = vld [vmem:[#allocation2 + $0x100] sm:$0xff] }
 0x673   : > { %10030 = vst.msk [vmem:[#allocation2 + $0x108] sm:$0xff] %vm24557_vm4, %v9992_v15  ;;  %vm24558_vm0 = vmmov %vm24557_vm4  ;;  %v10092_v1 = vsel %vm24561_vm13, %v21750_v57, 0.0 }
 0x674   : > { %16995 = vmatprep.mubr.msk.f32.mxu0 %vm24558_vm0, %v21748_v52  ;;  %24559 = vst [vmem:[#allocation98_spill] sm:$0xff] %v21755_v38  ;;  %vm24562_vm8 = vmmov %vm24558_vm0  ;;  %v10773_v52 = vld [vmem:[#allocation2 + $0x9] sm:$0xff] }
 0x675   : > { %16996 = vmatmul.mubr.msk.f32.gmra.mxu0 %vm24562_vm8, %v21755_v38  ;;  %vm24563_vm12 = vmmov %vm24558_vm0  ;;  %v21767_v49 = vld [vmem:[#allocation2 + $0xf8] sm:$0xff]  ;;  %24566 = vst [vmem:[#allocation127_spill] sm:$0xff] %v21773_v44 }
 0x676   : > { %17045 = vmatprep.mubr.msk.f32.mxu1 %vm24563_vm12, %v10092_v1  ;;  %vm24564_vm10 = vmmov %vm24558_vm0  ;;  %24565 = vst [vmem:[#allocation100_spill] sm:$0xff] %v21767_v49  ;;  %v21769_v15 = vld [vmem:[#allocation2 + $0xf7] sm:$0xff]  ;;  %16998 = vmatprep.mubr.msk.f32.mxu0 %vm24558_vm0, %v21767_v49  ;;  %v21781_v1 = vld [vmem:[#allocation2 + $0xff] sm:$0xff]  ;;  %v11224_v49 = vsel %vm24432_vm7, %v21464_v43, 0.0 }
 0x677   : > { %17046 = vmatmul.mubr.msk.f32.gmra.mxu1 %vm24564_vm10, %v21763_v7  ;;  %v10094_v38 = vsel %vm24183_vm9, %v21769_v15, 0.0  ;;  %vm24568_vm4 = vmmov %vm24558_vm0  ;;  %v21808_v43 = vld [vmem:[%s23063_s13 + $0x38] sm:$0xff] }
 0x678   : > { %vm24569_vm8 = vmmov %vm24558_vm0 }
 0x679   : > { %16999 = vmatmul.mubr.msk.f32.gmra.mxu0 %vm24568_vm4, %v21773_v44  ;;  %17048 = vmatprep.mubr.msk.f32.mxu1 %vm24569_vm8, %v10094_v38  ;;  %vm24570_vm12 = vmmov %vm24558_vm0  ;;  %v21795_v38 = vld [vmem:[%s23063_s13 + $0x30] sm:$0xff]  ;;  %v21798_v44 = vld [vmem:[#allocation2 + $0x19] sm:$0xff] }
 0x67a   : > { %vm24571_vm10 = vmmov %vm24558_vm0 }
 0x67b   : > { %17049 = vmatmul.mubr.msk.f32.gmra.mxu1 %vm24570_vm12, %v21781_v1  ;;  %17053 = vmatprep.mubr.msk.f32.mxu0 %vm24571_vm10, %v10773_v52  ;;  %vm24573_vm4 = vmmov %vm24558_vm0  ;;  %v17005_v52 = vpop.f32.mrf.mxu1 }
 0x67c   : > { %17103 = vmatprep.mubr.msk.f32.mxu1 %vm24558_vm0, %v11224_v49  ;;  %vm24574_vm8 = vmmov %vm24558_vm0  ;;  %v10808_v49 = vsel %vm18254_vm14, %v21800_v21, 0.0  ;;  %v21821_v54 = vadd.f32 %v17005_v52, %v16955_v20  ;;  %v10810_v20 = vsel %vm18285_vm1, %v21826_v34, 0.0  ;;  %v21841_v52 = vld [vmem:[#allocation2 + $0x39] sm:$0xff] }
 0x67d   : > { %17054 = vmatmul.mubr.msk.f32.vlgmr.msra.gmra.mxu0 %vm24573_vm4, %v10806_v31  ;;  %vm24575_vm12 = vmmov %vm24558_vm0  ;;  %v11226_v31 = vsel %vm24091_vm3, %v21486_v56, 0.0 }
 0x67e   : > { %17152 = vmatpush3.msra.mxu0 %v21437_v51  ;;  %17056 = vmatprep.mubr.msk.f32.mxu0 %vm24574_vm8, %v21798_v44  ;;  %vm24576_vm10 = vmmov %vm24558_vm0  ;;  %24578 = vst [vmem:[#allocation38_spill] sm:$0xff] %v21821_v54  ;;  %v21857_v54 = vld [vmem:[#allocation2 + $0x49] sm:$0xff] }
 0x67f   : > { %17104 = vmatmul.mubr.msk.f32.vlgmr.msra.gmra.mxu1 %vm24575_vm12, %v21478_v47  ;;  %17251 = vmatprep.subr.mxu0 %v21795_v38  ;;  %v21824_v47 = vld [vmem:[#allocation2 + $0x29] sm:$0xff]  ;;  %vm24579_vm4 = vmmov %vm24558_vm0 }
 0x680   : > { %17106 = vmatprep.mubr.msk.f32.mxu1 %vm24576_vm10, %v11226_v31  ;;  %17202 = vmatpush3.msra.mxu1 %v21455_v24  ;;  %vm24580_vm8 = vmmov %vm24558_vm0  ;;  %v11228_v24 = vsel %vm24098_vm5, %v21508_v2, 0.0  ;;  %v22037_v2 = vld [vmem:[#allocation2 + $0x101] sm:$0xff] }
 0x681   : > { %17057 = vmatmul.mubr.msk.f32.gmra.mxu0 %vm24558_vm0, %v10808_v49  ;;  %17301 = vmatprep.subr.mxu1 %v21808_v43  ;;  %vm24581_vm12 = vmmov %vm24558_vm0  ;;  %v21843_v49 = vld [vmem:[#allocation2 + $0x41] sm:$0xff] }
 0x682   : > { %17059 = vmatprep.mubr.msk.f32.mxu0 %vm24579_vm4, %v21824_v47  ;;  %vm24583_vm10 = vmmov %vm24558_vm0 }
 0x683   : > { %17107 = vmatmul.mubr.msk.f32.gmra.mxu1 %vm24580_vm8, %v21500_v30  ;;  %vm24584_vm4 = vmmov %vm24558_vm0  ;;  %v11230_v30 = vsel %vm24455_vm11, %v21530_v9, 0.0  ;;  %v21875_v9 = vld [vmem:[#allocation2 + $0x61] sm:$0xff] }
 0x684   : > { %17109 = vmatprep.mubr.msk.f32.mxu1 %vm24581_vm12, %v11228_v24  ;;  %vm24585_vm8 = vmmov %vm24558_vm0 }
 0x685   : > { %17060 = vmatmul.mubr.msk.f32.gmra.mxu0 %vm24583_vm10, %v10810_v20  ;;  %v10812_v20 = vsel %vm18307_vm2, %v21843_v49, 0.0  ;;  %vm24587_vm12 = vmmov %vm24558_vm0 }
 0x686   : > { %17062 = vmatprep.mubr.msk.f32.mxu0 %vm24558_vm0, %v21841_v52  ;;  %vm24588_vm10 = vmmov %vm24558_vm0 }
 0x687   : > { %17110 = vmatmul.mubr.msk.f32.gmra.mxu1 %vm24584_vm4, %v21522_v48  ;;  %v11232_v48 = vsel %vm24463_vm6, %v21552_v37, 0.0  ;;  %vm24589_vm4 = vmmov %vm24558_vm0  ;;  %vm24594_vm6 = vnez %v24472_v16  ;;  %v21891_v37 = vld [vmem:[#allocation2 + $0x71] sm:$0xff]  ;;  %v21905_v16 = vld [vmem:[#allocation2 + $0x79] sm:$0xff] }
 0x688   : > { %17112 = vmatprep.mubr.msk.f32.mxu1 %vm24585_vm8, %v11230_v30  ;;  %v24590_v30 = vld [vmem:[#allocation51_spill] sm:$0xff] }
 0x689   : > { %17063 = vmatmul.mubr.msk.f32.gmra.mxu0 %vm24587_vm12, %v10812_v20  ;;  %vm24591_vm8 = vnez %v24590_v30  ;;  %vm24592_vm12 = vmmov %vm24558_vm0 }
 0x68a   : > { %17065 = vmatprep.mubr.msk.f32.mxu0 %vm24588_vm10, %v21857_v54  ;;  %v10814_v20 = vsel %vm24591_vm8, %v21859_v26, 0.0  ;;  %vm24593_vm10 = vmmov %vm24558_vm0 }
 0x68b   : > { %17113 = vmatmul.mubr.msk.f32.gmra.mxu1 %vm24558_vm0, %v21544_v41  ;;  %v11234_v41 = vsel %vm24594_vm6, %v21574_v6, 0.0  ;;  %vm24600_vm6 = vnez %v24481_v42  ;;  %v21907_v6 = vld [vmem:[#allocation2 + $0x81] sm:$0xff]  ;;  %v21921_v42 = vld [vmem:[#allocation2 + $0x89] sm:$0xff] }
 0x68c   : > { %17115 = vmatprep.mubr.msk.f32.mxu1 %vm24589_vm4, %v11232_v48  ;;  %vm24595_vm4 = vmmov %vm24558_vm0  ;;  %v24596_v48 = vld [vmem:[#allocation52_spill] sm:$0xff] }
 0x68d   : > { %17066 = vmatmul.mubr.msk.f32.gmra.mxu0 %vm24592_vm12, %v10814_v20  ;;  %vm24597_vm11 = vnez %v24596_v48  ;;  %vm24598_vm12 = vmmov %vm24558_vm0 }
 0x68e   : > { %17068 = vmatprep.mubr.msk.f32.mxu0 %vm24593_vm10, %v21873_v62  ;;  %v10816_v20 = vsel %vm24597_vm11, %v21875_v9, 0.0  ;;  %vm24599_vm10 = vmmov %vm24558_vm0 }
 0x68f   : > { %17116 = vmatmul.mubr.msk.f32.gmra.mxu1 %vm24558_vm0, %v21566_v23  ;;  %v11236_v23 = vsel %vm24600_vm6, %v21596_v12, 0.0  ;;  %vm24606_vm6 = vnez %v24491_v8  ;;  %v21923_v12 = vld [vmem:[#allocation2 + $0x91] sm:$0xff]  ;;  %v21937_v8 = vld [vmem:[#allocation2 + $0x99] sm:$0xff] }
 0x690   : > { %17118 = vmatprep.mubr.msk.f32.mxu1 %vm24595_vm4, %v11234_v41  ;;  %vm24601_vm4 = vmmov %vm24558_vm0  ;;  %v24602_v41 = vld [vmem:[#allocation53_spill] sm:$0xff] }
 0x691   : > { %17069 = vmatmul.mubr.msk.f32.gmra.mxu0 %vm24598_vm12, %v10816_v20  ;;  %vm24603_vm5 = vnez %v24602_v41  ;;  %vm24604_vm12 = vmmov %vm24558_vm0 }
 0x692   : > { %17071 = vmatprep.mubr.msk.f32.mxu0 %vm24599_vm10, %v21889_v46  ;;  %v10818_v20 = vsel %vm24603_vm5, %v21891_v37, 0.0  ;;  %vm24605_vm10 = vmmov %vm24558_vm0 }
 0x693   : > { %17119 = vmatmul.mubr.msk.f32.gmra.mxu1 %vm24558_vm0, %v21588_v25  ;;  %v11238_v25 = vsel %vm24606_vm6, %v21618_v14, 0.0  ;;  %vm24612_vm6 = vnez %v24501_v60  ;;  %v21939_v14 = vld [vmem:[#allocation2 + $0xa1] sm:$0xff]  ;;  %v21953_v60 = vld [vmem:[#allocation2 + $0xa9] sm:$0xff] }
 0x694   : > { %17121 = vmatprep.mubr.msk.f32.mxu1 %vm24601_vm4, %v11236_v23  ;;  %vm24607_vm4 = vmmov %vm24558_vm0  ;;  %v24608_v23 = vld [vmem:[#allocation54_spill] sm:$0xff] }
 0x695   : > { %17072 = vmatmul.mubr.msk.f32.gmra.mxu0 %vm24604_vm12, %v10818_v20  ;;  %vm24609_vm3 = vnez %v24608_v23  ;;  %vm24610_vm12 = vmmov %vm24558_vm0 }
 0x696   : > { %17074 = vmatprep.mubr.msk.f32.mxu0 %vm24605_vm10, %v21905_v16  ;;  %v10820_v20 = vsel %vm24609_vm3, %v21907_v6, 0.0  ;;  %vm24611_vm10 = vmmov %vm24558_vm0 }
 0x697   : > { %17122 = vmatmul.mubr.msk.f32.gmra.mxu1 %vm24558_vm0, %v21610_v59  ;;  %v11240_v59 = vsel %vm24612_vm6, %v21640_v17, 0.0  ;;  %vm24618_vm6 = vnez %v24511_v3  ;;  %v21955_v17 = vld [vmem:[#allocation2 + $0xb1] sm:$0xff]  ;;  %v21969_v3 = vld [vmem:[#allocation2 + $0xb9] sm:$0xff] }
 0x698   : > { %17124 = vmatprep.mubr.msk.f32.mxu1 %vm24607_vm4, %v11238_v25  ;;  %vm24613_vm4 = vmmov %vm24558_vm0  ;;  %v24614_v25 = vld [vmem:[#allocation55_spill] sm:$0xff] }
 0x699   : > { %17075 = vmatmul.mubr.msk.f32.gmra.mxu0 %vm24610_vm12, %v10820_v20  ;;  %vm24615_vm7 = vnez %v24614_v25  ;;  %vm24616_vm12 = vmmov %vm24558_vm0 }
 0x69a   : > { %17077 = vmatprep.mubr.msk.f32.mxu0 %vm24611_vm10, %v21921_v42  ;;  %v10822_v20 = vsel %vm24615_vm7, %v21923_v12, 0.0  ;;  %vm24617_vm10 = vmmov %vm24558_vm0 }
 0x69b   : > { %17125 = vmatmul.mubr.msk.f32.gmra.mxu1 %vm24558_vm0, %v21632_v33  ;;  %v11242_v33 = vsel %vm24618_vm6, %v21662_v53, 0.0  ;;  %vm24624_vm6 = vnez %v24521_v18  ;;  %v21971_v53 = vld [vmem:[#allocation2 + $0xc1] sm:$0xff]  ;;  %v21985_v18 = vld [vmem:[#allocation2 + $0xc9] sm:$0xff] }
 0x69c   : > { %17127 = vmatprep.mubr.msk.f32.mxu1 %vm24613_vm4, %v11240_v59  ;;  %vm24619_vm4 = vmmov %vm24558_vm0  ;;  %v24620_v59 = vld [vmem:[#allocation56_spill] sm:$0xff] }
 0x69d   : > { %17078 = vmatmul.mubr.msk.f32.gmra.mxu0 %vm24616_vm12, %v10822_v20  ;;  %vm24621_vm7 = vnez %v24620_v59  ;;  %vm24622_vm12 = vmmov %vm24558_vm0 }
 0x69e   : > { %17080 = vmatprep.mubr.msk.f32.mxu0 %vm24617_vm10, %v21937_v8  ;;  %v10824_v20 = vsel %vm24621_vm7, %v21939_v14, 0.0  ;;  %vm24623_vm10 = vmmov %vm24558_vm0 }
 0x69f   : > { %17128 = vmatmul.mubr.msk.f32.gmra.mxu1 %vm24558_vm0, %v21654_v28  ;;  %v11244_v28 = vsel %vm24624_vm6, %v21684_v27, 0.0  ;;  %vm24630_vm6 = vnez %v24530_v19  ;;  %v21987_v27 = vld [vmem:[#allocation2 + $0xd1] sm:$0xff]  ;;  %v22001_v19 = vld [vmem:[#allocation2 + $0xd9] sm:$0xff] }
 0x6a0   : > { %17130 = vmatprep.mubr.msk.f32.mxu1 %vm24619_vm4, %v11242_v33  ;;  %vm24625_vm4 = vmmov %vm24558_vm0  ;;  %v24626_v33 = vld [vmem:[#allocation57_spill] sm:$0xff] }
 0x6a1   : > { %17081 = vmatmul.mubr.msk.f32.gmra.mxu0 %vm24622_vm12, %v10824_v20  ;;  %vm24627_vm7 = vnez %v24626_v33  ;;  %vm24628_vm12 = vmmov %vm24558_vm0 }
 0x6a2   : > { %17083 = vmatprep.mubr.msk.f32.mxu0 %vm24623_vm10, %v21953_v60  ;;  %v10826_v20 = vsel %vm24627_vm7, %v21955_v17, 0.0  ;;  %vm24629_vm10 = vmmov %vm24558_vm0 }
 0x6a3   : > { %17131 = vmatmul.mubr.msk.f32.gmra.mxu1 %vm24558_vm0, %v21676_v55  ;;  %v11246_v55 = vsel %vm24630_vm6, %v21706_v50, 0.0  ;;  %vm24636_vm6 = vnez %v24540_v58  ;;  %v22003_v50 = vld [vmem:[#allocation2 + $0xe1] sm:$0xff]  ;;  %v22017_v58 = vld [vmem:[#allocation2 + $0xe9] sm:$0xff] }
 0x6a4   : > { %17133 = vmatprep.mubr.msk.f32.mxu1 %vm24625_vm4, %v11244_v28  ;;  %vm24631_vm4 = vmmov %vm24558_vm0  ;;  %v24632_v28 = vld [vmem:[#allocation58_spill] sm:$0xff] }
 0x6a5   : > { %17084 = vmatmul.mubr.msk.f32.gmra.mxu0 %vm24628_vm12, %v10826_v20  ;;  %vm24633_vm7 = vnez %v24632_v28  ;;  %vm24634_vm12 = vmmov %vm24558_vm0 }
 0x6a6   : > { %17086 = vmatprep.mubr.msk.f32.mxu0 %vm24629_vm10, %v21969_v3  ;;  %v10828_v20 = vsel %vm24633_vm7, %v21971_v53, 0.0  ;;  %vm24635_vm10 = vmmov %vm24558_vm0 }
 0x6a7   : > { %17134 = vmatmul.mubr.msk.f32.gmra.mxu1 %vm24558_vm0, %v21698_v5  ;;  %v11248_v5 = vsel %vm24636_vm6, %v21728_v22, 0.0  ;;  %vm24642_vm6 = vnez %v24550_v63  ;;  %v22019_v22 = vld [vmem:[#allocation2 + $0xf1] sm:$0xff]  ;;  %v22032_v63 = vld [vmem:[#allocation2 + $0x107] sm:$0xff] }
 0x6a8   : > { %17136 = vmatprep.mubr.msk.f32.mxu1 %vm24631_vm4, %v11246_v55  ;;  %vm24637_vm4 = vmmov %vm24558_vm0  ;;  %v24638_v55 = vld [vmem:[#allocation59_spill] sm:$0xff] }
 0x6a9   : > { %17087 = vmatmul.mubr.msk.f32.gmra.mxu0 %vm24634_vm12, %v10828_v20  ;;  %vm24639_vm7 = vnez %v24638_v55  ;;  %vm24640_vm12 = vmmov %vm24558_vm0 }
 0x6aa   : > { %17089 = vmatprep.mubr.msk.f32.mxu0 %vm24635_vm10, %v21985_v18  ;;  %v10830_v20 = vsel %vm24639_vm7, %v21987_v27, 0.0  ;;  %vm24641_vm10 = vmmov %vm24558_vm0 }
 0x6ab   : > { %17137 = vmatmul.mubr.msk.f32.gmra.mxu1 %vm24558_vm0, %v21720_v35  ;;  %v11250_v35 = vsel %vm24642_vm6, %v21750_v57, 0.0  ;;  %v22035_v57 = vld [vmem:[#allocation2 + $0xf9] sm:$0xff] }
 0x6ac   : > { %17139 = vmatprep.mubr.msk.f32.mxu1 %vm24637_vm4, %v11248_v5  ;;  %vm24643_vm4 = vmmov %vm24558_vm0  ;;  %v24644_v5 = vld [vmem:[#allocation60_spill] sm:$0xff] }
 0x6ad   : > { %17090 = vmatmul.mubr.msk.f32.gmra.mxu0 %vm24640_vm12, %v10830_v20  ;;  %vm24645_vm7 = vnez %v24644_v5  ;;  %vm24646_vm12 = vmmov %vm24558_vm0 }
 0x6ae   : > { %17092 = vmatprep.mubr.msk.f32.mxu0 %vm24641_vm10, %v22001_v19  ;;  %v10832_v20 = vsel %vm24645_vm7, %v22003_v50, 0.0  ;;  %vm24647_vm10 = vmmov %vm24558_vm0 }
 0x6af   : > { %17140 = vmatmul.mubr.msk.f32.gmra.mxu1 %vm24558_vm0, %v21742_v29  ;;  %v11252_v29 = vsel %vm24561_vm13, %v21769_v15, 0.0  ;;  %v24654_v15 = vld [vmem:[#allocation62_spill] sm:$0xff] }
 0x6b0   : > { %17142 = vmatprep.mubr.msk.f32.mxu1 %vm24643_vm4, %v11250_v35  ;;  %vm24648_vm4 = vmmov %vm24558_vm0  ;;  %v24649_v35 = vld [vmem:[#allocation61_spill] sm:$0xff]  ;;  %vm24655_vm13 = vnez %v24654_v15 }
 0x6b1   : > { %17093 = vmatmul.mubr.msk.f32.gmra.mxu0 %vm24646_vm12, %v10832_v20  ;;  %vm24650_vm6 = vnez %v24649_v35  ;;  %vm24651_vm12 = vmmov %vm24558_vm0 }
 0x6b2   : > { %17095 = vmatprep.mubr.msk.f32.mxu0 %vm24647_vm10, %v22017_v58  ;;  %v10834_v20 = vsel %vm24650_vm6, %v22019_v22, 0.0  ;;  %vm24652_vm10 = vmmov %vm24558_vm0 }
 0x6b3   : > { %17143 = vmatmul.mubr.msk.f32.gmra.mxu1 %vm24558_vm0, %v21763_v7  ;;  %v11254_v7 = vsel %vm24183_vm9, %v22032_v63, 0.0  ;;  %vm24657_vm6 = vmmov %vm24558_vm0 }
 0x6b4   : > { %17145 = vmatprep.mubr.msk.f32.mxu1 %vm24648_vm4, %v11252_v29  ;;  %vm24653_vm4 = vmmov %vm24558_vm0  ;;  %v10836_v29 = vsel %vm24655_vm13, %v22037_v2, 0.0 }
 0x6b5   : > { %17096 = vmatmul.mubr.msk.f32.gmra.mxu0 %vm24651_vm12, %v10834_v20  ;;  %vm24656_vm12 = vmmov %vm24558_vm0  ;;  %v22051_v20 = vld [vmem:[#allocation2 + $0x10f] sm:$0xff] }
 0x6b6   : > { %17098 = vmatprep.mubr.msk.f32.mxu0 %vm24652_vm10, %v22035_v57  ;;  %vm24658_vm10 = vmmov %vm24558_vm0 }
 0x6b7   : > { %17146 = vmatmul.mubr.msk.f32.gmra.mxu1 %vm24558_vm0, %v21781_v1  ;;  %v22062_v1 = vld [vmem:[%s23063_s13 + $0x40] sm:$0xff] }
 0x6b8   : > { %17148 = vmatprep.mubr.msk.f32.mxu1 %vm24653_vm4, %v11254_v7  ;;  %vm24659_vm4 = vmmov %vm24558_vm0  ;;  %v22209_v7 = vld [vmem:[#allocation2 + $0x108] sm:$0xff] }
 0x6b9   : > { %17099 = vmatmul.mubr.msk.f32.gmra.mxu0 %vm24656_vm12, %v10836_v29  ;;  %vm24660_vm12 = vmmov %vm24558_vm0  ;;  %v22219_v29 = vld [vmem:[#allocation2 + $0x111] sm:$0xff] }
 0x6ba   : > { %17153 = vmatprep.mubr.msk.f32.mxu0 %vm24657_vm6, %v21462_v4  ;;  %v12031_v4 = vsel %vm18232_vm15, %v21800_v21, 0.0  ;;  %vm24661_vm6 = vmmov %vm24558_vm0  ;;  %v24690_v21 = vld [vmem:[#allocation117_spill] sm:$0xff] }
 0x6bb   : > { %17149 = vmatmul.mubr.msk.f32.gmra.mxu1 %vm24658_vm10, %v22051_v20  ;;  %vm24662_vm10 = vmmov %vm24558_vm0 }
 0x6bc   : > { %17203 = vmatprep.mubr.msk.f32.mxu1 %vm24558_vm0, %v21798_v44  ;;  %vm24666_vm15 = vmmov %vm24558_vm0  ;;  %v24697_v44 = vld [vmem:[#allocation121_spill] sm:$0xff] }
 0x6bd   : > { %17154 = vmatmul.mubr.msk.f32.vlgmr.msra.gmra.mxu0 %vm24659_vm4, %v21470_v61  ;;  %vm24663_vm4 = vmmov %vm24558_vm0  ;;  %v12033_v61 = vsel %vm18254_vm14, %v21826_v34, 0.0  ;;  %v24670_v34 = vld [vmem:[#allocation119_spill] sm:$0xff] }
 0x6be   : > { %17252 = vmatpush3.msra.mxu0 %v21795_v38  ;;  %17156 = vmatprep.mubr.msk.f32.mxu0 %vm24660_vm12, %v21484_v13  ;;  %vm24664_vm12 = vmmov %vm24558_vm0  ;;  %v12035_v13 = vsel %vm18285_vm1, %v21843_v49, 0.0  ;;  %v24703_v38 = vld [vmem:[#allocation97_spill] sm:$0xff]  ;;  %v24730_v49 = vld [vmem:[#allocation100_spill] sm:$0xff] }
 0x6bf   : > { %17204 = vmatmul.mubr.msk.f32.vlgmr.msra.gmra.mxu1 %vm24661_vm6, %v12031_v4  ;;  %17351 = vmatprep.subr.mxu0 %v22062_v1  ;;  %vm24665_vm6 = vmmov %vm24558_vm0  ;;  %v24739_v4 = vld [vmem:[#allocation4_spill] sm:$0xff] }
 0x6c0   : > { %17206 = vmatprep.mubr.msk.f32.mxu1 %vm24662_vm10, %v21824_v47  ;;  %17302 = vmatpush3.msra.mxu1 %v21808_v43  ;;  %vm24667_vm10 = vmmov %vm24558_vm0  ;;  %v24710_v43 = vld [vmem:[#allocation129_spill] sm:$0xff]  ;;  %v24717_v47 = vld [vmem:[#allocation15_spill] sm:$0xff] }
 0x6c1   : > { %17157 = vmatmul.mubr.msk.f32.gmra.mxu0 %vm24558_vm0, %v21492_v45  ;;  %v12037_v45 = vsel %vm18307_vm2, %v21859_v26, 0.0  ;;  %v24679_v26 = vld [vmem:[#allocation66_spill] sm:$0xff] }
 0x6c2   : > { %17159 = vmatprep.mubr.msk.f32.mxu0 %vm24663_vm4, %v21506_v40  ;;  %vm24668_vm4 = vmmov %vm24558_vm0  ;;  %v24674_v40 = vld [vmem:[#allocation27_spill] sm:$0xff] }
 0x6c3   : > { %17207 = vmatmul.mubr.msk.f32.gmra.mxu1 %vm24664_vm12, %v12033_v61  ;;  %vm24669_vm12 = vmmov %vm24558_vm0 }
 0x6c4   : > { %17209 = vmatprep.mubr.msk.f32.mxu1 %vm24665_vm6, %v21841_v52  ;;  %vm24671_vm6 = vmmov %vm24558_vm0  ;;  %v24724_v52 = vld [vmem:[#allocation65_spill] sm:$0xff] }
 0x6c5   : > { %17160 = vmatmul.mubr.msk.f32.gmra.mxu0 %vm24666_vm15, %v21514_v32  ;;  %vm24672_vm15 = vmmov %vm24558_vm0  ;;  %v24675_v32 = vld [vmem:[#allocation93_spill] sm:$0xff] }
 0x6c6   : > { %17162 = vmatprep.mubr.msk.f32.mxu0 %vm24667_vm10, %v21528_v39  ;;  %vm24673_vm10 = vmmov %vm24558_vm0  ;;  %v24681_v39 = vld [vmem:[#allocation91_spill] sm:$0xff] }
 0x6c7   : > { %17210 = vmatmul.mubr.msk.f32.gmra.mxu1 %vm24558_vm0, %v12035_v13  ;;  %v12836_v13 = vld [vmem:[#allocation2 + $0x28] sm:$0xff] }
 0x6c8   : > { %17212 = vmatprep.mubr.msk.f32.mxu1 %vm24668_vm4, %v21857_v54  ;;  %vm24676_vm4 = vmmov %vm24558_vm0  ;;  %v12039_v54 = vsel %vm24591_vm8, %v21875_v9, 0.0  ;;  %v24684_v9 = vld [vmem:[#allocation126_spill] sm:$0xff] }
 0x6c9   : > { %17163 = vmatmul.mubr.msk.f32.gmra.mxu0 %vm24669_vm12, %v21536_v11  ;;  %vm24677_vm12 = vmmov %vm24558_vm0  ;;  %v24686_v11 = vld [vmem:[#allocation86_spill] sm:$0xff] }
 0x6ca   : > { %17165 = vmatprep.mubr.msk.f32.mxu0 %vm24671_vm6, %v24670_v34  ;;  %vm24678_vm6 = vmmov %vm24558_vm0  ;;  %v12418_v34 = vld [vmem:[#allocation2 + $0x2f] sm:$0xff] }
 0x6cb   : > { %17213 = vmatmul.mubr.msk.f32.gmra.mxu1 %vm24672_vm15, %v12037_v45  ;;  %vm24680_vm15 = vmmov %vm24558_vm0  ;;  %v24745_v45 = vld [vmem:[#allocation118_spill] sm:$0xff] }
 0x6cc   : > { %17215 = vmatprep.mubr.msk.f32.mxu1 %vm24673_vm10, %v21873_v62  ;;  %vm24682_vm10 = vmmov %vm24558_vm0  ;;  %v12041_v62 = vsel %vm24597_vm11, %v21891_v37, 0.0  ;;  %v24691_v37 = vld [vmem:[#allocation116_spill] sm:$0xff] }
 0x6cd   : > { %17166 = vmatmul.mubr.msk.f32.gmra.mxu0 %vm24558_vm0, %v24674_v40  ;;  %v24746_v40 = vld [vmem:[#allocation5_spill] sm:$0xff] }
 0x6ce   : > { %17168 = vmatprep.mubr.msk.f32.mxu0 %vm24676_vm4, %v24675_v32  ;;  %vm24683_vm4 = vmmov %vm24558_vm0 }
 0x6cf   : > { %17216 = vmatmul.mubr.msk.f32.gmra.mxu1 %vm24677_vm12, %v12039_v54  ;;  %vm24685_vm12 = vmmov %vm24558_vm0  ;;  %v22242_v54 = vpop.f32.mrf.mxu0 }
 0x6d0   : > { %17218 = vmatprep.mubr.msk.f32.mxu1 %vm24678_vm6, %v21889_v46  ;;  %vm24687_vm6 = vmmov %vm24558_vm0  ;;  %v12043_v46 = vsel %vm24603_vm5, %v21907_v6, 0.0  ;;  %v24695_v6 = vld [vmem:[#allocation99_spill] sm:$0xff] }
 0x6d1   : > { %17169 = vmatmul.mubr.msk.f32.gmra.mxu0 %vm24680_vm15, %v24679_v26  ;;  %vm24688_vm15 = vmmov %vm24558_vm0  ;;  %v12838_v26 = vld [vmem:[#allocation2 + $0x38] sm:$0xff] }
 0x6d2   : > { %17171 = vmatprep.mubr.msk.f32.mxu0 %vm24682_vm10, %v24681_v39  ;;  %vm24689_vm10 = vmmov %vm24558_vm0  ;;  %v22245_v39 = vpop.f32.mrf.mxu1 }
 0x6d3   : > { %17219 = vmatmul.mubr.msk.f32.gmra.mxu1 %vm24558_vm0, %v12041_v62  ;;  %v12420_v62 = vld [vmem:[#allocation2 + $0x3f] sm:$0xff] }
 0x6d4   : > { %17221 = vmatprep.mubr.msk.f32.mxu1 %vm24683_vm4, %v21905_v16  ;;  %vm24692_vm4 = vmmov %vm24558_vm0  ;;  %v12045_v16 = vsel %vm24609_vm3, %v21923_v12, 0.0  ;;  %v24701_v12 = vld [vmem:[#allocation131_spill] sm:$0xff] }
 0x6d5   : > { %17172 = vmatmul.mubr.msk.f32.gmra.mxu0 %vm24685_vm12, %v24684_v9  ;;  %vm24693_vm12 = vmmov %vm24558_vm0 }
 0x6d6   : > { %17174 = vmatprep.mubr.msk.f32.mxu0 %vm24687_vm6, %v24686_v11  ;;  %vm24694_vm6 = vmmov %vm24558_vm0  ;;  %v24752_v11 = vld [vmem:[#allocation79_spill] sm:$0xff] }
 0x6d7   : > { %17222 = vmatmul.mubr.msk.f32.gmra.mxu1 %vm24688_vm15, %v12043_v46  ;;  %vm24696_vm15 = vmmov %vm24558_vm0  ;;  %v24753_v46 = vld [vmem:[#allocation6_spill] sm:$0xff] }
 0x6d8   : > { %17224 = vmatprep.mubr.msk.f32.mxu1 %vm24689_vm10, %v21921_v42  ;;  %vm24698_vm10 = vmmov %vm24558_vm0 }
 0x6d9   : > { %17175 = vmatmul.mubr.msk.f32.gmra.mxu0 %vm24558_vm0, %v24690_v21  ;;  %vm24699_vm0 = vnez %v24614_v25  ;;  %vm24700_vm5 = vmmov %vm24692_vm4 }
 0x6da   : > { %17177 = vmatprep.mubr.msk.f32.mxu0 %vm24692_vm4, %v24691_v37  ;;  %v12047_v42 = vsel %vm24699_vm0, %v21939_v14, 0.0  ;;  %vm24707_vm3 = vmmov %vm24692_vm4  ;;  %v24708_v14 = vld [vmem:[#allocation72_spill] sm:$0xff] }
 0x6db   : > { %17225 = vmatmul.mubr.msk.f32.gmra.mxu1 %vm24693_vm12, %v12045_v16  ;;  %vm24702_vm12 = vmmov %vm24692_vm4  ;;  %v12839_v37 = vld [vmem:[#allocation2 + $0x40] sm:$0xff] }
 0x6dc   : > { %17227 = vmatprep.mubr.msk.f32.mxu1 %vm24694_vm6, %v21937_v8  ;;  %vm24704_vm6 = vmmov %vm24692_vm4 }
 0x6dd   : > { %17178 = vmatmul.mubr.msk.f32.gmra.mxu0 %vm24696_vm15, %v24695_v6  ;;  %vm24705_vm15 = vnez %v24620_v59  ;;  %vm24714_vm0 = vmmov %vm24707_vm3 }
 0x6de   : > { %17180 = vmatprep.mubr.msk.f32.mxu0 %vm24698_vm10, %v24697_v44  ;;  %v12049_v8 = vsel %vm24705_vm15, %v21955_v17, 0.0  ;;  %vm24706_vm10 = vmmov %vm24692_vm4  ;;  %v24715_v17 = vld [vmem:[#allocation73_spill] sm:$0xff] }
 0x6df   : > { %17228 = vmatmul.mubr.msk.f32.gmra.mxu1 %vm24692_vm4, %v12047_v42  ;;  %vm24709_vm4 = vmmov %vm24707_vm3  ;;  %v12840_v44 = vld [vmem:[#allocation2 + $0x48] sm:$0xff] }
 0x6e0   : > { %17230 = vmatprep.mubr.msk.f32.mxu1 %vm24700_vm5, %v21953_v60  ;;  %vm24711_vm5 = vmmov %vm24707_vm3 }
 0x6e1   : > { %17181 = vmatmul.mubr.msk.f32.gmra.mxu0 %vm24702_vm12, %v24701_v12  ;;  %vm24712_vm12 = vnez %v24626_v33  ;;  %vm24721_vm15 = vmmov %vm24714_vm0  ;;  %v12422_v12 = vld [vmem:[#allocation2 + $0x4f] sm:$0xff] }
 0x6e2   : > { %17183 = vmatprep.mubr.msk.f32.mxu0 %vm24704_vm6, %v24703_v38  ;;  %v12051_v60 = vsel %vm24712_vm12, %v21971_v53, 0.0  ;;  %vm24713_vm6 = vmmov %vm24707_vm3  ;;  %v24722_v53 = vld [vmem:[#allocation17_spill] sm:$0xff] }
 0x6e3   : > { %17231 = vmatmul.mubr.msk.f32.gmra.mxu1 %vm24706_vm10, %v12049_v8  ;;  %vm24716_vm10 = vmmov %vm24714_vm0 }
 0x6e4   : > { %17233 = vmatprep.mubr.msk.f32.mxu1 %vm24707_vm3, %v21969_v3  ;;  %vm24718_vm3 = vmmov %vm24714_vm0 }
 0x6e5   : > { %17184 = vmatmul.mubr.msk.f32.gmra.mxu0 %vm24709_vm4, %v24708_v14  ;;  %vm24719_vm4 = vnez %v24632_v28  ;;  %vm24727_vm12 = vmmov %vm24714_vm0  ;;  %v24759_v14 = vld [vmem:[#allocation39_spill] sm:$0xff] }
 0x6e6   : > { %17186 = vmatprep.mubr.msk.f32.mxu0 %vm24711_vm5, %v24710_v43  ;;  %v12053_v3 = vsel %vm24719_vm4, %v21987_v27, 0.0  ;;  %vm24720_vm5 = vmmov %vm24714_vm0  ;;  %v24728_v27 = vld [vmem:[#allocation98_spill] sm:$0xff]  ;;  %v24760_v43 = vld [vmem:[#allocation7_spill] sm:$0xff] }
 0x6e7   : > { %17234 = vmatmul.mubr.msk.f32.gmra.mxu1 %vm24713_vm6, %v12051_v60  ;;  %vm24723_vm6 = vmmov %vm24714_vm0 }
 0x6e8   : > { %17236 = vmatprep.mubr.msk.f32.mxu1 %vm24714_vm0, %v21985_v18 }
 0x6e9   : > { %17187 = vmatmul.mubr.msk.f32.gmra.mxu0 %vm24716_vm10, %v24715_v17  ;;  %vm24725_vm10 = vnez %v24638_v55 }
 0x6ea   : > { %17189 = vmatprep.mubr.msk.f32.mxu0 %vm24718_vm3, %v24717_v47  ;;  %v12055_v18 = vsel %vm24725_vm10, %v22003_v50, 0.0  ;;  %vm24726_vm3 = vmmov %vm24714_vm0  ;;  %v24733_v50 = vld [vmem:[#allocation127_spill] sm:$0xff]  ;;  %v12841_v47 = vld [vmem:[#allocation2 + $0x50] sm:$0xff] }
 0x6eb   : > { %17237 = vmatmul.mubr.msk.f32.gmra.mxu1 %vm24720_vm5, %v12053_v3  ;;  %vm24729_vm5 = vmmov %vm24714_vm0 }
 0x6ec   : > { %17239 = vmatprep.mubr.msk.f32.mxu1 %vm24721_vm15, %v22001_v19  ;;  %vm24731_vm15 = vmmov %vm24714_vm0  ;;  %v12057_v19 = vsel %vm24645_vm7, %v22019_v22, 0.0  ;;  %v22217_v22 = vld [vmem:[#allocation2 + $0x109] sm:$0xff] }
 0x6ed   : > { %17190 = vmatmul.mubr.msk.f32.gmra.mxu0 %vm24723_vm6, %v24722_v53  ;;  %vm24732_vm6 = vmmov %vm24714_vm0 }
 0x6ee   : > { %17192 = vmatprep.mubr.msk.f32.mxu0 %vm24714_vm0, %v24724_v52  ;;  %v12842_v52 = vld [vmem:[#allocation2 + $0x58] sm:$0xff] }
 0x6ef   : > { %17240 = vmatmul.mubr.msk.f32.gmra.mxu1 %vm24726_vm3, %v12055_v18  ;;  %vm24734_vm3 = vmmov %vm24714_vm0 }
 0x6f0   : > { %17242 = vmatprep.mubr.msk.f32.mxu1 %vm24727_vm12, %v22017_v58  ;;  %vm24735_vm12 = vmmov %vm24714_vm0 }
 0x6f1   : > { %17193 = vmatmul.mubr.msk.f32.gmra.mxu0 %vm24729_vm5, %v24728_v27  ;;  %vm24736_vm5 = vnez %v24649_v35  ;;  %v12424_v27 = vld [vmem:[#allocation2 + $0x5f] sm:$0xff] }
 0x6f2   : > { %17195 = vmatprep.mubr.msk.f32.mxu0 %vm24731_vm15, %v24730_v49  ;;  %v12059_v58 = vsel %vm24736_vm5, %v22037_v2, 0.0  ;;  %vm24737_vm15 = vmmov %vm24714_vm0  ;;  %v12061_v2 = vsel %vm24655_vm13, %v22219_v29, 0.0 }
 0x6f3   : > { %17243 = vmatmul.mubr.msk.f32.gmra.mxu1 %vm24732_vm6, %v12057_v19  ;;  %vm24738_vm6 = vmmov %vm24714_vm0 }
 0x6f4   : > { %17245 = vmatprep.mubr.msk.f32.mxu1 %vm24714_vm0, %v22035_v57  ;;  %v22223_v57 = vld [vmem:[#allocation2 + $0x110] sm:$0xff]  ;;  %vm24743_vm5 = vmmov %vm24714_vm0  ;;  %v16958_v9 = vpop.f32.mrf.mxu0 }
 0x6f5   : > { %17196 = vmatmul.mubr.msk.f32.gmra.mxu0 %vm24734_vm3, %v24733_v50  ;;  %vm24740_vm3 = vnez %v24739_v4  ;;  %v24765_v50 = vld [vmem:[#allocation94_spill] sm:$0xff] }
 0x6f6   : > { %17198 = vmatprep.mubr.msk.f32.mxu0 %vm24735_vm12, %v22209_v7  ;;  %v12449_v61 = vsel %vm24740_vm3, %v21486_v56, 0.0  ;;  %vm24741_vm12 = vmmov %vm24714_vm0  ;;  %v12837_v56 = vld [vmem:[#allocation2 + $0x30] sm:$0xff]  ;;  %v17008_v21 = vpop.f32.mrf.mxu1  ;;  %v10303_v6 = vpop.f32.mrf.mxu0 }
 0x6f7   : > { %17246 = vmatmul.mubr.msk.f32.gmra.mxu1 %vm24737_vm15, %v12059_v58  ;;  %vm24742_vm15 = vmmov %vm24714_vm0  ;;  %v22253_v16 = vadd.f32 %v17008_v21, %v16958_v9  ;;  %v24766_v58 = vld [vmem:[#allocation10_spill] sm:$0xff]  ;;  %v24772_v9 = vld [vmem:[#allocation13_spill] sm:$0xff] }
 0x6f8   : > { %17248 = vmatprep.mubr.msk.f32.mxu1 %vm24738_vm6, %v22217_v22  ;;  %vm24744_vm6 = vmmov %vm24714_vm0  ;;  %v10624_v42 = vpop.f32.mrf.mxu1  ;;  %v16961_v8 = vpop.f32.mrf.mxu0 }
 0x6f9   : > { %17199 = vmatmul.mubr.msk.f32.gmra.mxu0 %vm24714_vm0, %v22223_v57  ;;  %vm24747_vm0 = vnez %v24746_v40  ;;  %vm24748_vm3 = vmmov %vm24743_vm5  ;;  %v22257_v38 = vadd.f32 %v10624_v42, %v10303_v6  ;;  %v12846_v6 = vld [vmem:[#allocation2 + $0x78] sm:$0xff] }
 0x6fa   : > { %17253 = vmatprep.mubr.msk.f32.mxu0 %vm24741_vm12, %v12449_v61  ;;  %v12451_v32 = vsel %vm24747_vm0, %v24745_v45, 0.0  ;;  %vm24749_vm12 = vmmov %vm24748_vm3  ;;  %v17011_v17 = vpop.f32.mrf.mxu1  ;;  %v10313_v53 = vpop.f32.mrf.mxu0  ;;  %v12844_v45 = vld [vmem:[#allocation2 + $0x68] sm:$0xff]  ;;  %v12428_v42 = vld [vmem:[#allocation2 + $0x7f] sm:$0xff] }
 0x6fb   : > { %17249 = vmatmul.mubr.msk.f32.gmra.mxu1 %vm24742_vm15, %v12061_v2  ;;  %vm24751_vm15 = vmmov %vm24748_vm3  ;;  %v22264_v3 = vadd.f32 %v17011_v17, %v16961_v8  ;;  %v12843_v2 = vld [vmem:[#allocation2 + $0x60] sm:$0xff] }
 0x6fc   : > { %17303 = vmatprep.mubr.msk.f32.mxu1 %vm24743_vm5, %v12836_v13  ;;  %vm24750_vm5 = vmmov %vm24748_vm3  ;;  %v10634_v18 = vpop.f32.mrf.mxu1  ;;  %v16964_v19 = vpop.f32.mrf.mxu0 }
 0x6fd   : > { %17254 = vmatmul.mubr.msk.f32.vlgmr.msra.gmra.mxu0 %vm24744_vm6, %v12418_v34  ;;  %vm24754_vm6 = vnez %v24753_v46  ;;  %vm24755_vm0 = vmmov %vm24748_vm3  ;;  %v22268_v49 = vadd.f32 %v10634_v18, %v10313_v53  ;;  %v12848_v18 = vld [vmem:[#allocation2 + $0x88] sm:$0xff] }
 0x6fe   : > { %17352 = vmatpush3.msra.mxu0 %v22062_v1  ;;  %17256 = vmatprep.mubr.msk.f32.mxu0 %vm24748_vm3, %v12451_v32  ;;  %v12453_v1 = vsel %vm24754_vm6, %v24752_v11, 0.0  ;;  %vm24756_vm3 = vmmov %vm24755_vm0  ;;  %v17014_v61 = vpop.f32.mrf.mxu1  ;;  %v10323_v34 = vpop.f32.mrf.mxu0  ;;  %v12426_v32 = vld [vmem:[#allocation2 + $0x6f] sm:$0xff] }
 0x6ff   : > { %17304 = vmatmul.mubr.msk.f32.vlgmr.msra.gmra.mxu1 %vm24749_vm12, %v12837_v56  ;;  %vm24757_vm12 = vmmov %vm24755_vm0  ;;  %v22275_v13 = vadd.f32 %v17014_v61, %v16964_v19  ;;  %v12430_v19 = vld [vmem:[#allocation2 + $0x8f] sm:$0xff]  ;;  %v24785_v61 = vld [vmem:[#allocation19_spill] sm:$0xff] }
 0x700   : > { %17306 = vmatprep.mubr.msk.f32.mxu1 %vm24750_vm5, %v12838_v26  ;;  %vm24758_vm5 = vmmov %vm24755_vm0  ;;  %v10644_v40 = vpop.f32.mrf.mxu1  ;;  %v16967_v26 = vpop.f32.mrf.mxu0 }
 0x701   : > { %17257 = vmatmul.mubr.msk.f32.gmra.mxu0 %vm24751_vm15, %v12420_v62  ;;  %vm24761_vm15 = vnez %v24760_v43  ;;  %vm24762_vm6 = vmmov %vm24755_vm0  ;;  %v22279_v56 = vadd.f32 %v10644_v40, %v10323_v34  ;;  %v24771_v62 = vld [vmem:[#allocation80_spill] sm:$0xff] }
 0x702   : > { %17259 = vmatprep.mubr.msk.f32.mxu0 %vm24755_vm0, %v12453_v1  ;;  %v12455_v60 = vsel %vm24761_vm15, %v24759_v14, 0.0  ;;  %vm24768_vm15 = vmmov %vm24755_vm0  ;;  %v17017_v46 = vpop.f32.mrf.mxu1  ;;  %v12845_v1 = vld [vmem:[#allocation2 + $0x70] sm:$0xff]  ;;  %v24777_v14 = vld [vmem:[#allocation88_spill] sm:$0xff] }
 0x703   : > { %17307 = vmatmul.mubr.msk.f32.gmra.mxu1 %vm24756_vm3, %v12839_v37  ;;  %vm24763_vm3 = vmmov %vm24755_vm0  ;;  %v22286_v21 = vadd.f32 %v17017_v46, %v16967_v26  ;;  %v10333_v37 = vpop.f32.mrf.mxu0  ;;  %v24778_v43 = vld [vmem:[#allocation16_spill] sm:$0xff]  ;;  %v12850_v26 = vld [vmem:[#allocation2 + $0x98] sm:$0xff] }
 0x704   : > { %17309 = vmatprep.mubr.msk.f32.mxu1 %vm24757_vm12, %v12840_v44  ;;  %vm24764_vm12 = vmmov %vm24755_vm0  ;;  %v10654_v44 = vpop.f32.mrf.mxu1 }
 0x705   : > { %17260 = vmatmul.mubr.msk.f32.gmra.mxu0 %vm24758_vm5, %v12422_v12  ;;  %vm24767_vm5 = vnez %v24766_v58  ;;  %v22290_v12 = vadd.f32 %v10654_v44, %v10333_v37  ;;  %v16970_v8 = vpop.f32.mrf.mxu0  ;;  %v24792_v37 = vld [vmem:[#allocation22_spill] sm:$0xff] }
 0x706   : > { %17262 = vmatprep.mubr.msk.f32.mxu0 %vm24762_vm6, %v12455_v60  ;;  %v12457_v4 = vsel %vm24767_vm5, %v24765_v50, 0.0  ;;  %vm24769_vm6 = vmmov %vm24755_vm0  ;;  %v17020_v17 = vpop.f32.mrf.mxu1 }
 0x707   : > { %17310 = vmatmul.mubr.msk.f32.gmra.mxu1 %vm24755_vm0, %v12841_v47  ;;  %vm24774_vm5 = vmmov %vm24755_vm0  ;;  %v12847_v47 = vld [vmem:[#allocation2 + $0x80] sm:$0xff]  ;;  %v22297_v53 = vadd.f32 %v17020_v17, %v16970_v8  ;;  %v12434_v17 = vld [vmem:[#allocation2 + $0xaf] sm:$0xff] }
 0x708   : > { %17312 = vmatprep.mubr.msk.f32.mxu1 %vm24763_vm3, %v12842_v52  ;;  %vm24770_vm3 = vmmov %vm24755_vm0  ;;  %v10343_v52 = vpop.f32.mrf.mxu0 }
 0x709   : > { %17263 = vmatmul.mubr.msk.f32.gmra.mxu0 %vm24764_vm12, %v12424_v27  ;;  %vm24773_vm12 = vnez %v24772_v9  ;;  %v10664_v27 = vpop.f32.mrf.mxu1  ;;  %v12432_v9 = vld [vmem:[#allocation2 + $0x9f] sm:$0xff] }
 0x70a   : > { %17265 = vmatprep.mubr.msk.f32.mxu0 %vm24768_vm15, %v12457_v4  ;;  %v12459_v11 = vsel %vm24773_vm12, %v24771_v62, 0.0  ;;  %vm24775_vm15 = vmmov %vm24755_vm0  ;;  %v22301_v50 = vadd.f32 %v10664_v27, %v10343_v52  ;;  %v16973_v58 = vpop.f32.mrf.mxu0  ;;  %v24784_v4 = vld [vmem:[#allocation96_spill] sm:$0xff]  ;;  %v24799_v27 = vld [vmem:[#allocation25_spill] sm:$0xff] }
 0x70b   : > { %17313 = vmatmul.mubr.msk.f32.gmra.mxu1 %vm24769_vm6, %v12843_v2  ;;  %vm24776_vm6 = vmmov %vm24755_vm0  ;;  %v17023_v34 = vpop.f32.mrf.mxu1 }
 0x70c   : > { %17315 = vmatprep.mubr.msk.f32.mxu1 %vm24755_vm0, %v12844_v45  ;;  %vm24780_vm12 = vmmov %vm24755_vm0  ;;  %v12849_v45 = vld [vmem:[#allocation2 + $0x90] sm:$0xff]  ;;  %v22308_v40 = vadd.f32 %v17023_v34, %v16973_v58  ;;  %v12854_v34 = vld [vmem:[#allocation2 + $0xb8] sm:$0xff] }
 0x70d   : > { %17266 = vmatmul.mubr.msk.f32.gmra.mxu0 %vm24770_vm3, %v12426_v32  ;;  %vm24779_vm3 = vnez %v24778_v43  ;;  %v10353_v32 = vpop.f32.mrf.mxu0  ;;  %v10674_v62 = vpop.f32.mrf.mxu1  ;;  %v12852_v43 = vld [vmem:[#allocation2 + $0xa8] sm:$0xff] }
 0x70e   : > { %17268 = vmatprep.mubr.msk.f32.mxu0 %vm24774_vm5, %v12459_v11  ;;  %v12461_v60 = vsel %vm24779_vm3, %v24777_v14, 0.0  ;;  %vm24781_vm5 = vmmov %vm24755_vm0  ;;  %v22312_v11 = vadd.f32 %v10674_v62, %v10353_v32  ;;  %v12436_v32 = vld [vmem:[#allocation2 + $0xbf] sm:$0xff] }
 0x70f   : > { %17316 = vmatmul.mubr.msk.f32.gmra.mxu1 %vm24775_vm15, %v12845_v1  ;;  %vm24782_vm15 = vmmov %vm24755_vm0  ;;  %v16976_v46 = vpop.f32.mrf.mxu0  ;;  %v24791_v1 = vld [vmem:[#allocation81_spill] sm:$0xff] }
 0x710   : > { %17318 = vmatprep.mubr.msk.f32.mxu1 %vm24776_vm6, %v12846_v6  ;;  %vm24783_vm6 = vmmov %vm24755_vm0 }
 0x711   : > { %17269 = vmatmul.mubr.msk.f32.gmra.mxu0 %vm24755_vm0, %v12428_v42  ;;  %vm24786_vm0 = vnez %v24785_v61  ;;  %vm24787_vm3 = vmmov %vm24781_vm5  ;;  %v17026_v44 = vpop.f32.mrf.mxu1  ;;  %v12851_v42 = vld [vmem:[#allocation2 + $0xa0] sm:$0xff]  ;;  %v10363_v14 = vpop.f32.mrf.mxu0 }
 0x712   : > { %17271 = vmatprep.mubr.msk.f32.mxu0 %vm24780_vm12, %v12461_v60  ;;  %v12463_v2 = vsel %vm24786_vm0, %v24784_v4, 0.0  ;;  %vm24788_vm12 = vmmov %vm24787_vm3  ;;  %v22319_v8 = vadd.f32 %v17026_v44, %v16976_v46  ;;  %v12853_v4 = vld [vmem:[#allocation2 + $0xb0] sm:$0xff]  ;;  %v24805_v46 = vld [vmem:[#allocation28_spill] sm:$0xff] }
 0x713   : > { %17319 = vmatmul.mubr.msk.f32.gmra.mxu1 %vm24781_vm5, %v12847_v47  ;;  %vm24789_vm5 = vmmov %vm24787_vm3  ;;  %v10684_v60 = vpop.f32.mrf.mxu1 }
 0x714   : > { %17321 = vmatprep.mubr.msk.f32.mxu1 %vm24782_vm15, %v12848_v18  ;;  %vm24790_vm15 = vmmov %vm24787_vm3  ;;  %v22323_v47 = vadd.f32 %v10684_v60, %v10363_v14  ;;  %v16979_v52 = vpop.f32.mrf.mxu0  ;;  %v24798_v18 = vld [vmem:[#allocation48_spill] sm:$0xff]  ;;  %v12856_v14 = vld [vmem:[#allocation2 + $0xc8] sm:$0xff] }
 0x715   : > { %17272 = vmatmul.mubr.msk.f32.gmra.mxu0 %vm24783_vm6, %v12430_v19  ;;  %vm24793_vm6 = vnez %v24792_v37  ;;  %vm24794_vm0 = vmmov %vm24787_vm3  ;;  %v12438_v60 = vld [vmem:[#allocation2 + $0xcf] sm:$0xff] }
 0x716   : > { %17274 = vmatprep.mubr.msk.f32.mxu0 %vm24787_vm3, %v12463_v2  ;;  %v12465_v6 = vsel %vm24793_vm6, %v24791_v1, 0.0  ;;  %vm24795_vm3 = vmmov %vm24794_vm0  ;;  %v17029_v58 = vpop.f32.mrf.mxu1  ;;  %v10373_v2 = vpop.f32.mrf.mxu0 }
 0x717   : > { %17322 = vmatmul.mubr.msk.f32.gmra.mxu1 %vm24788_vm12, %v12849_v45  ;;  %vm24796_vm12 = vmmov %vm24794_vm0  ;;  %v22330_v61 = vadd.f32 %v17029_v58, %v16979_v52 }
 0x718   : > { %17324 = vmatprep.mubr.msk.f32.mxu1 %vm24789_vm5, %v12850_v26  ;;  %vm24797_vm5 = vmmov %vm24794_vm0  ;;  %v10694_v45 = vpop.f32.mrf.mxu1 }
 0x719   : > { %17275 = vmatmul.mubr.msk.f32.gmra.mxu0 %vm24790_vm15, %v12432_v9  ;;  %vm24800_vm15 = vnez %v24799_v27  ;;  %vm24801_vm6 = vmmov %vm24794_vm0  ;;  %v22334_v26 = vadd.f32 %v10694_v45, %v10373_v2  ;;  %v24804_v9 = vld [vmem:[#allocation125_spill] sm:$0xff]  ;;  %v24811_v27 = vld [vmem:[#allocation31_spill] sm:$0xff] }
 0x71a   : > { %17277 = vmatprep.mubr.msk.f32.mxu0 %vm24794_vm0, %v12465_v6  ;;  %v12467_v19 = vsel %vm24800_vm15, %v24798_v18, 0.0  ;;  %v16982_v62 = vpop.f32.mrf.mxu0  ;;  %vm24807_vm15 = vmmov %vm24794_vm0  ;;  %v12855_v6 = vld [vmem:[#allocation2 + $0xc0] sm:$0xff]  ;;  %v24810_v18 = vld [vmem:[#allocation82_spill] sm:$0xff] }
 0x71b   : > { %17325 = vmatmul.mubr.msk.f32.gmra.mxu1 %vm24795_vm3, %v12851_v42  ;;  %vm24802_vm3 = vmmov %vm24794_vm0  ;;  %v12858_v45 = vld [vmem:[#allocation2 + $0xd8] sm:$0xff] }
 0x71c   : > { %17327 = vmatprep.mubr.msk.f32.mxu1 %vm24796_vm12, %v12852_v43  ;;  %vm24803_vm12 = vmmov %vm24794_vm0  ;;  %v17032_v37 = vpop.f32.mrf.mxu1  ;;  %v10383_v42 = vpop.f32.mrf.mxu0 }
 0x71d   : > { %17278 = vmatmul.mubr.msk.f32.gmra.mxu0 %vm24797_vm5, %v12434_v17  ;;  %vm24806_vm5 = vnez %v24805_v46  ;;  %v22341_v44 = vadd.f32 %v17032_v37, %v16982_v62  ;;  %v12440_v62 = vld [vmem:[#allocation2 + $0xdf] sm:$0xff]  ;;  %v24817_v37 = vld [vmem:[#allocation34_spill] sm:$0xff] }
 0x71e   : > { %17280 = vmatprep.mubr.msk.f32.mxu0 %vm24801_vm6, %v12467_v19  ;;  %v12469_v1 = vsel %vm24806_vm5, %v24804_v9, 0.0  ;;  %vm24808_vm6 = vmmov %vm24794_vm0  ;;  %v10704_v43 = vpop.f32.mrf.mxu1 }
 0x71f   : > { %17328 = vmatmul.mubr.msk.f32.gmra.mxu1 %vm24794_vm0, %v12853_v4  ;;  %v22345_v17 = vadd.f32 %v10704_v43, %v10383_v42  ;;  %v16985_v52 = vpop.f32.mrf.mxu0  ;;  %vm24813_vm5 = vmmov %vm24794_vm0  ;;  %v12857_v4 = vld [vmem:[#allocation2 + $0xd0] sm:$0xff] }
 0x720   : > { %17330 = vmatprep.mubr.msk.f32.mxu1 %vm24802_vm3, %v12854_v34  ;;  %vm24809_vm3 = vmmov %vm24794_vm0  ;;  %v12443_v43 = vld [vmem:[#allocation2 + $0xf7] sm:$0xff] }
 0x721   : > { %17281 = vmatmul.mubr.msk.f32.gmra.mxu0 %vm24803_vm12, %v12436_v32  ;;  %vm24812_vm12 = vnez %v24811_v27  ;;  %v17035_v58 = vpop.f32.mrf.mxu1  ;;  %v10393_v34 = vpop.f32.mrf.mxu0 }
 0x722   : > { %17283 = vmatprep.mubr.msk.f32.mxu0 %vm24807_vm15, %v12469_v1  ;;  %v12471_v19 = vsel %vm24812_vm12, %v24810_v18, 0.0  ;;  %v22352_v2 = vadd.f32 %v17035_v58, %v16985_v52  ;;  %vm24814_vm15 = vmmov %vm24794_vm0  ;;  %v24816_v1 = vld [vmem:[#allocation133_spill] sm:$0xff] }
 0x723   : > { %17331 = vmatmul.mubr.msk.f32.gmra.mxu1 %vm24808_vm6, %v12855_v6  ;;  %vm24815_vm6 = vmmov %vm24794_vm0  ;;  %v10714_v32 = vpop.f32.mrf.mxu1  ;;  %v12860_v18 = vld [vmem:[#allocation2 + $0xe8] sm:$0xff] }
 0x724   : > { %17333 = vmatprep.mubr.msk.f32.mxu1 %vm24794_vm0, %v12856_v14  ;;  %v22356_v9 = vadd.f32 %v10714_v32, %v10393_v34  ;;  %v16988_v46 = vpop.f32.mrf.mxu0  ;;  %vm24819_vm12 = vmmov %vm24794_vm0  ;;  %v12859_v14 = vld [vmem:[#allocation2 + $0xe0] sm:$0xff]  ;;  %v24823_v34 = vld [vmem:[#allocation37_spill] sm:$0xff] }
 0x725   : > { %17284 = vmatmul.mubr.msk.f32.gmra.mxu0 %vm24809_vm3, %v12438_v60  ;;  %vm24818_vm3 = vnez %v24817_v37  ;;  %v12862_v37 = vld [vmem:[#allocation2 + $0xf8] sm:$0xff] }
 0x726   : > { %17286 = vmatprep.mubr.msk.f32.mxu0 %vm24813_vm5, %v12471_v19  ;;  %v12473_v6 = vsel %vm24818_vm3, %v24816_v1, 0.0  ;;  %v17038_v42 = vpop.f32.mrf.mxu1  ;;  %vm24820_vm5 = vmmov %vm24794_vm0  ;;  %v10403_v52 = vpop.f32.mrf.mxu0  ;;  %v12442_v19 = vld [vmem:[#allocation2 + $0xef] sm:$0xff] }
 0x727   : > { %17334 = vmatmul.mubr.msk.f32.gmra.mxu1 %vm24814_vm15, %v12857_v4  ;;  %v22363_v60 = vadd.f32 %v17038_v42, %v16988_v46  ;;  %vm24821_vm15 = vmmov %vm24794_vm0  ;;  %v12444_v42 = vld [vmem:[#allocation2 + $0xff] sm:$0xff] }
 0x728   : > { %17336 = vmatprep.mubr.msk.f32.mxu1 %vm24815_vm6, %v12858_v45  ;;  %v10724_v27 = vpop.f32.mrf.mxu1  ;;  %vm24822_vm6 = vmmov %vm24794_vm0 }
 0x729   : > { %17287 = vmatmul.mubr.msk.f32.gmra.mxu0 %vm24794_vm0, %v12440_v62  ;;  %v22367_v58 = vadd.f32 %v10724_v27, %v10403_v52  ;;  %vm24824_vm0 = vnez %v24823_v34  ;;  %vm24825_vm3 = vmmov %vm24820_vm5  ;;  %v12861_v62 = vld [vmem:[#allocation2 + $0xf0] sm:$0xff]  ;;  %v12863_v27 = vld [vmem:[#allocation2 + $0x100] sm:$0xff] }
 0x72a   : > { %17289 = vmatprep.mubr.msk.f32.mxu0 %vm24819_vm12, %v12473_v6  ;;  %v16991_v4 = vpop.f32.mrf.mxu0  ;;  %v12475_v45 = vsel %vm24824_vm0, %v12443_v43, 0.0  ;;  %vm24826_vm12 = vmmov %vm24825_vm3 }
 0x72b   : > { %17337 = vmatmul.mubr.msk.f32.gmra.mxu1 %vm24820_vm5, %v12859_v14  ;;  %vm24827_vm5 = vmmov %vm24825_vm3 }
 0x72c   : > { %17339 = vmatprep.mubr.msk.f32.mxu1 %vm24821_vm15, %v12860_v18  ;;  %v17041_v32 = vpop.f32.mrf.mxu1  ;;  %v10413_v1 = vpop.f32.mrf.mxu0  ;;  %vm24828_vm15 = vmmov %vm24825_vm3 }
 0x72d   : > { %17290 = vmatmul.mubr.msk.f32.gmra.mxu0 %vm24822_vm6, %v12442_v19  ;;  %v22373_v46 = vadd.f32 %v17041_v32, %v16991_v4  ;;  %vm24829_vm6 = vnez %v24560_v10  ;;  %vm24830_vm0 = vmmov %vm24825_vm3  ;;  %v12447_v19 = vld [vmem:[#allocation2 + $0x117] sm:$0xff] }
 0x72e   : > { %17292 = vmatprep.mubr.msk.f32.mxu0 %vm24825_vm3, %v12475_v45  ;;  %v10734_v6 = vpop.f32.mrf.mxu1  ;;  %v12477_v43 = vsel %vm24829_vm6, %v22032_v63, 0.0  ;;  %vm24831_vm3 = vmmov %vm24830_vm0  ;;  %v12479_v63 = vsel %vm24183_vm9, %v12447_v19, 0.0  ;;  %v12866_v10 = vld [vmem:[#allocation2 + $0x118] sm:$0xff] }
 0x72f   : > { %17340 = vmatmul.mubr.msk.f32.gmra.mxu1 %vm24826_vm12, %v12861_v62  ;;  %v22377_v14 = vadd.f32 %v10734_v6, %v10413_v1  ;;  %vm24832_vm12 = vmmov %vm24830_vm0 }
 0x730   : > { %17342 = vmatprep.mubr.msk.f32.mxu1 %vm24827_vm5, %v12862_v37  ;;  %v16994_v52 = vpop.f32.mrf.mxu0  ;;  %vm24833_vm5 = vmmov %vm24830_vm0  ;;  %v12448_v37 = vld [vmem:[#allocation2 + $0x11f] sm:$0xff] }
 0x731   : > { %17293 = vmatmul.mubr.msk.f32.gmra.mxu0 %vm24828_vm15, %v12444_v42  ;;  %vm24834_vm15 = vmmov %vm24830_vm0 }
 0x732   : > { %v17044_v18 = vpop.f32.mrf.mxu1  ;;  %17295 = vmatprep.mubr.msk.f32.mxu0 %vm24830_vm0, %v12477_v43  ;;  %v10423_v34 = vpop.f32.mrf.mxu0  ;;  %vm24835_vm6 = vmmov %vm24830_vm0 }
 0x733   : > { %v22384_v4 = vadd.f32 %v17044_v18, %v16994_v52  ;;  %17343 = vmatmul.mubr.msk.f32.gmra.mxu1 %vm24831_vm3, %v12863_v27  ;;  %v12867_v52 = vld [vmem:[#allocation2 + $0x120] sm:$0xff]  ;;  %vm24836_vm3 = vmmov %vm24830_vm0  ;;  %v13224_v18 = vld [vmem:[#allocation2 + $0x31] sm:$0xff] }
 0x734   : > { %17345 = vmatprep.mubr.msk.f32.mxu1 %vm24832_vm12, %v22209_v7  ;;  %v10744_v45 = vpop.f32.mrf.mxu1  ;;  %vm24837_vm9 = vmmov %vm24830_vm0 }
 0x735   : > { %v22389_v32 = vadd.f32 %v10744_v45, %v10423_v34  ;;  %v16997_v62 = vpop.f32.mrf.mxu0  ;;  %17296 = vmatmul.mubr.msk.f32.gmra.mxu0 %vm24833_vm5, %v22051_v20  ;;  %vm24838_vm12 = vmmov %vm24830_vm0  ;;  %vm24839_vm5 = vnez %v24572_v36 }
 0x736   : > { %17298 = vmatprep.mubr.msk.f32.mxu0 %vm24834_vm15, %v12479_v63  ;;  %v13256_v45 = vsel %vm24839_vm5, %v13224_v18, 0.0  ;;  %vm24841_vm15 = vmmov %vm24830_vm0 }
 0x737   : > { %v17047_v1 = vpop.f32.mrf.mxu1  ;;  %17346 = vmatmul.mubr.msk.f32.gmra.mxu1 %vm24835_vm6, %v22223_v57  ;;  %v10433_v7 = vpop.f32.mrf.mxu0  ;;  %vm24843_vm6 = vmmov %vm24830_vm0 }
 0x738   : > { %v22396_v6 = vadd.f32 %v17047_v1, %v16997_v62  ;;  %17348 = vmatprep.mubr.msk.f32.mxu1 %vm24830_vm0, %v12866_v10  ;;  %v13225_v10 = vld [vmem:[#allocation2 + $0x39] sm:$0xff]  ;;  %v13226_v1 = vld [vmem:[#allocation2 + $0x41] sm:$0xff]  ;;  %vm24850_vm5 = vmmov %vm24830_vm0 }
 0x739   : > { %v10754_v42 = vpop.f32.mrf.mxu1  ;;  %v17000_v20 = vpop.f32.mrf.mxu0  ;;  %17299 = vmatmul.mubr.msk.f32.gmra.mxu0 %vm24836_vm3, %v12448_v37  ;;  %v10615_v37 = vadd.f32 %v22245_v39, %v22242_v54  ;;  %v13258_v18 = vsel %vm18254_vm14, %v13226_v1, 0.0  ;;  %vm24844_vm3 = vmmov %vm24830_vm0 }
 0x73a   : > { %v22401_v43 = vadd.f32 %v10754_v42, %v10433_v7  ;;  %17353 = vmatprep.mubr.msk.f32.mxu0 %vm24837_vm9, %v13223_v0  ;;  %v24842_v7 = vld [vmem:[#allocation38_spill] sm:$0xff]  ;;  %vm24845_vm14 = vmmov %vm24830_vm0 }
 0x73b   : > { %v17050_v27 = vpop.f32.mrf.mxu1  ;;  %v10443_v34 = vpop.f32.mrf.mxu0  ;;  %17349 = vmatmul.mubr.msk.f32.gmra.mxu1 %vm24838_vm12, %v12867_v52  ;;  %vm24846_vm9 = vmmov %vm24830_vm0 }
 0x73c   : > { %v22405_v19 = vadd.f32 %v17050_v27, %v17000_v20  ;;  %vm24848_vm12 = vmmov %vm24830_vm0 }
 0x73d   : > { %v10764_v57 = vpop.f32.mrf.mxu1  ;;  %v17055_v63 = vpop.f32.mrf.mxu0  ;;  %17354 = vmatmul.mubr.msk.f32.vlgmr.msra.gmra.mxu0 %vm24841_vm15, %v13256_v45  ;;  %v13228_v45 = vld [vmem:[#allocation2 + $0x51] sm:$0xff]  ;;  %vm24852_vm15 = vmmov %vm24830_vm0 }
 0x73e   : > { %v22410_v62 = vadd.f32 %v10764_v57, %v10443_v34  ;;  %v11161_v42 = vadd.f32 %v17055_v63, %v24842_v7  ;;  %17356 = vmatprep.mubr.msk.f32.mxu0 %vm24843_vm6, %v13225_v10  ;;  %v13227_v57 = vld [vmem:[#allocation2 + $0x49] sm:$0xff]  ;;  %v13260_v51 = vsel %vm18285_vm1, %v13228_v45, 0.0  ;;  %vm24847_vm1 = vmmov %vm24830_vm0 }
 0x73f   : > { %v17105_v20 = vpop.f32.mrf.mxu1  ;;  %v11001_v52 = vpop.f32.mrf.mxu0  ;;  %v13231_v45 = vld [vmem:[#allocation2 + $0x69] sm:$0xff]  ;;  %vm24854_vm6 = vmmov %vm24830_vm0 }
 0x740   : > { %24840 = vst [vmem:[#allocation77_spill] sm:$0xff] %v22410_v62  ;;  %v22417_v0 = vadd.f32 %v17105_v20, %v11161_v42  ;;  %v11160_v36 = vadd.f32 %v11001_v52, %v10615_v37  ;;  %v13229_v42 = vld [vmem:[#allocation2 + $0x59] sm:$0xff]  ;;  %v13230_v20 = vld [vmem:[#allocation2 + $0x61] sm:$0xff] }
 0x741   : > { %v11420_v27 = vpop.f32.mrf.mxu1  ;;  %v17058_v34 = vpop.f32.mrf.mxu0  ;;  %17357 = vmatmul.mubr.msk.f32.gmra.mxu0 %vm24830_vm0, %v13258_v18  ;;  %v13262_v31 = vsel %vm18307_vm2, %v13230_v20, 0.0  ;;  %vm24849_vm2 = vmmov %vm24830_vm0  ;;  %v13234_v20 = vld [vmem:[#allocation2 + $0x81] sm:$0xff] }
 0x742   : > { %v22422_v62 = vadd.f32 %v11420_v27, %v11160_v36  ;;  %v11163_v54 = vadd.f32 %v17058_v34, %v22253_v16  ;;  %17359 = vmatprep.mubr.msk.f32.mxu0 %vm24844_vm3, %v13227_v57  ;;  %v13266_v30 = vsel %vm24597_vm11, %v13234_v20, 0.0  ;;  %vm24853_vm11 = vnez %v24602_v41 }
 0x743   : > { %v17108_v39 = vpop.f32.mrf.mxu1  ;;  %v11011_v63 = vpop.f32.mrf.mxu0  ;;  %vm24855_vm3 = vnez %v24608_v23 }
 0x744   : > { %v22426_v10 = vadd.f32 %v17108_v39, %v11163_v54  ;;  %v11162_v37 = vadd.f32 %v11011_v63, %v22257_v38  ;;  %v13232_v54 = vld [vmem:[#allocation2 + $0x71] sm:$0xff] }
 0x745   : > { %v11430_v1 = vpop.f32.mrf.mxu1  ;;  %v17061_v7 = vpop.f32.mrf.mxu0  ;;  %17360 = vmatmul.mubr.msk.f32.gmra.mxu0 %vm24845_vm14, %v13260_v51  ;;  %v13264_v24 = vsel %vm24591_vm8, %v13232_v54, 0.0  ;;  %vm24851_vm8 = vmmov %vm24830_vm0 }
 0x746   : > { %v22432_v52 = vadd.f32 %v11430_v1, %v11162_v37  ;;  %v11165_v16 = vadd.f32 %v17061_v7, %v22264_v3  ;;  %17362 = vmatprep.mubr.msk.f32.mxu0 %vm24846_vm9, %v13229_v42  ;;  %v13233_v42 = vld [vmem:[#allocation2 + $0x79] sm:$0xff]  ;;  %vm24856_vm14 = vmmov %vm24830_vm0 }
 0x747   : > { %v17111_v36 = vpop.f32.mrf.mxu1  ;;  %v11021_v18 = vpop.f32.mrf.mxu0  ;;  %vm24857_vm9 = vmmov %vm24830_vm0  ;;  %v24876_v15 = vld [vmem:[#allocation77_spill] sm:$0xff] }
 0x748   : > { %v22436_v27 = vadd.f32 %v17111_v36, %v11165_v16  ;;  %v11164_v38 = vadd.f32 %v11021_v18, %v22268_v49 }
 0x749   : > { %v11440_v34 = vpop.f32.mrf.mxu1  ;;  %v17064_v57 = vpop.f32.mrf.mxu0  ;;  %17363 = vmatmul.mubr.msk.f32.gmra.mxu0 %vm24847_vm1, %v13262_v31  ;;  %vm24858_vm1 = vnez %v24614_v25 }
 0x74a   : > { %v22442_v39 = vadd.f32 %v11440_v34, %v11164_v38  ;;  %v11167_v3 = vadd.f32 %v17064_v57, %v22275_v13  ;;  %17365 = vmatprep.mubr.msk.f32.mxu0 %vm24848_vm12, %v13231_v45  ;;  %v13235_v57 = vld [vmem:[#allocation2 + $0x89] sm:$0xff]  ;;  %v13236_v45 = vld [vmem:[#allocation2 + $0x91] sm:$0xff]  ;;  %vm24859_vm12 = vmmov %vm24830_vm0 }
 0x74b   : > { %v17114_v63 = vpop.f32.mrf.mxu1  ;;  %v11031_v37 = vpop.f32.mrf.mxu0  ;;  %v13268_v48 = vsel %vm24853_vm11, %v13236_v45, 0.0  ;;  %vm24864_vm11 = vnez %v24626_v33 }
 0x74c   : > { %v22446_v51 = vadd.f32 %v17114_v63, %v11167_v3  ;;  %v11166_v49 = vadd.f32 %v11031_v37, %v22279_v56 }
 0x74d   : > { %v11450_v1 = vpop.f32.mrf.mxu1  ;;  %v17067_v7 = vpop.f32.mrf.mxu0  ;;  %17366 = vmatmul.mubr.msk.f32.gmra.mxu0 %vm24849_vm2, %v13264_v24  ;;  %vm24860_vm2 = vmmov %vm24830_vm0 }
 0x74e   : > { %v22452_v16 = vadd.f32 %v11450_v1, %v11166_v49  ;;  %v11169_v13 = vadd.f32 %v17067_v7, %v22286_v21  ;;  %17368 = vmatprep.mubr.msk.f32.mxu0 %vm24850_vm5, %v13233_v42  ;;  %v13237_v1 = vld [vmem:[#allocation2 + $0x99] sm:$0xff]  ;;  %v13238_v7 = vld [vmem:[#allocation2 + $0xa1] sm:$0xff]  ;;  %vm24861_vm5 = vnez %v24620_v59 }
 0x74f   : > { %v17117_v36 = vpop.f32.mrf.mxu1  ;;  %v11041_v18 = vpop.f32.mrf.mxu0  ;;  %v13270_v41 = vsel %vm24855_vm3, %v13238_v7, 0.0  ;;  %vm24866_vm3 = vmmov %vm24830_vm0 }
 0x750   : > { %v22456_v38 = vadd.f32 %v17117_v36, %v11169_v13  ;;  %v11168_v56 = vadd.f32 %v11041_v18, %v22290_v12 }
 0x751   : > { %v11460_v31 = vpop.f32.mrf.mxu1  ;;  %v17070_v34 = vpop.f32.mrf.mxu0  ;;  %17369 = vmatmul.mubr.msk.f32.gmra.mxu0 %vm24851_vm8, %v13266_v30  ;;  %v13239_v30 = vld [vmem:[#allocation2 + $0xa9] sm:$0xff]  ;;  %vm24862_vm8 = vmmov %vm24830_vm0 }
 0x752   : > { %v22462_v54 = vadd.f32 %v11460_v31, %v11168_v56  ;;  %v11171_v21 = vadd.f32 %v17070_v34, %v22297_v53  ;;  %17371 = vmatprep.mubr.msk.f32.mxu0 %vm24852_vm15, %v13235_v57  ;;  %v13240_v31 = vld [vmem:[#allocation2 + $0xb1] sm:$0xff]  ;;  %vm24863_vm15 = vmmov %vm24830_vm0 }
 0x753   : > { %v17120_v3 = vpop.f32.mrf.mxu1  ;;  %v11051_v63 = vpop.f32.mrf.mxu0  ;;  %v13272_v23 = vsel %vm24858_vm1, %v13240_v31, 0.0  ;;  %vm24871_vm1 = vmmov %vm24830_vm0 }
 0x754   : > { %v22466_v37 = vadd.f32 %v17120_v3, %v11171_v21  ;;  %v11170_v12 = vadd.f32 %v11051_v63, %v22301_v50 }
 0x755   : > { %v11470_v49 = vpop.f32.mrf.mxu1  ;;  %v17073_v24 = vpop.f32.mrf.mxu0  ;;  %17372 = vmatmul.mubr.msk.f32.gmra.mxu0 %vm24854_vm6, %v13268_v48  ;;  %v13242_v48 = vld [vmem:[#allocation2 + $0xc1] sm:$0xff]  ;;  %vm24865_vm6 = vmmov %vm24830_vm0 }
 0x756   : > { %v22472_v42 = vadd.f32 %v11470_v49, %v11170_v12  ;;  %v11173_v53 = vadd.f32 %v17073_v24, %v22308_v40  ;;  %17374 = vmatprep.mubr.msk.f32.mxu0 %vm24830_vm0, %v13237_v1  ;;  %v13241_v12 = vld [vmem:[#allocation2 + $0xb9] sm:$0xff]  ;;  %v13274_v25 = vsel %vm24861_vm5, %v13242_v48, 0.0  ;;  %vm24875_vm5 = vmmov %vm24830_vm0 }
 0x757   : > { %v17123_v20 = vpop.f32.mrf.mxu1  ;;  %v11061_v13 = vpop.f32.mrf.mxu0 }
 0x758   : > { %v22476_v36 = vadd.f32 %v17123_v20, %v11173_v53  ;;  %v11172_v50 = vadd.f32 %v11061_v13, %v22312_v11  ;;  %v13243_v13 = vld [vmem:[#allocation2 + $0xc9] sm:$0xff] }
 0x759   : > { %v11480_v18 = vpop.f32.mrf.mxu1  ;;  %v17076_v56 = vpop.f32.mrf.mxu0  ;;  %17375 = vmatmul.mubr.msk.f32.gmra.mxu0 %vm24856_vm14, %v13270_v41  ;;  %vm24867_vm14 = vmmov %vm24830_vm0 }
 0x75a   : > { %v22482_v34 = vadd.f32 %v11480_v18, %v11172_v50  ;;  %v11175_v40 = vadd.f32 %v17076_v56, %v22319_v8  ;;  %17377 = vmatprep.mubr.msk.f32.mxu0 %vm24857_vm9, %v13239_v30  ;;  %v13244_v50 = vld [vmem:[#allocation2 + $0xd1] sm:$0xff]  ;;  %vm24869_vm9 = vmmov %vm24830_vm0 }
 0x75b   : > { %v17126_v57 = vpop.f32.mrf.mxu1  ;;  %v11071_v45 = vpop.f32.mrf.mxu0  ;;  %v13276_v59 = vsel %vm24864_vm11, %v13244_v50, 0.0  ;;  %v13249_v50 = vld [vmem:[#allocation2 + $0xf9] sm:$0xff]  ;;  %vm24936_vm11 = vmmov %vm24830_vm0 }
 0x75c   : > { %v22486_v21 = vadd.f32 %v17126_v57, %v11175_v40  ;;  %v11174_v11 = vadd.f32 %v11071_v45, %v22323_v47  ;;  %v13245_v57 = vld [vmem:[#allocation2 + $0xd9] sm:$0xff]  ;;  %v13246_v45 = vld [vmem:[#allocation2 + $0xe1] sm:$0xff] }
 0x75d   : > { %v11490_v3 = vpop.f32.mrf.mxu1  ;;  %v17079_v63 = vpop.f32.mrf.mxu0  ;;  %17378 = vmatmul.mubr.msk.f32.gmra.mxu0 %vm24859_vm12, %v13272_v23  ;;  %v13278_v33 = vsel %vm24719_vm4, %v13246_v45, 0.0  ;;  %vm24868_vm4 = vmmov %vm24830_vm0 }
 0x75e   : > { %v22492_v49 = vadd.f32 %v11490_v3, %v11174_v11  ;;  %v11177_v8 = vadd.f32 %v17079_v63, %v22330_v61  ;;  %17380 = vmatprep.mubr.msk.f32.mxu0 %vm24860_vm2, %v13241_v12  ;;  %vm24873_vm12 = vmmov %vm24830_vm0 }
 0x75f   : > { %v17129_v24 = vpop.f32.mrf.mxu1  ;;  %v11081_v1 = vpop.f32.mrf.mxu0  ;;  %vm24874_vm2 = vmmov %vm24830_vm0 }
 0x760   : > { %v22496_v7 = vadd.f32 %v17129_v24, %v11177_v8  ;;  %v11176_v47 = vadd.f32 %v11081_v1, %v22334_v26  ;;  %v13247_v8 = vld [vmem:[#allocation2 + $0xe9] sm:$0xff]  ;;  %v13248_v24 = vld [vmem:[#allocation2 + $0xf1] sm:$0xff] }
 0x761   : > { %v11500_v53 = vpop.f32.mrf.mxu1  ;;  %v17082_v20 = vpop.f32.mrf.mxu0  ;;  %17381 = vmatmul.mubr.msk.f32.gmra.mxu0 %vm24862_vm8, %v13274_v25  ;;  %v13280_v28 = vsel %vm24725_vm10, %v13248_v24, 0.0  ;;  %vm24870_vm10 = vmmov %vm24830_vm0 }
 0x762   : > { %v22502_v41 = vadd.f32 %v11500_v53, %v11176_v47  ;;  %v11179_v61 = vadd.f32 %v17082_v20, %v22341_v44  ;;  %17383 = vmatprep.mubr.msk.f32.mxu0 %vm24863_vm15, %v13243_v13  ;;  %vm24934_vm8 = vmmov %vm24830_vm0 }
 0x763   : > { %v17132_v18 = vpop.f32.mrf.mxu1  ;;  %v11091_v56 = vpop.f32.mrf.mxu0  ;;  %vm24935_vm15 = vmmov %vm24830_vm0 }
 0x764   : > { %v22506_v30 = vadd.f32 %v17132_v18, %v11179_v61  ;;  %v11178_v26 = vadd.f32 %v11091_v56, %v22345_v17  ;;  %v13250_v61 = vld [vmem:[#allocation2 + $0x101] sm:$0xff] }
 0x765   : > { %v11510_v31 = vpop.f32.mrf.mxu1  ;;  %v17085_v40 = vpop.f32.mrf.mxu0  ;;  %17384 = vmatmul.mubr.msk.f32.gmra.mxu0 %vm24865_vm6, %v13276_v59  ;;  %v13282_v55 = vsel %vm24645_vm7, %v13250_v61, 0.0  ;;  %vm24872_vm7 = vnez %v24649_v35  ;;  %vm24937_vm6 = vmmov %vm24830_vm0 }
 0x766   : > { %v22512_v11 = vadd.f32 %v11510_v31, %v11178_v26  ;;  %v11181_v44 = vadd.f32 %v17085_v40, %v22352_v2  ;;  %17386 = vmatprep.mubr.msk.f32.mxu0 %vm24830_vm0, %v13245_v57 }
 0x767   : > { %v17135_v23 = vpop.f32.mrf.mxu1  ;;  %v11101_v3 = vpop.f32.mrf.mxu0 }
 0x768   : > { %v22516_v63 = vadd.f32 %v17135_v23, %v11181_v44  ;;  %v11180_v17 = vadd.f32 %v11101_v3, %v22356_v9  ;;  %v13253_v23 = vld [vmem:[#allocation2 + $0x119] sm:$0xff]  ;;  %v13254_v3 = vld [vmem:[#allocation2 + $0x121] sm:$0xff] }
 0x769   : > { %v11520_v12 = vpop.f32.mrf.mxu1  ;;  %v17088_v48 = vpop.f32.mrf.mxu0  ;;  %17387 = vmatmul.mubr.msk.f32.gmra.mxu0 %vm24866_vm3, %v13278_v33  ;;  %vm24938_vm3 = vmmov %vm24830_vm0 }
 0x76a   : > { %v22522_v1 = vadd.f32 %v11520_v12, %v11180_v17  ;;  %v11183_v2 = vadd.f32 %v17088_v48, %v22363_v60  ;;  %17389 = vmatprep.mubr.msk.f32.mxu0 %vm24867_vm14, %v13247_v8  ;;  %v13286_v48 = vsel %vm24655_vm13, %v13254_v3, 0.0  ;;  %vm24933_vm13 = vmmov %vm24830_vm0 }
 0x76b   : > { %v17138_v47 = vpop.f32.mrf.mxu1  ;;  %v11111_v25 = vpop.f32.mrf.mxu0  ;;  %vm24939_vm14 = vmmov %vm24830_vm0 }
 0x76c   : > { %v22526_v53 = vadd.f32 %v17138_v47, %v11183_v2  ;;  %v11182_v9 = vadd.f32 %v11111_v25, %v22367_v58 }
 0x76d   : > { %v11530_v20 = vpop.f32.mrf.mxu1  ;;  %v17091_v13 = vpop.f32.mrf.mxu0  ;;  %17390 = vmatmul.mubr.msk.f32.gmra.mxu0 %vm24868_vm4, %v13280_v28  ;;  %vm24943_vm4 = vmmov %vm24830_vm0 }
 0x76e   : > { %v22532_v18 = vadd.f32 %v11530_v20, %v11182_v9  ;;  %v11185_v60 = vadd.f32 %v17091_v13, %v22373_v46  ;;  %17392 = vmatprep.mubr.msk.f32.mxu0 %vm24869_vm9, %v13249_v50  ;;  %vm24947_vm9 = vmmov %vm24830_vm0 }
 0x76f   : > { %v17141_v56 = vpop.f32.mrf.mxu1  ;;  %v11121_v26 = vpop.f32.mrf.mxu0 }
 0x770   : > { %v22536_v59 = vadd.f32 %v17141_v56, %v11185_v60  ;;  %v11184_v58 = vadd.f32 %v11121_v26, %v22377_v14  ;;  %v13284_v14 = vsel %vm24872_vm7, %v22219_v29, 0.0  ;;  %vm24962_vm7 = vmmov %vm24830_vm0 }
 0x771   : > { %v11540_v31 = vpop.f32.mrf.mxu1  ;;  %v17094_v40 = vpop.f32.mrf.mxu0  ;;  %17393 = vmatmul.mubr.msk.f32.gmra.mxu0 %vm24870_vm10, %v13282_v55  ;;  %vm24952_vm10 = vmmov %vm24830_vm0 }
 0x772   : > { %v22542_v57 = vadd.f32 %v11540_v31, %v11184_v58  ;;  %v11187_v45 = vadd.f32 %v17094_v40, %v22384_v4  ;;  %17395 = vmatprep.mubr.msk.f32.mxu0 %vm24871_vm1, %v22217_v22  ;;  %vm24957_vm1 = vmmov %vm24830_vm0 }
 0x773   : > { %v17144_v46 = vpop.f32.mrf.mxu1  ;;  %v11131_v44 = vpop.f32.mrf.mxu0 }
 0x774   : > { %v22547_v17 = vadd.f32 %v17144_v46, %v11187_v45  ;;  %v11186_v5 = vadd.f32 %v11131_v44, %v22389_v32 }
 0x775   : > { %v11550_v33 = vpop.f32.mrf.mxu1  ;;  %v17097_v12 = vpop.f32.mrf.mxu0  ;;  %17396 = vmatmul.mubr.msk.f32.gmra.mxu0 %vm24873_vm12, %v13284_v14  ;;  %vm24966_vm12 = vmmov %vm24830_vm0 }
 0x776   : > { %v22554_v4 = vadd.f32 %v11550_v33, %v11186_v5  ;;  %v11189_v22 = vadd.f32 %v17097_v12, %v22396_v6  ;;  %17398 = vmatprep.mubr.msk.f32.mxu0 %vm24874_vm2, %v13253_v23  ;;  %vm24970_vm2 = vmmov %vm24830_vm0 }
 0x777   : > { %v17147_v8 = vpop.f32.mrf.mxu1  ;;  %v11141_v24 = vpop.f32.mrf.mxu0 }
 0x778   : > { %v22560_v32 = vadd.f32 %v17147_v8, %v11189_v22  ;;  %v11188_v35 = vadd.f32 %v11141_v24, %v22401_v43 }
 0x779   : > { %v11560_v29 = vpop.f32.mrf.mxu1  ;;  %v17100_v2 = vpop.f32.mrf.mxu0  ;;  %17399 = vmatmul.mubr.msk.f32.gmra.mxu0 %vm24875_vm5, %v13286_v48  ;;  %vm24974_vm5 = vmmov %vm24830_vm0 }
 0x77a   : > { %v22564_v47 = vadd.f32 %v11560_v29, %v11188_v35  ;;  %v11191_v25 = vadd.f32 %v17100_v2, %v22405_v19 }
 0x77b   : > { %v17150_v6 = vpop.f32.mrf.mxu1  ;;  %v11151_v9 = vpop.f32.mrf.mxu0 }
 0x77c   : > { %v22567_v28 = vadd.f32 %v17150_v6, %v11191_v25  ;;  %v11190_v20 = vadd.f32 %v11151_v9, %v24876_v15 }
 0x77d   : > { %v11570_v13 = vpop.f32.mrf.mxu1  ;;  %v17155_v50 = vpop.f32.mrf.mxu0 }
 0x77e   : > { %v22570_v61 = vadd.f32 %v11570_v13, %v11190_v20  ;;  %v22573_v43 = vadd.f32 %v17155_v50, %v22417_v0 }
 0x77f   : > { %v22575_v60 = vpop.f32.mrf.mxu1  ;;  %v11807_v56 = vpop.f32.mrf.mxu0 }
 0x780   : > { %v22578_v26 = vadd.f32 %v11807_v56, %v22422_v62 }
 0x781   : > { %v22580_v19 = vpop.f32.mrf.mxu1  ;;  %v17158_v58 = vpop.f32.mrf.mxu0 }
 0x782   : > { %v22583_v55 = vadd.f32 %v17158_v58, %v22426_v10 }
 0x783   : > { %v22585_v31 = vpop.f32.mrf.mxu1  ;;  %v11817_v40 = vpop.f32.mrf.mxu0 }
 0x784   : > { %v22588_v45 = vadd.f32 %v11817_v40, %v22432_v52 }
 0x785   : > { %v22590_v0 = vpop.f32.mrf.mxu1  ;;  %v17161_v46 = vpop.f32.mrf.mxu0 }
 0x786   : > { %v22593_v44 = vadd.f32 %v17161_v46, %v22436_v27 }
 0x787   : > { %v22595_v62 = vpop.f32.mrf.mxu1  ;;  %v11827_v23 = vpop.f32.mrf.mxu0 }
 0x788   : > { %v22598_v3 = vadd.f32 %v11827_v23, %v22442_v39 }
 0x789   : > { %v22600_v10 = vpop.f32.mrf.mxu1  ;;  %v17164_v5 = vpop.f32.mrf.mxu0 }
 0x78a   : > { %v22603_v14 = vadd.f32 %v17164_v5, %v22446_v51 }
 0x78b   : > { %v22605_v52 = vpop.f32.mrf.mxu1  ;;  %v11837_v33 = vpop.f32.mrf.mxu0 }
 0x78c   : > { %v22608_v12 = vadd.f32 %v11837_v33, %v22452_v16 }
 0x78d   : > { %v22610_v27 = vpop.f32.mrf.mxu1  ;;  %v17167_v22 = vpop.f32.mrf.mxu0 }
 0x78e   : > { %v22613_v48 = vadd.f32 %v17167_v22, %v22456_v38 }
 0x78f   : > { %v22615_v39 = vpop.f32.mrf.mxu1  ;;  %v11847_v8 = vpop.f32.mrf.mxu0 }
 0x790   : > { %v22618_v24 = vadd.f32 %v11847_v8, %v22462_v54 }
 0x791   : > { %v22620_v51 = vpop.f32.mrf.mxu1  ;;  %v17170_v35 = vpop.f32.mrf.mxu0 }
 0x792   : > { %v22623_v29 = vadd.f32 %v17170_v35, %v22466_v37 }
 0x793   : > { %v22625_v16 = vpop.f32.mrf.mxu1  ;;  %v11857_v2 = vpop.f32.mrf.mxu0 }
 0x794   : > { %v22628_v25 = vadd.f32 %v11857_v2, %v22472_v42 }
 0x795   : > { %v22630_v38 = vpop.f32.mrf.mxu1  ;;  %v17173_v6 = vpop.f32.mrf.mxu0 }
 0x796   : > { %v22633_v9 = vadd.f32 %v17173_v6, %v22476_v36 }
 0x797   : > { %v22635_v54 = vpop.f32.mrf.mxu1  ;;  %v11867_v15 = vpop.f32.mrf.mxu0 }
 0x798   : > { %v22638_v20 = vadd.f32 %v11867_v15, %v22482_v34 }
 0x799   : > { %v22640_v37 = vpop.f32.mrf.mxu1  ;;  %v17176_v13 = vpop.f32.mrf.mxu0 }
 0x79a   : > { %v22643_v50 = vadd.f32 %v17176_v13, %v22486_v21 }
 0x79b   : > { %v22645_v42 = vpop.f32.mrf.mxu1  ;;  %v11877_v56 = vpop.f32.mrf.mxu0 }
 0x79c   : > { %24877 = vst [vmem:[#allocation45_spill] sm:$0xff] %v22645_v42  ;;  %v22648_v58 = vadd.f32 %v11877_v56, %v22492_v49 }
 0x79d   : > { %v22650_v36 = vpop.f32.mrf.mxu1  ;;  %v17179_v40 = vpop.f32.mrf.mxu0 }
 0x79e   : > { %24878 = vst [vmem:[#allocation83_spill] sm:$0xff] %v22648_v58  ;;  %24879 = vst [vmem:[#allocation29_spill] sm:$0xff] %v22650_v36  ;;  %v22653_v46 = vadd.f32 %v17179_v40, %v22496_v7 }
 0x79f   : > { %v22655_v34 = vpop.f32.mrf.mxu1  ;;  %v11887_v23 = vpop.f32.mrf.mxu0 }
 0x7a0   : > { %24880 = vst [vmem:[#allocation30_spill] sm:$0xff] %v22653_v46  ;;  %24881 = vst [vmem:[#allocation18_spill] sm:$0xff] %v22655_v34  ;;  %v22658_v5 = vadd.f32 %v11887_v23, %v22502_v41 }
 0x7a1   : > { %v22660_v21 = vpop.f32.mrf.mxu1  ;;  %v17182_v33 = vpop.f32.mrf.mxu0 }
 0x7a2   : > { %24882 = vst [vmem:[#allocation84_spill] sm:$0xff] %v22658_v5  ;;  %24883 = vst [vmem:[#allocation103_spill] sm:$0xff] %v22660_v21  ;;  %v22663_v22 = vadd.f32 %v17182_v33, %v22506_v30 }
 0x7a3   : > { %v22665_v49 = vpop.f32.mrf.mxu1  ;;  %v11897_v8 = vpop.f32.mrf.mxu0 }
 0x7a4   : > { %24884 = vst [vmem:[#allocation101_spill] sm:$0xff] %v22663_v22  ;;  %24885 = vst [vmem:[#allocation89_spill] sm:$0xff] %v22665_v49  ;;  %v22668_v35 = vadd.f32 %v11897_v8, %v22512_v11 }
 0x7a5   : > { %v22670_v7 = vpop.f32.mrf.mxu1  ;;  %v17185_v2 = vpop.f32.mrf.mxu0 }
 0x7a6   : > { %24886 = vst [vmem:[#allocation41_spill] sm:$0xff] %v22668_v35  ;;  %24887 = vst [vmem:[#allocation90_spill] sm:$0xff] %v22670_v7  ;;  %v22673_v6 = vadd.f32 %v17185_v2, %v22516_v63 }
 0x7a7   : > { %v22675_v41 = vpop.f32.mrf.mxu1  ;;  %v11907_v15 = vpop.f32.mrf.mxu0 }
 0x7a8   : > { %24888 = vst [vmem:[#allocation113_spill] sm:$0xff] %v22673_v6  ;;  %24889 = vst [vmem:[#allocation87_spill] sm:$0xff] %v22675_v41  ;;  %v22678_v13 = vadd.f32 %v11907_v15, %v22522_v1 }
 0x7a9   : > { %v22680_v30 = vpop.f32.mrf.mxu1  ;;  %v17188_v56 = vpop.f32.mrf.mxu0 }
 0x7aa   : > { %24890 = vst [vmem:[#allocation42_spill] sm:$0xff] %v22678_v13  ;;  %24891 = vst [vmem:[#allocation67_spill] sm:$0xff] %v22680_v30  ;;  %v22683_v40 = vadd.f32 %v17188_v56, %v22526_v53 }
 0x7ab   : > { %v22685_v11 = vpop.f32.mrf.mxu1  ;;  %v11917_v23 = vpop.f32.mrf.mxu0 }
 0x7ac   : > { %24892 = vst [vmem:[#allocation68_spill] sm:$0xff] %v22683_v40  ;;  %24893 = vst [vmem:[#allocation102_spill] sm:$0xff] %v22685_v11  ;;  %v22688_v33 = vadd.f32 %v11917_v23, %v22532_v18 }
 0x7ad   : > { %v22690_v63 = vpop.f32.mrf.mxu1  ;;  %v17191_v8 = vpop.f32.mrf.mxu0 }
 0x7ae   : > { %24894 = vst [vmem:[#allocation134_spill] sm:$0xff] %v22688_v33  ;;  %24895 = vst [vmem:[#allocation24_spill] sm:$0xff] %v22690_v63  ;;  %v22693_v2 = vadd.f32 %v17191_v8, %v22536_v59 }
 0x7af   : > { %v22695_v1 = vpop.f32.mrf.mxu1  ;;  %v11927_v15 = vpop.f32.mrf.mxu0 }
 0x7b0   : > { %24896 = vst [vmem:[#allocation9_spill] sm:$0xff] %v22693_v2  ;;  %24897 = vst [vmem:[#allocation23_spill] sm:$0xff] %v22695_v1  ;;  %v22698_v30 = vadd.f32 %v11927_v15, %v22542_v57 }
 0x7b1   : > { %v22700_v53 = vpop.f32.mrf.mxu1  ;;  %v17194_v56 = vpop.f32.mrf.mxu0 }
 0x7b2   : > { %24898 = vst [vmem:[#allocation120_spill] sm:$0xff] %v22698_v30  ;;  %24899 = vst [vmem:[#allocation104_spill] sm:$0xff] %v22700_v53  ;;  %v22703_v11 = vadd.f32 %v17194_v56, %v22547_v17 }
 0x7b3   : > { %v22705_v18 = vpop.f32.mrf.mxu1  ;;  %v11937_v23 = vpop.f32.mrf.mxu0 }
 0x7b4   : > { %24900 = vst [vmem:[#allocation107_spill] sm:$0xff] %v22703_v11  ;;  %24901 = vst [vmem:[#allocation122_spill] sm:$0xff] %v22705_v18  ;;  %v22708_v63 = vadd.f32 %v11937_v23, %v22554_v4 }
 0x7b5   : > { %v22710_v59 = vpop.f32.mrf.mxu1  ;;  %v17197_v8 = vpop.f32.mrf.mxu0 }
 0x7b6   : > { %24902 = vst [vmem:[#allocation44_spill] sm:$0xff] %v22708_v63  ;;  %24903 = vst [vmem:[#allocation69_spill] sm:$0xff] %v22710_v59  ;;  %v22713_v1 = vadd.f32 %v17197_v8, %v22560_v32 }
 0x7b7   : > { %v22715_v57 = vpop.f32.mrf.mxu1  ;;  %v11947_v15 = vpop.f32.mrf.mxu0 }
 0x7b8   : > { %24904 = vst [vmem:[#allocation106_spill] sm:$0xff] %v22713_v1  ;;  %24905 = vst [vmem:[#allocation92_spill] sm:$0xff] %v22715_v57  ;;  %v22718_v53 = vadd.f32 %v11947_v15, %v22564_v47 }
 0x7b9   : > { %v22720_v17 = vpop.f32.mrf.mxu1  ;;  %v17200_v56 = vpop.f32.mrf.mxu0 }
 0x7ba   : > { %24906 = vst [vmem:[#allocation33_spill] sm:$0xff] %v22718_v53  ;;  %24907 = vst [vmem:[#allocation95_spill] sm:$0xff] %v22720_v17  ;;  %v22723_v18 = vadd.f32 %v17200_v56, %v22567_v28 }
 0x7bb   : > { %v22725_v4 = vpop.f32.mrf.mxu1  ;;  %v11957_v23 = vpop.f32.mrf.mxu0 }
 0x7bc   : > { %24908 = vst [vmem:[#allocation12_spill] sm:$0xff] %v22723_v18  ;;  %24909 = vst [vmem:[#allocation124_spill] sm:$0xff] %v22725_v4  ;;  %v22728_v59 = vadd.f32 %v11957_v23, %v22570_v61 }
 0x7bd   : > { %v22730_v32 = vpop.f32.mrf.mxu1  ;;  %v17255_v8 = vpop.f32.mrf.mxu0 }
 0x7be   : > { %24910 = vst [vmem:[#allocation20_spill] sm:$0xff] %v22728_v59  ;;  %24911 = vst [vmem:[#allocation135_spill] sm:$0xff] %v22730_v32 }
 0x7bf   : > { %v17305_v57 = vpop.f32.mrf.mxu1  ;;  %v12645_v1 = vpop.f32.mrf.mxu0 }
 0x7c1   : > { %v13032_v63 = vpop.f32.mrf.mxu1  ;;  %v17258_v47 = vpop.f32.mrf.mxu0 }
 0x7c3   : > { %v17308_v15 = vpop.f32.mrf.mxu1  ;;  %v12655_v53 = vpop.f32.mrf.mxu0 }
 0x7c5   : > { %v17261_v17 = vpop.f32.mrf.mxu0  ;;  %v22732_v11 = vpop.f32.mrf.mxu1 }
 0x7c7   : > { %v22734_v28 = vpop.f32.mrf.mxu0  ;;  %v22738_v4 = vpop.f32.mrf.mxu1 }
 0x7c9   : > { %v22736_v56 = vpop.f32.mrf.mxu0  ;;  %v22744_v32 = vpop.f32.mrf.mxu1 }
 0x7cb   : > { %v22740_v61 = vpop.f32.mrf.mxu0  ;;  %v22750_v30 = vpop.f32.mrf.mxu1 }
 0x7cd   : > { %v22742_v23 = vpop.f32.mrf.mxu0  ;;  %v22756_v40 = vpop.f32.mrf.mxu1 }
 0x7cf   : > { %v22746_v59 = vpop.f32.mrf.mxu0  ;;  %v22762_v6 = vpop.f32.mrf.mxu1 }
 0x7d1   : > { %v22748_v18 = vpop.f32.mrf.mxu0  ;;  %v22768_v49 = vpop.f32.mrf.mxu1 }
 0x7d3   : > { %v22752_v2 = vpop.f32.mrf.mxu0  ;;  %v22774_v5 = vpop.f32.mrf.mxu1 }
 0x7d5   : > { %v22754_v33 = vpop.f32.mrf.mxu0  ;;  %v22780_v36 = vpop.f32.mrf.mxu1 }
 0x7d6   : > { %24920 = vst [vmem:[#allocation109_spill] sm:$0xff] %v22780_v36 }
 0x7d7   : > { %v22758_v13 = vpop.f32.mrf.mxu0 }
 0x7d8   : > { %24912 = vst [vmem:[#allocation105_spill] sm:$0xff] %v22758_v13 }
 0x7d9   : > { %v22760_v41 = vpop.f32.mrf.mxu0 }
 0x7da   : > { %24913 = vst [vmem:[#allocation108_spill] sm:$0xff] %v22760_v41 }
 0x7db   : > { %v22764_v7 = vpop.f32.mrf.mxu0 }
 0x7dc   : > { %24914 = vst [vmem:[#allocation110_spill] sm:$0xff] %v22764_v7  ;;  %v22786_v7 = vpop.f32.mrf.mxu1 }
 0x7dd   : > { %v22766_v35 = vpop.f32.mrf.mxu0 }
 0x7de   : > { %24915 = vst [vmem:[#allocation128_spill] sm:$0xff] %v22766_v35 }
 0x7df   : > { %v22770_v22 = vpop.f32.mrf.mxu0 }
 0x7e0   : > { %24916 = vst [vmem:[#allocation36_spill] sm:$0xff] %v22770_v22  ;;  %v22792_v22 = vpop.f32.mrf.mxu1 }
 0x7e1   : > { %v22772_v21 = vpop.f32.mrf.mxu0  ;;  %24925 = vst [vmem:[#allocation64_spill] sm:$0xff] %v22792_v22 }
 0x7e2   : > { %24917 = vst [vmem:[#allocation63_spill] sm:$0xff] %v22772_v21 }
 0x7e3   : > { %v22776_v34 = vpop.f32.mrf.mxu0 }
 0x7e4   : > { %24918 = vst [vmem:[#allocation14_spill] sm:$0xff] %v22776_v34  ;;  %v22798_v34 = vpop.f32.mrf.mxu1 }
 0x7e5   : > { %v22778_v46 = vpop.f32.mrf.mxu0  ;;  %24928 = vst [vmem:[#allocation70_spill] sm:$0xff] %v22798_v34 }
 0x7e6   : > { %24919 = vst [vmem:[#allocation111_spill] sm:$0xff] %v22778_v46 }
 0x7e7   : > { %v22782_v41 = vpop.f32.mrf.mxu0 }
 0x7e8   : > { %24921 = vst [vmem:[#allocation21_spill] sm:$0xff] %v22782_v41  ;;  %v22806_v41 = vpop.f32.mrf.mxu1 }
 0x7e9   : > { %v22784_v58 = vpop.f32.mrf.mxu0  ;;  %24931 = vst [vmem:[#allocation78_spill] sm:$0xff] %v22806_v41 }
 0x7ea   : > { %24922 = vst [vmem:[#allocation85_spill] sm:$0xff] %v22784_v58  ;;  %v12386_v58 = vadd.f32 %v22575_v60, %v22573_v43  ;;  %v22816_v34 = vpop.f32.mrf.mxu1  ;;  %v12387_v43 = vadd.f32 %v22590_v0, %v22588_v45  ;;  %v12389_v45 = vadd.f32 %v22600_v10, %v22598_v3 }
 0x7eb   : > { %v22788_v35 = vpop.f32.mrf.mxu0 }
 0x7ec   : > { %24923 = vst [vmem:[#allocation112_spill] sm:$0xff] %v22788_v35  ;;  %v22837_v0 = vpop.f32.mrf.mxu1 }
 0x7ed   : > { %v22790_v13 = vpop.f32.mrf.mxu0 }
 0x7ee   : > { %24924 = vst [vmem:[#allocation71_spill] sm:$0xff] %v22790_v13  ;;  %v12385_v13 = vadd.f32 %v22580_v19, %v22578_v26  ;;  %v22825_v26 = vld [vmem:[%s23064_s14] ss:$0 sm:$0xff]  ;;  %v12390_v19 = vadd.f32 %v22595_v62, %v22593_v44 }
 0x7ef   : > { %v22794_v21 = vpop.f32.mrf.mxu0 }
 0x7f0   : > { %24926 = vst [vmem:[#allocation130_spill] sm:$0xff] %v22794_v21  ;;  %v12805_v21 = vadd.f32 %v17255_v8, %v12386_v58  ;;  %v12394_v8 = vadd.f32 %v22615_v39, %v22613_v48 }
 0x7f1   : > { %v22796_v42 = vpop.f32.mrf.mxu0 }
 0x7f2   : > { %24927 = vst [vmem:[#allocation8_spill] sm:$0xff] %v22796_v42  ;;  %v12388_v42 = vadd.f32 %v22585_v31, %v22583_v55  ;;  %v13192_v60 = vadd.f32 %v17305_v57, %v12805_v21  ;;  %v12806_v31 = vadd.f32 %v12655_v53, %v12387_v43  ;;  %v22849_v53 = vpop.f32.mrf.mxu1  ;;  %v12813_v48 = vadd.f32 %v22742_v23, %v12394_v8 }
 0x7f3   : > { %v22800_v46 = vpop.f32.mrf.mxu0  ;;  %v12395_v23 = vadd.f32 %v22630_v38, %v22628_v25 }
 0x7f4   : > { %24929 = vst [vmem:[#allocation75_spill] sm:$0xff] %v22800_v46  ;;  %v12804_v46 = vadd.f32 %v12645_v1, %v12385_v13  ;;  %v12809_v13 = vadd.f32 %v17261_v17, %v12390_v19  ;;  %v12808_v1 = vadd.f32 %v22734_v28, %v12389_v45  ;;  %v12393_v28 = vadd.f32 %v22620_v51, %v22618_v24 }
 0x7f5   : > { %v22802_v36 = vpop.f32.mrf.mxu0  ;;  %v13200_v45 = vadd.f32 %v22762_v6, %v12813_v48  ;;  %v12814_v25 = vadd.f32 %v22752_v2, %v12395_v23  ;;  %v24940_v2 = vld [vmem:[#allocation45_spill] sm:$0xff] }
 0x7f6   : > { %24930 = vst [vmem:[#allocation32_spill] sm:$0xff] %v22802_v36  ;;  %v13191_v55 = vadd.f32 %v13032_v63, %v12804_v46  ;;  %v12392_v46 = vadd.f32 %v22605_v52, %v22603_v14  ;;  %v13193_v63 = vadd.f32 %v22732_v11, %v12806_v31  ;;  %v13196_v17 = vadd.f32 %v22738_v4, %v12809_v13 }
 0x7f7   : > { %v22808_v35 = vpop.f32.mrf.mxu0  ;;  %v12812_v24 = vadd.f32 %v22746_v59, %v12393_v28  ;;  %v12398_v59 = vadd.f32 %v22635_v54, %v22633_v9 }
 0x7f8   : > { %24932 = vst [vmem:[#allocation26_spill] sm:$0xff] %v22808_v35  ;;  %v12807_v35 = vadd.f32 %v17258_v47, %v12388_v42  ;;  %v12811_v14 = vadd.f32 %v22736_v56, %v12392_v46  ;;  %v22865_v56 = vpop.f32.mrf.mxu1  ;;  %v12400_v46 = vadd.f32 %v24940_v2, %v22643_v50  ;;  %v24946_v50 = vld [vmem:[#allocation108_spill] sm:$0xff] }
 0x7f9   : > { %v22812_v22 = vpop.f32.mrf.mxu0  ;;  %v12817_v9 = vadd.f32 %v22754_v33, %v12398_v59 }
 0x7fa   : > { %v13194_v21 = vadd.f32 %v17308_v15, %v12807_v35  ;;  %v12391_v35 = vadd.f32 %v22610_v27, %v22608_v12  ;;  %v13195_v15 = vadd.f32 %v22744_v32, %v12808_v1  ;;  %v22881_v31 = vpop.f32.mrf.mxu1 }
 0x7fb   : > { %v22818_v36 = vpop.f32.mrf.mxu0 }
 0x7fc   : > { %v12810_v12 = vadd.f32 %v22740_v61, %v12391_v35  ;;  %v12396_v61 = vadd.f32 %v22625_v16, %v22623_v29  ;;  %v22897_v13 = vpop.f32.mrf.mxu1 }
 0x7fd   : > { %v17355_v41 = vpop.f32.mrf.mxu0 }
 0x7fe   : > { %v13611_v58 = vadd.f32 %v17355_v41, %v13192_v60  ;;  %v13198_v60 = vadd.f32 %v22750_v30, %v12811_v14  ;;  %v12815_v29 = vadd.f32 %v22748_v18, %v12396_v61  ;;  %v12397_v18 = vadd.f32 %v22640_v37, %v22638_v20  ;;  %v24942_v20 = vld [vmem:[#allocation105_spill] sm:$0xff] }
 0x7ff   : > { %v13451_v42 = vpop.f32.mrf.mxu0  ;;  %v13204_v14 = vadd.f32 %v22786_v7, %v12817_v9 }
 0x800   : > { %v13650_v44 = vadd.f32 %v22825_v26, %v13611_v58  ;;  %v13610_v62 = vadd.f32 %v13451_v42, %v13191_v55  ;;  %v13197_v55 = vadd.f32 %v22756_v40, %v12810_v12  ;;  %v12816_v37 = vadd.f32 %v24942_v20, %v12397_v18  ;;  %v24967_v20 = vld [vmem:[#allocation113_spill] sm:$0xff] }
 0x801   : > { %v17358_v41 = vpop.f32.mrf.mxu0 }
 0x802   : > { %13682 = vst.msk [vmem:[%s22833_s25 + $0x8] sm:$0xff] %vm24933_vm13, %v13650_v44  ;;  %v13649_v3 = vadd.f32 %v22825_v26, %v13610_v62  ;;  %v13613_v10 = vadd.f32 %v17358_v41, %v13194_v21  ;;  %v13199_v21 = vadd.f32 %v22768_v49, %v12812_v24  ;;  %v13202_v62 = vadd.f32 %v22774_v5, %v12815_v29  ;;  %v24955_v24 = vld [vmem:[#allocation70_spill] sm:$0xff]  ;;  %v24958_v29 = vld [vmem:[#allocation101_spill] sm:$0xff]  ;;  %vm24978_vm13 = vmmov %vm24830_vm0 }
 0x803   : > { %v13461_v57 = vpop.f32.mrf.mxu0 }
 0x804   : > { %13681 = vst.msk [vmem:[%s22833_s25] sm:$0xff] %vm24934_vm8, %v13649_v3  ;;  %v13652_v52 = vadd.f32 %v22825_v26, %v13613_v10  ;;  %v13612_v11 = vadd.f32 %v13461_v57, %v13193_v63  ;;  %v24941_v63 = vld [vmem:[#allocation109_spill] sm:$0xff]  ;;  %v24944_v3 = vld [vmem:[#allocation83_spill] sm:$0xff]  ;;  %v22913_v57 = vpop.f32.mrf.mxu1  ;;  %vm24982_vm8 = vmmov %vm24830_vm0 }
 0x805   : > { %v17361_v47 = vpop.f32.mrf.mxu0  ;;  %v13201_v1 = vadd.f32 %v24941_v63, %v12814_v25  ;;  %v24945_v10 = vld [vmem:[#allocation29_spill] sm:$0xff]  ;;  %v24961_v25 = vld [vmem:[#allocation36_spill] sm:$0xff] }
 0x806   : > { %13684 = vst.msk [vmem:[%s22833_s25 + $0x18] sm:$0xff] %vm24935_vm15, %v13652_v52  ;;  %v13651_v27 = vadd.f32 %v22825_v26, %v13612_v11  ;;  %v13615_v4 = vadd.f32 %v17361_v47, %v13196_v17  ;;  %v12399_v35 = vadd.f32 %v24945_v10, %v24944_v3  ;;  %v12819_v52 = vadd.f32 %v24946_v50, %v12400_v46  ;;  %v24948_v47 = vld [vmem:[#allocation30_spill] sm:$0xff]  ;;  %v24965_v46 = vld [vmem:[#allocation63_spill] sm:$0xff]  ;;  %vm24986_vm15 = vmmov %vm24830_vm0 }
 0x807   : > { %v13471_v43 = vpop.f32.mrf.mxu0  ;;  %v24969_v10 = vld [vmem:[#allocation14_spill] sm:$0xff]  ;;  %v24972_v50 = vld [vmem:[#allocation67_spill] sm:$0xff] }
 0x808   : > { %13683 = vst.msk [vmem:[%s22833_s25 + $0x10] sm:$0xff] %vm24936_vm11, %v13651_v27  ;;  %v13654_v39 = vadd.f32 %v22825_v26, %v13615_v4  ;;  %v13614_v32 = vadd.f32 %v13471_v43, %v13195_v15  ;;  %v24949_v15 = vld [vmem:[#allocation18_spill] sm:$0xff]  ;;  %v24950_v4 = vld [vmem:[#allocation64_spill] sm:$0xff]  ;;  %vm24990_vm11 = vmmov %vm24830_vm0 }
 0x809   : > { %v17364_v19 = vpop.f32.mrf.mxu0  ;;  %v12402_v12 = vadd.f32 %v24949_v15, %v24948_v47  ;;  %v13203_v28 = vadd.f32 %v24950_v4, %v12816_v37  ;;  %v24951_v43 = vld [vmem:[#allocation110_spill] sm:$0xff]  ;;  %v24968_v37 = vld [vmem:[#allocation87_spill] sm:$0xff]  ;;  %v24975_v4 = vld [vmem:[#allocation68_spill] sm:$0xff] }
 0x80a   : > { %13686 = vst.msk [vmem:[%s22833_s25 + $0x28] sm:$0xff] %vm24937_vm6, %v13654_v39  ;;  %v13653_v51 = vadd.f32 %v22825_v26, %v13614_v32  ;;  %v13617_v30 = vadd.f32 %v17364_v19, %v13198_v60  ;;  %v12818_v60 = vadd.f32 %v24951_v43, %v12399_v35  ;;  %v24953_v39 = vld [vmem:[#allocation84_spill] sm:$0xff]  ;;  %v24954_v32 = vld [vmem:[#allocation103_spill] sm:$0xff]  ;;  %v22929_v19 = vpop.f32.mrf.mxu1  ;;  %vm24994_vm6 = vmmov %vm24830_vm0 }
 0x80b   : > { %v13481_v58 = vpop.f32.mrf.mxu0  ;;  %v12401_v61 = vadd.f32 %v24954_v32, %v24953_v39  ;;  %v24973_v15 = vld [vmem:[#allocation111_spill] sm:$0xff] }
 0x80c   : > { %13685 = vst.msk [vmem:[%s22833_s25 + $0x20] sm:$0xff] %vm24830_vm0, %v13653_v51  ;;  %v13656_v16 = vadd.f32 %v22825_v26, %v13617_v30  ;;  %v13616_v40 = vadd.f32 %v13481_v58, %v13197_v55  ;;  %v13206_v51 = vadd.f32 %v24955_v24, %v12819_v52  ;;  %v24956_v30 = vld [vmem:[#allocation128_spill] sm:$0xff] }
 0x80d   : > { %v17367_v42 = vpop.f32.mrf.mxu0  ;;  %v12821_v23 = vadd.f32 %v24956_v30, %v12402_v12 }
 0x80e   : > { %13688 = vst.msk [vmem:[%s22833_s25 + $0x38] sm:$0xff] %vm24938_vm3, %v13656_v16  ;;  %v13655_v38 = vadd.f32 %v22825_v26, %v13616_v40  ;;  %v13619_v6 = vadd.f32 %v17367_v42, %v13200_v45  ;;  %v24959_v16 = vld [vmem:[#allocation89_spill] sm:$0xff]  ;;  %v24960_v42 = vld [vmem:[#allocation78_spill] sm:$0xff]  ;;  %vm25001_vm3 = vmmov %vm24830_vm0 }
 0x80f   : > { %v13491_v44 = vpop.f32.mrf.mxu0  ;;  %v12404_v40 = vadd.f32 %v24959_v16, %v24958_v29  ;;  %v13208_v2 = vadd.f32 %v22816_v34, %v12821_v23  ;;  %v24983_v16 = vld [vmem:[#allocation9_spill] sm:$0xff] }
 0x810   : > { %13687 = vst.msk [vmem:[%s22833_s25 + $0x30] sm:$0xff] %vm24939_vm14, %v13655_v38  ;;  %v13658_v54 = vadd.f32 %v22825_v26, %v13619_v6  ;;  %v13618_v49 = vadd.f32 %v13491_v44, %v13199_v21  ;;  %v13205_v21 = vadd.f32 %v24960_v42, %v12818_v60  ;;  %v12820_v38 = vadd.f32 %v24961_v25, %v12401_v61  ;;  %v24963_v44 = vld [vmem:[#allocation41_spill] sm:$0xff]  ;;  %v24979_v61 = vld [vmem:[#allocation134_spill] sm:$0xff]  ;;  %v24985_v25 = vld [vmem:[#allocation112_spill] sm:$0xff] }
 0x811   : > { %v17370_v41 = vpop.f32.mrf.mxu0  ;;  %vm25005_vm14 = vmmov %vm24830_vm0 }
 0x812   : > { %13690 = vst.msk [vmem:[%s22833_s25 + $0x48] sm:$0xff] %vm24943_vm4, %v13658_v54  ;;  %v13657_v5 = vadd.f32 %v22825_v26, %v13618_v49  ;;  %v13621_v33 = vadd.f32 %v17370_v41, %v13202_v62  ;;  %v24964_v62 = vld [vmem:[#allocation90_spill] sm:$0xff]  ;;  %v17341_v54 = vpop.f32.mrf.mxu1  ;;  %v12823_v41 = vadd.f32 %v24965_v46, %v12404_v40  ;;  %v13207_v3 = vadd.f32 %v22837_v0, %v12820_v38  ;;  %v24984_v40 = vld [vmem:[#allocation23_spill] sm:$0xff]  ;;  %vm25009_vm4 = vmmov %vm24830_vm0 }
 0x813   : > { %v13501_v17 = vpop.f32.mrf.mxu0  ;;  %v12403_v9 = vadd.f32 %v24964_v62, %v24963_v44  ;;  %v24988_v44 = vld [vmem:[#allocation104_spill] sm:$0xff]  ;;  %v24989_v46 = vld [vmem:[#allocation71_spill] sm:$0xff] }
 0x814   : > { %13689 = vst.msk [vmem:[%s22833_s25 + $0x40] sm:$0xff] %vm24947_vm9, %v13657_v5  ;;  %v13660_v11 = vadd.f32 %v22825_v26, %v13621_v33  ;;  %v13620_v8 = vadd.f32 %v13501_v17, %v13201_v1  ;;  %v12406_v5 = vadd.f32 %v24968_v37, %v24967_v20  ;;  %v13210_v47 = vadd.f32 %v22849_v53, %v12823_v41  ;;  %v24992_v20 = vld [vmem:[#allocation122_spill] sm:$0xff]  ;;  %vm25012_vm9 = vmmov %vm24830_vm0 }
 0x815   : > { %v17373_v27 = vpop.f32.mrf.mxu0  ;;  %v12822_v35 = vadd.f32 %v24969_v10, %v12403_v9 }
 0x816   : > { %13692 = vst.msk [vmem:[%s22833_s25 + $0x58] sm:$0xff] %vm24952_vm10, %v13660_v11  ;;  %v13659_v7 = vadd.f32 %v22825_v26, %v13620_v8  ;;  %v13623_v48 = vadd.f32 %v17373_v27, %v13204_v14  ;;  %v24971_v14 = vld [vmem:[#allocation42_spill] sm:$0xff]  ;;  %v13152_v11 = vpop.f32.mrf.mxu1  ;;  %v12825_v12 = vadd.f32 %v24973_v15, %v12406_v5  ;;  %vm25013_vm10 = vmmov %vm24830_vm0 }
 0x817   : > { %v13511_v55 = vpop.f32.mrf.mxu0  ;;  %v12405_v52 = vadd.f32 %v24972_v50, %v24971_v14 }
 0x818   : > { %13691 = vst.msk [vmem:[%s22833_s25 + $0x50] sm:$0xff] %vm24957_vm1, %v13659_v7  ;;  %v13662_v58 = vadd.f32 %v22825_v26, %v13623_v48  ;;  %v13622_v45 = vadd.f32 %v13511_v55, %v13203_v28  ;;  %v24976_v28 = vld [vmem:[#allocation102_spill] sm:$0xff]  ;;  %v13209_v7 = vadd.f32 %v22865_v56, %v12822_v35  ;;  %v24977_v48 = vld [vmem:[#allocation21_spill] sm:$0xff]  ;;  %v24980_v55 = vld [vmem:[#allocation24_spill] sm:$0xff]  ;;  %v13212_v23 = vadd.f32 %v22881_v31, %v12825_v12 }
 0x819   : > { %v17376_v59 = vpop.f32.mrf.mxu0  ;;  %v12408_v43 = vadd.f32 %v24976_v28, %v24975_v4  ;;  %v12824_v39 = vadd.f32 %v24977_v48, %v12405_v52  ;;  %v12407_v24 = vadd.f32 %v24980_v55, %v24979_v61  ;;  %vm25014_vm1 = vmmov %vm24830_vm0 }
 0x81a   : > { %13694 = vst.msk [vmem:[%s22833_s25 + $0x68] sm:$0xff] %vm24962_vm7, %v13662_v58  ;;  %v13661_v6 = vadd.f32 %v22825_v26, %v13622_v45  ;;  %v13625_v18 = vadd.f32 %v17376_v59, %v13206_v51  ;;  %v17344_v51 = vpop.f32.mrf.mxu1  ;;  %v24981_v58 = vld [vmem:[#allocation85_spill] sm:$0xff]  ;;  %v12410_v59 = vadd.f32 %v24984_v40, %v24983_v16  ;;  %vm25015_vm7 = vmmov %vm24830_vm0 }
 0x81b   : > { %v13521_v49 = vpop.f32.mrf.mxu0  ;;  %v12827_v45 = vadd.f32 %v24981_v58, %v12408_v43  ;;  %v12826_v38 = vadd.f32 %v24985_v25, %v12407_v24  ;;  %v25010_v25 = vld [vmem:[#allocation20_spill] sm:$0xff] }
 0x81c   : > { %13693 = vst.msk [vmem:[%s22833_s25 + $0x60] sm:$0xff] %vm24966_vm12, %v13661_v6  ;;  %v13664_v63 = vadd.f32 %v22825_v26, %v13625_v18  ;;  %v13624_v1 = vadd.f32 %v13521_v49, %v13205_v21  ;;  %v13211_v21 = vadd.f32 %v22897_v13, %v12824_v39  ;;  %v24987_v18 = vld [vmem:[#allocation120_spill] sm:$0xff]  ;;  %v13162_v9 = vpop.f32.mrf.mxu1  ;;  %v12829_v41 = vadd.f32 %v24989_v46, %v12410_v59  ;;  %v25002_v39 = vld [vmem:[#allocation33_spill] sm:$0xff]  ;;  %v25008_v59 = vld [vmem:[#allocation26_spill] sm:$0xff] }
 0x81d   : > { %v17379_v33 = vpop.f32.mrf.mxu0  ;;  %v12409_v62 = vadd.f32 %v24988_v44, %v24987_v18  ;;  %vm25016_vm12 = vmmov %vm24830_vm0 }
 0x81e   : > { %13696 = vst.msk [vmem:[%s22833_s25 + $0x78] sm:$0xff] %vm24970_vm2, %v13664_v63  ;;  %v13663_v34 = vadd.f32 %v22825_v26, %v13624_v1  ;;  %v13627_v17 = vadd.f32 %v17379_v33, %v13208_v2  ;;  %v13214_v2 = vadd.f32 %v22913_v57, %v12827_v45  ;;  %v24991_v1 = vld [vmem:[#allocation107_spill] sm:$0xff]  ;;  %v13213_v33 = vadd.f32 %v22929_v19, %v12826_v38  ;;  %v17347_v50 = vpop.f32.mrf.mxu1  ;;  %v25006_v45 = vld [vmem:[#allocation12_spill] sm:$0xff]  ;;  %vm25017_vm2 = vmmov %vm24830_vm0 }
 0x81f   : > { %v13531_v8 = vpop.f32.mrf.mxu0  ;;  %v12412_v37 = vadd.f32 %v24992_v20, %v24991_v1  ;;  %v25011_v38 = vld [vmem:[#allocation135_spill] sm:$0xff] }
 0x820   : > { %13695 = vst.msk [vmem:[%s22833_s25 + $0x70] sm:$0xff] %vm24974_vm5, %v13663_v34  ;;  %v13666_v0 = vadd.f32 %v22825_v26, %v13627_v17  ;;  %v13626_v27 = vadd.f32 %v13531_v8, %v13207_v3  ;;  %v24993_v3 = vld [vmem:[#allocation130_spill] sm:$0xff]  ;;  %v24995_v34 = vld [vmem:[#allocation44_spill] sm:$0xff]  ;;  %v24996_v17 = vld [vmem:[#allocation69_spill] sm:$0xff]  ;;  %v13216_v8 = vadd.f32 %v17341_v54, %v12829_v41  ;;  %v13172_v61 = vpop.f32.mrf.mxu1 }
 0x821   : > { %v17382_v60 = vpop.f32.mrf.mxu0  ;;  %v12828_v10 = vadd.f32 %v24993_v3, %v12409_v62  ;;  %v12411_v14 = vadd.f32 %v24996_v17, %v24995_v34  ;;  %vm25018_vm5 = vmmov %vm24830_vm0 }
 0x822   : > { %13698 = vst.msk [vmem:[%s22833_s25 + $0x88] sm:$0xff] %vm24978_vm13, %v13666_v0  ;;  %v13665_v53 = vadd.f32 %v22825_v26, %v13626_v27  ;;  %v13629_v32 = vadd.f32 %v17382_v60, %v13210_v47  ;;  %v24997_v47 = vld [vmem:[#allocation8_spill] sm:$0xff]  ;;  %v24998_v0 = vld [vmem:[#allocation106_spill] sm:$0xff]  ;;  %v25000_v60 = vld [vmem:[#allocation75_spill] sm:$0xff] }
 0x823   : > { %v13541_v30 = vpop.f32.mrf.mxu0  ;;  %v12831_v15 = vadd.f32 %v24997_v47, %v12412_v37  ;;  %v24999_v27 = vld [vmem:[#allocation92_spill] sm:$0xff]  ;;  %v13215_v43 = vadd.f32 %v13152_v11, %v12828_v10 }
 0x824   : > { %13697 = vst.msk [vmem:[%s22833_s25 + $0x80] sm:$0xff] %vm24982_vm8, %v13665_v53  ;;  %v13668_v56 = vadd.f32 %v22825_v26, %v13629_v32  ;;  %v13628_v29 = vadd.f32 %v13541_v30, %v13209_v7  ;;  %v12414_v4 = vadd.f32 %v24999_v27, %v24998_v0  ;;  %v12830_v7 = vadd.f32 %v25000_v60, %v12411_v14  ;;  %v25003_v53 = vld [vmem:[#allocation95_spill] sm:$0xff]  ;;  %v25004_v30 = vld [vmem:[#allocation32_spill] sm:$0xff] }
 0x825   : > { %v17385_v42 = vpop.f32.mrf.mxu0  ;;  %v12413_v32 = vadd.f32 %v25003_v53, %v25002_v39  ;;  %v13218_v24 = vadd.f32 %v17344_v51, %v12831_v15 }
 0x826   : > { %13700 = vst.msk [vmem:[%s22833_s25 + $0x98] sm:$0xff] %vm24986_vm15, %v13668_v56  ;;  %v13667_v31 = vadd.f32 %v22825_v26, %v13628_v29  ;;  %v13631_v6 = vadd.f32 %v17385_v42, %v13212_v23  ;;  %v12833_v23 = vadd.f32 %v25004_v30, %v12414_v4  ;;  %v25007_v56 = vld [vmem:[#allocation124_spill] sm:$0xff]  ;;  %v13217_v40 = vadd.f32 %v13162_v9, %v12830_v7 }
 0x827   : > { %v13551_v49 = vpop.f32.mrf.mxu0  ;;  %v12416_v29 = vadd.f32 %v25007_v56, %v25006_v45  ;;  %v12832_v42 = vadd.f32 %v25008_v59, %v12413_v32 }
 0x828   : > { %13699 = vst.msk [vmem:[%s22833_s25 + $0x90] sm:$0xff] %vm24990_vm11, %v13667_v31  ;;  %v13670_v13 = vadd.f32 %v22825_v26, %v13631_v6  ;;  %v13630_v63 = vadd.f32 %v13551_v49, %v13211_v21  ;;  %v12415_v31 = vadd.f32 %v25011_v38, %v25010_v25  ;;  %v17350_v6 = vpop.f32.mrf.mxu1  ;;  %v13220_v44 = vadd.f32 %v17347_v50, %v12833_v23 }
 0x829   : > { %v17388_v5 = vpop.f32.mrf.mxu0  ;;  %v12835_v62 = vadd.f32 %v22812_v22, %v12416_v29  ;;  %v13219_v46 = vadd.f32 %v13172_v61, %v12832_v42 }
 0x82a   : > { %13702 = vst.msk [vmem:[%s22833_s25 + $0xa8] sm:$0xff] %vm24994_vm6, %v13670_v13  ;;  %v13669_v57 = vadd.f32 %v22825_v26, %v13630_v63  ;;  %v13633_v35 = vadd.f32 %v17388_v5, %v13214_v2  ;;  %v12834_v41 = vadd.f32 %v22818_v36, %v12415_v31  ;;  %v13182_v1 = vpop.f32.mrf.mxu1 }
 0x82b   : > { %v13561_v52 = vpop.f32.mrf.mxu0  ;;  %v13222_v22 = vadd.f32 %v17350_v6, %v12835_v62 }
 0x82c   : > { %13701 = vst.msk [vmem:[%s22833_s25 + $0xa0] sm:$0xff] %vm24830_vm0, %v13669_v57  ;;  %v13672_v19 = vadd.f32 %v22825_v26, %v13633_v35  ;;  %v13632_v12 = vadd.f32 %v13561_v52, %v13213_v33  ;;  %v13221_v3 = vadd.f32 %v13182_v1, %v12834_v41 }
 0x82d   : > { %v17391_v28 = vpop.f32.mrf.mxu0 }
 0x82e   : > { %13704 = vst.msk [vmem:[%s22833_s25 + $0xb8] sm:$0xff] %vm25001_vm3, %v13672_v19  ;;  %v13671_v54 = vadd.f32 %v22825_v26, %v13632_v12  ;;  %v13635_v48 = vadd.f32 %v17391_v28, %v13216_v8 }
 0x82f   : > { %v13571_v55 = vpop.f32.mrf.mxu0 }
 0x830   : > { %13703 = vst.msk [vmem:[%s22833_s25 + $0xb0] sm:$0xff] %vm25005_vm14, %v13671_v54  ;;  %v13674_v11 = vadd.f32 %v22825_v26, %v13635_v48  ;;  %v13634_v58 = vadd.f32 %v13571_v55, %v13215_v43 }
 0x831   : > { %v17394_v16 = vpop.f32.mrf.mxu0 }
 0x832   : > { %13706 = vst.msk [vmem:[%s22833_s25 + $0xc8] sm:$0xff] %vm25009_vm4, %v13674_v11  ;;  %v13673_v51 = vadd.f32 %v22825_v26, %v13634_v58  ;;  %v13637_v21 = vadd.f32 %v17394_v16, %v13218_v24 }
 0x833   : > { %v13581_v18 = vpop.f32.mrf.mxu0 }
 0x834   : > { %13705 = vst.msk [vmem:[%s22833_s25 + $0xc0] sm:$0xff] %vm25012_vm9, %v13673_v51  ;;  %v13676_v9 = vadd.f32 %v22825_v26, %v13637_v21  ;;  %v13636_v49 = vadd.f32 %v13581_v18, %v13217_v40 }
 0x835   : > { %v17397_v2 = vpop.f32.mrf.mxu0 }
 0x836   : > { %13708 = vst.msk [vmem:[%s22833_s25 + $0xd8] sm:$0xff] %vm25013_vm10, %v13676_v9  ;;  %v13675_v13 = vadd.f32 %v22825_v26, %v13636_v49  ;;  %v13639_v63 = vadd.f32 %v17397_v2, %v13220_v44 }
 0x837   : > { %v13591_v20 = vpop.f32.mrf.mxu0 }
 0x838   : > { %13707 = vst.msk [vmem:[%s22833_s25 + $0xd0] sm:$0xff] %vm25014_vm1, %v13675_v13  ;;  %v13678_v37 = vadd.f32 %v22825_v26, %v13639_v63  ;;  %v13638_v5 = vadd.f32 %v13591_v20, %v13219_v46 }
 0x839   : > { %v17400_v33 = vpop.f32.mrf.mxu0 }
 0x83a   : > { %13710 = vst.msk [vmem:[%s22833_s25 + $0xe8] sm:$0xff] %vm25015_vm7, %v13678_v37  ;;  %v13677_v36 = vadd.f32 %v22825_v26, %v13638_v5  ;;  %v13641_v10 = vadd.f32 %v17400_v33, %v13222_v22 }
 0x83b   : > { %v13601_v57 = vpop.f32.mrf.mxu0 }
 0x83c   : > { %13709 = vst.msk [vmem:[%s22833_s25 + $0xe0] sm:$0xff] %vm25016_vm12, %v13677_v36  ;;  %v13680_v35 = vadd.f32 %v22825_v26, %v13641_v10  ;;  %v13640_v34 = vadd.f32 %v13601_v57, %v13221_v3 }
 0x83e   : > { %13712 = vst.msk [vmem:[%s22833_s25 + $0xf8] sm:$0xff] %vm25017_vm2, %v13680_v35  ;;  %v13679_v17 = vadd.f32 %v22825_v26, %v13640_v34 }
 0x840   : > { %13711 = vst.msk [vmem:[%s22833_s25 + $0xf0] sm:$0xff] %vm25018_vm5, %v13679_v17 }
 0x841 PF: > { %s25_s18 = sadd.s32 1, %s17418_s18  }
 0x842   : > { %p22_p4 = scmp.ge.s32.totalorder %s25_s18, 4  }
 0x844   :  { %24 = sbr.rel (!%p22_p4) target bundleno = 1 (0x1), region = 137 }

</bundles_post_ra>
